<compile_context>
chip_gen: v5e
topology: v5e:2x2
jax: 0.10.0
libtpu: 0.0.40
codegen_flags: <defaults>
</compile_context>

<pallas_src>
import math

import jax
import jax.numpy as jnp
from jax.experimental import pallas as pl
from jax.experimental.pallas import tpu as pltpu

LANE = 128                      # lane-dense channel width (all channel dims padded to this)
PADMAX = 8                      # time halo kept on both sides of the live region (>= max pad)
SQRT_HALF = math.sqrt(0.5)      # Python float -> inlined literal, NOT a captured jax constant


# ---------------------------------------------------------------------------
# Static layer plan (mirrors Converter.__init__ for n_speakers == 1)
# ---------------------------------------------------------------------------
def build_plan(in_dim, C, out_dim, convolutions):
    plan = [
        dict(kind="pw", cin=in_dim, cout=C, act=None, final=False),
        dict(kind="ct", cin=C, cout=C),
        dict(kind="glu", cin=C, cout=C, K=3, dil=1),
        dict(kind="glu", cin=C, cout=C, K=3, dil=3),
        dict(kind="ct", cin=C, cout=C),
        dict(kind="glu", cin=C, cout=C, K=3, dil=1),
        dict(kind="glu", cin=C, cout=C, K=3, dil=3),
    ]
    in_ch = C
    for out_ch, k, d in convolutions:
        if in_ch != out_ch:
            plan.append(dict(kind="pw", cin=in_ch, cout=out_ch, act="relu", final=False))
            in_ch = out_ch
        plan.append(dict(kind="glu", cin=in_ch, cout=out_ch, K=k, dil=d))
        in_ch = out_ch
    # final 1x1 conv to out_dim; F.sigmoid fused into the same kernel
    plan.append(dict(kind="pw", cin=in_ch, cout=out_dim, act="sigmoid", final=True))

    # Static correctness checks (see perf-review concerns).
    for layer in plan:
        assert layer["cin"] <= LANE and layer["cout"] <= LANE
        if layer["kind"] == "glu":
            pad = (layer["K"] - 1) // 2 * layer["dil"]
            assert pad <= PADMAX, f"PADMAX={PADMAX} too small for K={layer['K']} dil={layer['dil']}"
            assert layer["cin"] == layer["cout"], "GLU residual requires cin == cout"
    return plan


def compute_zero_bands(plan, T0):
    """Halo bands (buf_idx, row_start), each PADMAX rows, that must be zero.

    Left halo [0, PADMAX) of both buffers, plus for every GLU read the band just past
    the live region at that point.  Since T only grows, these rows are never written
    before the GLU read that needs them, so zeroing once per grid step suffices.
    """
    bands = {(0, 0), (1, 0)}
    T = T0
    for li, layer in enumerate(plan):
        if layer["kind"] == "glu":
            bands.add(((li - 1) % 2, PADMAX + T))
        if layer["kind"] == "ct":
            T *= 2
    return sorted(bands)


# ---------------------------------------------------------------------------
# Fully fused forward kernel (runs once per batch element via grid=(B,))
# ---------------------------------------------------------------------------
def make_fused_kernel(plan, T0):
    n_layers = len(plan)
    zero_bands = compute_zero_bands(plan, T0)

    def kernel(*refs):
        x_ref = refs[0]                               # (T0, LANE) bf16
        w_refs = refs[1:1 + 2 * n_layers]             # per-layer (w, b)
        o_ref = refs[1 + 2 * n_layers]                # (4*T0, LANE) bf16
        bufs = (refs[2 + 2 * n_layers], refs[3 + 2 * n_layers])   # bf16 ping/pong

        # Zero only the halo bands each GLU will read (not the full buffers).
        for buf_idx, start in zero_bands:
            bufs[buf_idx][start:start + PADMAX, :] = jnp.zeros(
                (PADMAX, LANE), bufs[buf_idx].dtype)

        T = T0
        OFF = PADMAX
        for li, layer in enumerate(plan):
            w_ref = w_refs[2 * li]
            b_ref = w_refs[2 * li + 1]
            dst = bufs[li % 2]
            if li == 0:
                src, soff = x_ref, 0
            else:
                src, soff = bufs[(li - 1) % 2], OFF
            kind = layer["kind"]

            if kind == "pw":  # 1x1 conv: (T, 128) @ (128, 128)
                y = jnp.dot(src[soff:soff + T, :], w_ref[...],
                            preferred_element_type=jnp.float32) + b_ref[...]
                if layer["act"] == "relu":
                    y = jnp.maximum(y, 0.0)
                if layer["final"]:
                    o_ref[...] = jax.nn.sigmoid(y).astype(o_ref.dtype)
                else:
                    dst[OFF:OFF + T, :] = y.astype(dst.dtype)

            elif kind == "ct":  # ConvTranspose1d(k=2, s=2); w = [W_even | W_odd]
                y = jnp.dot(src[soff:soff + T, :], w_ref[...],
                            preferred_element_type=jnp.float32) + b_ref[...]   # (T, 256)
                # Row-major (T, 2*LANE) -> (2T, LANE) IS the even/odd interleave:
                # one full-lane contiguous store instead of 2T masked stores.
                dst[OFF:OFF + 2 * T, :] = y.reshape(2 * T, LANE).astype(dst.dtype)
                T = 2 * T

            else:  # Conv1dGLU, non-causal "same" padding, residual
                K, dil = layer["K"], layer["dil"]
                pad = (K - 1) // 2 * dil
                base = soff - pad                       # zero halo == zero padding
                # Fold the K taps into the contraction: one (T, K*128)@(K*128, 256) dot
                # (MXU accumulates internally; no f32 VPU tap adds).
                xs = jnp.concatenate(
                    [src[base + k * dil: base + k * dil + T, :] for k in range(K)],
                    axis=-1)
                y = jnp.dot(xs, w_ref[...],
                            preferred_element_type=jnp.float32) + b_ref[...]   # (T, 256)
                a = y[:, :LANE]
                g = y[:, LANE:]
                res = src[soff:soff + T, :].astype(jnp.float32)
                out = (a * jax.nn.sigmoid(g) + res) * SQRT_HALF
                dst[OFF:OFF + T, :] = out.astype(dst.dtype)

    return kernel


# ---------------------------------------------------------------------------
# Host wrapper: pad channels to 128 lanes, call the single fused kernel
# ---------------------------------------------------------------------------
def converter_forward(x, plan, params, out_dim):
    B, T0, in_dim = x.shape
    T_out = 4 * T0
    Tbuf = T_out + 2 * PADMAX

    xp = jnp.zeros((B, T0, LANE), jnp.bfloat16)
    xp = xp.at[:, :, :in_dim].set(x.astype(jnp.bfloat16))

    flat = []
    for p in params:
        flat.append(p["w"])
        flat.append(p["b"])

    def _whole(arr):
        # Full-array block, same block for every grid step -> fetched once, resident.
        return pl.BlockSpec(arr.shape, lambda b: (0, 0))

    grid_spec = pltpu.PrefetchScalarGridSpec(
        num_scalar_prefetch=0,
        grid=(B,),                                           # batch-parallel (v7x megacore)
        in_specs=[pl.BlockSpec((None, T0, LANE), lambda b: (b, 0, 0))]   # batch squeezed
                 + [_whole(a) for a in flat],
        out_specs=pl.BlockSpec((None, T_out, LANE), lambda b: (b, 0, 0)),
        scratch_shapes=[
            pltpu.VMEM((Tbuf, LANE), jnp.bfloat16),          # ping (bf16 halves VMEM+bytes)
            pltpu.VMEM((Tbuf, LANE), jnp.bfloat16),          # pong
        ],
    )
    # TODO(synk): at production T set vmem_limit_bytes explicitly (per-chip budget) and
    # stream weights; at demo shapes the default scoped VMEM limit is ample.
    out = pl.pallas_call(
        make_fused_kernel(plan, T0),
        out_shape=jax.ShapeDtypeStruct((B, T_out, LANE), jnp.bfloat16),
        grid_spec=grid_spec,
        compiler_params=pltpu.CompilerParams(
            dimension_semantics=("parallel",)),
    )(xp, *flat)
    return out[:, :, :out_dim].astype(jnp.float32)


# ---------------------------------------------------------------------------
# Pure-JAX f32 reference (same padded/concatenated weight layout)
# ---------------------------------------------------------------------------
def converter_ref(x, plan, params, out_dim):
    B, T0, in_dim = x.shape
    h = jnp.zeros((B, T0, LANE), jnp.float32).at[:, :, :in_dim].set(x)
    T = T0
    for layer, p in zip(plan, params):
        w = p["w"].astype(jnp.float32)
        b = p["b"]
        kind = layer["kind"]
        if kind == "pw":
            y = jnp.einsum("btc,cd->btd", h, w) + b
            if layer["act"] == "relu":
                y = jnp.maximum(y, 0.0)
            h = jax.nn.sigmoid(y) if layer["final"] else y
        elif kind == "ct":
            y = jnp.einsum("btc,cd->btd", h, w) + b          # (B, T, 2*LANE)
            h = y.reshape(B, 2 * T, LANE)
            T = 2 * T
        else:
            K, dil = layer["K"], layer["dil"]
            pad = (K - 1) // 2 * dil
            hp = jnp.pad(h, ((0, 0), (pad, pad), (0, 0)))
            w3 = w.reshape(K, LANE, 2 * LANE)
            acc = jnp.zeros((B, T, 2 * LANE), jnp.float32)
            for k in range(K):
                acc = acc + jnp.einsum("btc,cd->btd", hp[:, k * dil:k * dil + T, :], w3[k])
            y = acc + b
            a, g = y[..., :LANE], y[..., LANE:]
            h = (a * jax.nn.sigmoid(g) + h) * SQRT_HALF
    return h[:, :, :out_dim]


# ---------------------------------------------------------------------------
# Deterministic synthetic parameters, built directly in the padded/concat layout
# ---------------------------------------------------------------------------
def build_params(key, plan):
    params = []
    keys = jax.random.split(key, len(plan))
    for lk, layer in zip(keys, plan):
        k1, k2, k3, k4 = jax.random.split(lk, 4)
        cin, cout = layer["cin"], layer["cout"]
        kind = layer["kind"]
        if kind == "pw":
            w = jnp.zeros((LANE, LANE), jnp.float32)
            w = w.at[:cin, :cout].set(0.08 * jax.random.normal(k1, (cin, cout)))
            b = jnp.zeros((1, LANE), jnp.float32)
            b = b.at[:, :cout].set(0.02 * jax.random.normal(k2, (1, cout)))
        elif kind == "ct":
            w = jnp.zeros((LANE, 2 * LANE), jnp.float32)                       # [even | odd]
            w = w.at[:cin, :cout].set(0.08 * jax.random.normal(k1, (cin, cout)))
            w = w.at[:cin, LANE:LANE + cout].set(0.08 * jax.random.normal(k2, (cin, cout)))
            bv = 0.02 * jax.random.normal(k3, (1, cout))
            b = jnp.zeros((1, 2 * LANE), jnp.float32)
            b = b.at[:, :cout].set(bv).at[:, LANE:LANE + cout].set(bv)
        else:  # glu: taps stacked along the contraction, [value | gate] along output lanes
            K = layer["K"]
            w = jnp.zeros((K, LANE, 2 * LANE), jnp.float32)
            w = w.at[:, :cin, :cout].set(0.08 * jax.random.normal(k1, (K, cin, cout)))
            w = w.at[:, :cin, LANE:LANE + cout].set(0.08 * jax.random.normal(k2, (K, cin, cout)))
            w = w.reshape(K * LANE, 2 * LANE)
            b = jnp.zeros((1, 2 * LANE), jnp.float32)
            b = b.at[:, :cout].set(0.02 * jax.random.normal(k3, (1, cout)))
            b = b.at[:, LANE:LANE + cout].set(0.02 * jax.random.normal(k4, (1, cout)))
        params.append(dict(w=w.astype(jnp.bfloat16), b=b))   # bf16 weights, f32 bias
    return params


# ---------------------------------------------------------------------------
if __name__ == "__main__":
    B, T, in_dim, out_dim, C = 2, 8, 16, 64, 32
    convolutions = ((C, 5, 1),) * 4   # same structure as the default, smaller width
    # n_speakers = 1 -> speaker projection path absent (speaker_embed_btc is None).

    key = jax.random.PRNGKey(0)
    kx, kp = jax.random.split(key)
    x = jax.random.normal(kx, (B, T, in_dim), jnp.float32)

    plan = build_plan(in_dim, C, out_dim, convolutions)
    params = build_params(kp, plan)

    out = converter_forward(x, plan, params, out_dim)
    out = jax.block_until_ready(out)

    assert out.shape == (B, 4 * T, out_dim), out.shape
    assert bool(jnp.all(jnp.isfinite(out)))
    assert bool(jnp.all((out >= 0.0) & (out <= 1.0)))   # sigmoid output range

    # bf16 activations / MXU vs pure-f32 reference -> loose tolerance.
    ref = converter_ref(x, plan, params, out_dim)
    max_err = float(jnp.max(jnp.abs(out - ref)))
    assert max_err < 5e-2, max_err

    print("KERNEL_OK")
</pallas_src>

<mosaic_0001>
module attributes {stable_mosaic.version = 11 : i64} {
  func.func @kernel(%arg0: i32, %arg1: memref<1x8x128xbf16, #tpu.memory_space<vmem>>, %arg2: memref<128x128xbf16, #tpu.memory_space<vmem>>, %arg3: memref<1x128xf32, #tpu.memory_space<vmem>>, %arg4: memref<128x256xbf16, #tpu.memory_space<vmem>>, %arg5: memref<1x256xf32, #tpu.memory_space<vmem>>, %arg6: memref<384x256xbf16, #tpu.memory_space<vmem>>, %arg7: memref<1x256xf32, #tpu.memory_space<vmem>>, %arg8: memref<384x256xbf16, #tpu.memory_space<vmem>>, %arg9: memref<1x256xf32, #tpu.memory_space<vmem>>, %arg10: memref<128x256xbf16, #tpu.memory_space<vmem>>, %arg11: memref<1x256xf32, #tpu.memory_space<vmem>>, %arg12: memref<384x256xbf16, #tpu.memory_space<vmem>>, %arg13: memref<1x256xf32, #tpu.memory_space<vmem>>, %arg14: memref<384x256xbf16, #tpu.memory_space<vmem>>, %arg15: memref<1x256xf32, #tpu.memory_space<vmem>>, %arg16: memref<640x256xbf16, #tpu.memory_space<vmem>>, %arg17: memref<1x256xf32, #tpu.memory_space<vmem>>, %arg18: memref<640x256xbf16, #tpu.memory_space<vmem>>, %arg19: memref<1x256xf32, #tpu.memory_space<vmem>>, %arg20: memref<640x256xbf16, #tpu.memory_space<vmem>>, %arg21: memref<1x256xf32, #tpu.memory_space<vmem>>, %arg22: memref<640x256xbf16, #tpu.memory_space<vmem>>, %arg23: memref<1x256xf32, #tpu.memory_space<vmem>>, %arg24: memref<128x128xbf16, #tpu.memory_space<vmem>>, %arg25: memref<1x128xf32, #tpu.memory_space<vmem>>, %arg26: memref<1x32x128xbf16, #tpu.memory_space<vmem>>, %arg27: memref<48x128xbf16, #tpu.memory_space<vmem>>, %arg28: memref<48x128xbf16, #tpu.memory_space<vmem>>) attributes {dimension_semantics = [#tpu.dimension_semantics<parallel>], iteration_bounds = array<i64: 2>, scalar_prefetch = 0 : i64, scratch_operands = 2 : i64, tpu.core_type = #tpu.core_type<tc>, window_params = [{transform_indices = @transform_0, window_bounds = array<i64: 1, 8, 128>}, {pipeline_mode = #tpu.pipeline_mode<synchronous>, transform_indices = @transform_1, window_bounds = array<i64: 128, 128>}, {pipeline_mode = #tpu.pipeline_mode<synchronous>, transform_indices = @transform_2, window_bounds = array<i64: 1, 128>}, {pipeline_mode = #tpu.pipeline_mode<synchronous>, transform_indices = @transform_3, window_bounds = array<i64: 128, 256>}, {pipeline_mode = #tpu.pipeline_mode<synchronous>, transform_indices = @transform_4, window_bounds = array<i64: 1, 256>}, {pipeline_mode = #tpu.pipeline_mode<synchronous>, transform_indices = @transform_5, window_bounds = array<i64: 384, 256>}, {pipeline_mode = #tpu.pipeline_mode<synchronous>, transform_indices = @transform_6, window_bounds = array<i64: 1, 256>}, {pipeline_mode = #tpu.pipeline_mode<synchronous>, transform_indices = @transform_7, window_bounds = array<i64: 384, 256>}, {pipeline_mode = #tpu.pipeline_mode<synchronous>, transform_indices = @transform_8, window_bounds = array<i64: 1, 256>}, {pipeline_mode = #tpu.pipeline_mode<synchronous>, transform_indices = @transform_9, window_bounds = array<i64: 128, 256>}, {pipeline_mode = #tpu.pipeline_mode<synchronous>, transform_indices = @transform_10, window_bounds = array<i64: 1, 256>}, {pipeline_mode = #tpu.pipeline_mode<synchronous>, transform_indices = @transform_11, window_bounds = array<i64: 384, 256>}, {pipeline_mode = #tpu.pipeline_mode<synchronous>, transform_indices = @transform_12, window_bounds = array<i64: 1, 256>}, {pipeline_mode = #tpu.pipeline_mode<synchronous>, transform_indices = @transform_13, window_bounds = array<i64: 384, 256>}, {pipeline_mode = #tpu.pipeline_mode<synchronous>, transform_indices = @transform_14, window_bounds = array<i64: 1, 256>}, {pipeline_mode = #tpu.pipeline_mode<synchronous>, transform_indices = @transform_15, window_bounds = array<i64: 640, 256>}, {pipeline_mode = #tpu.pipeline_mode<synchronous>, transform_indices = @transform_16, window_bounds = array<i64: 1, 256>}, {pipeline_mode = #tpu.pipeline_mode<synchronous>, transform_indices = @transform_17, window_bounds = array<i64: 640, 256>}, {pipeline_mode = #tpu.pipeline_mode<synchronous>, transform_indices = @transform_18, window_bounds = array<i64: 1, 256>}, {pipeline_mode = #tpu.pipeline_mode<synchronous>, transform_indices = @transform_19, window_bounds = array<i64: 640, 256>}, {pipeline_mode = #tpu.pipeline_mode<synchronous>, transform_indices = @transform_20, window_bounds = array<i64: 1, 256>}, {pipeline_mode = #tpu.pipeline_mode<synchronous>, transform_indices = @transform_21, window_bounds = array<i64: 640, 256>}, {pipeline_mode = #tpu.pipeline_mode<synchronous>, transform_indices = @transform_22, window_bounds = array<i64: 1, 256>}, {pipeline_mode = #tpu.pipeline_mode<synchronous>, transform_indices = @transform_23, window_bounds = array<i64: 128, 128>}, {pipeline_mode = #tpu.pipeline_mode<synchronous>, transform_indices = @transform_24, window_bounds = array<i64: 1, 128>}, {transform_indices = @transform_25, window_bounds = array<i64: 1, 32, 128>}]} {
    %cst = arith.constant 0.000000e+00 : bf16
    %0 = vector.broadcast %cst : bf16 to vector<8x128xbf16>
    %c0 = arith.constant 0 : index
    %c0_0 = arith.constant 0 : index
    %1 = vector.load %arg27[%c0, %c0_0] : memref<48x128xbf16, #tpu.memory_space<vmem>>, vector<8x128xbf16>
    tpu.vector_store %arg27[%c0, %c0_0], %0 {strides = array<i32>} : memref<48x128xbf16, #tpu.memory_space<vmem>>, vector<8x128xbf16>,
    %cst_1 = arith.constant 0.000000e+00 : bf16
    %2 = vector.broadcast %cst_1 : bf16 to vector<8x128xbf16>
    %c24 = arith.constant 24 : index
    %c0_2 = arith.constant 0 : index
    %3 = vector.load %arg27[%c24, %c0_2] : memref<48x128xbf16, #tpu.memory_space<vmem>>, vector<8x128xbf16>
    tpu.vector_store %arg27[%c24, %c0_2], %2 {strides = array<i32>} : memref<48x128xbf16, #tpu.memory_space<vmem>>, vector<8x128xbf16>,
    %cst_3 = arith.constant 0.000000e+00 : bf16
    %4 = vector.broadcast %cst_3 : bf16 to vector<8x128xbf16>
    %c40 = arith.constant 40 : index
    %c0_4 = arith.constant 0 : index
    %5 = vector.load %arg27[%c40, %c0_4] : memref<48x128xbf16, #tpu.memory_space<vmem>>, vector<8x128xbf16>
    tpu.vector_store %arg27[%c40, %c0_4], %4 {strides = array<i32>} : memref<48x128xbf16, #tpu.memory_space<vmem>>, vector<8x128xbf16>,
    %cst_5 = arith.constant 0.000000e+00 : bf16
    %6 = vector.broadcast %cst_5 : bf16 to vector<8x128xbf16>
    %c0_6 = arith.constant 0 : index
    %c0_7 = arith.constant 0 : index
    %7 = vector.load %arg28[%c0_6, %c0_7] : memref<48x128xbf16, #tpu.memory_space<vmem>>, vector<8x128xbf16>
    tpu.vector_store %arg28[%c0_6, %c0_7], %6 {strides = array<i32>} : memref<48x128xbf16, #tpu.memory_space<vmem>>, vector<8x128xbf16>,
    %cst_8 = arith.constant 0.000000e+00 : bf16
    %8 = vector.broadcast %cst_8 : bf16 to vector<8x128xbf16>
    %c24_9 = arith.constant 24 : index
    %c0_10 = arith.constant 0 : index
    %9 = vector.load %arg28[%c24_9, %c0_10] : memref<48x128xbf16, #tpu.memory_space<vmem>>, vector<8x128xbf16>
    tpu.vector_store %arg28[%c24_9, %c0_10], %8 {strides = array<i32>} : memref<48x128xbf16, #tpu.memory_space<vmem>>, vector<8x128xbf16>,
    %cst_11 = arith.constant 0.000000e+00 : bf16
    %10 = vector.broadcast %cst_11 : bf16 to vector<8x128xbf16>
    %c40_12 = arith.constant 40 : index
    %c0_13 = arith.constant 0 : index
    %11 = vector.load %arg28[%c40_12, %c0_13] : memref<48x128xbf16, #tpu.memory_space<vmem>>, vector<8x128xbf16>
    tpu.vector_store %arg28[%c40_12, %c0_13], %10 {strides = array<i32>} : memref<48x128xbf16, #tpu.memory_space<vmem>>, vector<8x128xbf16>,
    %c0_14 = arith.constant 0 : index
    %c0_15 = arith.constant 0 : index
    %c0_16 = arith.constant 0 : index
    %12 = vector.load %arg1[%c0_14, %c0_15, %c0_16] : memref<1x8x128xbf16, #tpu.memory_space<vmem>>, vector<1x8x128xbf16>
    %13 = vector.shape_cast %12 : vector<1x8x128xbf16> to vector<8x128xbf16>
    %c0_17 = arith.constant 0 : index
    %c0_18 = arith.constant 0 : index
    %14 = vector.load %arg2[%c0_17, %c0_18] : memref<128x128xbf16, #tpu.memory_space<vmem>>, vector<128x128xbf16>
    %cst_19 = arith.constant dense<0.000000e+00> : vector<8x128xf32>
    %15 = tpu.matmul %13, %14, %cst_19 {dimension_numbers = #tpu.dot_dimension_numbers<[1], [0], [0], [1], [0, 0, 1, 1], [], []>} : vector<8x128xbf16>, vector<128x128xbf16>, vector<8x128xf32> -> vector<8x128xf32>
    %c0_20 = arith.constant 0 : index
    %c0_21 = arith.constant 0 : index
    %16 = vector.load %arg3[%c0_20, %c0_21] : memref<1x128xf32, #tpu.memory_space<vmem>>, vector<1x128xf32>
    %17 = vector.broadcast %16 : vector<1x128xf32> to vector<8x128xf32>
    %18 = arith.addf %15, %17 : vector<8x128xf32>
    %19 = arith.truncf %18 : vector<8x128xf32> to vector<8x128xbf16>
    %c8 = arith.constant 8 : index
    %c0_22 = arith.constant 0 : index
    %20 = vector.load %arg27[%c8, %c0_22] : memref<48x128xbf16, #tpu.memory_space<vmem>>, vector<8x128xbf16>
    tpu.vector_store %arg27[%c8, %c0_22], %19 {strides = array<i32>} : memref<48x128xbf16, #tpu.memory_space<vmem>>, vector<8x128xbf16>,
    %c8_23 = arith.constant 8 : index
    %c0_24 = arith.constant 0 : index
    %21 = vector.load %arg27[%c8_23, %c0_24] : memref<48x128xbf16, #tpu.memory_space<vmem>>, vector<8x128xbf16>
    %c0_25 = arith.constant 0 : index
    %c0_26 = arith.constant 0 : index
    %22 = vector.load %arg4[%c0_25, %c0_26] : memref<128x256xbf16, #tpu.memory_space<vmem>>, vector<128x256xbf16>
    %cst_27 = arith.constant dense<0.000000e+00> : vector<8x256xf32>
    %23 = tpu.matmul %21, %22, %cst_27 {dimension_numbers = #tpu.dot_dimension_numbers<[1], [0], [0], [1], [0, 0, 1, 1], [], []>} : vector<8x128xbf16>, vector<128x256xbf16>, vector<8x256xf32> -> vector<8x256xf32>
    %c0_28 = arith.constant 0 : index
    %c0_29 = arith.constant 0 : index
    %24 = vector.load %arg5[%c0_28, %c0_29] : memref<1x256xf32, #tpu.memory_space<vmem>>, vector<1x256xf32>
    %25 = vector.broadcast %24 : vector<1x256xf32> to vector<8x256xf32>
    %26 = arith.addf %23, %25 : vector<8x256xf32>
    %27 = vector.shape_cast %26 : vector<8x256xf32> to vector<16x128xf32>
    %28 = arith.truncf %27 : vector<16x128xf32> to vector<16x128xbf16>
    %c8_30 = arith.constant 8 : index
    %c0_31 = arith.constant 0 : index
    %29 = vector.load %arg28[%c8_30, %c0_31] : memref<48x128xbf16, #tpu.memory_space<vmem>>, vector<16x128xbf16>
    tpu.vector_store %arg28[%c8_30, %c0_31], %28 {strides = array<i32>} : memref<48x128xbf16, #tpu.memory_space<vmem>>, vector<16x128xbf16>,
    %c7 = arith.constant 7 : index
    %c0_32 = arith.constant 0 : index
    %30 = vector.load %arg28[%c7, %c0_32] : memref<48x128xbf16, #tpu.memory_space<vmem>>, vector<16x128xbf16>
    %c8_33 = arith.constant 8 : index
    %c0_34 = arith.constant 0 : index
    %31 = vector.load %arg28[%c8_33, %c0_34] : memref<48x128xbf16, #tpu.memory_space<vmem>>, vector<16x128xbf16>
    %c9 = arith.constant 9 : index
    %c0_35 = arith.constant 0 : index
    %32 = vector.load %arg28[%c9, %c0_35] : memref<48x128xbf16, #tpu.memory_space<vmem>>, vector<16x128xbf16>
    %33 = tpu.concatenate %30, %31, %32 in 1 : vector<16x128xbf16>, vector<16x128xbf16>, vector<16x128xbf16> -> vector<16x384xbf16>
    %c0_36 = arith.constant 0 : index
    %c0_37 = arith.constant 0 : index
    %34 = vector.load %arg6[%c0_36, %c0_37] : memref<384x256xbf16, #tpu.memory_space<vmem>>, vector<384x256xbf16>
    %cst_38 = arith.constant dense<0.000000e+00> : vector<16x256xf32>
    %35 = tpu.matmul %33, %34, %cst_38 {dimension_numbers = #tpu.dot_dimension_numbers<[1], [0], [0], [1], [0, 0, 1, 1], [], []>} : vector<16x384xbf16>, vector<384x256xbf16>, vector<16x256xf32> -> vector<16x256xf32>
    %c0_39 = arith.constant 0 : index
    %c0_40 = arith.constant 0 : index
    %36 = vector.load %arg7[%c0_39, %c0_40] : memref<1x256xf32, #tpu.memory_space<vmem>>, vector<1x256xf32>
    %37 = vector.broadcast %36 : vector<1x256xf32> to vector<16x256xf32>
    %38 = arith.addf %35, %37 : vector<16x256xf32>
    %39 = vector.extract_strided_slice %38 {offsets = [0, 0], sizes = [16, 128], strides = [1, 1]} : vector<16x256xf32> to vector<16x128xf32>
    %40 = vector.extract_strided_slice %38 {offsets = [0, 128], sizes = [16, 128], strides = [1, 1]} : vector<16x256xf32> to vector<16x128xf32>
    %c8_41 = arith.constant 8 : index
    %c0_42 = arith.constant 0 : index
    %41 = vector.load %arg28[%c8_41, %c0_42] : memref<48x128xbf16, #tpu.memory_space<vmem>>, vector<16x128xbf16>
    %42 = arith.extf %41 : vector<16x128xbf16> to vector<16x128xf32>
    %43 = arith.negf %40 : vector<16x128xf32>
    %44 = math.exp %43 : vector<16x128xf32>
    %cst_43 = arith.constant 1.000000e+00 : f32
    %45 = vector.broadcast %cst_43 : f32 to vector<16x128xf32>
    %46 = arith.addf %45, %44 : vector<16x128xf32>
    %47 = arith.divf %45, %46 : vector<16x128xf32>
    %48 = arith.mulf %39, %47 : vector<16x128xf32>
    %49 = arith.addf %48, %42 : vector<16x128xf32>
    %cst_44 = arith.constant 0.707106769 : f32
    %50 = vector.broadcast %cst_44 : f32 to vector<16x128xf32>
    %51 = arith.mulf %49, %50 : vector<16x128xf32>
    %52 = arith.truncf %51 : vector<16x128xf32> to vector<16x128xbf16>
    %c8_45 = arith.constant 8 : index
    %c0_46 = arith.constant 0 : index
    %53 = vector.load %arg27[%c8_45, %c0_46] : memref<48x128xbf16, #tpu.memory_space<vmem>>, vector<16x128xbf16>
    tpu.vector_store %arg27[%c8_45, %c0_46], %52 {strides = array<i32>} : memref<48x128xbf16, #tpu.memory_space<vmem>>, vector<16x128xbf16>,
    %c5 = arith.constant 5 : index
    %c0_47 = arith.constant 0 : index
    %54 = vector.load %arg27[%c5, %c0_47] : memref<48x128xbf16, #tpu.memory_space<vmem>>, vector<16x128xbf16>
    %c8_48 = arith.constant 8 : index
    %c0_49 = arith.constant 0 : index
    %55 = vector.load %arg27[%c8_48, %c0_49] : memref<48x128xbf16, #tpu.memory_space<vmem>>, vector<16x128xbf16>
    %c11 = arith.constant 11 : index
    %c0_50 = arith.constant 0 : index
    %56 = vector.load %arg27[%c11, %c0_50] : memref<48x128xbf16, #tpu.memory_space<vmem>>, vector<16x128xbf16>
    %57 = tpu.concatenate %54, %55, %56 in 1 : vector<16x128xbf16>, vector<16x128xbf16>, vector<16x128xbf16> -> vector<16x384xbf16>
    %c0_51 = arith.constant 0 : index
    %c0_52 = arith.constant 0 : index
    %58 = vector.load %arg8[%c0_51, %c0_52] : memref<384x256xbf16, #tpu.memory_space<vmem>>, vector<384x256xbf16>
    %cst_53 = arith.constant dense<0.000000e+00> : vector<16x256xf32>
    %59 = tpu.matmul %57, %58, %cst_53 {dimension_numbers = #tpu.dot_dimension_numbers<[1], [0], [0], [1], [0, 0, 1, 1], [], []>} : vector<16x384xbf16>, vector<384x256xbf16>, vector<16x256xf32> -> vector<16x256xf32>
    %c0_54 = arith.constant 0 : index
    %c0_55 = arith.constant 0 : index
    %60 = vector.load %arg9[%c0_54, %c0_55] : memref<1x256xf32, #tpu.memory_space<vmem>>, vector<1x256xf32>
    %61 = vector.broadcast %60 : vector<1x256xf32> to vector<16x256xf32>
    %62 = arith.addf %59, %61 : vector<16x256xf32>
    %63 = vector.extract_strided_slice %62 {offsets = [0, 0], sizes = [16, 128], strides = [1, 1]} : vector<16x256xf32> to vector<16x128xf32>
    %64 = vector.extract_strided_slice %62 {offsets = [0, 128], sizes = [16, 128], strides = [1, 1]} : vector<16x256xf32> to vector<16x128xf32>
    %c8_56 = arith.constant 8 : index
    %c0_57 = arith.constant 0 : index
    %65 = vector.load %arg27[%c8_56, %c0_57] : memref<48x128xbf16, #tpu.memory_space<vmem>>, vector<16x128xbf16>
    %66 = arith.extf %65 : vector<16x128xbf16> to vector<16x128xf32>
    %67 = arith.negf %64 : vector<16x128xf32>
    %68 = math.exp %67 : vector<16x128xf32>
    %cst_58 = arith.constant 1.000000e+00 : f32
    %69 = vector.broadcast %cst_58 : f32 to vector<16x128xf32>
    %70 = arith.addf %69, %68 : vector<16x128xf32>
    %71 = arith.divf %69, %70 : vector<16x128xf32>
    %72 = arith.mulf %63, %71 : vector<16x128xf32>
    %73 = arith.addf %72, %66 : vector<16x128xf32>
    %cst_59 = arith.constant 0.707106769 : f32
    %74 = vector.broadcast %cst_59 : f32 to vector<16x128xf32>
    %75 = arith.mulf %73, %74 : vector<16x128xf32>
    %76 = arith.truncf %75 : vector<16x128xf32> to vector<16x128xbf16>
    %c8_60 = arith.constant 8 : index
    %c0_61 = arith.constant 0 : index
    %77 = vector.load %arg28[%c8_60, %c0_61] : memref<48x128xbf16, #tpu.memory_space<vmem>>, vector<16x128xbf16>
    tpu.vector_store %arg28[%c8_60, %c0_61], %76 {strides = array<i32>} : memref<48x128xbf16, #tpu.memory_space<vmem>>, vector<16x128xbf16>,
    %c8_62 = arith.constant 8 : index
    %c0_63 = arith.constant 0 : index
    %78 = vector.load %arg28[%c8_62, %c0_63] : memref<48x128xbf16, #tpu.memory_space<vmem>>, vector<16x128xbf16>
    %c0_64 = arith.constant 0 : index
    %c0_65 = arith.constant 0 : index
    %79 = vector.load %arg10[%c0_64, %c0_65] : memref<128x256xbf16, #tpu.memory_space<vmem>>, vector<128x256xbf16>
    %cst_66 = arith.constant dense<0.000000e+00> : vector<16x256xf32>
    %80 = tpu.matmul %78, %79, %cst_66 {dimension_numbers = #tpu.dot_dimension_numbers<[1], [0], [0], [1], [0, 0, 1, 1], [], []>} : vector<16x128xbf16>, vector<128x256xbf16>, vector<16x256xf32> -> vector<16x256xf32>
    %c0_67 = arith.constant 0 : index
    %c0_68 = arith.constant 0 : index
    %81 = vector.load %arg11[%c0_67, %c0_68] : memref<1x256xf32, #tpu.memory_space<vmem>>, vector<1x256xf32>
    %82 = vector.broadcast %81 : vector<1x256xf32> to vector<16x256xf32>
    %83 = arith.addf %80, %82 : vector<16x256xf32>
    %84 = vector.shape_cast %83 : vector<16x256xf32> to vector<32x128xf32>
    %85 = arith.truncf %84 : vector<32x128xf32> to vector<32x128xbf16>
    %c8_69 = arith.constant 8 : index
    %c0_70 = arith.constant 0 : index
    %86 = vector.load %arg27[%c8_69, %c0_70] : memref<48x128xbf16, #tpu.memory_space<vmem>>, vector<32x128xbf16>
    tpu.vector_store %arg27[%c8_69, %c0_70], %85 {strides = array<i32>} : memref<48x128xbf16, #tpu.memory_space<vmem>>, vector<32x128xbf16>,
    %c7_71 = arith.constant 7 : index
    %c0_72 = arith.constant 0 : index
    %87 = vector.load %arg27[%c7_71, %c0_72] : memref<48x128xbf16, #tpu.memory_space<vmem>>, vector<32x128xbf16>
    %c8_73 = arith.constant 8 : index
    %c0_74 = arith.constant 0 : index
    %88 = vector.load %arg27[%c8_73, %c0_74] : memref<48x128xbf16, #tpu.memory_space<vmem>>, vector<32x128xbf16>
    %c9_75 = arith.constant 9 : index
    %c0_76 = arith.constant 0 : index
    %89 = vector.load %arg27[%c9_75, %c0_76] : memref<48x128xbf16, #tpu.memory_space<vmem>>, vector<32x128xbf16>
    %90 = tpu.concatenate %87, %88, %89 in 1 : vector<32x128xbf16>, vector<32x128xbf16>, vector<32x128xbf16> -> vector<32x384xbf16>
    %c0_77 = arith.constant 0 : index
    %c0_78 = arith.constant 0 : index
    %91 = vector.load %arg12[%c0_77, %c0_78] : memref<384x256xbf16, #tpu.memory_space<vmem>>, vector<384x256xbf16>
    %cst_79 = arith.constant dense<0.000000e+00> : vector<32x256xf32>
    %92 = tpu.matmul %90, %91, %cst_79 {dimension_numbers = #tpu.dot_dimension_numbers<[1], [0], [0], [1], [0, 0, 1, 1], [], []>} : vector<32x384xbf16>, vector<384x256xbf16>, vector<32x256xf32> -> vector<32x256xf32>
    %c0_80 = arith.constant 0 : index
    %c0_81 = arith.constant 0 : index
    %93 = vector.load %arg13[%c0_80, %c0_81] : memref<1x256xf32, #tpu.memory_space<vmem>>, vector<1x256xf32>
    %94 = vector.broadcast %93 : vector<1x256xf32> to vector<32x256xf32>
    %95 = arith.addf %92, %94 : vector<32x256xf32>
    %96 = vector.extract_strided_slice %95 {offsets = [0, 0], sizes = [32, 128], strides = [1, 1]} : vector<32x256xf32> to vector<32x128xf32>
    %97 = vector.extract_strided_slice %95 {offsets = [0, 128], sizes = [32, 128], strides = [1, 1]} : vector<32x256xf32> to vector<32x128xf32>
    %c8_82 = arith.constant 8 : index
    %c0_83 = arith.constant 0 : index
    %98 = vector.load %arg27[%c8_82, %c0_83] : memref<48x128xbf16, #tpu.memory_space<vmem>>, vector<32x128xbf16>
    %99 = arith.extf %98 : vector<32x128xbf16> to vector<32x128xf32>
    %100 = arith.negf %97 : vector<32x128xf32>
    %101 = math.exp %100 : vector<32x128xf32>
    %cst_84 = arith.constant 1.000000e+00 : f32
    %102 = vector.broadcast %cst_84 : f32 to vector<32x128xf32>
    %103 = arith.addf %102, %101 : vector<32x128xf32>
    %104 = arith.divf %102, %103 : vector<32x128xf32>
    %105 = arith.mulf %96, %104 : vector<32x128xf32>
    %106 = arith.addf %105, %99 : vector<32x128xf32>
    %cst_85 = arith.constant 0.707106769 : f32
    %107 = vector.broadcast %cst_85 : f32 to vector<32x128xf32>
    %108 = arith.mulf %106, %107 : vector<32x128xf32>
    %109 = arith.truncf %108 : vector<32x128xf32> to vector<32x128xbf16>
    %c8_86 = arith.constant 8 : index
    %c0_87 = arith.constant 0 : index
    %110 = vector.load %arg28[%c8_86, %c0_87] : memref<48x128xbf16, #tpu.memory_space<vmem>>, vector<32x128xbf16>
    tpu.vector_store %arg28[%c8_86, %c0_87], %109 {strides = array<i32>} : memref<48x128xbf16, #tpu.memory_space<vmem>>, vector<32x128xbf16>,
    %c5_88 = arith.constant 5 : index
    %c0_89 = arith.constant 0 : index
    %111 = vector.load %arg28[%c5_88, %c0_89] : memref<48x128xbf16, #tpu.memory_space<vmem>>, vector<32x128xbf16>
    %c8_90 = arith.constant 8 : index
    %c0_91 = arith.constant 0 : index
    %112 = vector.load %arg28[%c8_90, %c0_91] : memref<48x128xbf16, #tpu.memory_space<vmem>>, vector<32x128xbf16>
    %c11_92 = arith.constant 11 : index
    %c0_93 = arith.constant 0 : index
    %113 = vector.load %arg28[%c11_92, %c0_93] : memref<48x128xbf16, #tpu.memory_space<vmem>>, vector<32x128xbf16>
    %114 = tpu.concatenate %111, %112, %113 in 1 : vector<32x128xbf16>, vector<32x128xbf16>, vector<32x128xbf16> -> vector<32x384xbf16>
    %c0_94 = arith.constant 0 : index
    %c0_95 = arith.constant 0 : index
    %115 = vector.load %arg14[%c0_94, %c0_95] : memref<384x256xbf16, #tpu.memory_space<vmem>>, vector<384x256xbf16>
    %cst_96 = arith.constant dense<0.000000e+00> : vector<32x256xf32>
    %116 = tpu.matmul %114, %115, %cst_96 {dimension_numbers = #tpu.dot_dimension_numbers<[1], [0], [0], [1], [0, 0, 1, 1], [], []>} : vector<32x384xbf16>, vector<384x256xbf16>, vector<32x256xf32> -> vector<32x256xf32>
    %c0_97 = arith.constant 0 : index
    %c0_98 = arith.constant 0 : index
    %117 = vector.load %arg15[%c0_97, %c0_98] : memref<1x256xf32, #tpu.memory_space<vmem>>, vector<1x256xf32>
    %118 = vector.broadcast %117 : vector<1x256xf32> to vector<32x256xf32>
    %119 = arith.addf %116, %118 : vector<32x256xf32>
    %120 = vector.extract_strided_slice %119 {offsets = [0, 0], sizes = [32, 128], strides = [1, 1]} : vector<32x256xf32> to vector<32x128xf32>
    %121 = vector.extract_strided_slice %119 {offsets = [0, 128], sizes = [32, 128], strides = [1, 1]} : vector<32x256xf32> to vector<32x128xf32>
    %c8_99 = arith.constant 8 : index
    %c0_100 = arith.constant 0 : index
    %122 = vector.load %arg28[%c8_99, %c0_100] : memref<48x128xbf16, #tpu.memory_space<vmem>>, vector<32x128xbf16>
    %123 = arith.extf %122 : vector<32x128xbf16> to vector<32x128xf32>
    %124 = arith.negf %121 : vector<32x128xf32>
    %125 = math.exp %124 : vector<32x128xf32>
    %cst_101 = arith.constant 1.000000e+00 : f32
    %126 = vector.broadcast %cst_101 : f32 to vector<32x128xf32>
    %127 = arith.addf %126, %125 : vector<32x128xf32>
    %128 = arith.divf %126, %127 : vector<32x128xf32>
    %129 = arith.mulf %120, %128 : vector<32x128xf32>
    %130 = arith.addf %129, %123 : vector<32x128xf32>
    %cst_102 = arith.constant 0.707106769 : f32
    %131 = vector.broadcast %cst_102 : f32 to vector<32x128xf32>
    %132 = arith.mulf %130, %131 : vector<32x128xf32>
    %133 = arith.truncf %132 : vector<32x128xf32> to vector<32x128xbf16>
    %c8_103 = arith.constant 8 : index
    %c0_104 = arith.constant 0 : index
    %134 = vector.load %arg27[%c8_103, %c0_104] : memref<48x128xbf16, #tpu.memory_space<vmem>>, vector<32x128xbf16>
    tpu.vector_store %arg27[%c8_103, %c0_104], %133 {strides = array<i32>} : memref<48x128xbf16, #tpu.memory_space<vmem>>, vector<32x128xbf16>,
    %c6 = arith.constant 6 : index
    %c0_105 = arith.constant 0 : index
    %135 = vector.load %arg27[%c6, %c0_105] : memref<48x128xbf16, #tpu.memory_space<vmem>>, vector<32x128xbf16>
    %c7_106 = arith.constant 7 : index
    %c0_107 = arith.constant 0 : index
    %136 = vector.load %arg27[%c7_106, %c0_107] : memref<48x128xbf16, #tpu.memory_space<vmem>>, vector<32x128xbf16>
    %c8_108 = arith.constant 8 : index
    %c0_109 = arith.constant 0 : index
    %137 = vector.load %arg27[%c8_108, %c0_109] : memref<48x128xbf16, #tpu.memory_space<vmem>>, vector<32x128xbf16>
    %c9_110 = arith.constant 9 : index
    %c0_111 = arith.constant 0 : index
    %138 = vector.load %arg27[%c9_110, %c0_111] : memref<48x128xbf16, #tpu.memory_space<vmem>>, vector<32x128xbf16>
    %c10 = arith.constant 10 : index
    %c0_112 = arith.constant 0 : index
    %139 = vector.load %arg27[%c10, %c0_112] : memref<48x128xbf16, #tpu.memory_space<vmem>>, vector<32x128xbf16>
    %140 = tpu.concatenate %135, %136, %137, %138, %139 in 1 : vector<32x128xbf16>, vector<32x128xbf16>, vector<32x128xbf16>, vector<32x128xbf16>, vector<32x128xbf16> -> vector<32x640xbf16>
    %c0_113 = arith.constant 0 : index
    %c0_114 = arith.constant 0 : index
    %141 = vector.load %arg16[%c0_113, %c0_114] : memref<640x256xbf16, #tpu.memory_space<vmem>>, vector<640x256xbf16>
    %cst_115 = arith.constant dense<0.000000e+00> : vector<32x256xf32>
    %142 = tpu.matmul %140, %141, %cst_115 {dimension_numbers = #tpu.dot_dimension_numbers<[1], [0], [0], [1], [0, 0, 1, 1], [], []>} : vector<32x640xbf16>, vector<640x256xbf16>, vector<32x256xf32> -> vector<32x256xf32>
    %c0_116 = arith.constant 0 : index
    %c0_117 = arith.constant 0 : index
    %143 = vector.load %arg17[%c0_116, %c0_117] : memref<1x256xf32, #tpu.memory_space<vmem>>, vector<1x256xf32>
    %144 = vector.broadcast %143 : vector<1x256xf32> to vector<32x256xf32>
    %145 = arith.addf %142, %144 : vector<32x256xf32>
    %146 = vector.extract_strided_slice %145 {offsets = [0, 0], sizes = [32, 128], strides = [1, 1]} : vector<32x256xf32> to vector<32x128xf32>
    %147 = vector.extract_strided_slice %145 {offsets = [0, 128], sizes = [32, 128], strides = [1, 1]} : vector<32x256xf32> to vector<32x128xf32>
    %c8_118 = arith.constant 8 : index
    %c0_119 = arith.constant 0 : index
    %148 = vector.load %arg27[%c8_118, %c0_119] : memref<48x128xbf16, #tpu.memory_space<vmem>>, vector<32x128xbf16>
    %149 = arith.extf %148 : vector<32x128xbf16> to vector<32x128xf32>
    %150 = arith.negf %147 : vector<32x128xf32>
    %151 = math.exp %150 : vector<32x128xf32>
    %cst_120 = arith.constant 1.000000e+00 : f32
    %152 = vector.broadcast %cst_120 : f32 to vector<32x128xf32>
    %153 = arith.addf %152, %151 : vector<32x128xf32>
    %154 = arith.divf %152, %153 : vector<32x128xf32>
    %155 = arith.mulf %146, %154 : vector<32x128xf32>
    %156 = arith.addf %155, %149 : vector<32x128xf32>
    %cst_121 = arith.constant 0.707106769 : f32
    %157 = vector.broadcast %cst_121 : f32 to vector<32x128xf32>
    %158 = arith.mulf %156, %157 : vector<32x128xf32>
    %159 = arith.truncf %158 : vector<32x128xf32> to vector<32x128xbf16>
    %c8_122 = arith.constant 8 : index
    %c0_123 = arith.constant 0 : index
    %160 = vector.load %arg28[%c8_122, %c0_123] : memref<48x128xbf16, #tpu.memory_space<vmem>>, vector<32x128xbf16>
    tpu.vector_store %arg28[%c8_122, %c0_123], %159 {strides = array<i32>} : memref<48x128xbf16, #tpu.memory_space<vmem>>, vector<32x128xbf16>,
    %c6_124 = arith.constant 6 : index
    %c0_125 = arith.constant 0 : index
    %161 = vector.load %arg28[%c6_124, %c0_125] : memref<48x128xbf16, #tpu.memory_space<vmem>>, vector<32x128xbf16>
    %c7_126 = arith.constant 7 : index
    %c0_127 = arith.constant 0 : index
    %162 = vector.load %arg28[%c7_126, %c0_127] : memref<48x128xbf16, #tpu.memory_space<vmem>>, vector<32x128xbf16>
    %c8_128 = arith.constant 8 : index
    %c0_129 = arith.constant 0 : index
    %163 = vector.load %arg28[%c8_128, %c0_129] : memref<48x128xbf16, #tpu.memory_space<vmem>>, vector<32x128xbf16>
    %c9_130 = arith.constant 9 : index
    %c0_131 = arith.constant 0 : index
    %164 = vector.load %arg28[%c9_130, %c0_131] : memref<48x128xbf16, #tpu.memory_space<vmem>>, vector<32x128xbf16>
    %c10_132 = arith.constant 10 : index
    %c0_133 = arith.constant 0 : index
    %165 = vector.load %arg28[%c10_132, %c0_133] : memref<48x128xbf16, #tpu.memory_space<vmem>>, vector<32x128xbf16>
    %166 = tpu.concatenate %161, %162, %163, %164, %165 in 1 : vector<32x128xbf16>, vector<32x128xbf16>, vector<32x128xbf16>, vector<32x128xbf16>, vector<32x128xbf16> -> vector<32x640xbf16>
    %c0_134 = arith.constant 0 : index
    %c0_135 = arith.constant 0 : index
    %167 = vector.load %arg18[%c0_134, %c0_135] : memref<640x256xbf16, #tpu.memory_space<vmem>>, vector<640x256xbf16>
    %cst_136 = arith.constant dense<0.000000e+00> : vector<32x256xf32>
    %168 = tpu.matmul %166, %167, %cst_136 {dimension_numbers = #tpu.dot_dimension_numbers<[1], [0], [0], [1], [0, 0, 1, 1], [], []>} : vector<32x640xbf16>, vector<640x256xbf16>, vector<32x256xf32> -> vector<32x256xf32>
    %c0_137 = arith.constant 0 : index
    %c0_138 = arith.constant 0 : index
    %169 = vector.load %arg19[%c0_137, %c0_138] : memref<1x256xf32, #tpu.memory_space<vmem>>, vector<1x256xf32>
    %170 = vector.broadcast %169 : vector<1x256xf32> to vector<32x256xf32>
    %171 = arith.addf %168, %170 : vector<32x256xf32>
    %172 = vector.extract_strided_slice %171 {offsets = [0, 0], sizes = [32, 128], strides = [1, 1]} : vector<32x256xf32> to vector<32x128xf32>
    %173 = vector.extract_strided_slice %171 {offsets = [0, 128], sizes = [32, 128], strides = [1, 1]} : vector<32x256xf32> to vector<32x128xf32>
    %c8_139 = arith.constant 8 : index
    %c0_140 = arith.constant 0 : index
    %174 = vector.load %arg28[%c8_139, %c0_140] : memref<48x128xbf16, #tpu.memory_space<vmem>>, vector<32x128xbf16>
    %175 = arith.extf %174 : vector<32x128xbf16> to vector<32x128xf32>
    %176 = arith.negf %173 : vector<32x128xf32>
    %177 = math.exp %176 : vector<32x128xf32>
    %cst_141 = arith.constant 1.000000e+00 : f32
    %178 = vector.broadcast %cst_141 : f32 to vector<32x128xf32>
    %179 = arith.addf %178, %177 : vector<32x128xf32>
    %180 = arith.divf %178, %179 : vector<32x128xf32>
    %181 = arith.mulf %172, %180 : vector<32x128xf32>
    %182 = arith.addf %181, %175 : vector<32x128xf32>
    %cst_142 = arith.constant 0.707106769 : f32
    %183 = vector.broadcast %cst_142 : f32 to vector<32x128xf32>
    %184 = arith.mulf %182, %183 : vector<32x128xf32>
    %185 = arith.truncf %184 : vector<32x128xf32> to vector<32x128xbf16>
    %c8_143 = arith.constant 8 : index
    %c0_144 = arith.constant 0 : index
    %186 = vector.load %arg27[%c8_143, %c0_144] : memref<48x128xbf16, #tpu.memory_space<vmem>>, vector<32x128xbf16>
    tpu.vector_store %arg27[%c8_143, %c0_144], %185 {strides = array<i32>} : memref<48x128xbf16, #tpu.memory_space<vmem>>, vector<32x128xbf16>,
    %c6_145 = arith.constant 6 : index
    %c0_146 = arith.constant 0 : index
    %187 = vector.load %arg27[%c6_145, %c0_146] : memref<48x128xbf16, #tpu.memory_space<vmem>>, vector<32x128xbf16>
    %c7_147 = arith.constant 7 : index
    %c0_148 = arith.constant 0 : index
    %188 = vector.load %arg27[%c7_147, %c0_148] : memref<48x128xbf16, #tpu.memory_space<vmem>>, vector<32x128xbf16>
    %c8_149 = arith.constant 8 : index
    %c0_150 = arith.constant 0 : index
    %189 = vector.load %arg27[%c8_149, %c0_150] : memref<48x128xbf16, #tpu.memory_space<vmem>>, vector<32x128xbf16>
    %c9_151 = arith.constant 9 : index
    %c0_152 = arith.constant 0 : index
    %190 = vector.load %arg27[%c9_151, %c0_152] : memref<48x128xbf16, #tpu.memory_space<vmem>>, vector<32x128xbf16>
    %c10_153 = arith.constant 10 : index
    %c0_154 = arith.constant 0 : index
    %191 = vector.load %arg27[%c10_153, %c0_154] : memref<48x128xbf16, #tpu.memory_space<vmem>>, vector<32x128xbf16>
    %192 = tpu.concatenate %187, %188, %189, %190, %191 in 1 : vector<32x128xbf16>, vector<32x128xbf16>, vector<32x128xbf16>, vector<32x128xbf16>, vector<32x128xbf16> -> vector<32x640xbf16>
    %c0_155 = arith.constant 0 : index
    %c0_156 = arith.constant 0 : index
    %193 = vector.load %arg20[%c0_155, %c0_156] : memref<640x256xbf16, #tpu.memory_space<vmem>>, vector<640x256xbf16>
    %cst_157 = arith.constant dense<0.000000e+00> : vector<32x256xf32>
    %194 = tpu.matmul %192, %193, %cst_157 {dimension_numbers = #tpu.dot_dimension_numbers<[1], [0], [0], [1], [0, 0, 1, 1], [], []>} : vector<32x640xbf16>, vector<640x256xbf16>, vector<32x256xf32> -> vector<32x256xf32>
    %c0_158 = arith.constant 0 : index
    %c0_159 = arith.constant 0 : index
    %195 = vector.load %arg21[%c0_158, %c0_159] : memref<1x256xf32, #tpu.memory_space<vmem>>, vector<1x256xf32>
    %196 = vector.broadcast %195 : vector<1x256xf32> to vector<32x256xf32>
    %197 = arith.addf %194, %196 : vector<32x256xf32>
    %198 = vector.extract_strided_slice %197 {offsets = [0, 0], sizes = [32, 128], strides = [1, 1]} : vector<32x256xf32> to vector<32x128xf32>
    %199 = vector.extract_strided_slice %197 {offsets = [0, 128], sizes = [32, 128], strides = [1, 1]} : vector<32x256xf32> to vector<32x128xf32>
    %c8_160 = arith.constant 8 : index
    %c0_161 = arith.constant 0 : index
    %200 = vector.load %arg27[%c8_160, %c0_161] : memref<48x128xbf16, #tpu.memory_space<vmem>>, vector<32x128xbf16>
    %201 = arith.extf %200 : vector<32x128xbf16> to vector<32x128xf32>
    %202 = arith.negf %199 : vector<32x128xf32>
    %203 = math.exp %202 : vector<32x128xf32>
    %cst_162 = arith.constant 1.000000e+00 : f32
    %204 = vector.broadcast %cst_162 : f32 to vector<32x128xf32>
    %205 = arith.addf %204, %203 : vector<32x128xf32>
    %206 = arith.divf %204, %205 : vector<32x128xf32>
    %207 = arith.mulf %198, %206 : vector<32x128xf32>
    %208 = arith.addf %207, %201 : vector<32x128xf32>
    %cst_163 = arith.constant 0.707106769 : f32
    %209 = vector.broadcast %cst_163 : f32 to vector<32x128xf32>
    %210 = arith.mulf %208, %209 : vector<32x128xf32>
    %211 = arith.truncf %210 : vector<32x128xf32> to vector<32x128xbf16>
    %c8_164 = arith.constant 8 : index
    %c0_165 = arith.constant 0 : index
    %212 = vector.load %arg28[%c8_164, %c0_165] : memref<48x128xbf16, #tpu.memory_space<vmem>>, vector<32x128xbf16>
    tpu.vector_store %arg28[%c8_164, %c0_165], %211 {strides = array<i32>} : memref<48x128xbf16, #tpu.memory_space<vmem>>, vector<32x128xbf16>,
    %c6_166 = arith.constant 6 : index
    %c0_167 = arith.constant 0 : index
    %213 = vector.load %arg28[%c6_166, %c0_167] : memref<48x128xbf16, #tpu.memory_space<vmem>>, vector<32x128xbf16>
    %c7_168 = arith.constant 7 : index
    %c0_169 = arith.constant 0 : index
    %214 = vector.load %arg28[%c7_168, %c0_169] : memref<48x128xbf16, #tpu.memory_space<vmem>>, vector<32x128xbf16>
    %c8_170 = arith.constant 8 : index
    %c0_171 = arith.constant 0 : index
    %215 = vector.load %arg28[%c8_170, %c0_171] : memref<48x128xbf16, #tpu.memory_space<vmem>>, vector<32x128xbf16>
    %c9_172 = arith.constant 9 : index
    %c0_173 = arith.constant 0 : index
    %216 = vector.load %arg28[%c9_172, %c0_173] : memref<48x128xbf16, #tpu.memory_space<vmem>>, vector<32x128xbf16>
    %c10_174 = arith.constant 10 : index
    %c0_175 = arith.constant 0 : index
    %217 = vector.load %arg28[%c10_174, %c0_175] : memref<48x128xbf16, #tpu.memory_space<vmem>>, vector<32x128xbf16>
    %218 = tpu.concatenate %213, %214, %215, %216, %217 in 1 : vector<32x128xbf16>, vector<32x128xbf16>, vector<32x128xbf16>, vector<32x128xbf16>, vector<32x128xbf16> -> vector<32x640xbf16>
    %c0_176 = arith.constant 0 : index
    %c0_177 = arith.constant 0 : index
    %219 = vector.load %arg22[%c0_176, %c0_177] : memref<640x256xbf16, #tpu.memory_space<vmem>>, vector<640x256xbf16>
    %cst_178 = arith.constant dense<0.000000e+00> : vector<32x256xf32>
    %220 = tpu.matmul %218, %219, %cst_178 {dimension_numbers = #tpu.dot_dimension_numbers<[1], [0], [0], [1], [0, 0, 1, 1], [], []>} : vector<32x640xbf16>, vector<640x256xbf16>, vector<32x256xf32> -> vector<32x256xf32>
    %c0_179 = arith.constant 0 : index
    %c0_180 = arith.constant 0 : index
    %221 = vector.load %arg23[%c0_179, %c0_180] : memref<1x256xf32, #tpu.memory_space<vmem>>, vector<1x256xf32>
    %222 = vector.broadcast %221 : vector<1x256xf32> to vector<32x256xf32>
    %223 = arith.addf %220, %222 : vector<32x256xf32>
    %224 = vector.extract_strided_slice %223 {offsets = [0, 0], sizes = [32, 128], strides = [1, 1]} : vector<32x256xf32> to vector<32x128xf32>
    %225 = vector.extract_strided_slice %223 {offsets = [0, 128], sizes = [32, 128], strides = [1, 1]} : vector<32x256xf32> to vector<32x128xf32>
    %c8_181 = arith.constant 8 : index
    %c0_182 = arith.constant 0 : index
    %226 = vector.load %arg28[%c8_181, %c0_182] : memref<48x128xbf16, #tpu.memory_space<vmem>>, vector<32x128xbf16>
    %227 = arith.extf %226 : vector<32x128xbf16> to vector<32x128xf32>
    %228 = arith.negf %225 : vector<32x128xf32>
    %229 = math.exp %228 : vector<32x128xf32>
    %cst_183 = arith.constant 1.000000e+00 : f32
    %230 = vector.broadcast %cst_183 : f32 to vector<32x128xf32>
    %231 = arith.addf %230, %229 : vector<32x128xf32>
    %232 = arith.divf %230, %231 : vector<32x128xf32>
    %233 = arith.mulf %224, %232 : vector<32x128xf32>
    %234 = arith.addf %233, %227 : vector<32x128xf32>
    %cst_184 = arith.constant 0.707106769 : f32
    %235 = vector.broadcast %cst_184 : f32 to vector<32x128xf32>
    %236 = arith.mulf %234, %235 : vector<32x128xf32>
    %237 = arith.truncf %236 : vector<32x128xf32> to vector<32x128xbf16>
    %c8_185 = arith.constant 8 : index
    %c0_186 = arith.constant 0 : index
    %238 = vector.load %arg27[%c8_185, %c0_186] : memref<48x128xbf16, #tpu.memory_space<vmem>>, vector<32x128xbf16>
    tpu.vector_store %arg27[%c8_185, %c0_186], %237 {strides = array<i32>} : memref<48x128xbf16, #tpu.memory_space<vmem>>, vector<32x128xbf16>,
    %c8_187 = arith.constant 8 : index
    %c0_188 = arith.constant 0 : index
    %239 = vector.load %arg27[%c8_187, %c0_188] : memref<48x128xbf16, #tpu.memory_space<vmem>>, vector<32x128xbf16>
    %c0_189 = arith.constant 0 : index
    %c0_190 = arith.constant 0 : index
    %240 = vector.load %arg24[%c0_189, %c0_190] : memref<128x128xbf16, #tpu.memory_space<vmem>>, vector<128x128xbf16>
    %cst_191 = arith.constant dense<0.000000e+00> : vector<32x128xf32>
    %241 = tpu.matmul %239, %240, %cst_191 {dimension_numbers = #tpu.dot_dimension_numbers<[1], [0], [0], [1], [0, 0, 1, 1], [], []>} : vector<32x128xbf16>, vector<128x128xbf16>, vector<32x128xf32> -> vector<32x128xf32>
    %c0_192 = arith.constant 0 : index
    %c0_193 = arith.constant 0 : index
    %242 = vector.load %arg25[%c0_192, %c0_193] : memref<1x128xf32, #tpu.memory_space<vmem>>, vector<1x128xf32>
    %243 = vector.broadcast %242 : vector<1x128xf32> to vector<32x128xf32>
    %244 = arith.addf %241, %243 : vector<32x128xf32>
    %245 = arith.negf %244 : vector<32x128xf32>
    %246 = math.exp %245 : vector<32x128xf32>
    %cst_194 = arith.constant 1.000000e+00 : f32
    %247 = vector.broadcast %cst_194 : f32 to vector<32x128xf32>
    %248 = arith.addf %247, %246 : vector<32x128xf32>
    %249 = arith.divf %247, %248 : vector<32x128xf32>
    %250 = arith.truncf %249 : vector<32x128xf32> to vector<32x128xbf16>
    %c0_195 = arith.constant 0 : index
    %c0_196 = arith.constant 0 : index
    %c0_197 = arith.constant 0 : index
    %251 = vector.load %arg26[%c0_195, %c0_196, %c0_197] : memref<1x32x128xbf16, #tpu.memory_space<vmem>>, vector<1x32x128xbf16>
    %252 = vector.shape_cast %251 : vector<1x32x128xbf16> to vector<32x128xbf16>
    %253 = vector.shape_cast %250 : vector<32x128xbf16> to vector<1x32x128xbf16>
    tpu.vector_store %arg26[%c0_195, %c0_196, %c0_197], %253 {strides = array<i32>} : memref<1x32x128xbf16, #tpu.memory_space<vmem>>, vector<1x32x128xbf16>,
    return
  }
  func.func @transform_0(%arg0: i32) -> (i32, i32, i32) {
    %c0_i32 = arith.constant 0 : i32
    %c0_i32_0 = arith.constant 0 : i32
    %c0_i32_1 = arith.constant 0 : i32
    return %arg0, %c0_i32, %c0_i32_0 : i32, i32, i32
  }
  func.func @transform_1(%arg0: i32) -> (i32, i32) {
    %c0_i32 = arith.constant 0 : i32
    %c0_i32_0 = arith.constant 0 : i32
    %c0_i32_1 = arith.constant 0 : i32
    return %c0_i32, %c0_i32_0 : i32, i32
  }
  func.func @transform_2(%arg0: i32) -> (i32, i32) {
    %c0_i32 = arith.constant 0 : i32
    %c0_i32_0 = arith.constant 0 : i32
    %c0_i32_1 = arith.constant 0 : i32
    return %c0_i32, %c0_i32_0 : i32, i32
  }
  func.func @transform_3(%arg0: i32) -> (i32, i32) {
    %c0_i32 = arith.constant 0 : i32
    %c0_i32_0 = arith.constant 0 : i32
    %c0_i32_1 = arith.constant 0 : i32
    return %c0_i32, %c0_i32_0 : i32, i32
  }
  func.func @transform_4(%arg0: i32) -> (i32, i32) {
    %c0_i32 = arith.constant 0 : i32
    %c0_i32_0 = arith.constant 0 : i32
    %c0_i32_1 = arith.constant 0 : i32
    return %c0_i32, %c0_i32_0 : i32, i32
  }
  func.func @transform_5(%arg0: i32) -> (i32, i32) {
    %c0_i32 = arith.constant 0 : i32
    %c0_i32_0 = arith.constant 0 : i32
    %c0_i32_1 = arith.constant 0 : i32
    return %c0_i32, %c0_i32_0 : i32, i32
  }
  func.func @transform_6(%arg0: i32) -> (i32, i32) {
    %c0_i32 = arith.constant 0 : i32
    %c0_i32_0 = arith.constant 0 : i32
    %c0_i32_1 = arith.constant 0 : i32
    return %c0_i32, %c0_i32_0 : i32, i32
  }
  func.func @transform_7(%arg0: i32) -> (i32, i32) {
    %c0_i32 = arith.constant 0 : i32
    %c0_i32_0 = arith.constant 0 : i32
    %c0_i32_1 = arith.constant 0 : i32
    return %c0_i32, %c0_i32_0 : i32, i32
  }
  func.func @transform_8(%arg0: i32) -> (i32, i32) {
    %c0_i32 = arith.constant 0 : i32
    %c0_i32_0 = arith.constant 0 : i32
    %c0_i32_1 = arith.constant 0 : i32
    return %c0_i32, %c0_i32_0 : i32, i32
  }
  func.func @transform_9(%arg0: i32) -> (i32, i32) {
    %c0_i32 = arith.constant 0 : i32
    %c0_i32_0 = arith.constant 0 : i32
    %c0_i32_1 = arith.constant 0 : i32
    return %c0_i32, %c0_i32_0 : i32, i32
  }
  func.func @transform_10(%arg0: i32) -> (i32, i32) {
    %c0_i32 = arith.constant 0 : i32
    %c0_i32_0 = arith.constant 0 : i32
    %c0_i32_1 = arith.constant 0 : i32
    return %c0_i32, %c0_i32_0 : i32, i32
  }
  func.func @transform_11(%arg0: i32) -> (i32, i32) {
    %c0_i32 = arith.constant 0 : i32
    %c0_i32_0 = arith.constant 0 : i32
    %c0_i32_1 = arith.constant 0 : i32
    return %c0_i32, %c0_i32_0 : i32, i32
  }
  func.func @transform_12(%arg0: i32) -> (i32, i32) {
    %c0_i32 = arith.constant 0 : i32
    %c0_i32_0 = arith.constant 0 : i32
    %c0_i32_1 = arith.constant 0 : i32
    return %c0_i32, %c0_i32_0 : i32, i32
  }
  func.func @transform_13(%arg0: i32) -> (i32, i32) {
    %c0_i32 = arith.constant 0 : i32
    %c0_i32_0 = arith.constant 0 : i32
    %c0_i32_1 = arith.constant 0 : i32
    return %c0_i32, %c0_i32_0 : i32, i32
  }
  func.func @transform_14(%arg0: i32) -> (i32, i32) {
    %c0_i32 = arith.constant 0 : i32
    %c0_i32_0 = arith.constant 0 : i32
    %c0_i32_1 = arith.constant 0 : i32
    return %c0_i32, %c0_i32_0 : i32, i32
  }
  func.func @transform_15(%arg0: i32) -> (i32, i32) {
    %c0_i32 = arith.constant 0 : i32
    %c0_i32_0 = arith.constant 0 : i32
    %c0_i32_1 = arith.constant 0 : i32
    return %c0_i32, %c0_i32_0 : i32, i32
  }
  func.func @transform_16(%arg0: i32) -> (i32, i32) {
    %c0_i32 = arith.constant 0 : i32
    %c0_i32_0 = arith.constant 0 : i32
    %c0_i32_1 = arith.constant 0 : i32
    return %c0_i32, %c0_i32_0 : i32, i32
  }
  func.func @transform_17(%arg0: i32) -> (i32, i32) {
    %c0_i32 = arith.constant 0 : i32
    %c0_i32_0 = arith.constant 0 : i32
    %c0_i32_1 = arith.constant 0 : i32
    return %c0_i32, %c0_i32_0 : i32, i32
  }
  func.func @transform_18(%arg0: i32) -> (i32, i32) {
    %c0_i32 = arith.constant 0 : i32
    %c0_i32_0 = arith.constant 0 : i32
    %c0_i32_1 = arith.constant 0 : i32
    return %c0_i32, %c0_i32_0 : i32, i32
  }
  func.func @transform_19(%arg0: i32) -> (i32, i32) {
    %c0_i32 = arith.constant 0 : i32
    %c0_i32_0 = arith.constant 0 : i32
    %c0_i32_1 = arith.constant 0 : i32
    return %c0_i32, %c0_i32_0 : i32, i32
  }
  func.func @transform_20(%arg0: i32) -> (i32, i32) {
    %c0_i32 = arith.constant 0 : i32
    %c0_i32_0 = arith.constant 0 : i32
    %c0_i32_1 = arith.constant 0 : i32
    return %c0_i32, %c0_i32_0 : i32, i32
  }
  func.func @transform_21(%arg0: i32) -> (i32, i32) {
    %c0_i32 = arith.constant 0 : i32
    %c0_i32_0 = arith.constant 0 : i32
    %c0_i32_1 = arith.constant 0 : i32
    return %c0_i32, %c0_i32_0 : i32, i32
  }
  func.func @transform_22(%arg0: i32) -> (i32, i32) {
    %c0_i32 = arith.constant 0 : i32
    %c0_i32_0 = arith.constant 0 : i32
    %c0_i32_1 = arith.constant 0 : i32
    return %c0_i32, %c0_i32_0 : i32, i32
  }
  func.func @transform_23(%arg0: i32) -> (i32, i32) {
    %c0_i32 = arith.constant 0 : i32
    %c0_i32_0 = arith.constant 0 : i32
    %c0_i32_1 = arith.constant 0 : i32
    return %c0_i32, %c0_i32_0 : i32, i32
  }
  func.func @transform_24(%arg0: i32) -> (i32, i32) {
    %c0_i32 = arith.constant 0 : i32
    %c0_i32_0 = arith.constant 0 : i32
    %c0_i32_1 = arith.constant 0 : i32
    return %c0_i32, %c0_i32_0 : i32, i32
  }
  func.func @transform_25(%arg0: i32) -> (i32, i32, i32) {
    %c0_i32 = arith.constant 0 : i32
    %c0_i32_0 = arith.constant 0 : i32
    %c0_i32_1 = arith.constant 0 : i32
    return %arg0, %c0_i32, %c0_i32_0 : i32, i32, i32
  }
}

</mosaic_0001>

<bundles_post_ra>
// kernel: tpu_custom_call.1
= control target key start
LH: loop header
LB: loop body
LE: loop exit
PB: predicated region body
PF: predicated region fallthrough
CT: control target
= control target key end

     0   :  { %s13509_s0 = inlined_call_operand.hbm [shape: bf16[2,8,128], index: 0, kind: input, shape index: {}]   ;;  %s13510_s1 = inlined_call_operand.hbm [shape: bf16[128,128], index: 1, kind: input, shape index: {}]   ;;  %s13511_s2 = inlined_call_operand.hbm [shape: f32[1,128], index: 2, kind: input, shape index: {}]   ;;  %s13512_s3 = inlined_call_operand.hbm [shape: bf16[128,256], index: 3, kind: input, shape index: {}]   ;;  %s13513_s4 = inlined_call_operand.vmem [shape: f32[1,256], index: 4, kind: input, shape index: {}]   ;;  %s13514_s5 = inlined_call_operand.hbm [shape: bf16[384,256], index: 5, kind: input, shape index: {}]   ;;  %s13515_s6 = inlined_call_operand.vmem [shape: f32[1,256], index: 6, kind: input, shape index: {}]   ;;  %s13516_s7 = inlined_call_operand.hbm [shape: bf16[384,256], index: 7, kind: input, shape index: {}]   ;;  %s13517_s8 = inlined_call_operand.vmem [shape: f32[1,256], index: 8, kind: input, shape index: {}]   ;;  %s13518_s9 = inlined_call_operand.hbm [shape: bf16[128,256], index: 9, kind: input, shape index: {}]   ;;  %s13519_s10 = inlined_call_operand.vmem [shape: f32[1,256], index: 10, kind: input, shape index: {}]   ;;  %s13520_s11 = inlined_call_operand.hbm [shape: bf16[384,256], index: 11, kind: input, shape index: {}]   ;;  %s13521_s12 = inlined_call_operand.vmem [shape: f32[1,256], index: 12, kind: input, shape index: {}]   ;;  %s13522_s13 = inlined_call_operand.hbm [shape: bf16[384,256], index: 13, kind: input, shape index: {}]   ;;  %s13523_s14 = inlined_call_operand.vmem [shape: f32[1,256], index: 14, kind: input, shape index: {}]   ;;  %s13524_s15 = inlined_call_operand.hbm [shape: bf16[640,256], index: 15, kind: input, shape index: {}]   ;;  %s13525_s16 = inlined_call_operand.vmem [shape: f32[1,256], index: 16, kind: input, shape index: {}]   ;;  %s13526_s17 = inlined_call_operand.hbm [shape: bf16[640,256], index: 17, kind: input, shape index: {}]   ;;  %s13527_s18 = inlined_call_operand.vmem [shape: f32[1,256], index: 18, kind: input, shape index: {}]   ;;  %s13528_s19 = inlined_call_operand.hbm [shape: bf16[640,256], index: 19, kind: input, shape index: {}]   ;;  %s13529_s20 = inlined_call_operand.vmem [shape: f32[1,256], index: 20, kind: input, shape index: {}]   ;;  %s13530_s21 = inlined_call_operand.hbm [shape: bf16[640,256], index: 21, kind: input, shape index: {}]   ;;  %s13531_s22 = inlined_call_operand.vmem [shape: f32[1,256], index: 22, kind: input, shape index: {}]   ;;  %s13532_s23 = inlined_call_operand.hbm [shape: bf16[128,128], index: 23, kind: input, shape index: {}]   ;;  %s13533_s24 = inlined_call_operand.vmem [shape: f32[1,128], index: 24, kind: input, shape index: {}]   ;;  %s13534_s25 = inlined_call_operand.hbm [shape: bf16[2,32,128], index: 25, kind: output, shape index: {}]  }
   0x1   :  { %13539 = sst [smem:[#allocation37_spill]] %s13509_s0 }
   0x2   :  { %13540 = sst [smem:[#allocation38_spill]] %s13510_s1 }
   0x3   :  { %13541 = sst [smem:[#allocation39_spill]] %s13511_s2 }
   0x4   :  { %13542 = sst [smem:[#allocation40_spill]] %s13512_s3 }
   0x5   :  { %13543 = sst [smem:[#allocation41_spill]] %s13513_s4 }
   0x6   :  { %13544 = sst [smem:[#allocation42_spill]] %s13514_s5 }
   0x7   :  { %13545 = sst [smem:[#allocation43_spill]] %s13515_s6 }
   0x8   :  { %13546 = sst [smem:[#allocation44_spill]] %s13516_s7 }
   0x9   :  { %13547 = sst [smem:[#allocation45_spill]] %s13517_s8 }
   0xa   :  { %13548 = sst [smem:[#allocation46_spill]] %s13518_s9 }
   0xb   :  { %13549 = sst [smem:[#allocation47_spill]] %s13520_s11 }
   0xc   :  { %13550 = sst [smem:[#allocation48_spill]] %s13522_s13 }
   0xd   :  { %13551 = sst [smem:[#allocation49_spill]] %s13523_s14 }
   0xe   :  { %13552 = sst [smem:[#allocation50_spill]] %s13524_s15 }
   0xf   :  { %13553 = sst [smem:[#allocation51_spill]] %s13525_s16 }
  0x10   :  { %13554 = sst [smem:[#allocation52_spill]] %s13527_s18 }
  0x11   :  { %13555 = sst [smem:[#allocation53_spill]] %s13529_s20 }
  0x12   :  { %13556 = sst [smem:[#allocation54_spill]] %s13531_s22 }
  0x13   :  { %13557 = sst [smem:[#allocation55_spill]] %s13533_s24 }
  0x14   :  { %13558 = sst [smem:[#allocation56_spill]] %s13534_s25 }
  0x15   :  { %30 = vsyncpa [#allocation5], 0 }
  0x16   :  { %32 = vsyncpa [#allocation5 + $0x1], 0 }
  0x17   :  { %33 = vsyncpa [#allocation8], 0 }
  0x18   :  { %34 = vsyncpa [#allocation11], 0 }
  0x19   :  { %35 = vsyncpa [#allocation14], 0 }
  0x1a   :  { %36 = vsyncpa [#allocation17], 0 }
  0x1b   :  { %37 = vsyncpa [#allocation20], 0 }
  0x1c   :  { %38 = vsyncpa [#allocation23], 0 }
  0x1d   :  { %39 = vsyncpa [#allocation26], 0 }
  0x1e   :  { %40 = vsyncpa [#allocation6], 0 }
  0x1f   :  { %42 = vsyncpa [#allocation6 + $0x1], 0  ;;  %s11769_s29 = smov 0   ;;  %s11771_s2 = smov 0  }
  0x20   :  { %s11773_s6 = smov 0   ;;  %s11775_s30 = smov 0  }
  0x21 LB: > { %s13559_s26 = sld [smem:[#allocation38_spill]]  ;;  %s11793_s8 = sadd.s32 4294967295, %s11616_s30   ;;  %s11616_s30 = sphi %s11775_s30, %s13645_s30   ;;  %s11612_s6 = sphi %s11773_s6, %s13644_s6   ;;  %s11608_s2 = sphi %s11771_s2, %s13643_s2   ;;  %s11604_s29 = sphi %s11769_s29, %s13642_s29  }
  0x22   : > { %p7780_p0 = scmp.ge.s32.totalorder %s11616_s30, 1  ;;  %p69_p1 = scmp.eq.s32.totalorder %s11793_s8, 0 }
  0x23   : > { %p609_p2 = scmp.lt.s32.totalorder %s11616_s30, 3  ;;  %s11618_s4 = smov [#allocation7]  }
  0x24   : > { %s622_s28 = sshll.u32 %s11618_s4, 4  ;;  %s13561_s0 = sld [smem:[#allocation40_spill]]  ;;  %s623_s28 = int_to_ptr.vmem [resolvable:$true] %s622_s28 }
  0x25   : > { %p11798_p3 = pnand %p7780_p0, %p609_p2  ;;  %s13537_s4 = smov 64  }
  0x26   : > { %s13538_s24 = smov 4   ;;  %s11622_s9 = smov 128  }
  0x27   : > { %s620_s1 = sshll.u32 %s13559_s26, 4  ;;  %p10831_p4 = pneg %p11798_p3  ;;  %s621_s1 = int_to_ptr.hbm [resolvable:$true] %s620_s1 }
  0x28   : > { %s11619_s26 = smov [#allocation10]   ;;  %s11623_s5 = smov 8  }
  0x29   : > { %p11810_p6 = pnand %p10831_p4, %p69_p1  ;;  %s648_s25 = sshll.u32 %s11619_s26, 4  ;;  %s649_s25 = int_to_ptr.vmem [resolvable:$true] %s648_s25 }
  0x2a   : > { %s646_s7 = sshll.u32 %s13561_s0, 4  ;;  %s13563_s20 = sld [smem:[#allocation44_spill]]  ;;  %s647_s7 = int_to_ptr.hbm [resolvable:$true] %s646_s7 }
  0x2b   : > { %10834 = dma.hbm_to_vmem [thread:$0]  (!%p11810_p6), %s621_s1, 1024, %s623_s28, [#allocation8], %s13537_s4, %s13537_s4, %s13538_s24  }
  0x2c   : > { %10840 = dma.hbm_to_vmem [thread:$0]  (!%p11810_p6), %s647_s7, 2048, %s649_s25, [#allocation11], %s11622_s9, %s11622_s9, %s11623_s5  }
  0x2d   : > { %s11624_s18 = smov [#allocation13]   ;;  %s13564_s11 = sld [smem:[#allocation47_spill]] }
  0x2e   : > { %s682_s16 = sshll.u32 %s11624_s18, 4  ;;  %s11625_s25 = smov [#allocation16]   ;;  %s683_s16 = int_to_ptr.vmem [resolvable:$true] %s682_s16 }
  0x2f   : > { %s716_s7 = sshll.u32 %s11625_s25, 4  ;;  %s13565_s15 = sld [smem:[#allocation50_spill]]  ;;  %s717_s7 = int_to_ptr.vmem [resolvable:$true] %s716_s7 }
  0x30   : > { %s680_s26 = sshll.u32 %s13563_s20, 4  ;;  %s782_s0 = sshll.u32 %s13528_s19, 4  ;;  %s681_s26 = int_to_ptr.hbm [resolvable:$true] %s680_s26  ;;  %s783_s0 = int_to_ptr.hbm [resolvable:$true] %s782_s0 }
  0x31   : > { %10846 = dma.hbm_to_vmem [thread:$0]  (!%p11810_p6), %s681_s26, 6144, %s683_s16, [#allocation14], %s11622_s9, %s11622_s9, %s11623_s5  }
  0x32   : > { %s11626_s16 = smov [#allocation19]   ;;  %s11627_s4 = smov [#allocation22]  }
  0x33   : > { %s714_s28 = sshll.u32 %s13564_s11, 4  ;;  %s750_s26 = sshll.u32 %s11626_s16, 4  ;;  %s715_s28 = int_to_ptr.hbm [resolvable:$true] %s714_s28  ;;  %s751_s26 = int_to_ptr.vmem [resolvable:$true] %s750_s26 }
  0x34   : > { %10852 = dma.hbm_to_vmem [thread:$0]  (!%p11810_p6), %s715_s28, 6144, %s717_s7, [#allocation17], %s11622_s9, %s11622_s9, %s11623_s5  }
  0x35   : > { %s748_s20 = sshll.u32 %s13565_s15, 4  ;;  %s784_s1 = sshll.u32 %s11627_s4, 4  ;;  %s749_s20 = int_to_ptr.hbm [resolvable:$true] %s748_s20  ;;  %s785_s1 = int_to_ptr.vmem [resolvable:$true] %s784_s1 }
  0x36   : > { %10858 = dma.hbm_to_vmem [thread:$0]  (!%p11810_p6), %s749_s20, 10240, %s751_s26, [#allocation20], %s11622_s9, %s11622_s9, %s11623_s5  }
  0x37   : > { %s13566_s24 = sld [smem:[#allocation39_spill]]  ;;  %s11628_s11 = smov [#allocation9]  }
  0x38   : > { %10864 = dma.hbm_to_vmem [thread:$0]  (!%p11810_p6), %s783_s0, 10240, %s785_s1, [#allocation23], %s11622_s9, %s11622_s9, %s11623_s5  }
  0x39   : > { %s13567_s18 = sld [smem:[#allocation42_spill]]  ;;  %s637_s20 = sshll.u32 %s11628_s11, 4  ;;  %s638_s20 = int_to_ptr.vmem [resolvable:$true] %s637_s20 }
  0x3a   : > { %s11629_s26 = smov [#allocation12]   ;;  %s13568_s22 = sld [smem:[#allocation46_spill]] }
  0x3b   : > { %s13569_s13 = sld [smem:[#allocation48_spill]]  ;;  %s11630_s7 = smov [#allocation15]  }
  0x3c   : > { %s11631_s14 = smov [#allocation18]   ;;  %s799_s25 = sshll.u32 %s13530_s21, 4  ;;  %s800_s25 = int_to_ptr.hbm [resolvable:$true] %s799_s25 }
  0x3d   : > { %s635_s28 = sshll.u32 %s13566_s24, 4  ;;  %s665_s24 = sshll.u32 %s11629_s26, 4  ;;  %s636_s28 = int_to_ptr.hbm [resolvable:$true] %s635_s28  ;;  %s666_s24 = int_to_ptr.vmem [resolvable:$true] %s665_s24 }
  0x3e   : > { %10837 = dma.hbm_to_vmem [thread:$0]  (!%p11810_p6), %s636_s28, 16, %s638_s20, [#allocation8]  }
  0x3f   : > { %s663_s16 = sshll.u32 %s13567_s18, 4  ;;  %s699_s28 = sshll.u32 %s11630_s7, 4  ;;  %s664_s16 = int_to_ptr.hbm [resolvable:$true] %s663_s16  ;;  %s700_s28 = int_to_ptr.vmem [resolvable:$true] %s699_s28 }
  0x40   : > { %s697_s15 = sshll.u32 %s13568_s22, 4  ;;  %s733_s18 = sshll.u32 %s11631_s14, 4  ;;  %s698_s15 = int_to_ptr.hbm [resolvable:$true] %s697_s15  ;;  %s734_s18 = int_to_ptr.vmem [resolvable:$true] %s733_s18 }
  0x41   : > { %10843 = dma.hbm_to_vmem [thread:$0]  (!%p11810_p6), %s664_s16, 6144, %s666_s24, [#allocation11], %s11622_s9, %s11622_s9, %s11623_s5  }
  0x42   : > { %s731_s1 = sshll.u32 %s13569_s13, 4  ;;  %s765_s16 = sshll.u32 %s13526_s17, 4  ;;  %s732_s1 = int_to_ptr.hbm [resolvable:$true] %s731_s1  ;;  %s766_s16 = int_to_ptr.hbm [resolvable:$true] %s765_s16 }
  0x43   : > { %10849 = dma.hbm_to_vmem [thread:$0]  (!%p11810_p6), %s698_s15, 2048, %s700_s28, [#allocation14], %s11622_s9, %s11622_s9, %s11623_s5  }
  0x44   : > { %10855 = dma.hbm_to_vmem [thread:$0]  (!%p11810_p6), %s732_s1, 6144, %s734_s18, [#allocation17], %s11622_s9, %s11622_s9, %s11623_s5  }
  0x45   : > { %s11632_s15 = smov [#allocation21]   ;;  %s11633_s0 = smov [#allocation24]  }
  0x46   : > { %s767_s22 = sshll.u32 %s11632_s15, 4  ;;  %s801_s11 = sshll.u32 %s11633_s0, 4  ;;  %s768_s22 = int_to_ptr.vmem [resolvable:$true] %s767_s22  ;;  %s802_s11 = int_to_ptr.vmem [resolvable:$true] %s801_s11 }
  0x47   : > { %10861 = dma.hbm_to_vmem [thread:$0]  (!%p11810_p6), %s766_s16, 10240, %s768_s22, [#allocation20], %s11622_s9, %s11622_s9, %s11623_s5  }
  0x48   : > { %s816_s28 = sshll.u32 %s13532_s23, 4  ;;  %s11634_s14 = smov [#allocation25]   ;;  %s817_s28 = int_to_ptr.hbm [resolvable:$true] %s816_s28 }
  0x49   : > { %10867 = dma.hbm_to_vmem [thread:$0]  (!%p11810_p6), %s800_s25, 10240, %s802_s11, [#allocation23], %s11622_s9, %s11622_s9, %s11623_s5  }
  0x4a   : > { %s818_s18 = sshll.u32 %s11634_s14, 4  ;;  %s13570_s20 = smov 4   ;;  %s819_s18 = int_to_ptr.vmem [resolvable:$true] %s818_s18 }
  0x4b   : > { %s13571_s26 = smov 64   ;;  %s7779_s16 = sadd.s32 4294967294, %s11616_s30  }
  0x4c   : > { %10870 = dma.hbm_to_vmem [thread:$0]  (!%p11810_p6), %s817_s28, 1024, %s819_s18, [#allocation26], %s13571_s26, %s13571_s26, %s13570_s20  }
  0x4d   : > { %s11911_s24 = sadd.s32 1, %s11616_s30   ;;  %s55_s4 = sadd.s32 1, %s11612_s6 }
  0x4e   : > { %s52_s15 = ssub.s32 %s11616_s30, %s11911_s24  ;;  %p62_p7 = scmp.ne.s32.totalorder %s11612_s6, %s11608_s2 }
  0x4f   : > { %p53_p8 = scmp.eq.s32.totalorder %s52_s15, 0  ;;  %p63_p9 = scmp.eq.s32.totalorder %s11616_s30, 0 }
  0x50   : > { %p68_p10 = scmp.ne.s32.totalorder %s11608_s2, %s11604_s29  ;;  %p596_p11 = scmp.eq.s32.totalorder %s11793_s8, 1 }
  0x51   : > { %s11923_s9 = scalar_select %p53_p8, %s11612_s6, %s55_s4  }
  0x52   : > { %p11927_p12 = por %p69_p1, %p68_p10  ;;  %p11931_p13 = por %p596_p11, %p62_p7 }
  0x53   : > { %p602_p0 = scmp.eq.s32.totalorder %s7779_s16, 1  ;;  %p64_p2 = por %p63_p9, %p62_p7 }
  0x54   : > { %s835_s25 = sand.u32 1, %s11612_s6   ;;  %p10892_p6 = scmp.lt.s32.totalorder %s11616_s30, 2 }
  0x55   : > { %p11936_p4 = por %p602_p0, %p68_p10  ;;  %s7795_s0 = sshll.u32 %s835_s25, 2 }
  0x56   : > { %s7796_s11 = sshll.u32 %s11616_s30, 2  ;;  %s13575_s28 = sld [smem:[#allocation37_spill]] }
  0x57   : > { %s839_s20 = scalar_lea.vmem [#allocation4], %s7795_s0  ;;  %p11945_p8 = pnand %p10892_p6, %p64_p2 }
  0x58   : > { %s847_s26 = sshll.u32 %s839_s20, 4  ;;  %s836_s4 = scalar_lea.sflag [#allocation5], %s835_s25  ;;  %s848_s26 = int_to_ptr.vmem [resolvable:$true] %s847_s26 }
  0x59   : > { %p11496_p9 = pneg %p11945_p8 }
  0x5c   : > { %s843_s14 = scalar_lea.hbm %s13575_s28, %s7796_s11  ;;  %s11499_s0 = scalar_lea.hbm %s13575_s28, 8 }
  0x5d   : > { %s845_s18 = sshll.u32 %s843_s14, 4  ;;  %s846_s18 = int_to_ptr.hbm [resolvable:$true] %s845_s18 }
  0x5e   : > { %s11492_s15 = sshra.s32 %s846_s18, 4  ;;  %s11493_s15 = int_to_ptr.hbm [resolvable:$true] %s11492_s15 }
  0x5f   : > { %s11494_s13 = scalar_lea.hbm %s11493_s15, 4  ;;  %p11500_p0 = scmp.lt.s32.totalorder %s11493_s15, %s13575_s28 }
  0x60   : > { %p11495_p7 = scmp.ne.s32.totalorder %s11493_s15, %s11494_s13  ;;  %p11501_p2 = scmp.lt.s32.totalorder %s11499_s0, %s11494_s13 }
  0x62   : > { %p11497_p10 = pnand %p11496_p9, %p11495_p7  ;;  %p11502_p6 = por %p11501_p2, %p11500_p0 }
  0x64   : > { %p11498_p11 = pneg %p11497_p10 }
  0x66   : > { %p11503_p5 = pnand %p11502_p6, %p11498_p11 }
  0x68   : > { %11506 = shalt.err (!%p11503_p5)
}
  0x69   : > { %10874 = dma.hbm_to_vmem [thread:$0]  (!%p11945_p8), %s846_s18, 64, %s848_s26, %s836_s4  }
  0x6a   : > { %856 = sbr.rel (%p11798_p3) target bundleno = 2810 (0xafa), region = 120  ;;  %s11962_s25 = sand.u32 (!%p11798_p3), 1, %s11608_s2  }
  0x6b   : > { %s7798_s20 = sshll.u32 (!%p11798_p3), %s11962_s25, 2  ;;  %s859_s11 = scalar_lea.sflag (!%p11798_p3), [#allocation5], %s11962_s25 }
  0x6c   : > { %s11966_s1 = scalar_lea.vmem (!%p11798_p3), [#allocation4], %s7798_s20 }
  0x6f   : > { %11567 = dma.done.wait (%p11927_p12), %s859_s11, 64  }
  0x70   : > { %11569 = vsyncadd (%p11927_p12), %s859_s11, 4294967232 }
  0x71   : > { %11571 = dma.done.wait (%p69_p1), [#allocation8], 1040  }
  0x72   : > { %11573 = vsyncadd (%p69_p1), [#allocation8], 4294966256 }
  0x73   : > { %11575 = dma.done.wait (%p69_p1), [#allocation11], 8192  }
  0x74   : > { %11577 = vsyncadd (%p69_p1), [#allocation11], 4294959104 }
  0x75   : > { %11579 = dma.done.wait (%p69_p1), [#allocation14], 8192  }
  0x76   : > { %11581 = vsyncadd (%p69_p1), [#allocation14], 4294959104 }
  0x77   : > { %11583 = dma.done.wait (%p69_p1), [#allocation17], 12288  }
  0x78   : > { %11585 = vsyncadd (%p69_p1), [#allocation17], 4294955008 }
  0x79   : > { %11587 = dma.done.wait (%p69_p1), [#allocation20], 20480  }
  0x7a   : > { %11589 = vsyncadd (%p69_p1), [#allocation20], 4294946816 }
  0x7b   : > { %11591 = dma.done.wait (%p69_p1), [#allocation23], 20480  }
  0x7c   : > { %11593 = vsyncadd (%p69_p1), [#allocation23], 4294946816 }
  0x7d   : > { %11595 = dma.done.wait (%p69_p1), [#allocation26], 1024  }
  0x7e   : > { %11597 = vsyncadd (%p69_p1), [#allocation26], 4294966272  ;;  %v10141_v0 = vld [vmem:[#allocation7 + $0x38] sm:$0xff]  ;;  %v10140_v1 = vld [vmem:[#allocation7 + $0x30] sm:$0xff]  ;;  %s13577_s3 = sld [smem:[#allocation41_spill]]  ;;  %vm1218_vm0 = vcmask 1043456  }
  0x7f   : > { %1071 = vmatpush.bf16.msra.mxu0 %v10141_v0  ;;  %v7903_v2 = vld [vmem:[#allocation10 + $0x70] sm:$0xf]  ;;  %v10157_v3 = vld [vmem:[#allocation10 + $0x74] sm:$0xf0]  ;;  %v10156_v4 = vld [vmem:[#allocation10 + $0x74] sm:$0xf] }
  0x80   : > { %v7904_v5 = vor.u32 %v10157_v3, %v7903_v2  ;;  %v7905_v6 = vld [vmem:[#allocation10 + $0x78] sm:$0xf0]  ;;  %v7895_v7 = vld [vmem:[#allocation10 + $0x60] sm:$0xf]  ;;  %v10155_v8 = vld [vmem:[#allocation10 + $0x64] sm:$0xf0] }
  0x81   : > { %v7908_v9 = vor.u32 %v10156_v4, %v7905_v6  ;;  %v10154_v10 = vld [vmem:[#allocation10 + $0x64] sm:$0xf]  ;;  %v7897_v11 = vld [vmem:[#allocation10 + $0x68] sm:$0xf0]  ;;  %v7896_v13 = vor.u32 %v10155_v8, %v7895_v7  ;;  %v7887_v15 = vld [vmem:[#allocation10 + $0x50] sm:$0xf] }
  0x82   : > { %v10139_v12 = vld [vmem:[#allocation7 + $0x28] sm:$0xff]  ;;  %1189 = vmatpush.bf16.msra.mxu1 %v7904_v5  ;;  %v7900_v14 = vor.u32 %v10154_v10, %v7897_v11  ;;  %v10153_v16 = vld [vmem:[#allocation10 + $0x54] sm:$0xf0]  ;;  %v10152_v17 = vld [vmem:[#allocation10 + $0x54] sm:$0xf]  ;;  %vm1260_vm1 = vcmask 1042432  }
  0x83   : > { %1072 = vmatpush.bf16.msra.mxu0 %v10140_v1  ;;  %1202 = vmatpush.bf16.msra.mxu2 %v7908_v9  ;;  %v7889_v18 = vld [vmem:[#allocation10 + $0x58] sm:$0xf0]  ;;  %v7888_v20 = vor.u32 %v10153_v16, %v7887_v15  ;;  %v7879_v22 = vld [vmem:[#allocation10 + $0x40] sm:$0xf]  ;;  %v10151_v23 = vld [vmem:[#allocation10 + $0x44] sm:$0xf0] }
  0x84   : > { %v10138_v19 = vld [vmem:[#allocation7 + $0x20] sm:$0xff]  ;;  %v7892_v21 = vor.u32 %v10152_v17, %v7889_v18  ;;  %v7881_v25 = vld [vmem:[#allocation10 + $0x48] sm:$0xf0]  ;;  %v10137_v26 = vld [vmem:[#allocation7 + $0x18] sm:$0xff]  ;;  %v7880_v27 = vor.u32 %v10151_v23, %v7879_v22  ;;  %vm1318_vm2 = vsmask.f32 4352 }
  0x85   : > { %v10150_v24 = vld [vmem:[#allocation10 + $0x44] sm:$0xf]  ;;  %v7871_v29 = vld [vmem:[#allocation10 + $0x30] sm:$0xf]  ;;  %v10149_v30 = vld [vmem:[#allocation10 + $0x34] sm:$0xf0] }
  0x86   : > { %1190 = vmatpush.bf16.msra.mxu1 %v7896_v13  ;;  %v7884_v28 = vor.u32 %v10150_v24, %v7881_v25  ;;  %v10148_v31 = vld [vmem:[#allocation10 + $0x34] sm:$0xf]  ;;  %v7873_v32 = vld [vmem:[#allocation10 + $0x38] sm:$0xf0]  ;;  %v7872_v34 = vor.u32 %v10149_v30, %v7871_v29  ;;  %v10135_v36 = vld [vmem:[#allocation7 + $0x8] sm:$0xff]  ;;  %s13578_s16 = sld [smem:[#allocation43_spill]] }
  0x87   : > { %1073 = vmatpush.bf16.msra.mxu0 %v10139_v12  ;;  %1203 = vmatpush.bf16.msra.mxu2 %v7900_v14  ;;  %v10136_v33 = vld [vmem:[#allocation7 + $0x10] sm:$0xff]  ;;  %v7876_v35 = vor.u32 %v10148_v31, %v7873_v32  ;;  %v10134_v37 = vld [vmem:[#allocation7] sm:$0xff]  ;;  %v1002_v38 = vld [vmem:[%s11966_s1] sm:$0xf]  ;;  %vm1770_vm11 = vcmask 1040384   ;;  %s13583_s0 = sld [smem:[#allocation45_spill]] }
  0x88   : > { %v7863_v39 = vld [vmem:[#allocation10 + $0x20] sm:$0xf]  ;;  %v10147_v40 = vld [vmem:[#allocation10 + $0x24] sm:$0xf0]  ;;  %v10146_v41 = vld [vmem:[#allocation10 + $0x24] sm:$0xf] }
  0x89   : > { %v7864_v42 = vor.u32 %v10147_v40, %v7863_v39  ;;  %v7865_v43 = vld [vmem:[#allocation10 + $0x28] sm:$0xf0]  ;;  %v7855_v45 = vld [vmem:[#allocation10 + $0x10] sm:$0xf]  ;;  %v10145_v46 = vld [vmem:[#allocation10 + $0x14] sm:$0xf0] }
  0x8a   : > { %1191 = vmatpush.bf16.msra.mxu1 %v7888_v20  ;;  %v7868_v44 = vor.u32 %v10146_v41, %v7865_v43  ;;  %v10144_v47 = vld [vmem:[#allocation10 + $0x14] sm:$0xf]  ;;  %v7856_v48 = vor.u32 %v10145_v46, %v7855_v45  ;;  %v7857_v49 = vld [vmem:[#allocation10 + $0x18] sm:$0xf0]  ;;  %v7847_v51 = vld [vmem:[#allocation10] sm:$0xf] }
  0x8b   : > { %1074 = vmatpush.bf16.msra.mxu0 %v10138_v19  ;;  %1204 = vmatpush.bf16.msra.mxu2 %v7892_v21  ;;  %v7860_v50 = vor.u32 %v10144_v47, %v7857_v49  ;;  %v10143_v52 = vld [vmem:[#allocation10 + $0x4] sm:$0xf0]  ;;  %v10142_v53 = vld [vmem:[#allocation10 + $0x4] sm:$0xf]  ;;  %v7849_v55 = vld [vmem:[#allocation10 + $0x8] sm:$0xf0] }
  0x8c   : > { %v7848_v54 = vor.u32 %v10143_v52, %v7847_v51  ;;  %v7852_v56 = vor.u32 %v10142_v53, %v7849_v55  ;;  %v7967_v57 = vld [vmem:[#allocation12 + $0x70] sm:$0xf]  ;;  %v10173_v58 = vld [vmem:[#allocation12 + $0x74] sm:$0xf0]  ;;  %v7959_v59 = vld [vmem:[#allocation12 + $0x60] sm:$0xf] }
  0x8d   : > { %v7968_v60 = vor.u32 %v10173_v58, %v7967_v57  ;;  %v10171_v61 = vld [vmem:[#allocation12 + $0x64] sm:$0xf0]  ;;  %v8031_v62 = vld [vmem:[#allocation12 + $0xf0] sm:$0xf]  ;;  %v10189_v63 = vld [vmem:[#allocation12 + $0xf4] sm:$0xf0] }
  0x8e   : > { %1192 = vmatpush.bf16.msra.mxu1 %v7880_v27  ;;  %v8032_v0 = vor.u32 %v10189_v63, %v8031_v62  ;;  %v7960_v1 = vor.u32 %v10171_v61, %v7959_v59  ;;  %v10960_v2 = vld [vmem:[#allocation9] ss:$0 sm:$0xff]  ;;  %v7951_v8 = vld [vmem:[#allocation12 + $0x50] sm:$0xf]  ;;  %v10169_v9 = vld [vmem:[#allocation12 + $0x54] sm:$0xf0] }
  0x8f   : > { %1075 = vmatpush.bf16.msra.mxu0 %v10137_v26  ;;  %1205 = vmatpush.bf16.msra.mxu2 %v7884_v28  ;;  %v7952_v10 = vor.u32 %v10169_v9, %v7951_v8  ;;  %v8023_v11 = vld [vmem:[#allocation12 + $0xe0] sm:$0xf]  ;;  %v10187_v12 = vld [vmem:[#allocation12 + $0xe4] sm:$0xf0]  ;;  %v8015_v17 = vld [vmem:[#allocation12 + $0xd0] sm:$0xf] }
  0x90   : > { %1605 = vmatpush.bf16.msra.mxu3 %v7968_v60  ;;  %v8024_v13 = vor.u32 %v10187_v12, %v8023_v11  ;;  %v7943_v14 = vld [vmem:[#allocation12 + $0x40] sm:$0xf]  ;;  %v10167_v15 = vld [vmem:[#allocation12 + $0x44] sm:$0xf0]  ;;  %v10185_v18 = vld [vmem:[#allocation12 + $0xd4] sm:$0xf0] }
  0x91   : > { %v7944_v16 = vor.u32 %v10167_v15, %v7943_v14  ;;  %v10172_v19 = vld [vmem:[#allocation12 + $0x74] sm:$0xf]  ;;  %v8016_v20 = vor.u32 %v10185_v18, %v8015_v17  ;;  %v7969_v21 = vld [vmem:[#allocation12 + $0x78] sm:$0xf0]  ;;  %v7935_v23 = vld [vmem:[#allocation12 + $0x30] sm:$0xf] }
  0x92   : > { %1193 = vmatpush.bf16.msra.mxu1 %v7872_v34  ;;  %v7972_v22 = vor.u32 %v10172_v19, %v7969_v21  ;;  %v10165_v24 = vld [vmem:[#allocation12 + $0x34] sm:$0xf0]  ;;  %v8095_v25 = vld [vmem:[#allocation12 + $0x170] sm:$0xf]  ;;  %v8007_v28 = vld [vmem:[#allocation12 + $0xc0] sm:$0xf] }
  0x93   : > { %1076 = vmatpush.bf16.msra.mxu0 %v10136_v33  ;;  %1206 = vmatpush.bf16.msra.mxu2 %v7876_v35  ;;  %v7936_v26 = vor.u32 %v10165_v24, %v7935_v23  ;;  %v10205_v27 = vld [vmem:[#allocation12 + $0x174] sm:$0xf0]  ;;  %v10183_v30 = vld [vmem:[#allocation12 + $0xc4] sm:$0xf0]  ;;  %v10170_v31 = vld [vmem:[#allocation12 + $0x64] sm:$0xf] }
  0x94   : > { %1606 = vmatpush.bf16.msra.mxu3 %v7960_v1  ;;  %v8096_v29 = vor.u32 %v10205_v27, %v8095_v25  ;;  %v7961_v32 = vld [vmem:[#allocation12 + $0x68] sm:$0xf0]  ;;  %v8008_v33 = vor.u32 %v10183_v30, %v8007_v28  ;;  %v7927_v35 = vld [vmem:[#allocation12 + $0x20] sm:$0xf]  ;;  %v10203_v39 = vld [vmem:[#allocation12 + $0x164] sm:$0xf0] }
  0x95   : > { %v7964_v34 = vor.u32 %v10170_v31, %v7961_v32  ;;  %v7999_v40 = vld [vmem:[#allocation12 + $0xb0] sm:$0xf]  ;;  %v10181_v41 = vld [vmem:[#allocation12 + $0xb4] sm:$0xf0]  ;;  %v7953_v45 = vld [vmem:[#allocation12 + $0x58] sm:$0xf0] }
  0x96   : > { %1194 = vmatpush.bf16.msra.mxu1 %v7864_v42  ;;  %v8000_v43 = vor.u32 %v10181_v41, %v7999_v40  ;;  %v7919_v47 = vld [vmem:[#allocation12 + $0x10] sm:$0xf]  ;;  %v10201_v51 = vld [vmem:[#allocation12 + $0x154] sm:$0xf0]  ;;  %v7991_v52 = vld [vmem:[#allocation12 + $0xa0] sm:$0xf] }
  0x97   : > { %1077 = vmatpush.bf16.msra.mxu0 %v10135_v36  ;;  %1207 = vmatpush.bf16.msra.mxu2 %v7868_v44  ;;  %v10163_v36 = vld [vmem:[#allocation12 + $0x24] sm:$0xf0]  ;;  %v10168_v44 = vld [vmem:[#allocation12 + $0x54] sm:$0xf]  ;;  %v8079_v49 = vld [vmem:[#allocation12 + $0x150] sm:$0xf] }
  0x98   : > { %1607 = vmatpush.bf16.msra.mxu3 %v7952_v10  ;;  %v7956_v46 = vor.u32 %v10168_v44, %v7953_v45  ;;  %v10179_v53 = vld [vmem:[#allocation12 + $0xa4] sm:$0xf0]  ;;  %v7945_v57 = vld [vmem:[#allocation12 + $0x48] sm:$0xf0]  ;;  %v11635_v59 = vmov 0   ;;  %s13596_s27 = sld [smem:[#allocation49_spill]] }
  0x99   : > { %v7992_v55 = vor.u32 %v10179_v53, %v7991_v52  ;;  %999 = vst [vmem:[#allocation3] sm:$0xf] %v11635_v59  ;;  %v7911_v60 = vld [vmem:[#allocation12] sm:$0xf]  ;;  %v10159_v61 = vld [vmem:[#allocation12 + $0x4] sm:$0xf0] }
  0x9a   : > { %1195 = vmatpush.bf16.msra.mxu1 %v7856_v48  ;;  %v10161_v48 = vld [vmem:[#allocation12 + $0x14] sm:$0xf0]  ;;  %v8071_v62 = vld [vmem:[#allocation12 + $0x140] sm:$0xf]  ;;  %v7912_v63 = vor.u32 %v10159_v61, %v7911_v60  ;;  %v7983_v1 = vld [vmem:[#allocation12 + $0x90] sm:$0xf] }
  0x9b   : > { %1078 = vmatpush.bf16.msra.mxu0 %v10134_v37  ;;  %1208 = vmatpush.bf16.msra.mxu2 %v7860_v50  ;;  %v8087_v37 = vld [vmem:[#allocation12 + $0x160] sm:$0xf]  ;;  %v7920_v50 = vor.u32 %v10161_v48, %v7919_v47  ;;  %v8033_v9 = vld [vmem:[#allocation12 + $0xf8] sm:$0xf0]  ;;  %v8063_v10 = vld [vmem:[#allocation12 + $0x130] sm:$0xf] }
  0x9c   : > { %1608 = vmatpush.bf16.msra.mxu3 %v7944_v16  ;;  %v8088_v42 = vor.u32 %v10203_v39, %v8087_v37  ;;  %v10197_v11 = vld [vmem:[#allocation12 + $0x134] sm:$0xf0]  ;;  %v7975_v14 = vld [vmem:[#allocation12 + $0x80] sm:$0xf]  ;;  %v10175_v15 = vld [vmem:[#allocation12 + $0x84] sm:$0xf0] }
  0x9d   : > { %v10162_v16 = vld [vmem:[#allocation12 + $0x24] sm:$0xf]  ;;  %v7976_v17 = vor.u32 %v10175_v15, %v7975_v14  ;;  %v7929_v18 = vld [vmem:[#allocation12 + $0x28] sm:$0xf0]  ;;  %v10204_v23 = vld [vmem:[#allocation12 + $0x174] sm:$0xf] }
  0x9e   : > { %1079 = vmatmul.bf16.vlgmr.msra.gmra.mxu0 %v1002_v38  ;;  %1196 = vmatpush.bf16.msra.mxu1 %v7848_v54  ;;  %v7928_v38 = vor.u32 %v10163_v36, %v7927_v35  ;;  %v8080_v54 = vor.u32 %v10201_v51, %v8079_v49  ;;  %v10186_v19 = vld [vmem:[#allocation12 + $0xe4] sm:$0xf]  ;;  %v7932_v21 = vor.u32 %v10162_v16, %v7929_v18  ;;  %v8097_v24 = vld [vmem:[#allocation12 + $0x178] sm:$0xf0]  ;;  %v8055_v25 = vld [vmem:[#allocation12 + $0x120] sm:$0xf] }
  0x9f   : > { %1209 = vmatpush.bf16.msra.mxu2 %v7852_v56  ;;  %1619 = vmatpush.bf16.msrb.mxu0 %v8032_v0  ;;  %v10166_v56 = vld [vmem:[#allocation12 + $0x44] sm:$0xf]  ;;  %v10199_v0 = vld [vmem:[#allocation12 + $0x144] sm:$0xf0]  ;;  %v10160_v28 = vld [vmem:[#allocation12 + $0x14] sm:$0xf] }
  0xa0   : > { %1609 = vmatpush.bf16.msra.mxu3 %v7936_v26  ;;  %v7948_v58 = vor.u32 %v10166_v56, %v7945_v57  ;;  %v8100_v26 = vor.u32 %v10204_v23, %v8097_v24  ;;  %v10195_v27 = vld [vmem:[#allocation12 + $0x124] sm:$0xf0]  ;;  %v10184_v31 = vld [vmem:[#allocation12 + $0xd4] sm:$0xf]  ;;  %v8017_v32 = vld [vmem:[#allocation12 + $0xd8] sm:$0xf0] }
  0xa1   : > { %v8056_v30 = vor.u32 %v10195_v27, %v8055_v25  ;;  %v8089_v35 = vld [vmem:[#allocation12 + $0x168] sm:$0xf0]  ;;  %v8047_v36 = vld [vmem:[#allocation12 + $0x110] sm:$0xf]  ;;  %v10193_v37 = vld [vmem:[#allocation12 + $0x114] sm:$0xf0] }
  0xa2   : > { %1633 = vmatpush.bf16.msrb.mxu1 %v8096_v29  ;;  %v7921_v29 = vld [vmem:[#allocation12 + $0x18] sm:$0xf0]  ;;  %v10158_v40 = vld [vmem:[#allocation12 + $0x4] sm:$0xf]  ;;  %v7913_v41 = vld [vmem:[#allocation12 + $0x8] sm:$0xf0] }
  0xa3   : > { %1620 = vmatpush.bf16.msrb.mxu0 %v8024_v13  ;;  %1647 = vmatpush.bf16.msrb.mxu2 %v7972_v22  ;;  %v8064_v13 = vor.u32 %v10197_v11, %v8063_v10  ;;  %v10200_v44 = vld [vmem:[#allocation12 + $0x154] sm:$0xf]  ;;  %v8081_v45 = vld [vmem:[#allocation12 + $0x158] sm:$0xf0]  ;;  %996 = vst [vmem:[#allocation2] sm:$0xf] %v11635_v59  ;;  %v7916_v47 = vor.u32 %v10158_v40, %v7913_v41 }
  0xa4   : > { %1610 = vmatpush.bf16.msra.mxu3 %v7928_v38  ;;  %v8020_v38 = vor.u32 %v10184_v31, %v8017_v32  ;;  %997 = vst [vmem:[#allocation2 + $0xc] sm:$0xf] %v11635_v59  ;;  %v1103_v51 = vld [vmem:[%s13577_s3] sm:$0x3]  ;;  %v8039_v52 = vld [vmem:[#allocation12 + $0x100] sm:$0xf] }
  0xa5   : > { %998 = vst [vmem:[#allocation2 + $0x14] sm:$0xf] %v11635_v59  ;;  %v10191_v53 = vld [vmem:[#allocation12 + $0x104] sm:$0xf0]  ;;  %v10180_v56 = vld [vmem:[#allocation12 + $0xb4] sm:$0xf] }
  0xa6   : > { %1634 = vmatpush.bf16.msrb.mxu1 %v8088_v42  ;;  %v10182_v42 = vld [vmem:[#allocation12 + $0xc4] sm:$0xf]  ;;  %1000 = vst [vmem:[#allocation3 + $0xc] sm:$0xf] %v11635_v59  ;;  %v8001_v57 = vld [vmem:[#allocation12 + $0xb8] sm:$0xf0] }
  0xa7   : > { %1621 = vmatpush.bf16.msrb.mxu0 %v8016_v20  ;;  %1648 = vmatpush.bf16.msrb.mxu2 %v7964_v34  ;;  %v8025_v20 = vld [vmem:[#allocation12 + $0xe8] sm:$0xf0]  ;;  %v7924_v34 = vor.u32 %v10160_v28, %v7921_v29  ;;  %1001 = vst [vmem:[#allocation3 + $0x14] sm:$0xf] %v11635_v59  ;;  %v8004_v61 = vor.u32 %v10180_v56, %v8001_v57  ;;  %v10196_v10 = vld [vmem:[#allocation12 + $0x134] sm:$0xf] }
  0xa8   : > { %1611 = vmatpush.bf16.msra.mxu3 %v7920_v50  ;;  %v8028_v22 = vor.u32 %v10186_v19, %v8025_v20  ;;  %v8084_v50 = vor.u32 %v10200_v44, %v8081_v45  ;;  %v8065_v11 = vld [vmem:[#allocation12 + $0x138] sm:$0xf0]  ;;  %v10194_v20 = vld [vmem:[#allocation12 + $0x124] sm:$0xf]  ;;  %v7977_v27 = vld [vmem:[#allocation12 + $0x88] sm:$0xf0] }
  0xa9   : > { %v8068_v14 = vor.u32 %v10196_v10, %v8065_v11  ;;  %v7985_v18 = vld [vmem:[#allocation12 + $0x98] sm:$0xf0]  ;;  %v10192_v28 = vld [vmem:[#allocation12 + $0x114] sm:$0xf]  ;;  %vm1828_vm12 = vsmask.f32 5376 }
  0xaa   : > { %1635 = vmatpush.bf16.msrb.mxu1 %v8080_v54  ;;  %v1106_v54 = vperm.slane %v1103_v51, 1  ;;  %v8049_v29 = vld [vmem:[#allocation12 + $0x118] sm:$0xf0]  ;;  %s13609_s26 = sld [smem:[#allocation51_spill]]  ;;  %s7812_s18 = sshll.u32 %s11962_s25, 4 }
  0xab   : > { %1622 = vmatpush.bf16.msrb.mxu0 %v8008_v33  ;;  %1649 = vmatpush.bf16.msrb.mxu2 %v7956_v46  ;;  %v10202_v33 = vld [vmem:[#allocation12 + $0x164] sm:$0xf]  ;;  %v8048_v46 = vor.u32 %v10193_v37, %v8047_v36  ;;  %v8052_v32 = vor.u32 %v10192_v28, %v8049_v29  ;;  %v8041_v37 = vld [vmem:[#allocation12 + $0x108] sm:$0xf0]  ;;  %s13624_s15 = sld [smem:[#allocation52_spill]]  ;;  %s7567_s20 = scalar_lea.sflag [#allocation6], %s11962_s25 }
  0xac   : > { %1612 = vmatpush.bf16.msra.mxu3 %v7912_v63  ;;  %v8092_v39 = vor.u32 %v10202_v33, %v8089_v35  ;;  %v8073_v63 = vld [vmem:[#allocation12 + $0x148] sm:$0xf0]  ;;  %v10190_v36 = vld [vmem:[#allocation12 + $0x104] sm:$0xf]  ;;  %s13631_s14 = sld [smem:[#allocation53_spill]] }
  0xad   : > { %v1239_v33 = vld [vmem:[#allocation3 + $0xc] sm:$0x1]  ;;  %s13636_s1 = sld [smem:[#allocation54_spill]] }
  0xae   : > { %v1258_v35 = vunpack.c.l.b16 %v1239_v33  ;;  %v8225_v33 = vld [vmem:[#allocation13 + $0xf0] sm:$0xf]  ;;  %s13637_s3 = sld [smem:[#allocation55_spill]] }
  0xaf   : > { %1623 = vmatpush.bf16.msrb.mxu0 %v8000_v43  ;;  %1650 = vmatpush.bf16.msrb.mxu2 %v7948_v58  ;;  %v8009_v43 = vld [vmem:[#allocation12 + $0xc8] sm:$0xf0]  ;;  %v11636_v58 = vmov 1935823168  }
  0xb0   : > { %v8012_v49 = vor.u32 %v10182_v42, %v8009_v43  ;;  %v1225_v60 = vunpack.c.l.s4 %v11636_v58  ;;  %v1259_v43 = vpack.c.b16 %v1258_v35, %v1258_v35 }
  0xb2   : > { %v12010_v59 = vunpack.c.0.s8 %v1225_v60 }
  0xb3   : > { %1624 = vmatpush.bf16.msrb.mxu0 %v7992_v55  ;;  %v8040_v55 = vor.u32 %v10191_v53, %v8039_v52 }
 0x11b   : > { %v1080_v3 = vpop.f32.mrf.mxu0 }
 0x11c   : > { %v1081_v4 = vadd.f32 %v10960_v2, %v1080_v3  ;;  %v10177_v2 = vld [vmem:[#allocation12 + $0x94] sm:$0xf0]  ;;  %v8072_v3 = vor.u32 %v10199_v0, %v8071_v62  ;;  %v10198_v62 = vld [vmem:[#allocation12 + $0x144] sm:$0xf]  ;;  %v1105_v0 = vperm.slane %v1103_v51, 0 }
 0x11e   : > { %v1084_v5 = vpack.c.bf16 %v1081_v4, %v1081_v4  ;;  %v7984_v4 = vor.u32 %v10177_v2, %v7983_v1  ;;  %1636 = vmatpush.bf16.msrb.mxu1 %v8072_v3  ;;  %v8076_v1 = vor.u32 %v10198_v62, %v8073_v63 }
 0x120   : > { %1085 = vst [vmem:[#allocation2 + $0x4] sm:$0xf] %v1084_v5  ;;  %v10164_v5 = vld [vmem:[#allocation12 + $0x34] sm:$0xf]  ;;  %1625 = vmatpush.bf16.msrb.mxu0 %v7984_v4 }
 0x122   : > { %1637 = vmatpush.bf16.msrb.mxu1 %v8064_v13 }
 0x123   : > { %v1082_v6 = vpop.f32.mrf.mxu0 }
 0x124   : > { %v7937_v6 = vld [vmem:[#allocation12 + $0x38] sm:$0xf0]  ;;  %1626 = vmatpush.bf16.msrb.mxu0 %v7976_v17  ;;  %v10176_v17 = vld [vmem:[#allocation12 + $0x94] sm:$0xf] }
 0x125   : > { %v7940_v8 = vor.u32 %v10164_v5, %v7937_v6  ;;  %v7988_v19 = vor.u32 %v10176_v17, %v7985_v18 }
 0x126   : > { %1638 = vmatpush.bf16.msrb.mxu1 %v8056_v30 }
 0x127   : > { %v1086_v7 = vld [vmem:[#allocation2 + $0x4] sm:$0xf]  ;;  %1651 = vmatpush.bf16.msrb.mxu2 %v7940_v8 }
 0x128   : > { %1197 = vmatmul.bf16.vlgmr.msra.gmra.mxu1 %v1086_v7  ;;  %1210 = vmatmul.bf16.vlgmr.msra.gmra.mxu2 %v1086_v7  ;;  %v10188_v7 = vld [vmem:[#allocation12 + $0xf4] sm:$0xf]  ;;  %v7993_v8 = vld [vmem:[#allocation12 + $0xa8] sm:$0xf0] }
 0x129   : > { %v8036_v12 = vor.u32 %v10188_v7, %v8033_v9  ;;  %1675 = vmatpush.bf16.msra.mxu0 %v8100_v26  ;;  %v10178_v7 = vld [vmem:[#allocation12 + $0xa4] sm:$0xf] }
 0x12a   : > { %1639 = vmatpush.bf16.msrb.mxu1 %v8048_v46  ;;  %v7996_v9 = vor.u32 %v10178_v7, %v7993_v8  ;;  %v10174_v26 = vld [vmem:[#allocation12 + $0x84] sm:$0xf] }
 0x12b   : > { %1661 = vmatpush.bf16.msrb.mxu3 %v8036_v12  ;;  %1652 = vmatpush.bf16.msrb.mxu2 %v7932_v21  ;;  %v8057_v21 = vld [vmem:[#allocation12 + $0x128] sm:$0xf0]  ;;  %v7980_v31 = vor.u32 %v10174_v26, %v7977_v27 }
 0x12c   : > { %v8060_v25 = vor.u32 %v10194_v20, %v8057_v21 }
 0x12d   : > { %1676 = vmatpush.bf16.msra.mxu0 %v8092_v39  ;;  %v8044_v39 = vor.u32 %v10190_v36, %v8041_v37  ;;  %v8145_v37 = vld [vmem:[#allocation13 + $0x50] sm:$0xf] }
 0x12e   : > { %1640 = vmatpush.bf16.msrb.mxu1 %v8040_v55 }
 0x12f   : > { %1662 = vmatpush.bf16.msrb.mxu3 %v8028_v22  ;;  %1653 = vmatpush.bf16.msrb.mxu2 %v7924_v34  ;;  %v1236_v34 = vld [vmem:[#allocation3] sm:$0x8] }
 0x131   : > { %1677 = vmatpush.bf16.msra.mxu0 %v8084_v50  ;;  %v1262_v50 = vrot.slane %v1259_v43, 5  ;;  %v8217_v43 = vld [vmem:[#allocation13 + $0xe0] sm:$0xf] }
 0x133   : > { %1663 = vmatpush.bf16.msrb.mxu3 %v8020_v38  ;;  %1654 = vmatpush.bf16.msrb.mxu2 %v7916_v47  ;;  %v1243_v38 = vunpack.c.l.b16 %v1236_v34  ;;  %v10237_v34 = vld [vmem:[#allocation13 + $0xf4] sm:$0xf0] }
 0x134   : > { %v8226_v35 = vor.u32 %v10237_v34, %v8225_v33  ;;  %v8113_v34 = vld [vmem:[#allocation13 + $0x10] sm:$0xf] }
 0x135   : > { %1678 = vmatpush.bf16.msra.mxu0 %v8076_v1 }
 0x137   : > { %1664 = vmatpush.bf16.msrb.mxu3 %v8012_v49  ;;  %2129 = vmatpush.bf16.msra.mxu2 %v8226_v35  ;;  %v10209_v35 = vld [vmem:[#allocation13 + $0x14] sm:$0xf0] }
 0x139   : > { %1679 = vmatpush.bf16.msra.mxu0 %v8068_v14 }
 0x13b   : > { %1665 = vmatpush.bf16.msrb.mxu3 %v8004_v61 }
 0x13d   : > { %1680 = vmatpush.bf16.msra.mxu0 %v8060_v25 }
 0x13f   : > { %1666 = vmatpush.bf16.msrb.mxu3 %v7996_v9 }
 0x141   : > { %1681 = vmatpush.bf16.msra.mxu0 %v8052_v32 }
 0x143   : > { %1667 = vmatpush.bf16.msrb.mxu3 %v7988_v19 }
 0x145   : > { %1682 = vmatpush.bf16.msra.mxu0 %v8044_v39 }
 0x147   : > { %1668 = vmatpush.bf16.msrb.mxu3 %v7980_v31  ;;  %v10219_v31 = vld [vmem:[#allocation13 + $0x64] sm:$0xf0] }
 0x1a5   : > { %v1198_v48 = vpop.f32.mrf.mxu1 }
 0x1a6   : > { %v1199_v5 = vadd.f32 %v1198_v48, %v1105_v0 }
 0x1ab   : > { %v1211_v2 = vpop.f32.mrf.mxu2 }
 0x1ac   : > { %v1212_v3 = vadd.f32 %v1211_v2, %v1106_v54 }
 0x1ad   : > { %v1200_v4 = vpop.f32.mrf.mxu1 }
 0x1ae   : > { %v1217_v6 = vrot.slane %v1212_v3, 4 }
 0x1b0   : > { %v1219_v12 = vsel %vm1218_vm0, %v1199_v5, %v1217_v6  ;;  %v1220_v13 = vsel %vm1218_vm0, %v1217_v6, %v1199_v5 }
 0x1b1   : > { %v1221_v15 = vrot.slane %v1220_v13, 4  ;;  %v1227_v16 = vperm.slane %v1219_v12, %v12010_v59 }
 0x1b3   : > { %v1231_v22 = vperm.slane %v1221_v15, %v12010_v59  ;;  %v1232_v23 = vpack.c.bf16 %v1227_v16, %v1227_v16  ;;  %v1213_v24 = vpop.f32.mrf.mxu2 }
 0x1b4   : > { %v12032_v24 = vld [vmem:[%s13578_s16] sm:$0x3]  ;;  %s10705_s16 = sshll.u32 %s11793_s8, 4 }
 0x1b5   : > { %v1233_v30 = vpack.c.bf16 %v1231_v22, %v1231_v22  ;;  %1234 = vst [vmem:[#allocation3 + $0x4] sm:$0xf] %v1232_v23  ;;  %v8161_v22 = vld [vmem:[#allocation13 + $0x70] sm:$0xf]  ;;  %v10221_v23 = vld [vmem:[#allocation13 + $0x74] sm:$0xf0] }
 0x1b6   : > { %v8162_v26 = vor.u32 %v10221_v23, %v8161_v22  ;;  %v1315_v29 = vperm.slane %v12032_v24, 1  ;;  %v10229_v22 = vld [vmem:[#allocation13 + $0xb4] sm:$0xf0] }
 0x1b7   : > { %1235 = vst [vmem:[#allocation3 + $0x8] sm:$0xf] %v1233_v30  ;;  %v8153_v30 = vld [vmem:[#allocation13 + $0x60] sm:$0xf] }
 0x1b8   : > { %2115 = vmatpush.bf16.msra.mxu1 %v8162_v26  ;;  %v8154_v32 = vor.u32 %v10219_v31, %v8153_v30  ;;  %v10216_v30 = vld [vmem:[#allocation13 + $0x54] sm:$0xf]  ;;  %v8147_v31 = vld [vmem:[#allocation13 + $0x58] sm:$0xf0] }
 0x1b9   : > { %v8150_v33 = vor.u32 %v10216_v30, %v8147_v31 }
 0x1bc   : > { %v12016_v40 = vld [vmem:[#allocation3 + $0x4] sm:$0xf]  ;;  %2116 = vmatpush.bf16.msra.mxu1 %v8154_v32 }
 0x1bd   : > { %v1244_v41 = vunpack.c.l.b16 %v12016_v40 }
 0x1be   : > { %v12019_v42 = vld [vmem:[#allocation3 + $0x8] sm:$0xf] }
 0x1bf   : > { %v1245_v44 = vunpack.c.l.b16 %v12019_v42  ;;  %v1246_v45 = vpack.c.b16 %v1244_v41, %v1243_v38  ;;  %v10217_v38 = vld [vmem:[#allocation13 + $0x54] sm:$0xf0] }
 0x1c1   : > { %v1247_v46 = vpack.c.b16 %v1245_v44, %v1245_v44  ;;  %v1248_v47 = vpack.c.b16 %v1245_v44, %v1244_v41  ;;  %v1320_v48 = vshrl.u32 %v1246_v45, 16  ;;  %v1323_v49 = vshll.u32 %v1246_v45, 16  ;;  %v10235_v44 = vld [vmem:[#allocation13 + $0xe4] sm:$0xf0] }
 0x1c2   : > { %v8146_v41 = vor.u32 %v10217_v38, %v8145_v37  ;;  %v1314_v37 = vperm.slane %v12032_v24, 0  ;;  %v10249_v38 = vld [vmem:[#allocation13 + $0x154] sm:$0xf0]  ;;  %v1689_v24 = vunpack.c.l.bf16 %v12016_v40 }
 0x1c3   : > { %v1322_v51 = vrot.slane %v1320_v48, 3  ;;  %v1325_v52 = vrot.slane %v1323_v49, 4  ;;  %v1328_v53 = vshrl.u32 %v1247_v46, 16  ;;  %v1331_v54 = vshll.u32 %v1247_v46, 16  ;;  %v8137_v49 = vld [vmem:[#allocation13 + $0x40] sm:$0xf] }
 0x1c4   : > { %v1261_v55 = vrot.slane %v1248_v47, 5  ;;  %v1250_v56 = vshrl.u32 %v1248_v47, 16  ;;  %v1253_v57 = vshll.u32 %v1248_v47, 16  ;;  %v8218_v47 = vor.u32 %v10235_v44, %v8217_v43  ;;  %2117 = vmatpush.bf16.msra.mxu1 %v8146_v41  ;;  %v8185_v43 = vld [vmem:[#allocation13 + $0xa0] sm:$0xf] }
 0x1c5   : > { %v1326_v58 = vor.u32 %v1325_v52, %v1322_v51  ;;  %v1330_v60 = vrot.slane %v1328_v53, 3  ;;  %v1333_v61 = vrot.slane %v1331_v54, 4  ;;  %v8209_v53 = vld [vmem:[#allocation13 + $0xd0] sm:$0xf]  ;;  %v10233_v54 = vld [vmem:[#allocation13 + $0xd4] sm:$0xf0] }
 0x1c6   : > { %v1263_v62 = vsel %vm1260_vm1, %v1261_v55, %v1262_v50  ;;  %v1346_v63 = vshrl.u32 %v1261_v55, 16  ;;  %v1349_v0 = vshll.u32 %v1261_v55, 16  ;;  %v1252_v1 = vrot.slane %v1250_v56, 4  ;;  %2130 = vmatpush.bf16.msra.mxu2 %v8218_v47  ;;  %v10215_v50 = vld [vmem:[#allocation13 + $0x44] sm:$0xf0] }
 0x1c7   : > { %v1334_v2 = vor.u32 %v1333_v61, %v1330_v60  ;;  %v1354_v3 = vshrl.u32 %v1263_v62, 16  ;;  %v1357_v4 = vshll.u32 %v1263_v62, 16  ;;  %v1255_v5 = vrot.slane %v1253_v57, 5  ;;  %v10220_v55 = vld [vmem:[#allocation13 + $0x74] sm:$0xf] }
 0x1c8   : > { %v1348_v6 = vrot.slane %v1346_v63, 3  ;;  %v1351_v7 = vrot.slane %v1349_v0, 4  ;;  %v8138_v52 = vor.u32 %v10215_v50, %v8137_v49  ;;  %v8210_v57 = vor.u32 %v10233_v54, %v8209_v53  ;;  %v8129_v62 = vld [vmem:[#allocation13 + $0x30] sm:$0xf]  ;;  %v10213_v63 = vld [vmem:[#allocation13 + $0x34] sm:$0xf0] }
 0x1c9   : > { %v1335_v8 = vsel %vm1318_vm2, %v1326_v58, %v1334_v2  ;;  %v1356_v9 = vrot.slane %v1354_v3, 3  ;;  %v1359_v10 = vrot.slane %v1357_v4, 4  ;;  %v1256_v11 = vor.u32 %v1255_v5, %v1252_v1  ;;  %v8163_v58 = vld [vmem:[#allocation13 + $0x78] sm:$0xf0]  ;;  %v8289_v0 = vld [vmem:[#allocation13 + $0x170] sm:$0xf] }
 0x1ca   : > { %1613 = vmatmul.bf16.vlgmr.msra.gmra.mxu3 %v1335_v8  ;;  %1655 = vmatmul.bf16.vlgmr.msrb.gmra.mxu2 %v1335_v8  ;;  %v1352_v12 = vor.u32 %v1351_v7, %v1348_v6  ;;  %v8166_v60 = vor.u32 %v10220_v55, %v8163_v58  ;;  %v8130_v2 = vor.u32 %v10213_v63, %v8129_v62  ;;  %v10253_v3 = vld [vmem:[#allocation13 + $0x174] sm:$0xf0]  ;;  %v8201_v4 = vld [vmem:[#allocation13 + $0xc0] sm:$0xf]  ;;  %v10231_v5 = vld [vmem:[#allocation13 + $0xc4] sm:$0xf0] }
 0x1cb   : > { %v1360_v13 = vor.u32 %v1359_v10, %v1356_v9  ;;  %v1337_v14 = vshrl.u32 %v1256_v11, 16  ;;  %v1340_v15 = vshll.u32 %v1256_v11, 16  ;;  %2118 = vmatpush.bf16.msra.mxu1 %v8138_v52  ;;  %2131 = vmatpush.bf16.msra.mxu2 %v8210_v57  ;;  %v8290_v7 = vor.u32 %v10253_v3, %v8289_v0  ;;  %v10218_v9 = vld [vmem:[#allocation13 + $0x64] sm:$0xf]  ;;  %v8155_v10 = vld [vmem:[#allocation13 + $0x68] sm:$0xf0] }
 0x1cc   : > { %v8202_v8 = vor.u32 %v10231_v5, %v8201_v4  ;;  %v10227_v44 = vld [vmem:[#allocation13 + $0xa4] sm:$0xf0]  ;;  %v8105_v49 = vld [vmem:[#allocation13] sm:$0xf]  ;;  %v10225_v57 = vld [vmem:[#allocation13 + $0x94] sm:$0xf0] }
 0x1cd   : > { %v1361_v16 = vsel %vm1318_vm2, %v1352_v12, %v1360_v13  ;;  %v1339_v17 = vrot.slane %v1337_v14, 3  ;;  %v1342_v18 = vrot.slane %v1340_v15, 4  ;;  %v8158_v12 = vor.u32 %v10218_v9, %v8155_v10  ;;  %2143 = vmatpush.bf16.msra.mxu3 %v8290_v7  ;;  %v8121_v14 = vld [vmem:[#allocation13 + $0x20] sm:$0xf]  ;;  %v10211_v15 = vld [vmem:[#allocation13 + $0x24] sm:$0xf0] }
 0x1ce   : > { %1641 = vmatmul.bf16.vlgmr.msrb.gmra.mxu1 %v1361_v16  ;;  %v8186_v47 = vor.u32 %v10227_v44, %v8185_v43  ;;  %v8265_v52 = vld [vmem:[#allocation13 + $0x140] sm:$0xf]  ;;  %v10247_v53 = vld [vmem:[#allocation13 + $0x144] sm:$0xf0]  ;;  %v10212_v58 = vld [vmem:[#allocation13 + $0x34] sm:$0xf] }
 0x1cf   : > { %v1343_v19 = vor.u32 %v1342_v18, %v1339_v17  ;;  %2119 = vmatpush.bf16.msra.mxu1 %v8130_v2  ;;  %2132 = vmatpush.bf16.msra.mxu2 %v8202_v8  ;;  %v8122_v17 = vor.u32 %v10211_v15, %v8121_v14  ;;  %v10251_v18 = vld [vmem:[#allocation13 + $0x164] sm:$0xf0]  ;;  %v8266_v55 = vor.u32 %v10247_v53, %v8265_v52  ;;  %v8131_v62 = vld [vmem:[#allocation13 + $0x38] sm:$0xf0]  ;;  %v10236_v63 = vld [vmem:[#allocation13 + $0xf4] sm:$0xf] }
 0x1d0   : > { %v8227_v0 = vld [vmem:[#allocation13 + $0xf8] sm:$0xf0]  ;;  %v8134_v4 = vor.u32 %v10212_v58, %v8131_v62  ;;  %v10245_v7 = vld [vmem:[#allocation13 + $0x134] sm:$0xf0]  ;;  %v8123_v14 = vld [vmem:[#allocation13 + $0x28] sm:$0xf0] }
 0x1d1   : > { %1627 = vmatmul.bf16.vlgmr.msrb.gmra.mxu0 %v1343_v19  ;;  %v8230_v5 = vor.u32 %v10236_v63, %v8227_v0  ;;  %v8211_v43 = vld [vmem:[#allocation13 + $0xd8] sm:$0xf0]  ;;  %v10241_v52 = vld [vmem:[#allocation13 + $0x114] sm:$0xf0]  ;;  %v10206_v53 = vld [vmem:[#allocation13 + $0x4] sm:$0xf] }
 0x1d2   : > { %2157 = vmatpush.bf16.msrb.mxu0 %v8166_v60  ;;  %v10248_v62 = vld [vmem:[#allocation13 + $0x154] sm:$0xf]  ;;  %v8275_v63 = vld [vmem:[#allocation13 + $0x158] sm:$0xf0] }
 0x1d3   : > { %2120 = vmatpush.bf16.msra.mxu1 %v8122_v17  ;;  %v10234_v17 = vld [vmem:[#allocation13 + $0xe4] sm:$0xf] }
 0x1d6   : > { %2158 = vmatpush.bf16.msrb.mxu0 %v8158_v12  ;;  %v10223_v12 = vld [vmem:[#allocation13 + $0x84] sm:$0xf0] }
 0x1da   : > { %1669 = vmatmul.bf16.vlgmr.msrb.gmra.mxu3 %v1343_v19  ;;  %v8193_v19 = vld [vmem:[#allocation13 + $0xb0] sm:$0xf]  ;;  %2159 = vmatpush.bf16.msrb.mxu0 %v8150_v33  ;;  %v8249_v33 = vld [vmem:[#allocation13 + $0x120] sm:$0xf] }
 0x1e1   : > { %1683 = vmatmul.bf16.vlgmr.msra.gmra.mxu0 %v1361_v16  ;;  %v8281_v16 = vld [vmem:[#allocation13 + $0x160] sm:$0xf] }
 0x24d   : > { %v12025_v20 = vpop.f32.mrf.mxu3  ;;  %v1656_v28 = vpop.f32.mrf.mxu2 }
 0x24e   : > { %v12027_v21 = vpop.f32.mrf.mxu0  ;;  %v1657_v36 = vadd.f32 %v1656_v28, %v1315_v29  ;;  %v8282_v28 = vor.u32 %v10251_v18, %v8281_v16  ;;  %v1615_v8 = vadd.f32 %v12025_v20, %v1314_v37  ;;  %v8219_v18 = vld [vmem:[#allocation13 + $0xe8] sm:$0xf0] }
 0x250   : > { %2144 = vmatpush.bf16.msra.mxu3 %v8282_v28  ;;  %v10252_v28 = vld [vmem:[#allocation13 + $0x174] sm:$0xf]  ;;  %v1629_v30 = vadd.f32 %v12027_v21, %v1615_v8 }
 0x255   : > { %v12034_v25 = vpop.f32.mrf.mxu3  ;;  %v1658_v51 = vpop.f32.mrf.mxu2 }
 0x256   : > { %v12036_v27 = vpop.f32.mrf.mxu0  ;;  %v1659_v61 = vadd.f32 %v1658_v51, %v1315_v29  ;;  %v8194_v29 = vor.u32 %v10229_v22, %v8193_v19  ;;  %v10207_v51 = vld [vmem:[#allocation13 + $0x4] sm:$0xf0] }
 0x257   : > { %v8106_v54 = vor.u32 %v10207_v51, %v8105_v49 }
 0x258   : > { %2133 = vmatpush.bf16.msra.mxu2 %v8194_v29  ;;  %v8291_v29 = vld [vmem:[#allocation13 + $0x178] sm:$0xf0] }
 0x25c   : > { %2134 = vmatpush.bf16.msra.mxu2 %v8186_v47  ;;  %v8283_v47 = vld [vmem:[#allocation13 + $0x168] sm:$0xf0] }
 0x25d   : > { %v1670_v39 = vpop.f32.mrf.mxu3 }
 0x25e   : > { %v1684_v45 = vpop.f32.mrf.mxu0  ;;  %v1671_v46 = vadd.f32 %v1670_v39, %v1657_v36  ;;  %v8273_v36 = vld [vmem:[#allocation13 + $0x150] sm:$0xf]  ;;  %v8114_v39 = vor.u32 %v10209_v35, %v8113_v34  ;;  %v10243_v34 = vld [vmem:[#allocation13 + $0x124] sm:$0xf0]  ;;  %v10208_v35 = vld [vmem:[#allocation13 + $0x14] sm:$0xf] }
 0x25f   : > { %v8274_v41 = vor.u32 %v10249_v38, %v8273_v36  ;;  %v1642_v36 = vpop.f32.mrf.mxu1  ;;  %v8250_v38 = vor.u32 %v10243_v34, %v8249_v33  ;;  %v10244_v33 = vld [vmem:[#allocation13 + $0x134] sm:$0xf]  ;;  %v8259_v34 = vld [vmem:[#allocation13 + $0x138] sm:$0xf0] }
 0x260   : > { %v1685_v48 = vadd.f32 %v1684_v45, %v1671_v46  ;;  %v10214_v45 = vld [vmem:[#allocation13 + $0x44] sm:$0xf]  ;;  %2121 = vmatpush.bf16.msra.mxu1 %v8114_v39  ;;  %v8115_v39 = vld [vmem:[#allocation13 + $0x18] sm:$0xf0] }
 0x261   : > { %2145 = vmatpush.bf16.msra.mxu3 %v8274_v41  ;;  %v10232_v41 = vld [vmem:[#allocation13 + $0xd4] sm:$0xf] }
 0x262   : > { %v8101_v56 = vmul.f32 -1.442695, %v1685_v48  ;;  %v8139_v48 = vld [vmem:[#allocation13 + $0x48] sm:$0xf0]  ;;  %v8214_v21 = vor.u32 %v10232_v41, %v8211_v43  ;;  %v10242_v41 = vld [vmem:[#allocation13 + $0x124] sm:$0xf] }
 0x263   : > { %v8142_v50 = vor.u32 %v10214_v45, %v8139_v48  ;;  %v8118_v45 = vor.u32 %v10208_v35, %v8115_v39  ;;  %v8241_v48 = vld [vmem:[#allocation13 + $0x110] sm:$0xf]  ;;  %v8262_v35 = vor.u32 %v10244_v33, %v8259_v34  ;;  %v8179_v39 = vld [vmem:[#allocation13 + $0x98] sm:$0xf0]  ;;  %v1739_v43 = vld [vmem:[#allocation2] sm:$0xc] }
 0x264   : > { %10962 = vpow2.f32 %v8101_v56  ;;  %v8177_v56 = vld [vmem:[#allocation13 + $0x90] sm:$0xf]  ;;  %2122 = vmatpush.bf16.msra.mxu1 %v8106_v54  ;;  %v8107_v54 = vld [vmem:[#allocation13 + $0x8] sm:$0xf0]  ;;  %v8242_v58 = vor.u32 %v10241_v52, %v8241_v48  ;;  %v10240_v48 = vld [vmem:[#allocation13 + $0x114] sm:$0xf]  ;;  %v1748_v52 = vunpack.c.l.b16 %v1739_v43 }
 0x265   : > { %v1672_v1 = vpop.f32.mrf.mxu3  ;;  %2160 = vmatpush.bf16.msrb.mxu0 %v8142_v50  ;;  %2146 = vmatpush.bf16.msra.mxu3 %v8266_v55  ;;  %v1617_v50 = vadd.f32 %v12034_v25, %v1314_v37  ;;  %v1643_v55 = vadd.f32 %v1642_v36, %v1629_v30  ;;  %v8187_v30 = vld [vmem:[#allocation13 + $0xa8] sm:$0xf0] }
 0x266   : > { %v1673_v6 = vadd.f32 %v1672_v1, %v1659_v61  ;;  %v1686_v11 = vpop.f32.mrf.mxu0  ;;  %v8178_v61 = vor.u32 %v10225_v57, %v8177_v56 }
 0x268   : > { %v1687_v13 = vadd.f32 %v1686_v11, %v1673_v6  ;;  %v8257_v6 = vld [vmem:[#allocation13 + $0x130] sm:$0xf]  ;;  %v8169_v11 = vld [vmem:[#allocation13 + $0x80] sm:$0xf]  ;;  %2135 = vmatpush.bf16.msra.mxu2 %v8178_v61  ;;  %2171 = vmatpush.bf16.msrb.mxu1 %v8230_v5  ;;  %v8203_v61 = vld [vmem:[#allocation13 + $0xc8] sm:$0xf0]  ;;  %v1631_v5 = vadd.f32 %v12036_v27, %v1617_v50 }
 0x269   : > { %v8258_v10 = vor.u32 %v10245_v7, %v8257_v6  ;;  %2161 = vmatpush.bf16.msrb.mxu0 %v8134_v4  ;;  %v8170_v20 = vor.u32 %v10223_v12, %v8169_v11  ;;  %v8278_v4 = vor.u32 %v10248_v62, %v8275_v63  ;;  %v10228_v12 = vld [vmem:[#allocation13 + $0xb4] sm:$0xf] }
 0x26a   : > { %v10963_v23 = vpop.eup %10962  ;;  %v8102_v26 = vmul.f32 -1.442695, %v1687_v13  ;;  %v10210_v13 = vld [vmem:[#allocation13 + $0x24] sm:$0xf] }
 0x26b   : > { %v12039_v32 = vadd.f32 1.0, %v10963_v23  ;;  %v8126_v16 = vor.u32 %v10210_v13, %v8123_v14  ;;  %2147 = vmatpush.bf16.msra.mxu3 %v8258_v10  ;;  %v10239_v10 = vld [vmem:[#allocation13 + $0x104] sm:$0xf0]  ;;  %v8195_v13 = vld [vmem:[#allocation13 + $0xb8] sm:$0xf0] }
 0x26c   : > { %10964 = vpow2.f32 %v8102_v26  ;;  %v8222_v26 = vor.u32 %v10234_v17, %v8219_v18  ;;  %2136 = vmatpush.bf16.msra.mxu2 %v8170_v20  ;;  %v10246_v14 = vld [vmem:[#allocation13 + $0x144] sm:$0xf]  ;;  %v8198_v27 = vor.u32 %v10228_v12, %v8195_v13  ;;  %v1644_v17 = vpop.f32.mrf.mxu1 }
 0x26d   : > { %10966 = vrcp.f32 %v12039_v32  ;;  %v1708_v46 = vand.u32 2147483647, %v12039_v32  ;;  %v1710_v2 = vand.u32 2147483648, %v12039_v32  ;;  %vm1704_vm4 = vweird.f32 %v12039_v32  ;;  %2162 = vmatpush.bf16.msrb.mxu0 %v8126_v16  ;;  %v8267_v16 = vld [vmem:[#allocation13 + $0x148] sm:$0xf0] }
 0x26e   : > { %2172 = vmatpush.bf16.msrb.mxu1 %v8222_v26  ;;  %v8270_v19 = vor.u32 %v10246_v14, %v8267_v16  ;;  %v1645_v22 = vadd.f32 %v1644_v17, %v1631_v5 }
 0x26f   : > { %vm12063_vm6 = vcmp.eq.f32.partialorder %v1708_v46, 8.507059e+37  ;;  %v1711_v23 = vor.u32 1.1754944e-38, %v1710_v2  ;;  %v10250_v46 = vld [vmem:[#allocation13 + $0x164] sm:$0xf]  ;;  %2148 = vmatpush.bf16.msra.mxu3 %v8250_v38  ;;  %v10224_v38 = vld [vmem:[#allocation13 + $0x94] sm:$0xf] }
 0x270   : > { %v8286_v51 = vor.u32 %v10250_v46, %v8283_v47  ;;  %v10222_v47 = vld [vmem:[#allocation13 + $0x84] sm:$0xf] }
 0x271   : > { %2163 = vmatpush.bf16.msrb.mxu0 %v8118_v45  ;;  %v8251_v45 = vld [vmem:[#allocation13 + $0x128] sm:$0xf0] }
 0x272   : > { %v10965_v60 = vpop.eup %10964  ;;  %2173 = vmatpush.bf16.msrb.mxu1 %v8214_v21  ;;  %v8254_v46 = vor.u32 %v10242_v41, %v8251_v45 }
 0x273   : > { %v12044_v1 = vpop.eup %10966  ;;  %v12047_v3 = vadd.f32 1.0, %v10965_v60  ;;  %v10230_v60 = vld [vmem:[#allocation13 + $0xc4] sm:$0xf]  ;;  %2149 = vmatpush.bf16.msra.mxu3 %v8242_v58 }
 0x274   : > { %v1700_v9 = vmul.f32 %v12044_v1, %v12039_v32  ;;  %vm1705_vm3 = vweird.f32 %v12044_v1  ;;  %v8294_v32 = vor.u32 %v10252_v28, %v8291_v29  ;;  %v8206_v37 = vor.u32 %v10230_v60, %v8203_v61  ;;  %v10226_v29 = vld [vmem:[#allocation13 + $0xa4] sm:$0xf]  ;;  %v8235_v61 = vld [vmem:[#allocation13 + $0x108] sm:$0xf0] }
 0x275   : > { %10968 = vrcp.f32 %v12047_v3  ;;  %vm12059_vm5 = vmor %vm1704_vm4, %vm1705_vm3  ;;  %v1725_v6 = vand.u32 2147483648, %v12047_v3  ;;  %v1723_v40 = vand.u32 2147483647, %v12047_v3  ;;  %vm1719_vm8 = vweird.f32 %v12047_v3  ;;  %v10238_v60 = vld [vmem:[#allocation13 + $0x104] sm:$0xf] }
 0x276   : > { %v1701_v15 = vsub.f32 1.0, %v1700_v9  ;;  %2185 = vmatpush.bf16.msrb.mxu2 %v8294_v32  ;;  %v8233_v9 = vld [vmem:[#allocation13 + $0x100] sm:$0xf]  ;;  %2174 = vmatpush.bf16.msrb.mxu1 %v8206_v37  ;;  %v8190_v32 = vor.u32 %v10226_v29, %v8187_v30  ;;  %v8238_v62 = vor.u32 %v10238_v60, %v8235_v61  ;;  %v10268_v61 = vld [vmem:[#allocation15 + $0x64] sm:$0xf0] }
 0x277   : > { %v8234_v11 = vor.u32 %v10239_v10, %v8233_v9  ;;  %v1726_v18 = vor.u32 1.1754944e-38, %v1725_v6  ;;  %vm1724_vm10 = vcmp.eq.f32.partialorder %v1723_v40, 8.507059e+37  ;;  %v8351_v60 = vld [vmem:[#allocation15 + $0x60] sm:$0xf] }
 0x278   : > { %v1702_v31 = vmul.f32 %v12044_v1, %v1701_v15 }
 0x279   : > { %2150 = vmatpush.bf16.msra.mxu3 %v8234_v11 }
 0x27a   : > { %v1703_v44 = vadd.f32 %v12044_v1, %v1702_v31  ;;  %2186 = vmatpush.bf16.msrb.mxu2 %v8286_v51  ;;  %2175 = vmatpush.bf16.msrb.mxu1 %v8198_v27 }
 0x27b   : > { %v10969_v49 = vpop.eup %10968 }
 0x27c   : > { %v1707_v56 = vsel %vm12059_vm5, %v12044_v1, %v1703_v44  ;;  %v1715_v57 = vmul.f32 %v10969_v49, %v12047_v3  ;;  %v8110_v1 = vor.u32 %v10206_v53, %v8107_v54  ;;  %vm1720_vm7 = vweird.f32 %v10969_v49  ;;  %v1744_v53 = vld [vmem:[#allocation2 + $0xc] sm:$0x3] }
 0x27d   : > { %v1712_v25 = vsel %vm12063_vm6, %v1711_v23, %v1707_v56  ;;  %vm1721_vm9 = vmor %vm1719_vm8, %vm1720_vm7  ;;  %v1690_v3 = vunpack.c.l.bf16 %v12019_v42  ;;  %v8182_v44 = vor.u32 %v10224_v38, %v8179_v39  ;;  %v8171_v42 = vld [vmem:[#allocation13 + $0x88] sm:$0xf0] }
 0x27e   : > { %v1729_v0 = vmul.f32 %v1712_v25, %v1643_v55  ;;  %v1716_v2 = vsub.f32 1.0, %v1715_v57  ;;  %2164 = vmatpush.bf16.msrb.mxu0 %v8110_v1  ;;  %2187 = vmatpush.bf16.msrb.mxu2 %v8278_v4  ;;  %v8174_v54 = vor.u32 %v10222_v47, %v8171_v42  ;;  %v1767_v57 = vunpack.c.l.b16 %v1744_v53  ;;  %v12104_v42 = vld [vmem:[%s13583_s0] sm:$0x3]  ;;  %v8361_v53 = vld [vmem:[#allocation15 + $0x78] sm:$0xf0]  ;;  %s13640_s0 = sld [smem:[#allocation56_spill]] }
 0x27f   : > { %2176 = vmatpush.bf16.msrb.mxu1 %v8190_v32 }
 0x280   : > { %v1731_v7 = vadd.f32 %v1729_v0, %v1689_v24  ;;  %v1717_v8 = vmul.f32 %v10969_v49, %v1716_v2  ;;  %v1769_v25 = vpack.c.b16 %v1767_v57, %v1767_v57  ;;  %v1825_v57 = vperm.slane %v12104_v42, 1 }
 0x282   : > { %v1733_v15 = vmul.f32 0.70710677, %v1731_v7  ;;  %v1718_v20 = vadd.f32 %v10969_v49, %v1717_v8  ;;  %2188 = vmatpush.bf16.msrb.mxu2 %v8270_v19  ;;  %v1772_v8 = vrot.slane %v1769_v25, 7  ;;  %v8353_v25 = vld [vmem:[#allocation15 + $0x68] sm:$0xf0] }
 0x283   : > { %2177 = vmatpush.bf16.msrb.mxu1 %v8182_v44 }
 0x284   : > { %v1735_v23 = vpack.c.bf16 %v1733_v15, %v1733_v15  ;;  %v1722_v26 = vsel %vm1721_vm9, %v10969_v49, %v1718_v20  ;;  %v8243_v49 = vld [vmem:[#allocation13 + $0x118] sm:$0xf0]  ;;  %s7578_s7 = scalar_lea.hbm %s13640_s0, %s10705_s16 }
 0x285   : > { %v1727_v28 = vsel %vm1724_vm10, %v1726_v18, %v1722_v26  ;;  %v8246_v56 = vor.u32 %v10240_v48, %v8243_v49  ;;  %v8359_v48 = vld [vmem:[#allocation15 + $0x70] sm:$0xf]  ;;  %v10270_v49 = vld [vmem:[#allocation15 + $0x74] sm:$0xf0] }
 0x286   : > { %1737 = vst [vmem:[#allocation2 + $0x4] sm:$0xf] %v1735_v23  ;;  %v1730_v31 = vmul.f32 %v1727_v28, %v1645_v22  ;;  %2189 = vmatpush.bf16.msrb.mxu2 %v8262_v35 }
 0x287   : > { %2178 = vmatpush.bf16.msrb.mxu1 %v8174_v54 }
 0x288   : > { %v1732_v36 = vadd.f32 %v1730_v31, %v1690_v3 }
 0x28a   : > { %v1734_v21 = vmul.f32 0.70710677, %v1732_v36  ;;  %2190 = vmatpush.bf16.msrb.mxu2 %v8254_v46 }
 0x28c   : > { %v1736_v50 = vpack.c.bf16 %v1734_v21, %v1734_v21 }
 0x28d   : > { %v12086_v51 = vld [vmem:[#allocation2 + $0x4] sm:$0xf] }
 0x28e   : > { %1738 = vst [vmem:[#allocation2 + $0x8] sm:$0xf] %v1736_v50  ;;  %v1749_v55 = vunpack.c.l.b16 %v12086_v51  ;;  %2191 = vmatpush.bf16.msrb.mxu2 %v8246_v56  ;;  %v1743_v24 = vld [vmem:[#allocation2 + $0x4] sm:$0xe]  ;;  %v10269_v50 = vld [vmem:[#allocation15 + $0x74] sm:$0xf] }
 0x28f   : > { %v1766_v5 = vunpack.c.l.b16 %v1743_v24  ;;  %v8364_v56 = vor.u32 %v10269_v50, %v8361_v53  ;;  %v8352_v24 = vor.u32 %v10268_v61, %v8351_v60  ;;  %v10256_v53 = vld [vmem:[#allocation15 + $0x4] sm:$0xf0]  ;;  %v1824_v61 = vperm.slane %v12104_v42, 0 }
 0x290   : > { %v1751_v58 = vpack.c.b16 %v1749_v55, %v1748_v52  ;;  %v8360_v52 = vor.u32 %v10270_v49, %v8359_v48  ;;  %v8313_v48 = vld [vmem:[#allocation15 + $0x18] sm:$0xf0] }
 0x291   : > { %2373 = vmatpush.bf16.msra.mxu0 %v8364_v56  ;;  %v8305_v56 = vld [vmem:[#allocation15 + $0x8] sm:$0xf0] }
 0x292   : > { %v1830_v63 = vshrl.u32 %v1751_v58, 16  ;;  %v1833_v0 = vshll.u32 %v1751_v58, 16  ;;  %2192 = vmatpush.bf16.msrb.mxu2 %v8238_v62  ;;  %2359 = vmatpush.bf16.msrb.mxu3 %v8360_v52  ;;  %v10267_v62 = vld [vmem:[#allocation15 + $0x64] sm:$0xf]  ;;  %v8303_v52 = vld [vmem:[#allocation15] sm:$0xf] }
 0x294   : > { %v1832_v9 = vrot.slane %v1830_v63, 2  ;;  %v1835_v10 = vrot.slane %v1833_v0, 3  ;;  %v8343_v0 = vld [vmem:[#allocation15 + $0x50] sm:$0xf] }
 0x295   : > { %v1741_v37 = vld [vmem:[#allocation2 + $0x8] sm:$0x7] }
 0x296   : > { %v12089_v2 = vld [vmem:[#allocation2 + $0x8] sm:$0xf]  ;;  %v1750_v1 = vunpack.c.l.b16 %v1741_v37  ;;  %v1836_v26 = vor.u32 %v1835_v10, %v1832_v9  ;;  %v8356_v37 = vor.u32 %v10267_v62, %v8353_v25  ;;  %2360 = vmatpush.bf16.msrb.mxu3 %v8352_v24 }
 0x297   : > { %v1754_v4 = vunpack.c.l.b16 %v12089_v2 }
 0x298   : > { %v1752_v6 = vpack.c.b16 %v1750_v1, %v1750_v1  ;;  %2374 = vmatpush.bf16.msra.mxu0 %v8356_v37  ;;  %v10266_v1 = vld [vmem:[#allocation15 + $0x54] sm:$0xf0] }
 0x299   : > { %v1768_v7 = vpack.c.b16 %v1754_v4, %v1766_v5  ;;  %v1755_v40 = vpack.c.b16 %v1754_v4, %v1749_v55  ;;  %v10265_v4 = vld [vmem:[#allocation15 + $0x54] sm:$0xf] }
 0x29a   : > { %v1838_v11 = vshrl.u32 %v1752_v6, 16  ;;  %v1841_v12 = vshll.u32 %v1752_v6, 16  ;;  %v8344_v6 = vor.u32 %v10266_v1, %v8343_v0 }
 0x29b   : > { %v1771_v13 = vrot.slane %v1768_v7, 7  ;;  %v1757_v14 = vshrl.u32 %v1755_v40, 16  ;;  %v1760_v15 = vshll.u32 %v1755_v40, 16  ;;  %v8345_v7 = vld [vmem:[#allocation15 + $0x58] sm:$0xf0] }
 0x29c   : > { %v1840_v20 = vrot.slane %v1838_v11, 2  ;;  %v1843_v27 = vrot.slane %v1841_v12, 3  ;;  %v8348_v40 = vor.u32 %v10265_v4, %v8345_v7  ;;  %2361 = vmatpush.bf16.msrb.mxu3 %v8344_v6  ;;  %v8335_v11 = vld [vmem:[#allocation15 + $0x40] sm:$0xf]  ;;  %v10264_v12 = vld [vmem:[#allocation15 + $0x44] sm:$0xf0] }
 0x29d   : > { %v1773_v16 = vsel %vm1770_vm11, %v1771_v13, %v1772_v8  ;;  %v1856_v17 = vshrl.u32 %v1771_v13, 16  ;;  %v1859_v18 = vshll.u32 %v1771_v13, 16  ;;  %v1759_v23 = vrot.slane %v1757_v14, 5  ;;  %v10263_v13 = vld [vmem:[#allocation15 + $0x44] sm:$0xf] }
 0x29e   : > { %v1864_v19 = vshrl.u32 %v1773_v16, 16  ;;  %v1867_v22 = vshll.u32 %v1773_v16, 16  ;;  %v1844_v28 = vor.u32 %v1843_v27, %v1840_v20  ;;  %v1762_v30 = vrot.slane %v1760_v15, 6  ;;  %2375 = vmatpush.bf16.msra.mxu0 %v8348_v40  ;;  %v8337_v20 = vld [vmem:[#allocation15 + $0x48] sm:$0xf0] }
 0x29f   : > { %v1858_v29 = vrot.slane %v1856_v17, 2  ;;  %v1861_v3 = vrot.slane %v1859_v18, 3  ;;  %v8336_v15 = vor.u32 %v10264_v12, %v8335_v11  ;;  %v8340_v16 = vor.u32 %v10263_v13, %v8337_v20  ;;  %v8327_v18 = vld [vmem:[#allocation15 + $0x30] sm:$0xf] }
 0x2a0   : > { %v1866_v31 = vrot.slane %v1864_v19, 2  ;;  %v1869_v32 = vrot.slane %v1867_v22, 3  ;;  %v1845_v33 = vsel %vm1828_vm12, %v1836_v26, %v1844_v28  ;;  %v1763_v34 = vor.u32 %v1762_v30, %v1759_v23  ;;  %v10262_v19 = vld [vmem:[#allocation15 + $0x34] sm:$0xf0]  ;;  %v10261_v22 = vld [vmem:[#allocation15 + $0x34] sm:$0xf] }
 0x2a1   : > { %2123 = vmatmul.bf16.vlgmr.msra.gmra.mxu1 %v1845_v33  ;;  %2165 = vmatmul.bf16.vlgmr.msrb.gmra.mxu0 %v1845_v33  ;;  %v1862_v35 = vor.u32 %v1861_v3, %v1858_v29  ;;  %v8328_v26 = vor.u32 %v10262_v19, %v8327_v18  ;;  %v8329_v28 = vld [vmem:[#allocation15 + $0x38] sm:$0xf0]  ;;  %v10259_v33 = vld [vmem:[#allocation15 + $0x24] sm:$0xf]  ;;  %v2199_v12 = vunpack.c.l.bf16 %v12086_v51 }
 0x2a2   : > { %v1870_v36 = vor.u32 %v1869_v32, %v1866_v31  ;;  %v1847_v38 = vshrl.u32 %v1763_v34, 16  ;;  %v1850_v39 = vshll.u32 %v1763_v34, 16  ;;  %2362 = vmatpush.bf16.msrb.mxu3 %v8336_v15  ;;  %2376 = vmatpush.bf16.msra.mxu0 %v8340_v16  ;;  %v8332_v30 = vor.u32 %v10261_v22, %v8329_v28  ;;  %v8319_v31 = vld [vmem:[#allocation15 + $0x20] sm:$0xf]  ;;  %v10260_v32 = vld [vmem:[#allocation15 + $0x24] sm:$0xf0] }
 0x2a3   : > { %v2200_v28 = vunpack.c.l.bf16 %v12089_v2  ;;  %v8423_v2 = vld [vmem:[#allocation16 + $0x60] sm:$0xf] }
 0x2a4   : > { %v1871_v41 = vsel %vm1828_vm12, %v1862_v35, %v1870_v36  ;;  %v1849_v43 = vrot.slane %v1847_v38, 2  ;;  %v1852_v44 = vrot.slane %v1850_v39, 3  ;;  %v8320_v36 = vor.u32 %v10260_v32, %v8319_v31  ;;  %v8321_v38 = vld [vmem:[#allocation15 + $0x28] sm:$0xf0]  ;;  %v8431_v32 = vld [vmem:[#allocation16 + $0x70] sm:$0xf] }
 0x2a5   : > { %2151 = vmatmul.bf16.vlgmr.msra.gmra.mxu3 %v1871_v41 }
 0x2a6   : > { %v1853_v45 = vor.u32 %v1852_v44, %v1849_v43  ;;  %2363 = vmatpush.bf16.msrb.mxu3 %v8328_v26  ;;  %2377 = vmatpush.bf16.msra.mxu0 %v8332_v30  ;;  %v8311_v43 = vld [vmem:[#allocation15 + $0x10] sm:$0xf]  ;;  %v10258_v44 = vld [vmem:[#allocation15 + $0x14] sm:$0xf0] }
 0x2a7   : > { %v8312_v49 = vor.u32 %v10258_v44, %v8311_v43  ;;  %v10286_v44 = vld [vmem:[#allocation16 + $0x64] sm:$0xf0] }
 0x2a8   : > { %2137 = vmatmul.bf16.vlgmr.msra.gmra.mxu2 %v1853_v45 }
 0x2aa   : > { %2364 = vmatpush.bf16.msrb.mxu3 %v8320_v36  ;;  %v8433_v36 = vld [vmem:[#allocation16 + $0x78] sm:$0xf0] }
 0x2ae   : > { %2365 = vmatpush.bf16.msrb.mxu3 %v8312_v49  ;;  %v8425_v49 = vld [vmem:[#allocation16 + $0x68] sm:$0xf0] }
 0x2b1   : > { %2179 = vmatmul.bf16.vlgmr.msrb.gmra.mxu1 %v1853_v45  ;;  %v10257_v45 = vld [vmem:[#allocation15 + $0x14] sm:$0xf] }
 0x2b2   : > { %v8316_v50 = vor.u32 %v10257_v45, %v8313_v48  ;;  %v10285_v45 = vld [vmem:[#allocation16 + $0x64] sm:$0xf]  ;;  %v8424_v48 = vor.u32 %v10286_v44, %v8423_v2  ;;  %v8463_v2 = vld [vmem:[#allocation16 + $0xb0] sm:$0xf] }
 0x2b8   : > { %2193 = vmatmul.bf16.vlgmr.msrb.gmra.mxu2 %v1871_v41  ;;  %v8324_v41 = vor.u32 %v10259_v33, %v8321_v38  ;;  %v10288_v33 = vld [vmem:[#allocation16 + $0x74] sm:$0xf0] }
 0x2ba   : > { %2378 = vmatpush.bf16.msra.mxu0 %v8324_v41  ;;  %v10320_v41 = vld [vmem:[#allocation16 + $0x174] sm:$0xf0] }
 0x2be   : > { %2379 = vmatpush.bf16.msra.mxu0 %v8316_v50  ;;  %v8428_v50 = vor.u32 %v10285_v45, %v8425_v49  ;;  %v10296_v45 = vld [vmem:[#allocation16 + $0xb4] sm:$0xf0] }
 0x2bf   : > { %v10308_v49 = vld [vmem:[#allocation16 + $0x114] sm:$0xf0] }
 0x31e   : > { %v12095_v21 = vpop.f32.mrf.mxu1  ;;  %v2166_v54 = vpop.f32.mrf.mxu0 }
 0x31f   : > { %v2167_v63 = vadd.f32 %v2166_v54, %v1825_v57  ;;  %v10255_v54 = vld [vmem:[#allocation15 + $0x4] sm:$0xf]  ;;  %v2125_v37 = vadd.f32 %v12095_v21, %v1824_v61 }
 0x326   : > { %v12097_v46 = vpop.f32.mrf.mxu1  ;;  %v2168_v10 = vpop.f32.mrf.mxu0 }
 0x327   : > { %v2169_v17 = vadd.f32 %v2168_v10, %v1825_v57  ;;  %v8304_v57 = vor.u32 %v10256_v53, %v8303_v52  ;;  %v2127_v11 = vadd.f32 %v12097_v46, %v1824_v61  ;;  %v8551_v52 = vld [vmem:[#allocation16 + $0x160] sm:$0xf]  ;;  %v10318_v53 = vld [vmem:[#allocation16 + $0x164] sm:$0xf0]  ;;  %v8417_v61 = vld [vmem:[#allocation16 + $0x58] sm:$0xf0] }
 0x328   : > { %v2152_v6 = vpop.f32.mrf.mxu3 }
 0x329   : > { %2366 = vmatpush.bf16.msrb.mxu3 %v8304_v57  ;;  %v10284_v57 = vld [vmem:[#allocation16 + $0x54] sm:$0xf0] }
 0x32b   : > { %v12099_v47 = vpop.f32.mrf.mxu2 }
 0x32c   : > { %v2139_v1 = vadd.f32 %v12099_v47, %v2125_v37 }
 0x32e   : > { %v2180_v58 = vpop.f32.mrf.mxu1  ;;  %v2153_v40 = vadd.f32 %v2152_v6, %v2139_v1  ;;  %v12119_v1 = vld [vmem:[%s13519_s10] sm:$0x3]  ;;  %v10282_v6 = vld [vmem:[#allocation16 + $0x44] sm:$0xf0] }
 0x32f   : > { %v2181_v5 = vadd.f32 %v2180_v58, %v2167_v63  ;;  %v8308_v58 = vor.u32 %v10255_v54, %v8305_v56  ;;  %v8552_v54 = vor.u32 %v10318_v53, %v8551_v52  ;;  %v8415_v56 = vld [vmem:[#allocation16 + $0x50] sm:$0xf]  ;;  %v8464_v52 = vor.u32 %v10296_v45, %v8463_v2  ;;  %v8375_v53 = vld [vmem:[#allocation16] sm:$0xf]  ;;  %v10297_v2 = vld [vmem:[#allocation16 + $0xc4] sm:$0xf] }
 0x330   : > { %v2154_v19 = vpop.f32.mrf.mxu3  ;;  %v10317_v45 = vld [vmem:[#allocation16 + $0x164] sm:$0xf] }
 0x331   : > { %2380 = vmatpush.bf16.msra.mxu0 %v8308_v58  ;;  %v10283_v58 = vld [vmem:[#allocation16 + $0x54] sm:$0xf] }
 0x333   : > { %v12106_v55 = vpop.f32.mrf.mxu2 }
 0x336   : > { %v2182_v27 = vpop.f32.mrf.mxu1 }
 0x337   : > { %v2183_v23 = vadd.f32 %v2182_v27, %v2169_v17 }
 0x33b   : > { %v2194_v8 = vpop.f32.mrf.mxu2 }
 0x33c   : > { %v2195_v9 = vadd.f32 %v2194_v8, %v2181_v5 }
 0x33e   : > { %v8295_v14 = vmul.f32 -1.442695, %v2195_v9 }
 0x340   : > { %10970 = vpow2.f32 %v8295_v14  ;;  %v2141_v14 = vadd.f32 %v12106_v55, %v2127_v11 }
 0x343   : > { %v2196_v29 = vpop.f32.mrf.mxu2 }
 0x344   : > { %v2197_v3 = vadd.f32 %v2196_v29, %v2183_v23  ;;  %v2155_v23 = vadd.f32 %v2154_v19, %v2141_v14  ;;  %v8399_v14 = vld [vmem:[#allocation16 + $0x30] sm:$0xf] }
 0x346   : > { %v10971_v34 = vpop.eup %10970  ;;  %v8296_v35 = vmul.f32 -1.442695, %v2197_v3 }
 0x347   : > { %v2207_v39 = vadd.f32 1.0, %v10971_v34  ;;  %v10287_v34 = vld [vmem:[#allocation16 + $0x74] sm:$0xf] }
 0x348   : > { %10972 = vpow2.f32 %v8296_v35  ;;  %v8432_v35 = vor.u32 %v10288_v33, %v8431_v32  ;;  %v8436_v38 = vor.u32 %v10287_v34, %v8433_v36  ;;  %v10298_v32 = vld [vmem:[#allocation16 + $0xc4] sm:$0xf0]  ;;  %v8519_v33 = vld [vmem:[#allocation16 + $0x120] sm:$0xf]  ;;  %v8383_v36 = vld [vmem:[#allocation16 + $0x10] sm:$0xf] }
 0x349   : > { %10974 = vrcp.f32 %v2207_v39  ;;  %v2220_v0 = vand.u32 2147483648, %v2207_v39  ;;  %v2218_v5 = vand.u32 2147483647, %v2207_v39  ;;  %vm2214_vm14 = vweird.f32 %v2207_v39 }
 0x34a   : > { %2866 = vmatpush.bf16.msra.mxu1 %v8432_v35  ;;  %2923 = vmatpush.bf16.msrb.mxu0 %v8436_v38  ;;  %v10310_v35 = vld [vmem:[#allocation16 + $0x124] sm:$0xf0]  ;;  %v10276_v38 = vld [vmem:[#allocation16 + $0x14] sm:$0xf0] }
 0x34b   : > { %v2221_v42 = vor.u32 1.1754944e-38, %v2220_v0  ;;  %vm2219_vm3 = vcmp.eq.f32.partialorder %v2218_v5, 8.507059e+37  ;;  %v10316_v0 = vld [vmem:[#allocation16 + $0x154] sm:$0xf0]  ;;  %v8407_v5 = vld [vmem:[#allocation16 + $0x40] sm:$0xf]  ;;  %v8384_v44 = vor.u32 %v10276_v38, %v8383_v36 }
 0x34c   : > { %v8561_v36 = vld [vmem:[#allocation16 + $0x178] sm:$0xf0] }
 0x34e   : > { %v10973_v60 = vpop.eup %10972  ;;  %2867 = vmatpush.bf16.msra.mxu1 %v8424_v48  ;;  %2924 = vmatpush.bf16.msrb.mxu0 %v8428_v50  ;;  %v8511_v48 = vld [vmem:[#allocation16 + $0x110] sm:$0xf] }
 0x34f   : > { %v10975_v62 = vpop.eup %10974  ;;  %v2208_v24 = vadd.f32 1.0, %v10973_v60  ;;  %v8416_v60 = vor.u32 %v10284_v57, %v8415_v56  ;;  %v10273_v56 = vld [vmem:[#allocation16 + $0x4] sm:$0xf] }
 0x350   : > { %v2210_v25 = vmul.f32 %v10975_v62, %v2207_v39  ;;  %vm2215_vm13 = vweird.f32 %v10975_v62  ;;  %v8559_v39 = vld [vmem:[#allocation16 + $0x170] sm:$0xf] }
 0x351   : > { %10976 = vrcp.f32 %v2208_v24  ;;  %vm2216_vm15 = vmor %vm2214_vm14, %vm2215_vm13  ;;  %v2235_v15 = vand.u32 2147483648, %v2208_v24  ;;  %v2233_v16 = vand.u32 2147483647, %v2208_v24  ;;  %vm2229_vm5 = vweird.f32 %v2208_v24 }
 0x352   : > { %v2211_v63 = vsub.f32 1.0, %v2210_v25  ;;  %v8560_v43 = vor.u32 %v10320_v41, %v8559_v39  ;;  %v8420_v25 = vor.u32 %v10283_v58, %v8417_v61  ;;  %2868 = vmatpush.bf16.msra.mxu1 %v8416_v60  ;;  %v8520_v39 = vor.u32 %v10310_v35, %v8519_v33  ;;  %v10275_v41 = vld [vmem:[#allocation16 + $0x14] sm:$0xf]  ;;  %v8377_v60 = vld [vmem:[#allocation16 + $0x8] sm:$0xf0] }
 0x353   : > { %v2236_v22 = vor.u32 1.1754944e-38, %v2235_v15  ;;  %vm2234_vm7 = vcmp.eq.f32.partialorder %v2233_v16, 8.507059e+37  ;;  %v10280_v15 = vld [vmem:[#allocation16 + $0x34] sm:$0xf0]  ;;  %v8401_v16 = vld [vmem:[#allocation16 + $0x38] sm:$0xf0]  ;;  %v8512_v58 = vor.u32 %v10308_v49, %v8511_v48 }
 0x354   : > { %v2212_v4 = vmul.f32 %v10975_v62, %v2211_v63  ;;  %2904 = vmatpush.bf16.msra.mxu3 %v8560_v43  ;;  %v8543_v63 = vld [vmem:[#allocation16 + $0x150] sm:$0xf]  ;;  %2925 = vmatpush.bf16.msrb.mxu0 %v8420_v25  ;;  %v8385_v43 = vld [vmem:[#allocation16 + $0x18] sm:$0xf0]  ;;  %v8455_v61 = vld [vmem:[#allocation16 + $0xa0] sm:$0xf] }
 0x355   : > { %v8388_v50 = vor.u32 %v10275_v41, %v8385_v43  ;;  %v10319_v35 = vld [vmem:[#allocation16 + $0x174] sm:$0xf] }
 0x356   : > { %v2213_v7 = vadd.f32 %v10975_v62, %v2212_v4  ;;  %v8544_v4 = vor.u32 %v10316_v0, %v8543_v63  ;;  %v8380_v63 = vor.u32 %v10273_v56, %v8377_v60  ;;  %v8564_v38 = vor.u32 %v10319_v35, %v8561_v36  ;;  %v10315_v60 = vld [vmem:[#allocation16 + $0x154] sm:$0xf] }
 0x357   : > { %v10977_v8 = vpop.eup %10976 }
 0x358   : > { %v2217_v9 = vsel %vm2216_vm15, %v10975_v62, %v2213_v7  ;;  %v2225_v10 = vmul.f32 %v10977_v8, %v2208_v24  ;;  %vm2230_vm4 = vweird.f32 %v10977_v8  ;;  %2905 = vmatpush.bf16.msra.mxu3 %v8552_v54  ;;  %v8495_v62 = vld [vmem:[#allocation16 + $0xf0] sm:$0xf]  ;;  %v10304_v24 = vld [vmem:[#allocation16 + $0xf4] sm:$0xf0]  ;;  %v10281_v7 = vld [vmem:[#allocation16 + $0x44] sm:$0xf] }
 0x359   : > { %v2222_v21 = vsel %vm2219_vm3, %v2221_v42, %v2217_v9  ;;  %vm2231_vm6 = vmor %vm2229_vm5, %vm2230_vm4  ;;  %v8496_v37 = vor.u32 %v10304_v24, %v8495_v62  ;;  %v8409_v42 = vld [vmem:[#allocation16 + $0x48] sm:$0xf0]  ;;  %v10302_v9 = vld [vmem:[#allocation16 + $0xe4] sm:$0xf0] }
 0x35a   : > { %v2239_v13 = vmul.f32 %v2222_v21, %v2153_v40  ;;  %v2226_v47 = vsub.f32 1.0, %v2225_v10  ;;  %v8487_v40 = vld [vmem:[#allocation16 + $0xe0] sm:$0xf]  ;;  %v8412_v10 = vor.u32 %v10281_v7, %v8409_v42  ;;  %v10274_v54 = vld [vmem:[#allocation16 + $0x4] sm:$0xf0] }
 0x35b   : > { %2885 = vmatpush.bf16.msra.mxu2 %v8496_v37  ;;  %v8488_v11 = vor.u32 %v10302_v9, %v8487_v40  ;;  %v8535_v21 = vld [vmem:[#allocation16 + $0x140] sm:$0xf]  ;;  %v10294_v62 = vld [vmem:[#allocation16 + $0xa4] sm:$0xf0]  ;;  %v8376_v24 = vor.u32 %v10274_v54, %v8375_v53  ;;  %v2269_v37 = vperm.slane %v12119_v1, 0 }
 0x35c   : > { %v2241_v20 = vadd.f32 %v2239_v13, %v2199_v12  ;;  %v2227_v27 = vmul.f32 %v10977_v8, %v2226_v47  ;;  %2906 = vmatpush.bf16.msra.mxu3 %v8544_v4  ;;  %v10314_v12 = vld [vmem:[#allocation16 + $0x144] sm:$0xf0]  ;;  %v2270_v13 = vperm.slane %v12119_v1, 1  ;;  %2926 = vmatpush.bf16.msrb.mxu0 %v8412_v10  ;;  %v8456_v0 = vor.u32 %v10294_v62, %v8455_v61  ;;  %v8503_v4 = vld [vmem:[#allocation16 + $0x100] sm:$0xf] }
 0x35d   : > { %v8536_v47 = vor.u32 %v10314_v12, %v8535_v21  ;;  %v10303_v40 = vld [vmem:[#allocation16 + $0xf4] sm:$0xf]  ;;  %v8497_v9 = vld [vmem:[#allocation16 + $0xf8] sm:$0xf0]  ;;  %v8447_v21 = vld [vmem:[#allocation16 + $0x90] sm:$0xf] }
 0x35e   : > { %v2243_v17 = vmul.f32 0.70710677, %v2241_v20  ;;  %v2228_v18 = vadd.f32 %v10977_v8, %v2227_v27  ;;  %v10279_v20 = vld [vmem:[#allocation16 + $0x34] sm:$0xf]  ;;  %v8400_v27 = vor.u32 %v10280_v15, %v8399_v14  ;;  %v10292_v12 = vld [vmem:[#allocation16 + $0x94] sm:$0xf0] }
 0x35f   : > { %2886 = vmatpush.bf16.msra.mxu2 %v8488_v11  ;;  %v8404_v19 = vor.u32 %v10279_v20, %v8401_v16  ;;  %v8500_v11 = vor.u32 %v10303_v40, %v8497_v9  ;;  %v8448_v14 = vor.u32 %v10292_v12, %v8447_v21  ;;  %v10301_v16 = vld [vmem:[#allocation16 + $0xe4] sm:$0xf]  ;;  %v8545_v62 = vld [vmem:[#allocation16 + $0x158] sm:$0xf0] }
 0x360   : > { %v2245_v46 = vpack.c.bf16 %v2243_v17, %v2243_v17  ;;  %v2232_v26 = vsel %vm2231_vm6, %v10977_v8, %v2228_v18  ;;  %v8408_v8 = vor.u32 %v10282_v6, %v8407_v5  ;;  %2907 = vmatpush.bf16.msra.mxu3 %v8536_v47  ;;  %v8479_v17 = vld [vmem:[#allocation16 + $0xd0] sm:$0xf]  ;;  %v10300_v18 = vld [vmem:[#allocation16 + $0xd4] sm:$0xf0]  ;;  %v10306_v5 = vld [vmem:[#allocation16 + $0x104] sm:$0xf0] }
 0x361   : > { %v2237_v51 = vsel %vm2234_vm7, %v2236_v22, %v2232_v26  ;;  %v8480_v22 = vor.u32 %v10300_v18, %v8479_v17  ;;  %v8391_v26 = vld [vmem:[#allocation16 + $0x20] sm:$0xf]  ;;  %2927 = vmatpush.bf16.msrb.mxu0 %v8404_v19  ;;  %v8504_v7 = vor.u32 %v10306_v5, %v8503_v4  ;;  %v8489_v17 = vld [vmem:[#allocation16 + $0xe8] sm:$0xf0] }
 0x362   : > { %2247 = vst [vmem:[#allocation3 + $0x4] sm:$0xf] %v2245_v46  ;;  %v2240_v55 = vmul.f32 %v2237_v51, %v2155_v23  ;;  %2869 = vmatpush.bf16.msra.mxu1 %v8408_v8  ;;  %v8527_v23 = vld [vmem:[#allocation16 + $0x130] sm:$0xf]  ;;  %v10312_v46 = vld [vmem:[#allocation16 + $0x134] sm:$0xf0]  ;;  %v8492_v19 = vor.u32 %v10301_v16, %v8489_v17 }
 0x363   : > { %v8528_v51 = vor.u32 %v10312_v46, %v8527_v23  ;;  %2887 = vmatpush.bf16.msra.mxu2 %v8480_v22  ;;  %v8439_v22 = vld [vmem:[#allocation16 + $0x80] sm:$0xf]  ;;  %v10290_v23 = vld [vmem:[#allocation16 + $0x84] sm:$0xf0] }
 0x364   : > { %v2242_v29 = vadd.f32 %v2240_v55, %v2200_v28  ;;  %v10278_v28 = vld [vmem:[#allocation16 + $0x24] sm:$0xf0]  ;;  %v10277_v55 = vld [vmem:[#allocation16 + $0x24] sm:$0xf]  ;;  %v8440_v46 = vor.u32 %v10290_v23, %v8439_v22 }
 0x365   : > { %2908 = vmatpush.bf16.msra.mxu3 %v8528_v51 }
 0x366   : > { %v2244_v30 = vmul.f32 0.70710677, %v2242_v29  ;;  %2870 = vmatpush.bf16.msra.mxu1 %v8400_v27  ;;  %v8393_v29 = vld [vmem:[#allocation16 + $0x28] sm:$0xf0] }
 0x368   : > { %v2246_v3 = vpack.c.bf16 %v2244_v30, %v2244_v30  ;;  %v8392_v30 = vor.u32 %v10278_v28, %v8391_v26 }
 0x369   : > { %2909 = vmatpush.bf16.msra.mxu3 %v8520_v39 }
 0x36a   : > { %2248 = vst [vmem:[#allocation3 + $0x8] sm:$0xf] %v2246_v3  ;;  %v8396_v3 = vor.u32 %v10277_v55, %v8393_v29  ;;  %2871 = vmatpush.bf16.msra.mxu1 %v8392_v30  ;;  %v10299_v30 = vld [vmem:[#allocation16 + $0xd4] sm:$0xf] }
 0x36c   : > { %2928 = vmatpush.bf16.msrb.mxu0 %v8396_v3  ;;  %v8481_v3 = vld [vmem:[#allocation16 + $0xd8] sm:$0xf0] }
 0x36d   : > { %2910 = vmatpush.bf16.msra.mxu3 %v8512_v58  ;;  %v8465_v58 = vld [vmem:[#allocation16 + $0xb8] sm:$0xf0] }
 0x36e   : > { %2872 = vmatpush.bf16.msra.mxu1 %v8384_v44  ;;  %v8473_v44 = vld [vmem:[#allocation16 + $0xc8] sm:$0xf0] }
 0x36f   : > { %v8476_v49 = vor.u32 %v10297_v2, %v8473_v44 }
 0x370   : > { %2929 = vmatpush.bf16.msrb.mxu0 %v8388_v50  ;;  %v8553_v50 = vld [vmem:[#allocation16 + $0x168] sm:$0xf0] }
 0x371   : > { %v10254_v31 = vld [vmem:[#allocation3 + $0x4] sm:$0xff]  ;;  %2911 = vmatpush.bf16.msra.mxu3 %v8504_v7  ;;  %v8556_v54 = vor.u32 %v10317_v45, %v8553_v50 }
 0x372   : > { %2367 = vmatmul.bf16.vlgmr.msrb.gmra.mxu3 %v10254_v31  ;;  %2381 = vmatmul.bf16.vlgmr.msra.gmra.mxu0 %v10254_v31  ;;  %v8471_v31 = vld [vmem:[#allocation16 + $0xc0] sm:$0xf] }
 0x373   : > { %v8472_v34 = vor.u32 %v10298_v32, %v8471_v31  ;;  %2873 = vmatpush.bf16.msra.mxu1 %v8376_v24  ;;  %v8548_v24 = vor.u32 %v10315_v60, %v8545_v62  ;;  %v10291_v60 = vld [vmem:[#allocation16 + $0x94] sm:$0xf] }
 0x374   : > { %2930 = vmatpush.bf16.msrb.mxu0 %v8380_v63  ;;  %v8457_v63 = vld [vmem:[#allocation16 + $0xa8] sm:$0xf0]  ;;  %v10311_v62 = vld [vmem:[#allocation16 + $0x134] sm:$0xf] }
 0x375   : > { %2888 = vmatpush.bf16.msra.mxu2 %v8472_v34  ;;  %v8484_v34 = vor.u32 %v10299_v30, %v8481_v3 }
 0x377   : > { %2942 = vmatpush.bf16.msrb.mxu1 %v8500_v11 }
 0x379   : > { %2889 = vmatpush.bf16.msra.mxu2 %v8464_v52 }
 0x37b   : > { %2943 = vmatpush.bf16.msrb.mxu1 %v8492_v19 }
 0x37d   : > { %2890 = vmatpush.bf16.msra.mxu2 %v8456_v0  ;;  %v10313_v0 = vld [vmem:[#allocation16 + $0x144] sm:$0xf] }
 0x37f   : > { %2944 = vmatpush.bf16.msrb.mxu1 %v8484_v34 }
 0x381   : > { %2891 = vmatpush.bf16.msra.mxu2 %v8448_v14 }
 0x383   : > { %2945 = vmatpush.bf16.msrb.mxu1 %v8476_v49 }
 0x385   : > { %2892 = vmatpush.bf16.msra.mxu2 %v8440_v46 }
 0x389   : > { %2961 = vmatpush.bf16.msrb.mxu2 %v8564_v38 }
 0x38d   : > { %2962 = vmatpush.bf16.msrb.mxu2 %v8556_v54 }
 0x391   : > { %2963 = vmatpush.bf16.msrb.mxu2 %v8548_v24 }
 0x3ef   : > { %v2382_v57 = vpop.f32.mrf.mxu0 }
 0x3f0   : > { %v2383_v25 = vadd.f32 %v2382_v57, %v2270_v13  ;;  %v10295_v57 = vld [vmem:[#allocation16 + $0xb4] sm:$0xf] }
 0x3f1   : > { %v8468_v61 = vor.u32 %v10295_v57, %v8465_v58 }
 0x3f2   : > { %v2391_v8 = vrot.slane %v2383_v25, 4 }
 0x3f3   : > { %2946 = vmatpush.bf16.msrb.mxu1 %v8468_v61  ;;  %v8449_v61 = vld [vmem:[#allocation16 + $0x98] sm:$0xf0] }
 0x3f5   : > { %v2368_v6 = vpop.f32.mrf.mxu3 }
 0x3f6   : > { %v2369_v42 = vadd.f32 %v2368_v6, %v2269_v37  ;;  %v8537_v6 = vld [vmem:[#allocation16 + $0x148] sm:$0xf0] }
 0x3f7   : > { %v2384_v10 = vpop.f32.mrf.mxu0  ;;  %v8540_v9 = vor.u32 %v10313_v0, %v8537_v6  ;;  %v10289_v0 = vld [vmem:[#allocation16 + $0x84] sm:$0xf] }
 0x3f8   : > { %v2393_v47 = vsel %vm1218_vm0, %v2369_v42, %v2391_v8  ;;  %v2394_v20 = vsel %vm1218_vm0, %v2391_v8, %v2369_v42  ;;  %v2385_v27 = vadd.f32 %v2384_v10, %v2270_v13  ;;  %v2427_v13 = vld [vmem:[#allocation2] sm:$0x8] }
 0x3f9   : > { %v2406_v15 = vperm.slane %v2393_v47, %v12010_v59  ;;  %v2395_v26 = vrot.slane %v2394_v20, 4  ;;  %v2442_v43 = vunpack.c.l.b16 %v2427_v13  ;;  %2964 = vmatpush.bf16.msrb.mxu2 %v8540_v9 }
 0x3fa   : > { %v2392_v28 = vrot.slane %v2385_v27, 4 }
 0x3fb   : > { %v2419_v18 = vpack.c.bf16 %v2406_v15, %v2406_v15  ;;  %v2410_v31 = vperm.slane %v2395_v26, %v12010_v59 }
 0x3fd   : > { %2423 = vst [vmem:[#allocation2 + $0x4] sm:$0xf] %v2419_v18  ;;  %v2370_v51 = vpop.f32.mrf.mxu3 }
 0x3fe   : > { %v2371_v55 = vadd.f32 %v2370_v51, %v2269_v37  ;;  %v10293_v37 = vld [vmem:[#allocation16 + $0xa4] sm:$0xf] }
 0x3ff   : > { %v8460_v5 = vor.u32 %v10293_v37, %v8457_v63  ;;  %v8529_v63 = vld [vmem:[#allocation16 + $0x138] sm:$0xf0] }
 0x400   : > { %v2396_v29 = vsel %vm1218_vm0, %v2371_v55, %v2392_v28  ;;  %v2397_v1 = vsel %vm1218_vm0, %v2392_v28, %v2371_v55  ;;  %vm2452_vm0 = vsmask.f32 3328 }
 0x401   : > { %v2398_v32 = vrot.slane %v2397_v1, 4  ;;  %v2414_v33 = vperm.slane %v2396_v29, %v12010_v59  ;;  %2947 = vmatpush.bf16.msrb.mxu1 %v8460_v5 }
 0x403   : > { %v2418_v39 = vperm.slane %v2398_v32, %v12010_v59  ;;  %v10709_v41 = vpack.c.bf16 %v2414_v33, %v2410_v31  ;;  %v2436_v59 = vld [vmem:[#allocation2 + $0x14] sm:$0x1] }
 0x404   : > { %v12135_v48 = vld [vmem:[#allocation2 + $0x4] sm:$0xf]  ;;  %v2479_v25 = vunpack.c.l.b16 %v2436_v59 }
 0x405   : > { %v2422_v52 = vpack.c.bf16 %v2418_v39, %v2418_v39  ;;  %10751 = vst [vmem:[#allocation2 + $0x8] sm:$0xff] %v10709_v41   ;;  %v2443_v53 = vunpack.c.l.b16 %v12135_v48 }
 0x406   : > { %v2482_v14 = vpack.c.b16 %v2479_v25, %v2479_v25 }
 0x407   : > { %2426 = vst [vmem:[#allocation2 + $0x10] sm:$0xf] %v2422_v52  ;;  %v2447_v56 = vpack.c.b16 %v2443_v53, %v2442_v43 }
 0x408   : > { %v2486_v45 = vrot.slane %v2482_v14, 5 }
 0x409   : > { %v2543_v4 = vshrl.u32 %v2447_v56, 16  ;;  %v2546_v42 = vshll.u32 %v2447_v56, 16 }
 0x40b   : > { %v2545_v16 = vrot.slane %v2543_v4, 3  ;;  %v2548_v17 = vrot.slane %v2546_v42, 4 }
 0x40c   : > { %v12138_v7 = vld [vmem:[#allocation2 + $0x8] sm:$0xf]  ;;  %v12140_v8 = vld [vmem:[#allocation2 + $0xc] sm:$0xf] }
 0x40d   : > { %v10271_v40 = vld [vmem:[#allocation2 + $0x4] sm:$0xff]  ;;  %v2444_v10 = vunpack.c.l.b16 %v12138_v7  ;;  %v2445_v11 = vunpack.c.l.b16 %v12140_v8  ;;  %v2549_v32 = vor.u32 %v2548_v17, %v2545_v16 }
 0x40e   : > { %v12144_v21 = vld [vmem:[#allocation2 + $0x10] sm:$0xf]  ;;  %v2483_v47 = vrot.slane %v10271_v40, 5  ;;  %v8441_v40 = vld [vmem:[#allocation16 + $0x88] sm:$0xf0] }
 0x40f   : > { %v10272_v12 = vld [vmem:[#allocation2 + $0xc] sm:$0xff]  ;;  %v2446_v15 = vunpack.c.l.b16 %v12144_v21  ;;  %v2448_v20 = vpack.c.b16 %v2445_v11, %v2444_v10  ;;  %v2450_v27 = vpack.c.b16 %v2444_v10, %v2443_v53  ;;  %v8444_v17 = vor.u32 %v10289_v0, %v8441_v40 }
 0x410   : > { %v2484_v18 = vrot.slane %v10272_v12, 5  ;;  %v2577_v19 = vshrl.u32 %v2483_v47, 16  ;;  %v2580_v22 = vshll.u32 %v2483_v47, 16  ;;  %v10309_v12 = vld [vmem:[#allocation16 + $0x124] sm:$0xf] }
 0x411   : > { %v2451_v23 = vpack.c.b16 %v2446_v15, %v2445_v11  ;;  %v2551_v46 = vshrl.u32 %v2448_v20, 16  ;;  %v2554_v26 = vshll.u32 %v2448_v20, 16  ;;  %v2454_v51 = vshrl.u32 %v2450_v27, 16 }
 0x412   : > { %v2485_v28 = vsel %vm1260_vm1, %v2483_v47, %v2484_v18  ;;  %v2579_v55 = vrot.slane %v2577_v19, 3  ;;  %v2582_v29 = vrot.slane %v2580_v22, 4  ;;  %v2457_v1 = vshll.u32 %v2450_v27, 16  ;;  %v8521_v47 = vld [vmem:[#allocation16 + $0x128] sm:$0xf0] }
 0x413   : > { %v2553_v13 = vrot.slane %v2551_v46, 3  ;;  %v2556_v30 = vrot.slane %v2554_v26, 4  ;;  %v2585_v3 = vshrl.u32 %v2485_v28, 16  ;;  %v2588_v31 = vshll.u32 %v2485_v28, 16  ;;  %v8513_v28 = vld [vmem:[#allocation16 + $0x118] sm:$0xf0] }
 0x414   : > { %v2456_v33 = vrot.slane %v2454_v51, 4  ;;  %v2459_v34 = vrot.slane %v2457_v1, 5  ;;  %v2462_v35 = vshrl.u32 %v2451_v23, 16  ;;  %v2465_v41 = vshll.u32 %v2451_v23, 16  ;;  %v10307_v51 = vld [vmem:[#allocation16 + $0x114] sm:$0xf] }
 0x415   : > { %v12148_v36 = vor.u32 %v2556_v30, %v2553_v13  ;;  %v2587_v38 = vrot.slane %v2585_v3, 3  ;;  %v2590_v39 = vrot.slane %v2588_v31, 4  ;;  %v2583_v43 = vor.u32 %v2582_v29, %v2579_v55  ;;  %v10305_v3 = vld [vmem:[#allocation16 + $0x104] sm:$0xf]  ;;  %v8505_v31 = vld [vmem:[#allocation16 + $0x108] sm:$0xf0] }
 0x416   : > { %v2460_v2 = vor.u32 %v2459_v34, %v2456_v33  ;;  %v2464_v44 = vrot.slane %v2462_v35, 4  ;;  %v2467_v52 = vrot.slane %v2465_v41, 5  ;;  %v2449_v53 = vpack.c.b16 %v2446_v15, %v2446_v15 }
 0x417   : > { %v2558_v49 = vsel %vm1318_vm2, %v2549_v32, %v12148_v36  ;;  %v2591_v50 = vor.u32 %v2590_v39, %v2587_v38  ;;  %v2487_v58 = vsel %vm1260_vm1, %v2484_v18, %v2486_v45  ;;  %v8452_v11 = vor.u32 %v10291_v60, %v8449_v61 }
 0x418   : > { %2874 = vmatmul.bf16.vlgmr.msra.gmra.mxu1 %v2558_v49  ;;  %2931 = vmatmul.bf16.vlgmr.msrb.gmra.mxu0 %v2558_v49  ;;  %v2560_v54 = vshrl.u32 %v2460_v2, 16  ;;  %v2563_v56 = vshll.u32 %v2460_v2, 16  ;;  %v2468_v57 = vor.u32 %v2467_v52, %v2464_v44  ;;  %v2594_v25 = vshrl.u32 %v2449_v53, 16 }
 0x419   : > { %v2592_v59 = vsel %vm1318_vm2, %v2583_v43, %v2591_v50  ;;  %v2597_v37 = vshll.u32 %v2449_v53, 16  ;;  %v2612_v9 = vshrl.u32 %v2487_v58, 16  ;;  %v2615_v10 = vshll.u32 %v2487_v58, 16  ;;  %2948 = vmatpush.bf16.msrb.mxu1 %v8452_v11  ;;  %v2536_v53 = vld [vmem:[%s13521_s12] sm:$0x3] }
 0x41a   : > { %2912 = vmatmul.bf16.vlgmr.msra.gmra.mxu3 %v2592_v59  ;;  %v2469_v24 = vsel %vm2452_vm0, %v2460_v2, %v2468_v57  ;;  %v2562_v4 = vrot.slane %v2560_v54, 3  ;;  %v2565_v5 = vrot.slane %v2563_v56, 4  ;;  %v8532_v20 = vor.u32 %v10311_v62, %v8529_v63  ;;  %v10338_v11 = vld [vmem:[#allocation18 + $0x74] sm:$0xf0] }
 0x41b   : > { %v2568_v6 = vshrl.u32 %v2469_v24, 16  ;;  %v2571_v42 = vshll.u32 %v2469_v24, 16  ;;  %v2596_v27 = vrot.slane %v2594_v25, 3  ;;  %v2599_v16 = vrot.slane %v2597_v37, 4 }
 0x41c   : > { %v2566_v18 = vor.u32 %v2565_v5, %v2562_v4  ;;  %2965 = vmatpush.bf16.msrb.mxu2 %v8532_v20  ;;  %v8524_v22 = vor.u32 %v10309_v12, %v8521_v47  ;;  %v2614_v23 = vrot.slane %v2612_v9, 3  ;;  %v2617_v46 = vrot.slane %v2615_v10, 4  ;;  %v8635_v10 = vld [vmem:[#allocation18 + $0x70] sm:$0xf] }
 0x41d   : > { %v2570_v14 = vrot.slane %v2568_v6, 3  ;;  %v2573_v15 = vrot.slane %v2571_v42, 4  ;;  %v2600_v55 = vor.u32 %v2599_v16, %v2596_v27  ;;  %2949 = vmatpush.bf16.msrb.mxu1 %v8444_v17  ;;  %v8516_v1 = vor.u32 %v10307_v51, %v8513_v28  ;;  %v8627_v17 = vld [vmem:[#allocation18 + $0x60] sm:$0xf] }
 0x41e   : > { %v2618_v29 = vor.u32 %v2617_v46, %v2614_v23  ;;  %v2603_v13 = vshrl.u32 %v2468_v57, 16  ;;  %v2606_v30 = vshll.u32 %v2468_v57, 16  ;;  %v8508_v34 = vor.u32 %v10305_v3, %v8505_v31  ;;  %v10335_v23 = vld [vmem:[#allocation18 + $0x64] sm:$0xf]  ;;  %v8629_v46 = vld [vmem:[#allocation18 + $0x68] sm:$0xf0] }
 0x41f   : > { %v2574_v19 = vor.u32 %v2573_v15, %v2570_v14  ;;  %v2601_v32 = vsel %vm1318_vm2, %v12148_v36, %v2600_v55  ;;  %v8636_v47 = vor.u32 %v10338_v11, %v8635_v10  ;;  %v10337_v14 = vld [vmem:[#allocation18 + $0x74] sm:$0xf]  ;;  %v8637_v15 = vld [vmem:[#allocation18 + $0x78] sm:$0xf0]  ;;  %v8632_v28 = vor.u32 %v10335_v23, %v8629_v46  ;;  %v8619_v3 = vld [vmem:[#allocation18 + $0x50] sm:$0xf] }
 0x420   : > { %2966 = vmatpush.bf16.msrb.mxu2 %v8524_v22  ;;  %v2619_v33 = vsel %vm1318_vm2, %v2591_v50, %v2618_v29  ;;  %v2605_v35 = vrot.slane %v2603_v13, 3  ;;  %v2608_v38 = vrot.slane %v2606_v30, 4  ;;  %v8640_v27 = vor.u32 %v10337_v14, %v8637_v15  ;;  %v10334_v31 = vld [vmem:[#allocation18 + $0x54] sm:$0xf0]  ;;  %v10368_v10 = vld [vmem:[#allocation18 + $0x164] sm:$0xf0] }
 0x421   : > { %v2575_v26 = vsel %vm1318_vm2, %v2566_v18, %v2574_v19  ;;  %3522 = vmatpush.bf16.msrb.mxu3 %v8636_v47  ;;  %v10336_v18 = vld [vmem:[#allocation18 + $0x64] sm:$0xf0]  ;;  %v8699_v15 = vld [vmem:[#allocation18 + $0xf0] sm:$0xf]  ;;  %v10330_v23 = vld [vmem:[#allocation18 + $0x34] sm:$0xf0] }
 0x422   : > { %2893 = vmatmul.bf16.vlgmr.msra.gmra.mxu2 %v2575_v26  ;;  %v2609_v39 = vor.u32 %v2608_v38, %v2605_v35  ;;  %v8628_v22 = vor.u32 %v10336_v18, %v8627_v17  ;;  %v8620_v35 = vor.u32 %v10334_v31, %v8619_v3  ;;  %v10333_v38 = vld [vmem:[#allocation18 + $0x54] sm:$0xf] }
 0x424   : > { %2967 = vmatpush.bf16.msrb.mxu2 %v8516_v1  ;;  %v2610_v41 = vsel %vm1318_vm2, %v2574_v19, %v2609_v39  ;;  %v8621_v39 = vld [vmem:[#allocation18 + $0x58] sm:$0xf0] }
 0x425   : > { %3523 = vmatpush.bf16.msrb.mxu3 %v8628_v22 }
 0x428   : > { %2879 = vmatmul.bf16.gmra.mxu1 %v2601_v32  ;;  %2936 = vmatmul.bf16.gmra.mxu0 %v2601_v32 }
 0x429   : > { %2968 = vmatpush.bf16.msrb.mxu2 %v8508_v34  ;;  %3524 = vmatpush.bf16.msrb.mxu3 %v8620_v35 }
 0x42a   : > { %2917 = vmatmul.bf16.gmra.mxu3 %v2619_v33 }
 0x42d   : > { %3579 = vmatpush.bf16.msra.mxu2 %v8640_v27 }
 0x431   : > { %3580 = vmatpush.bf16.msra.mxu2 %v8632_v28  ;;  %v10329_v28 = vld [vmem:[#allocation18 + $0x34] sm:$0xf] }
 0x432   : > { %2898 = vmatmul.bf16.gmra.mxu2 %v2610_v41 }
 0x438   : > { %2950 = vmatmul.bf16.vlgmr.msrb.gmra.mxu1 %v2575_v26  ;;  %v12181_v26 = vperm.slane %v2536_v53, 0 }
 0x442   : > { %2969 = vmatmul.bf16.vlgmr.msrb.gmra.mxu2 %v2592_v59  ;;  %v2539_v59 = vperm.slane %v2536_v53, 1 }
 0x448   : > { %2955 = vmatmul.bf16.gmra.mxu1 %v2610_v41  ;;  %v8763_v41 = vld [vmem:[#allocation18 + $0x170] sm:$0xf] }
 0x452   : > { %2974 = vmatmul.bf16.gmra.mxu2 %v2619_v33 }
 0x495   : > { %v12159_v43 = vpop.f32.mrf.mxu1  ;;  %v2932_v52 = vpop.f32.mrf.mxu0 }
 0x496   : > { %v2933_v57 = vadd.f32 %v2932_v52, %v2539_v59  ;;  %v2876_v52 = vadd.f32 %v12159_v43, %v12181_v26 }
 0x49d   : > { %v12161_v36 = vpop.f32.mrf.mxu1  ;;  %v2934_v58 = vpop.f32.mrf.mxu0 }
 0x49e   : > { %v2935_v37 = vadd.f32 %v2934_v58, %v2539_v59  ;;  %v2913_v32 = vpop.f32.mrf.mxu3 }
 0x4a5   : > { %v12163_v2 = vpop.f32.mrf.mxu2  ;;  %v12165_v44 = vpop.f32.mrf.mxu1 }
 0x4a6   : > { %v2937_v0 = vpop.f32.mrf.mxu0 }
 0x4a7   : > { %v2938_v12 = vadd.f32 %v2937_v0, %v2539_v59 }
 0x4ad   : > { %v12167_v45 = vpop.f32.mrf.mxu2  ;;  %v12169_v49 = vpop.f32.mrf.mxu1 }
 0x4ae   : > { %v2939_v51 = vpop.f32.mrf.mxu0 }
 0x4af   : > { %v2940_v33 = vadd.f32 %v2939_v51, %v2539_v59  ;;  %v8624_v59 = vor.u32 %v10333_v38, %v8621_v39  ;;  %v8691_v39 = vld [vmem:[#allocation18 + $0xe0] sm:$0xf] }
 0x4b1   : > { %3581 = vmatpush.bf16.msra.mxu2 %v8624_v59 }
 0x4b5   : > { %v12171_v50 = vpop.f32.mrf.mxu2  ;;  %v2951_v54 = vpop.f32.mrf.mxu1 }
 0x4b6   : > { %v2952_v60 = vadd.f32 %v2951_v54, %v2933_v57  ;;  %v10370_v54 = vld [vmem:[#allocation18 + $0x174] sm:$0xf0] }
 0x4bd   : > { %v12176_v56 = vpop.f32.mrf.mxu2  ;;  %v2953_v61 = vpop.f32.mrf.mxu1 }
 0x4be   : > { %v2954_v63 = vadd.f32 %v2953_v61, %v2935_v37  ;;  %v2895_v61 = vadd.f32 %v12163_v2, %v2876_v52  ;;  %v10332_v37 = vld [vmem:[#allocation18 + $0x44] sm:$0xf0] }
 0x4c0   : > { %v2914_v46 = vadd.f32 %v2913_v32, %v2895_v61  ;;  %v2915_v32 = vpop.f32.mrf.mxu3 }
 0x4c5   : > { %v2970_v62 = vpop.f32.mrf.mxu2  ;;  %v2956_v6 = vpop.f32.mrf.mxu1 }
 0x4c6   : > { %v2971_v24 = vadd.f32 %v2970_v62, %v2952_v60  ;;  %v2957_v20 = vadd.f32 %v2956_v6, %v2938_v12  ;;  %v8764_v60 = vor.u32 %v10370_v54, %v8763_v41  ;;  %v8755_v6 = vld [vmem:[#allocation18 + $0x160] sm:$0xf]  ;;  %v10352_v41 = vld [vmem:[#allocation18 + $0xe4] sm:$0xf0] }
 0x4c7   : > { %v8756_v14 = vor.u32 %v10368_v10, %v8755_v6  ;;  %v8595_v54 = vld [vmem:[#allocation18 + $0x20] sm:$0xf] }
 0x4c8   : > { %v8565_v25 = vmul.f32 -1.442695, %v2971_v24  ;;  %3560 = vmatpush.bf16.msra.mxu1 %v8764_v60 }
 0x4ca   : > { %10978 = vpow2.f32 %v8565_v25  ;;  %v8611_v25 = vld [vmem:[#allocation18 + $0x40] sm:$0xf] }
 0x4cb   : > { %v8612_v0 = vor.u32 %v10332_v37, %v8611_v25 }
 0x4cc   : > { %3561 = vmatpush.bf16.msra.mxu1 %v8756_v14  ;;  %v10326_v14 = vld [vmem:[#allocation18 + $0x14] sm:$0xf0] }
 0x4cd   : > { %v2972_v4 = vpop.f32.mrf.mxu2  ;;  %v2958_v30 = vpop.f32.mrf.mxu1  ;;  %3525 = vmatpush.bf16.msrb.mxu3 %v8612_v0  ;;  %v8683_v0 = vld [vmem:[#allocation18 + $0xd0] sm:$0xf] }
 0x4ce   : > { %v2973_v5 = vadd.f32 %v2972_v4, %v2954_v63  ;;  %v2959_v58 = vadd.f32 %v2958_v30, %v2940_v33  ;;  %v10331_v4 = vld [vmem:[#allocation18 + $0x44] sm:$0xf]  ;;  %v2878_v30 = vadd.f32 %v12161_v36, %v12181_v26 }
 0x4d0   : > { %v10979_v42 = vpop.eup %10978  ;;  %v8566_v40 = vmul.f32 -1.442695, %v2973_v5  ;;  %v8613_v5 = vld [vmem:[#allocation18 + $0x48] sm:$0xf0]  ;;  %v2897_v25 = vadd.f32 %v12167_v45, %v2878_v30 }
 0x4d1   : > { %v12178_v9 = vadd.f32 1.0, %v10979_v42  ;;  %v8693_v45 = vld [vmem:[#allocation18 + $0xe8] sm:$0xf0] }
 0x4d2   : > { %10980 = vpow2.f32 %v8566_v40  ;;  %v8616_v40 = vor.u32 %v10331_v4, %v8613_v5 }
 0x4d3   : > { %10982 = vrcp.f32 %v12178_v9  ;;  %v3009_v53 = vand.u32 2147483647, %v12178_v9  ;;  %v3011_v62 = vand.u32 2147483648, %v12178_v9  ;;  %vm3005_vm9 = vweird.f32 %v12178_v9 }
 0x4d4   : > { %3582 = vmatpush.bf16.msra.mxu2 %v8616_v40  ;;  %v8587_v40 = vld [vmem:[#allocation18 + $0x10] sm:$0xf] }
 0x4d5   : > { %v2975_v16 = vpop.f32.mrf.mxu2  ;;  %vm12197_vm8 = vcmp.eq.f32.partialorder %v3009_v53, 8.507059e+37  ;;  %v3012_v18 = vor.u32 1.1754944e-38, %v3011_v62  ;;  %v8692_v53 = vor.u32 %v10352_v41, %v8691_v39  ;;  %v10327_v62 = vld [vmem:[#allocation18 + $0x24] sm:$0xf]  ;;  %v8723_v39 = vld [vmem:[#allocation18 + $0x120] sm:$0xf] }
 0x4d6   : > { %v2976_v19 = vadd.f32 %v2975_v16, %v2957_v20  ;;  %v10354_v20 = vld [vmem:[#allocation18 + $0xf4] sm:$0xf0]  ;;  %v2980_v16 = vunpack.c.l.bf16 %v12135_v48 }
 0x4d7   : > { %v8700_v22 = vor.u32 %v10354_v20, %v8699_v15  ;;  %v10325_v15 = vld [vmem:[#allocation18 + $0x14] sm:$0xf] }
 0x4d8   : > { %v10981_v55 = vpop.eup %10980  ;;  %v8567_v29 = vmul.f32 -1.442695, %v2976_v19 }
 0x4d9   : > { %v12183_v1 = vpop.eup %10982  ;;  %v12185_v13 = vadd.f32 1.0, %v10981_v55  ;;  %v8605_v55 = vld [vmem:[#allocation18 + $0x38] sm:$0xf0]  ;;  %3541 = vmatpush.bf16.msra.mxu0 %v8700_v22  ;;  %v8731_v22 = vld [vmem:[#allocation18 + $0x130] sm:$0xf] }
 0x4da   : > { %v3001_v34 = vmul.f32 %v12183_v1, %v12178_v9  ;;  %10984 = vpow2.f32 %v8567_v29  ;;  %vm3006_vm2 = vweird.f32 %v12183_v1  ;;  %v8603_v9 = vld [vmem:[#allocation18 + $0x30] sm:$0xf]  ;;  %v8608_v52 = vor.u32 %v10329_v28, %v8605_v55  ;;  %v8579_v55 = vld [vmem:[#allocation18] sm:$0xf] }
 0x4db   : > { %10986 = vrcp.f32 %v12185_v13  ;;  %v3026_v2 = vand.u32 2147483648, %v12185_v13  ;;  %vm12209_vm10 = vmor %vm3005_vm9, %vm3006_vm2  ;;  %v8747_v29 = vld [vmem:[#allocation18 + $0x150] sm:$0xf]  ;;  %v3024_v31 = vand.u32 2147483647, %v12185_v13  ;;  %v8604_v38 = vor.u32 %v10330_v23, %v8603_v9 }
 0x4dc   : > { %v3002_v57 = vsub.f32 1.0, %v3001_v34  ;;  %3583 = vmatpush.bf16.msra.mxu2 %v8608_v52  ;;  %vm3020_vm14 = vweird.f32 %v12185_v13  ;;  %v10362_v9 = vld [vmem:[#allocation18 + $0x134] sm:$0xf0]  ;;  %v2916_v23 = vadd.f32 %v2915_v32, %v2897_v25  ;;  %v8588_v28 = vor.u32 %v10326_v14, %v8587_v40  ;;  %v2918_v32 = vpop.f32.mrf.mxu3  ;;  %v10351_v40 = vld [vmem:[#allocation18 + $0xe4] sm:$0xf] }
 0x4dd   : > { %v2977_v24 = vpop.f32.mrf.mxu2  ;;  %v3027_v35 = vor.u32 1.1754944e-38, %v3026_v2  ;;  %3526 = vmatpush.bf16.msrb.mxu3 %v8604_v38  ;;  %3542 = vmatpush.bf16.msra.mxu0 %v8692_v53  ;;  %v10350_v2 = vld [vmem:[#allocation18 + $0xd4] sm:$0xf0]  ;;  %vm3025_vm3 = vcmp.eq.f32.partialorder %v3024_v31, 8.507059e+37  ;;  %v8732_v30 = vor.u32 %v10362_v9, %v8731_v22  ;;  %v10324_v31 = vld [vmem:[#allocation18 + $0x4] sm:$0xf0]  ;;  %v2981_v25 = vunpack.c.l.bf16 %v12138_v7 }
 0x4de   : > { %v3003_v63 = vmul.f32 %v12183_v1, %v3002_v57  ;;  %v2978_v43 = vadd.f32 %v2977_v24, %v2959_v58  ;;  %v10328_v57 = vld [vmem:[#allocation18 + $0x24] sm:$0xf0]  ;;  %v8597_v24 = vld [vmem:[#allocation18 + $0x28] sm:$0xf0]  ;;  %v8667_v53 = vld [vmem:[#allocation18 + $0xb0] sm:$0xf] }
 0x4df   : > { %v8596_v61 = vor.u32 %v10328_v57, %v8595_v54  ;;  %v8600_v37 = vor.u32 %v10327_v62, %v8597_v24  ;;  %v8581_v38 = vld [vmem:[#allocation18 + $0x8] sm:$0xf0]  ;;  %v10346_v54 = vld [vmem:[#allocation18 + $0xb4] sm:$0xf0]  ;;  %v8701_v62 = vld [vmem:[#allocation18 + $0xf8] sm:$0xf0] }
 0x4e0   : > { %v10985_v11 = vpop.eup %10984  ;;  %v3004_v12 = vadd.f32 %v12183_v1, %v3003_v63  ;;  %v8568_v47 = vmul.f32 -1.442695, %v2978_v43  ;;  %v8739_v63 = vld [vmem:[#allocation18 + $0x140] sm:$0xf]  ;;  %v10364_v43 = vld [vmem:[#allocation18 + $0x144] sm:$0xf0] }
 0x4e1   : > { %v12204_v27 = vpop.eup %10986  ;;  %v12213_v19 = vadd.f32 1.0, %v10985_v11  ;;  %v8740_v42 = vor.u32 %v10364_v43, %v8739_v63  ;;  %3527 = vmatpush.bf16.msrb.mxu3 %v8596_v61  ;;  %3584 = vmatpush.bf16.msra.mxu2 %v8600_v37  ;;  %v8668_v61 = vor.u32 %v10346_v54, %v8667_v53  ;;  %v8715_v63 = vld [vmem:[#allocation18 + $0x110] sm:$0xf]  ;;  %v10358_v43 = vld [vmem:[#allocation18 + $0x114] sm:$0xf0] }
 0x4e2   : > { %v3008_v51 = vsel %vm12209_vm10, %v12183_v1, %v3004_v12  ;;  %v3016_v48 = vmul.f32 %v12204_v27, %v12185_v13  ;;  %10988 = vpow2.f32 %v8568_v47  ;;  %v10366_v1 = vld [vmem:[#allocation18 + $0x154] sm:$0xf0]  ;;  %vm3021_vm13 = vweird.f32 %v12204_v27 }
 0x4e3   : > { %v3013_v3 = vsel %vm12197_vm8, %v3012_v18, %v3008_v51  ;;  %10990 = vrcp.f32 %v12213_v19  ;;  %v8748_v36 = vor.u32 %v10366_v1, %v8747_v29  ;;  %v3039_v60 = vand.u32 2147483647, %v12213_v19  ;;  %vm12236_vm15 = vmor %vm3020_vm14, %vm3021_vm13  ;;  %v8589_v18 = vld [vmem:[#allocation18 + $0x18] sm:$0xf0]  ;;  %v10323_v1 = vld [vmem:[#allocation18 + $0x4] sm:$0xf] }
 0x4e4   : > { %v3060_v33 = vmul.f32 %v3013_v3, %v2914_v46  ;;  %v3017_v34 = vsub.f32 1.0, %v3016_v48  ;;  %v3041_v11 = vand.u32 2147483648, %v12213_v19  ;;  %v8684_v47 = vor.u32 %v10350_v2, %v8683_v0  ;;  %v8675_v46 = vld [vmem:[#allocation18 + $0xc0] sm:$0xf]  ;;  %v10344_v2 = vld [vmem:[#allocation18 + $0xa4] sm:$0xf0] }
 0x4e5   : > { %3562 = vmatpush.bf16.msra.mxu1 %v8748_v36  ;;  %v2881_v13 = vadd.f32 %v12165_v44, %v12181_v26  ;;  %v10348_v44 = vld [vmem:[#allocation18 + $0xc4] sm:$0xf0]  ;;  %v8592_v29 = vor.u32 %v10325_v15, %v8589_v18  ;;  %vm12254_vm5 = vcmp.eq.f32.partialorder %v3039_v60, 8.507059e+37  ;;  %3528 = vmatpush.bf16.msrb.mxu3 %v8588_v28  ;;  %vm3035_vm6 = vweird.f32 %v12213_v19  ;;  %v8659_v0 = vld [vmem:[#allocation18 + $0xa0] sm:$0xf] }
 0x4e6   : > { %v3064_v58 = vadd.f32 %v3060_v33, %v2980_v16  ;;  %v3018_v59 = vmul.f32 %v12204_v27, %v3017_v34  ;;  %3543 = vmatpush.bf16.msra.mxu0 %v8684_v47  ;;  %v8676_v3 = vor.u32 %v10348_v44, %v8675_v46  ;;  %v8584_v52 = vor.u32 %v10323_v1, %v8581_v38  ;;  %v10360_v36 = vld [vmem:[#allocation18 + $0x124] sm:$0xf0]  ;;  %v3080_v46 = vld [vmem:[#allocation3] sm:$0xc]  ;;  %v10347_v34 = vld [vmem:[#allocation18 + $0xc4] sm:$0xf] }
 0x4e7   : > { %v2900_v51 = vadd.f32 %v12171_v50, %v2881_v13  ;;  %v3042_v50 = vor.u32 1.1754944e-38, %v3041_v11  ;;  %3585 = vmatpush.bf16.msra.mxu2 %v8592_v29  ;;  %v8724_v60 = vor.u32 %v10360_v36, %v8723_v39  ;;  %v2982_v11 = vunpack.c.l.bf16 %v12140_v8  ;;  %v8707_v13 = vld [vmem:[#allocation18 + $0x100] sm:$0xf]  ;;  %v10342_v8 = vld [vmem:[#allocation18 + $0x94] sm:$0xf0] }
 0x4e8   : > { %v10989_v4 = vpop.eup %10988  ;;  %v3068_v5 = vmul.f32 0.70710677, %v3064_v58  ;;  %v3019_v6 = vadd.f32 %v12204_v27, %v3018_v59  ;;  %v8696_v15 = vor.u32 %v10351_v40, %v8693_v45  ;;  %v3096_v1 = vunpack.c.l.b16 %v3080_v46  ;;  %v8749_v40 = vld [vmem:[#allocation18 + $0x158] sm:$0xf0] }
 0x4e9   : > { %v12232_v10 = vpop.eup %10990  ;;  %v12241_v12 = vadd.f32 1.0, %v10989_v4  ;;  %3563 = vmatpush.bf16.msra.mxu1 %v8740_v42  ;;  %v2883_v4 = vadd.f32 %v12169_v49, %v12181_v26  ;;  %v8716_v49 = vor.u32 %v10358_v43, %v8715_v63  ;;  %v10343_v43 = vld [vmem:[#allocation18 + $0xa4] sm:$0xf]  ;;  %vm3108_vm10 = vsmask.f32 2304 }
 0x4ea   : > { %v3072_v20 = vpack.c.bf16 %v3068_v5, %v3068_v5  ;;  %v3023_v16 = vsel %vm12236_vm15, %v12204_v27, %v3019_v6  ;;  %v3031_v17 = vmul.f32 %v12232_v10, %v12213_v19  ;;  %vm3036_vm4 = vweird.f32 %v12232_v10  ;;  %3544 = vmatpush.bf16.msra.mxu0 %v8676_v3  ;;  %v10353_v19 = vld [vmem:[#allocation18 + $0xf4] sm:$0xf]  ;;  %v8643_v3 = vld [vmem:[#allocation18 + $0x80] sm:$0xf] }
 0x4eb   : > { %10992 = vrcp.f32 %v12241_v12  ;;  %v3028_v48 = vsel %vm3025_vm3, %v3027_v35, %v3023_v16  ;;  %v8580_v35 = vor.u32 %v10324_v31, %v8579_v55  ;;  %vm12262_vm7 = vmor %vm3035_vm6, %vm3036_vm4  ;;  %v3056_v59 = vand.u32 2147483648, %v12241_v12  ;;  %3586 = vmatpush.bf16.msra.mxu2 %v8584_v52 }
 0x4ec   : > { %3076 = vst [vmem:[#allocation3 + $0x4] sm:$0xf] %v3072_v20  ;;  %v3032_v27 = vsub.f32 1.0, %v3031_v17  ;;  %v3061_v41 = vmul.f32 %v3028_v48, %v2916_v23  ;;  %v8704_v37 = vor.u32 %v10353_v19, %v8701_v62  ;;  %v2919_v5 = vadd.f32 %v2918_v32, %v2900_v51  ;;  %v10356_v20 = vld [vmem:[#allocation18 + $0x104] sm:$0xf0] }
 0x4ed   : > { %3564 = vmatpush.bf16.msra.mxu1 %v8732_v30  ;;  %3529 = vmatpush.bf16.msrb.mxu3 %v8580_v35  ;;  %v2902_v16 = vadd.f32 %v12176_v56, %v2883_v4  ;;  %v8651_v17 = vld [vmem:[#allocation18 + $0x90] sm:$0xf]  ;;  %v3054_v9 = vand.u32 2147483647, %v12241_v12  ;;  %v3057_v23 = vor.u32 1.1754944e-38, %v3056_v59  ;;  %vm3050_vm2 = vweird.f32 %v12241_v12  ;;  %v2920_v56 = vpop.f32.mrf.mxu3 }
 0x4ee   : > { %v3033_v33 = vmul.f32 %v12232_v10, %v3032_v27  ;;  %v3065_v7 = vadd.f32 %v3061_v41, %v2981_v25  ;;  %3545 = vmatpush.bf16.msra.mxu0 %v8668_v61  ;;  %v8708_v51 = vor.u32 %v10356_v20, %v8707_v13  ;;  %v10349_v48 = vld [vmem:[#allocation18 + $0xd4] sm:$0xf]  ;;  %v8685_v27 = vld [vmem:[#allocation18 + $0xd8] sm:$0xf0]  ;;  %v2983_v41 = vunpack.c.l.bf16 %v12144_v21  ;;  %v3090_v4 = vld [vmem:[#allocation3 + $0x14] sm:$0x3] }
 0x4ef   : > { %v2921_v31 = vadd.f32 %v2920_v56, %v2902_v16  ;;  %v8688_v32 = vor.u32 %v10349_v48, %v8685_v27  ;;  %vm3055_vm9 = vcmp.eq.f32.partialorder %v3054_v9, 8.507059e+37  ;;  %v10369_v59 = vld [vmem:[#allocation18 + $0x174] sm:$0xf]  ;;  %v8669_v62 = vld [vmem:[#allocation18 + $0xb8] sm:$0xf0] }
 0x4f0   : > { %v3034_v57 = vadd.f32 %v12232_v10, %v3033_v33  ;;  %v3069_v28 = vmul.f32 0.70710677, %v3065_v7  ;;  %v10340_v33 = vld [vmem:[#allocation18 + $0x84] sm:$0xf0]  ;;  %v10345_v19 = vld [vmem:[#allocation18 + $0xb4] sm:$0xf] }
 0x4f1   : > { %v12267_v24 = vpop.eup %10992  ;;  %3565 = vmatpush.bf16.msra.mxu1 %v8724_v60  ;;  %3598 = vmatpush.bf16.msra.mxu3 %v8704_v37  ;;  %v8644_v53 = vor.u32 %v10340_v33, %v8643_v3  ;;  %v8765_v60 = vld [vmem:[#allocation18 + $0x178] sm:$0xf0]  ;;  %v8672_v21 = vor.u32 %v10345_v19, %v8669_v62  ;;  %v8757_v37 = vld [vmem:[#allocation18 + $0x168] sm:$0xf0]  ;;  %v10363_v27 = vld [vmem:[#allocation18 + $0x144] sm:$0xf] }
 0x4f2   : > { %v3038_v6 = vsel %vm12262_vm7, %v12232_v10, %v3034_v57  ;;  %v3046_v42 = vmul.f32 %v12267_v24, %v12241_v12  ;;  %v8660_v10 = vor.u32 %v10344_v2, %v8659_v0  ;;  %vm3051_vm0 = vweird.f32 %v12267_v24  ;;  %v8661_v0 = vld [vmem:[#allocation18 + $0xa8] sm:$0xf0]  ;;  %v10365_v2 = vld [vmem:[#allocation18 + $0x154] sm:$0xf]  ;;  %v8653_v9 = vld [vmem:[#allocation18 + $0x98] sm:$0xf0] }
 0x4f3   : > { %v3043_v47 = vsel %vm12254_vm5, %v3042_v50, %v3038_v6  ;;  %v12285_v44 = vld [vmem:[#allocation3 + $0x4] sm:$0xf]  ;;  %vm12290_vm8 = vmor %vm3050_vm2, %vm3051_vm0  ;;  %v8652_v12 = vor.u32 %v10342_v8, %v8651_v17  ;;  %v8677_v50 = vld [vmem:[#allocation18 + $0xc8] sm:$0xf0]  ;;  %v8768_v61 = vor.u32 %v10369_v59, %v8765_v60  ;;  %v3135_v17 = vunpack.c.l.b16 %v3090_v4 }
 0x4f4   : > { %v3062_v26 = vmul.f32 %v3043_v47, %v2919_v5  ;;  %v3047_v14 = vsub.f32 1.0, %v3046_v42  ;;  %3546 = vmatpush.bf16.msra.mxu0 %v8660_v10  ;;  %v3097_v39 = vunpack.c.l.b16 %v12285_v44  ;;  %v8680_v54 = vor.u32 %v10347_v34, %v8677_v50  ;;  %v10361_v4 = vld [vmem:[#allocation18 + $0x134] sm:$0xf] }
 0x4f5   : > { %3566 = vmatpush.bf16.msra.mxu1 %v8716_v49  ;;  %3599 = vmatpush.bf16.msra.mxu3 %v8696_v15  ;;  %v8752_v15 = vor.u32 %v10365_v2, %v8749_v40  ;;  %v3138_v3 = vpack.c.b16 %v3135_v17, %v3135_v17 }
 0x4f6   : > { %v3066_v18 = vadd.f32 %v3062_v26, %v2982_v11  ;;  %v3048_v22 = vmul.f32 %v12267_v24, %v3047_v14  ;;  %v3101_v58 = vpack.c.b16 %v3097_v39, %v3096_v1  ;;  %v8571_v26 = vld [vmem:[#allocation3 + $0x4] sm:$0xe]  ;;  %v8664_v14 = vor.u32 %v10343_v43, %v8661_v0 }
 0x4f7   : > { %v3142_v60 = vrot.slane %v3138_v3, 7 }
 0x4f8   : > { %v3070_v55 = vmul.f32 0.70710677, %v3066_v18  ;;  %v3049_v29 = vadd.f32 %v12267_v24, %v3048_v22  ;;  %3547 = vmatpush.bf16.msra.mxu0 %v8652_v12  ;;  %v3199_v6 = vshrl.u32 %v3101_v58, 16  ;;  %v3202_v42 = vshll.u32 %v3101_v58, 16  ;;  %v10341_v22 = vld [vmem:[#allocation18 + $0x94] sm:$0xf] }
 0x4f9   : > { %3567 = vmatpush.bf16.msra.mxu1 %v8708_v51  ;;  %3600 = vmatpush.bf16.msra.mxu3 %v8688_v32  ;;  %v8656_v56 = vor.u32 %v10341_v22, %v8653_v9 }
 0x4fa   : > { %v10714_v35 = vpack.c.bf16 %v3070_v55, %v3069_v28  ;;  %v3053_v38 = vsel %vm12290_vm8, %v12267_v24, %v3049_v29  ;;  %v10367_v24 = vld [vmem:[#allocation18 + $0x164] sm:$0xf]  ;;  %v3201_v16 = vrot.slane %v3199_v6, 2  ;;  %v3204_v8 = vrot.slane %v3202_v42, 3  ;;  %v8741_v28 = vld [vmem:[#allocation18 + $0x148] sm:$0xf0] }
 0x4fb   : > { %v3058_v52 = vsel %vm3055_vm9, %v3057_v23, %v3053_v38  ;;  %v8760_v63 = vor.u32 %v10367_v24, %v8757_v37  ;;  %v10339_v55 = vld [vmem:[#allocation18 + $0x84] sm:$0xf] }
 0x4fc   : > { %10752 = vst [vmem:[#allocation3 + $0x8] sm:$0xff] %v10714_v35   ;;  %v3063_v36 = vmul.f32 %v3058_v52, %v2921_v31  ;;  %3548 = vmatpush.bf16.msra.mxu0 %v8644_v53  ;;  %v8645_v31 = vld [vmem:[#allocation18 + $0x88] sm:$0xf0]  ;;  %v8744_v35 = vor.u32 %v10363_v27, %v8741_v28  ;;  %v8717_v28 = vld [vmem:[#allocation18 + $0x118] sm:$0xf0] }
 0x4fd   : > { %3601 = vmatpush.bf16.msra.mxu3 %v8680_v54 }
 0x4fe   : > { %v3067_v57 = vadd.f32 %v3063_v36, %v2983_v41  ;;  %v8648_v36 = vor.u32 %v10339_v55, %v8645_v31 }
 0x500   : > { %v3071_v25 = vmul.f32 0.70710677, %v3067_v57  ;;  %3617 = vmatpush.bf16.msrb.mxu0 %v8768_v61 }
 0x501   : > { %3602 = vmatpush.bf16.msra.mxu3 %v8672_v21 }
 0x502   : > { %v3075_v5 = vpack.c.bf16 %v3071_v25, %v3071_v25 }
 0x503   : > { %v12299_v45 = vld [vmem:[#allocation3 + $0x8] sm:$0xf]  ;;  %v12301_v7 = vld [vmem:[#allocation3 + $0xc] sm:$0xf] }
 0x504   : > { %v10321_v11 = vld [vmem:[#allocation3 + $0x4] sm:$0xf0]  ;;  %3079 = vst [vmem:[#allocation3 + $0x10] sm:$0xf] %v3075_v5  ;;  %v3098_v47 = vunpack.c.l.b16 %v12299_v45  ;;  %v3099_v49 = vunpack.c.l.b16 %v12301_v7  ;;  %3618 = vmatpush.bf16.msrb.mxu0 %v8760_v63  ;;  %v8733_v5 = vld [vmem:[#allocation18 + $0x138] sm:$0xf0] }
 0x505   : > { %v8572_v10 = vor.u32 %v10321_v11, %v8571_v26  ;;  %3603 = vmatpush.bf16.msra.mxu3 %v8664_v14  ;;  %v8725_v26 = vld [vmem:[#allocation18 + $0x128] sm:$0xf0] }
 0x506   : > { %v3102_v13 = vpack.c.b16 %v3099_v49, %v3098_v47  ;;  %v3106_v20 = vpack.c.b16 %v3098_v47, %v3097_v39  ;;  %v3205_v39 = vor.u32 %v3204_v8, %v3201_v16 }
 0x507   : > { %v3139_v18 = vrot.slane %v8572_v10, 7 }
 0x508   : > { %v3207_v23 = vshrl.u32 %v3102_v13, 16  ;;  %v3210_v46 = vshll.u32 %v3102_v13, 16  ;;  %v3110_v51 = vshrl.u32 %v3106_v20, 16  ;;  %v3113_v48 = vshll.u32 %v3106_v20, 16  ;;  %3619 = vmatpush.bf16.msrb.mxu0 %v8752_v15 }
 0x509   : > { %v3233_v12 = vshrl.u32 %v3139_v18, 16  ;;  %v3236_v33 = vshll.u32 %v3139_v18, 16  ;;  %3604 = vmatpush.bf16.msra.mxu3 %v8656_v56  ;;  %v8736_v13 = vor.u32 %v10361_v4, %v8733_v5  ;;  %v10357_v56 = vld [vmem:[#allocation18 + $0x114] sm:$0xf] }
 0x50a   : > { %v3209_v29 = vrot.slane %v3207_v23, 2  ;;  %v3212_v30 = vrot.slane %v3210_v46, 3  ;;  %v3112_v34 = vrot.slane %v3110_v51, 5  ;;  %v3115_v50 = vrot.slane %v3113_v48, 6 }
 0x50b   : > { %v12305_v1 = vld [vmem:[#allocation3 + $0x10] sm:$0xf]  ;;  %v3235_v59 = vrot.slane %v3233_v12, 2  ;;  %v3238_v19 = vrot.slane %v3236_v33, 3  ;;  %v8720_v31 = vor.u32 %v10357_v56, %v8717_v28  ;;  %v10355_v33 = vld [vmem:[#allocation18 + $0x104] sm:$0xf] }
 0x50c   : > { %v10322_v32 = vld [vmem:[#allocation3 + $0xc] sm:$0xff]  ;;  %v3105_v38 = vunpack.c.l.b16 %v12305_v1  ;;  %v12308_v41 = vor.u32 %v3212_v30, %v3209_v29  ;;  %3620 = vmatpush.bf16.msrb.mxu0 %v8744_v35  ;;  %v3116_v62 = vor.u32 %v3115_v50, %v3112_v34  ;;  %v10383_v28 = vld [vmem:[#allocation19 + $0x54] sm:$0xf0] }
 0x50d   : > { %v3084_v52 = vld [vmem:[#allocation3 + $0x10] sm:$0x7]  ;;  %v3140_v53 = vrot.slane %v10322_v32, 7  ;;  %3605 = vmatpush.bf16.msra.mxu3 %v8648_v36  ;;  %v3239_v14 = vor.u32 %v3238_v19, %v3235_v59 }
 0x50e   : > { %v3100_v54 = vunpack.c.l.b16 %v3084_v52  ;;  %v3107_v57 = vpack.c.b16 %v3105_v38, %v3099_v49  ;;  %v3214_v58 = vsel %vm1828_vm12, %v3205_v39, %v12308_v41  ;;  %v3216_v11 = vshrl.u32 %v3116_v62, 16  ;;  %v10359_v49 = vld [vmem:[#allocation18 + $0x124] sm:$0xf]  ;;  %v8709_v34 = vld [vmem:[#allocation18 + $0x108] sm:$0xf0] }
 0x50f   : > { %3530 = vmatmul.bf16.vlgmr.msrb.gmra.mxu3 %v3214_v58  ;;  %3587 = vmatmul.bf16.vlgmr.msra.gmra.mxu2 %v3214_v58  ;;  %v3141_v61 = vsel %vm1770_vm11, %v3139_v18, %v3140_v53  ;;  %v3219_v47 = vshll.u32 %v3116_v62, 16  ;;  %v3143_v16 = vsel %vm1770_vm11, %v3140_v53, %v3142_v60  ;;  %v8728_v22 = vor.u32 %v10359_v49, %v8725_v26  ;;  %v8819_v56 = vld [vmem:[#allocation19 + $0x50] sm:$0xf] }
 0x510   : > { %v3103_v24 = vpack.c.b16 %v3100_v54, %v3100_v54  ;;  %v3241_v25 = vshrl.u32 %v3141_v61, 16  ;;  %v3244_v21 = vshll.u32 %v3141_v61, 16  ;;  %v3118_v37 = vshrl.u32 %v3107_v57, 16  ;;  %3621 = vmatpush.bf16.msrb.mxu0 %v8736_v13  ;;  %v10387_v13 = vld [vmem:[#allocation19 + $0x74] sm:$0xf0] }
 0x511   : > { %v3121_v63 = vshll.u32 %v3107_v57, 16  ;;  %v3218_v9 = vrot.slane %v3216_v11, 2  ;;  %v3221_v23 = vrot.slane %v3219_v47, 3  ;;  %v3268_v29 = vshrl.u32 %v3143_v16, 16 }
 0x512   : > { %v3250_v43 = vshrl.u32 %v3103_v24, 16  ;;  %v3253_v0 = vshll.u32 %v3103_v24, 16  ;;  %v3243_v6 = vrot.slane %v3241_v25, 2  ;;  %v3246_v42 = vrot.slane %v3244_v21, 3 }
 0x513   : > { %v3120_v2 = vrot.slane %v3118_v37, 5  ;;  %v3123_v40 = vrot.slane %v3121_v63, 6  ;;  %v3271_v30 = vshll.u32 %v3143_v16, 16  ;;  %v3222_v12 = vor.u32 %v3221_v23, %v3218_v9  ;;  %v3192_v63 = vld [vmem:[%s13596_s27] sm:$0x3] }
 0x514   : > { %v3247_v10 = vor.u32 %v3246_v42, %v3243_v6  ;;  %v3252_v20 = vrot.slane %v3250_v43, 2  ;;  %v3255_v18 = vrot.slane %v3253_v0, 3  ;;  %3622 = vmatpush.bf16.msrb.mxu0 %v8728_v22  ;;  %v3270_v35 = vrot.slane %v3268_v29, 2  ;;  %v8827_v9 = vld [vmem:[#allocation19 + $0x60] sm:$0xf] }
 0x515   : > { %v3124_v15 = vor.u32 %v3123_v40, %v3120_v2  ;;  %v3273_v38 = vrot.slane %v3271_v30, 3  ;;  %v8712_v39 = vor.u32 %v10355_v33, %v8709_v34  ;;  %v3195_v4 = vperm.slane %v3192_v63, 1  ;;  %v10385_v23 = vld [vmem:[#allocation19 + $0x64] sm:$0xf0]  ;;  %v10419_v33 = vld [vmem:[#allocation19 + $0x174] sm:$0xf0] }
 0x516   : > { %v3248_v17 = vsel %vm1828_vm12, %v3239_v14, %v3247_v10  ;;  %v3256_v55 = vor.u32 %v3255_v18, %v3252_v20  ;;  %v8820_v29 = vor.u32 %v10383_v28, %v8819_v56  ;;  %v12343_v30 = vperm.slane %v3192_v63, 0  ;;  %v10415_v56 = vld [vmem:[#allocation19 + $0x154] sm:$0xf0] }
 0x517   : > { %v3125_v8 = vsel %vm3108_vm10, %v3116_v62, %v3124_v15  ;;  %3568 = vmatmul.bf16.vlgmr.msra.gmra.mxu1 %v3248_v17  ;;  %v3259_v52 = vshrl.u32 %v3124_v15, 16  ;;  %v3262_v36 = vshll.u32 %v3124_v15, 16  ;;  %v3274_v53 = vor.u32 %v3273_v38, %v3270_v35  ;;  %v8835_v15 = vld [vmem:[#allocation19 + $0x70] sm:$0xf] }
 0x518   : > { %v3224_v46 = vshrl.u32 %v3125_v8, 16  ;;  %v3227_v51 = vshll.u32 %v3125_v8, 16  ;;  %v3257_v50 = vsel %vm1828_vm12, %v12308_v41, %v3256_v55  ;;  %3623 = vmatpush.bf16.msrb.mxu0 %v8720_v31  ;;  %v8836_v16 = vor.u32 %v10387_v13, %v8835_v15 }
 0x519   : > { %v3261_v54 = vrot.slane %v3259_v52, 2  ;;  %v3264_v57 = vrot.slane %v3262_v36, 3  ;;  %v3275_v58 = vsel %vm1828_vm12, %v3247_v10, %v3274_v53  ;;  %v10381_v52 = vld [vmem:[#allocation19 + $0x44] sm:$0xf0] }
 0x51a   : > { %v3226_v48 = vrot.slane %v3224_v46, 2  ;;  %v3229_v27 = vrot.slane %v3227_v51, 3  ;;  %4359 = vmatpush.bf16.msrb.mxu1 %v8836_v16  ;;  %v8828_v51 = vor.u32 %v10385_v23, %v8827_v9  ;;  %v10401_v16 = vld [vmem:[#allocation19 + $0xe4] sm:$0xf0] }
 0x51b   : > { %v3265_v59 = vor.u32 %v3264_v57, %v3261_v54  ;;  %v10433_v9 = vld [vmem:[#allocation19 + $0x1e4] sm:$0xf0] }
 0x51c   : > { %v3230_v3 = vor.u32 %v3229_v27, %v3226_v48  ;;  %3624 = vmatpush.bf16.msrb.mxu0 %v8712_v39  ;;  %v8811_v39 = vld [vmem:[#allocation19 + $0x40] sm:$0xf] }
 0x51d   : > { %v8812_v57 = vor.u32 %v10381_v52, %v8811_v39  ;;  %v10399_v39 = vld [vmem:[#allocation19 + $0xd4] sm:$0xf0]  ;;  %v9011_v52 = vld [vmem:[#allocation19 + $0x1d0] sm:$0xf] }
 0x51e   : > { %v3231_v32 = vsel %vm1828_vm12, %v3222_v12, %v3230_v3  ;;  %v3266_v60 = vsel %vm1828_vm12, %v3230_v3, %v3265_v59  ;;  %4360 = vmatpush.bf16.msrb.mxu1 %v8828_v51  ;;  %v10403_v59 = vld [vmem:[#allocation19 + $0xf4] sm:$0xf0] }
 0x51f   : > { %3549 = vmatmul.bf16.vlgmr.msra.gmra.mxu0 %v3231_v32  ;;  %3535 = vmatmul.bf16.gmra.mxu3 %v3257_v50 }
 0x520   : > { %3592 = vmatmul.bf16.gmra.mxu2 %v3257_v50 }
 0x522   : > { %4361 = vmatpush.bf16.msrb.mxu1 %v8820_v29 }
 0x526   : > { %4362 = vmatpush.bf16.msrb.mxu1 %v8812_v57 }
 0x527   : > { %3573 = vmatmul.bf16.gmra.mxu1 %v3275_v58 }
 0x52f   : > { %3554 = vmatmul.bf16.gmra.mxu0 %v3266_v60  ;;  %3606 = vmatmul.bf16.vlgmr.msra.gmra.mxu3 %v3231_v32  ;;  %v8963_v32 = vld [vmem:[#allocation19 + $0x170] sm:$0xf] }
 0x530   : > { %v8964_v38 = vor.u32 %v10419_v33, %v8963_v32  ;;  %v10377_v32 = vld [vmem:[#allocation19 + $0x24] sm:$0xf0] }
 0x532   : > { %4397 = vmatpush.bf16.msrb.mxu3 %v8964_v38  ;;  %v8883_v38 = vld [vmem:[#allocation19 + $0xd0] sm:$0xf] }
 0x53f   : > { %3625 = vmatmul.bf16.vlgmr.msrb.gmra.mxu0 %v3248_v17  ;;  %3611 = vmatmul.bf16.gmra.mxu3 %v3266_v60  ;;  %v9027_v60 = vld [vmem:[#allocation19 + $0x1f0] sm:$0xf] }
 0x54f   : > { %3630 = vmatmul.bf16.gmra.mxu0 %v3275_v58  ;;  %v8899_v58 = vld [vmem:[#allocation19 + $0xf0] sm:$0xf] }
 0x592   : > { %v12321_v41 = vpop.f32.mrf.mxu3  ;;  %v3588_v37 = vpop.f32.mrf.mxu2 }
 0x593   : > { %v3589_v5 = vadd.f32 %v3588_v37, %v3195_v4  ;;  %v3532_v37 = vadd.f32 %v12321_v41, %v12343_v30  ;;  %v8803_v41 = vld [vmem:[#allocation19 + $0x30] sm:$0xf] }
 0x594   : > { %v3569_v36 = vpop.f32.mrf.mxu1 }
 0x59a   : > { %v12323_v61 = vpop.f32.mrf.mxu3  ;;  %v3590_v6 = vpop.f32.mrf.mxu2 }
 0x59b   : > { %v3591_v49 = vadd.f32 %v3590_v6, %v3195_v4 }
 0x59c   : > { %v12325_v19 = vpop.f32.mrf.mxu0  ;;  %v3571_v57 = vpop.f32.mrf.mxu1 }
 0x5a2   : > { %v12327_v62 = vpop.f32.mrf.mxu3 }
 0x5a3   : > { %v3593_v14 = vpop.f32.mrf.mxu2 }
 0x5a4   : > { %v12329_v24 = vpop.f32.mrf.mxu0  ;;  %v3594_v46 = vadd.f32 %v3593_v14, %v3195_v4  ;;  %v10379_v14 = vld [vmem:[#allocation19 + $0x34] sm:$0xf0] }
 0x5a5   : > { %v8804_v13 = vor.u32 %v10379_v14, %v8803_v41 }
 0x5a7   : > { %4363 = vmatpush.bf16.msrb.mxu1 %v8804_v13  ;;  %v8931_v13 = vld [vmem:[#allocation19 + $0x130] sm:$0xf] }
 0x5aa   : > { %v12331_v25 = vpop.f32.mrf.mxu3 }
 0x5ab   : > { %v3595_v12 = vpop.f32.mrf.mxu2 }
 0x5ac   : > { %v12333_v21 = vpop.f32.mrf.mxu0  ;;  %v3596_v53 = vadd.f32 %v3595_v12, %v3195_v4  ;;  %v8900_v4 = vor.u32 %v10403_v59, %v8899_v58 }
 0x5ae   : > { %4378 = vmatpush.bf16.msrb.mxu2 %v8900_v4  ;;  %v8787_v4 = vld [vmem:[#allocation19 + $0x10] sm:$0xf] }
 0x5b2   : > { %v3607_v43 = vpop.f32.mrf.mxu3 }
 0x5b3   : > { %v3608_v42 = vadd.f32 %v3607_v43, %v3589_v5  ;;  %v10435_v43 = vld [vmem:[#allocation19 + $0x1f4] sm:$0xf0] }
 0x5b4   : > { %v12338_v0 = vpop.f32.mrf.mxu0 }
 0x5ba   : > { %v3609_v2 = vpop.f32.mrf.mxu3 }
 0x5bb   : > { %v3610_v26 = vadd.f32 %v3609_v2, %v3591_v49  ;;  %v8955_v2 = vld [vmem:[#allocation19 + $0x160] sm:$0xf] }
 0x5bc   : > { %v3626_v40 = vpop.f32.mrf.mxu0 }
 0x5bd   : > { %v3627_v11 = vadd.f32 %v3626_v40, %v3608_v42  ;;  %v9028_v42 = vor.u32 %v10435_v43, %v9027_v60  ;;  %v10417_v40 = vld [vmem:[#allocation19 + $0x164] sm:$0xf0] }
 0x5be   : > { %v10413_v43 = vld [vmem:[#allocation19 + $0x144] sm:$0xf0] }
 0x5bf   : > { %v8769_v47 = vmul.f32 -1.442695, %v3627_v11  ;;  %v3551_v11 = vadd.f32 %v12325_v19, %v3532_v37  ;;  %4416 = vmatpush.bf16.msra.mxu0 %v9028_v42  ;;  %v10375_v42 = vld [vmem:[#allocation19 + $0x14] sm:$0xf0] }
 0x5c1   : > { %10994 = vpow2.f32 %v8769_v47  ;;  %v3570_v33 = vadd.f32 %v3569_v36, %v3551_v11 }
 0x5c2   : > { %v3612_v17 = vpop.f32.mrf.mxu3 }
 0x5c3   : > { %v3613_v48 = vadd.f32 %v3612_v17, %v3594_v46  ;;  %v9019_v17 = vld [vmem:[#allocation19 + $0x1e0] sm:$0xf] }
 0x5c4   : > { %v3628_v10 = vpop.f32.mrf.mxu0 }
 0x5c5   : > { %v3629_v20 = vadd.f32 %v3628_v10, %v3610_v26  ;;  %v8956_v26 = vor.u32 %v10417_v40, %v8955_v2 }
 0x5c7   : > { %v10995_v8 = vpop.eup %10994  ;;  %v8770_v18 = vmul.f32 -1.442695, %v3629_v20  ;;  %v8891_v20 = vld [vmem:[#allocation19 + $0xe0] sm:$0xf]  ;;  %4398 = vmatpush.bf16.msrb.mxu3 %v8956_v26  ;;  %v10397_v26 = vld [vmem:[#allocation19 + $0xc4] sm:$0xf0] }
 0x5c8   : > { %v12340_v22 = vadd.f32 1.0, %v10995_v8 }
 0x5c9   : > { %10996 = vpow2.f32 %v8770_v18  ;;  %v8892_v18 = vor.u32 %v10401_v16, %v8891_v20 }
 0x5ca   : > { %10998 = vrcp.f32 %v12340_v22  ;;  %v3614_v35 = vpop.f32.mrf.mxu3  ;;  %v3665_v63 = vand.u32 2147483647, %v12340_v22  ;;  %v3667_v47 = vand.u32 2147483648, %v12340_v22  ;;  %vm3661_vm13 = vweird.f32 %v12340_v22 }
 0x5cb   : > { %v3615_v6 = vadd.f32 %v3614_v35, %v3596_v53  ;;  %4379 = vmatpush.bf16.msrb.mxu2 %v8892_v18  ;;  %v3534_v53 = vadd.f32 %v12323_v61, %v12343_v30  ;;  %v8884_v61 = vor.u32 %v10399_v39, %v8883_v38  ;;  %v8779_v18 = vld [vmem:[#allocation19] sm:$0xf] }
 0x5cc   : > { %v3631_v27 = vpop.f32.mrf.mxu0  ;;  %vm12359_vm12 = vcmp.eq.f32.partialorder %v3665_v63, 8.507059e+37  ;;  %v3668_v12 = vor.u32 1.1754944e-38, %v3667_v47  ;;  %v8939_v63 = vld [vmem:[#allocation19 + $0x140] sm:$0xf]  ;;  %v8788_v47 = vor.u32 %v10375_v42, %v8787_v4  ;;  %v8915_v4 = vld [vmem:[#allocation19 + $0x110] sm:$0xf] }
 0x5cd   : > { %v3632_v55 = vadd.f32 %v3631_v27, %v3613_v48  ;;  %v9020_v48 = vor.u32 %v10433_v9, %v9019_v17  ;;  %v8947_v27 = vld [vmem:[#allocation19 + $0x150] sm:$0xf]  ;;  %v3553_v41 = vadd.f32 %v12329_v24, %v3534_v53  ;;  %v10407_v42 = vld [vmem:[#allocation19 + $0x114] sm:$0xf0]  ;;  %v8907_v24 = vld [vmem:[#allocation19 + $0x100] sm:$0xf] }
 0x5cf   : > { %v10997_v3 = vpop.eup %10996  ;;  %v8771_v31 = vmul.f32 -1.442695, %v3632_v55  ;;  %v3636_v55 = vunpack.c.l.bf16 %v12285_v44  ;;  %4417 = vmatpush.bf16.msra.mxu0 %v9020_v48  ;;  %4380 = vmatpush.bf16.msrb.mxu2 %v8884_v61  ;;  %v10373_v48 = vld [vmem:[#allocation19 + $0x4] sm:$0xf0] }
 0x5d0   : > { %v12345_v34 = vpop.eup %10998  ;;  %v12347_v50 = vadd.f32 1.0, %v10997_v3  ;;  %v8780_v39 = vor.u32 %v10373_v48, %v8779_v18  ;;  %v10423_v18 = vld [vmem:[#allocation19 + $0x194] sm:$0xf0]  ;;  %v8843_v48 = vld [vmem:[#allocation19 + $0x80] sm:$0xf] }
 0x5d1   : > { %v3657_v54 = vmul.f32 %v12345_v34, %v12340_v22  ;;  %11000 = vpow2.f32 %v8771_v31  ;;  %vm3662_vm11 = vweird.f32 %v12345_v34  ;;  %v8948_v31 = vor.u32 %v10415_v56, %v8947_v27  ;;  %v8795_v22 = vld [vmem:[#allocation19 + $0x20] sm:$0xf]  ;;  %v8867_v27 = vld [vmem:[#allocation19 + $0xb0] sm:$0xf] }
 0x5d2   : > { %11002 = vrcp.f32 %v12347_v50  ;;  %v3680_v19 = vand.u32 2147483647, %v12347_v50  ;;  %vm12371_vm14 = vmor %vm3661_vm13, %vm3662_vm11  ;;  %v3682_v36 = vand.u32 2147483648, %v12347_v50  ;;  %v8796_v37 = vor.u32 %v10377_v32, %v8795_v22  ;;  %v10427_v22 = vld [vmem:[#allocation19 + $0x1b4] sm:$0xf0] }
 0x5d3   : > { %v3658_v5 = vsub.f32 1.0, %v3657_v54  ;;  %4399 = vmatpush.bf16.msrb.mxu3 %v8948_v31  ;;  %vm3676_vm4 = vweird.f32 %v12347_v50  ;;  %v8995_v31 = vld [vmem:[#allocation19 + $0x1b0] sm:$0xf]  ;;  %v3572_v32 = vadd.f32 %v3571_v57, %v3553_v41  ;;  %v3638_v41 = vunpack.c.l.bf16 %v12301_v7  ;;  %v10405_v7 = vld [vmem:[#allocation19 + $0x104] sm:$0xf0] }
 0x5d4   : > { %v3633_v49 = vpop.f32.mrf.mxu0  ;;  %vm12388_vm15 = vcmp.eq.f32.partialorder %v3680_v19, 8.507059e+37  ;;  %4364 = vmatpush.bf16.msrb.mxu1 %v8796_v37  ;;  %v10411_v19 = vld [vmem:[#allocation19 + $0x134] sm:$0xf0]  ;;  %v9091_v57 = vld [vmem:[#allocation19 + $0x270] sm:$0xf]  ;;  %vm3923_vm13 = vcmask 1044480  }
 0x5d5   : > { %v3659_v10 = vmul.f32 %v12345_v34, %v3658_v5  ;;  %v3634_v15 = vadd.f32 %v3633_v49, %v3615_v6  ;;  %v8940_v6 = vor.u32 %v10413_v43, %v8939_v63  ;;  %v8875_v49 = vld [vmem:[#allocation19 + $0xc0] sm:$0xf]  ;;  %v10451_v37 = vld [vmem:[#allocation19 + $0x274] sm:$0xf0]  ;;  %v3637_v43 = vunpack.c.l.bf16 %v12299_v45 }
 0x5d6   : > { %v8876_v14 = vor.u32 %v10397_v26, %v8875_v49  ;;  %v8987_v63 = vld [vmem:[#allocation19 + $0x1a0] sm:$0xf]  ;;  %v10391_v49 = vld [vmem:[#allocation19 + $0x94] sm:$0xf0] }
 0x5d7   : > { %v11001_v23 = vpop.eup %11000  ;;  %v3660_v46 = vadd.f32 %v12345_v34, %v3659_v10  ;;  %v8772_v51 = vmul.f32 -1.442695, %v3634_v15  ;;  %v9003_v10 = vld [vmem:[#allocation19 + $0x1c0] sm:$0xf]  ;;  %v10429_v15 = vld [vmem:[#allocation19 + $0x1c4] sm:$0xf0]  ;;  %4400 = vmatpush.bf16.msrb.mxu3 %v8940_v6 }
 0x5d8   : > { %v12366_v28 = vpop.eup %11002  ;;  %v12375_v3 = vadd.f32 1.0, %v11001_v23  ;;  %v9004_v8 = vor.u32 %v10429_v15, %v9003_v10  ;;  %v3683_v23 = vor.u32 1.1754944e-38, %v3682_v36  ;;  %4365 = vmatpush.bf16.msrb.mxu1 %v8788_v47  ;;  %4381 = vmatpush.bf16.msrb.mxu2 %v8876_v14  ;;  %v10425_v6 = vld [vmem:[#allocation19 + $0x1a4] sm:$0xf0]  ;;  %v8916_v47 = vor.u32 %v10407_v42, %v8915_v4  ;;  %v9083_v15 = vld [vmem:[#allocation19 + $0x260] sm:$0xf] }
 0x5d9   : > { %v3664_v35 = vsel %vm12371_vm14, %v12345_v34, %v3660_v46  ;;  %v3672_v44 = vmul.f32 %v12366_v28, %v12347_v50  ;;  %11004 = vpow2.f32 %v8772_v51  ;;  %v10431_v34 = vld [vmem:[#allocation19 + $0x1d4] sm:$0xf0]  ;;  %vm3677_vm3 = vweird.f32 %v12366_v28  ;;  %v8965_v4 = vld [vmem:[#allocation19 + $0x178] sm:$0xf0] }
 0x5da   : > { %v3669_v54 = vsel %vm12359_vm12, %v3668_v12, %v3664_v35  ;;  %11006 = vrcp.f32 %v12375_v3  ;;  %v9012_v5 = vor.u32 %v10431_v34, %v9011_v52  ;;  %v3695_v11 = vand.u32 2147483647, %v12375_v3  ;;  %vm12402_vm5 = vmor %vm3676_vm4, %vm3677_vm3  ;;  %v10395_v12 = vld [vmem:[#allocation19 + $0xb4] sm:$0xf0]  ;;  %v10409_v35 = vld [vmem:[#allocation19 + $0x124] sm:$0xf0] }
 0x5db   : > { %v3716_v58 = vmul.f32 %v3669_v54, %v3570_v33  ;;  %v3673_v59 = vsub.f32 1.0, %v3672_v44  ;;  %v8932_v51 = vor.u32 %v10411_v19, %v8931_v13  ;;  %v3537_v50 = vadd.f32 %v12327_v62, %v12343_v30  ;;  %v8923_v62 = vld [vmem:[#allocation19 + $0x120] sm:$0xf]  ;;  %v10393_v34 = vld [vmem:[#allocation19 + $0xa4] sm:$0xf0] }
 0x5dc   : > { %4418 = vmatpush.bf16.msra.mxu0 %v9012_v5  ;;  %v3697_v38 = vand.u32 2147483648, %v12375_v3  ;;  %v8859_v52 = vld [vmem:[#allocation19 + $0xa0] sm:$0xf]  ;;  %v8868_v53 = vor.u32 %v10395_v12, %v8867_v27  ;;  %v8996_v54 = vor.u32 %v10427_v22, %v8995_v31  ;;  %v8924_v36 = vor.u32 %v10409_v35, %v8923_v62  ;;  %4366 = vmatpush.bf16.msrb.mxu1 %v8780_v39  ;;  %v10449_v13 = vld [vmem:[#allocation19 + $0x264] sm:$0xf0] }
 0x5dd   : > { %v3720_v2 = vadd.f32 %v3716_v58, %v3636_v55  ;;  %v3674_v40 = vmul.f32 %v12366_v28, %v3673_v59  ;;  %v3556_v44 = vadd.f32 %v12333_v21, %v3537_v50  ;;  %4401 = vmatpush.bf16.msrb.mxu3 %v8932_v51  ;;  %v3574_v58 = vpop.f32.mrf.mxu1  ;;  %vm12422_vm7 = vcmp.eq.f32.partialorder %v3695_v11, 8.507059e+37  ;;  %v10447_v31 = vld [vmem:[#allocation19 + $0x254] sm:$0xf0]  ;;  %v8971_v22 = vld [vmem:[#allocation19 + $0x180] sm:$0xf] }
 0x5de   : > { %vm3691_vm0 = vweird.f32 %v12375_v3  ;;  %4382 = vmatpush.bf16.msrb.mxu2 %v8868_v53  ;;  %v8860_v61 = vor.u32 %v10393_v34, %v8859_v52  ;;  %v9092_v5 = vor.u32 %v10451_v37, %v9091_v57  ;;  %v3698_v11 = vor.u32 1.1754944e-38, %v3697_v38  ;;  %v3736_v39 = vld [vmem:[#allocation2] sm:$0x8]  ;;  %v10386_v37 = vld [vmem:[#allocation19 + $0x74] sm:$0xf] }
 0x5df   : > { %v11005_v20 = vpop.eup %11004  ;;  %v3724_v16 = vmul.f32 0.70710677, %v3720_v2  ;;  %v3675_v17 = vadd.f32 %v12366_v28, %v3674_v40  ;;  %v8988_v45 = vor.u32 %v10425_v6, %v8987_v63  ;;  %v3539_v14 = vadd.f32 %v12331_v25, %v12343_v30  ;;  %v10445_v21 = vld [vmem:[#allocation19 + $0x244] sm:$0xf0]  ;;  %v10418_v6 = vld [vmem:[#allocation19 + $0x174] sm:$0xf] }
 0x5e0   : > { %v12398_v9 = vpop.eup %11006  ;;  %v12406_v46 = vadd.f32 1.0, %v11005_v20  ;;  %4419 = vmatpush.bf16.msra.mxu0 %v9004_v8  ;;  %v3575_v10 = vadd.f32 %v3574_v58, %v3556_v44  ;;  %4435 = vmatpush.bf16.msra.mxu1 %v9092_v5  ;;  %v8979_v20 = vld [vmem:[#allocation19 + $0x190] sm:$0xf]  ;;  %v9084_v19 = vor.u32 %v10449_v13, %v9083_v15  ;;  %v10402_v44 = vld [vmem:[#allocation19 + $0xf4] sm:$0xf] }
 0x5e1   : > { %v3728_v56 = vpack.c.bf16 %v3724_v16, %v3724_v16  ;;  %v3679_v55 = vsel %vm12402_vm5, %v12366_v28, %v3675_v17  ;;  %v3687_v29 = vmul.f32 %v12398_v9, %v12375_v3  ;;  %vm3692_vm6 = vweird.f32 %v12398_v9  ;;  %4402 = vmatpush.bf16.msrb.mxu3 %v8924_v36  ;;  %v8851_v3 = vld [vmem:[#allocation19 + $0x90] sm:$0xf]  ;;  %v9067_v58 = vld [vmem:[#allocation19 + $0x240] sm:$0xf]  ;;  %v10384_v15 = vld [vmem:[#allocation19 + $0x64] sm:$0xf] }
 0x5e2   : > { %v3684_v33 = vsel %vm12388_vm15, %v3683_v23, %v3679_v55  ;;  %11008 = vrcp.f32 %v12406_v46  ;;  %vm12431_vm2 = vmor %vm3691_vm0, %vm3692_vm6  ;;  %v3710_v30 = vand.u32 2147483647, %v12406_v46  ;;  %4383 = vmatpush.bf16.msrb.mxu2 %v8860_v61  ;;  %v8852_v23 = vor.u32 %v10391_v49, %v8851_v3  ;;  %v10389_v55 = vld [vmem:[#allocation19 + $0x84] sm:$0xf0]  ;;  %v8829_v13 = vld [vmem:[#allocation19 + $0x68] sm:$0xf0] }
 0x5e3   : > { %3732 = vst [vmem:[#allocation2 + $0x4] sm:$0xf] %v3728_v56  ;;  %v3688_v28 = vsub.f32 1.0, %v3687_v29  ;;  %v3717_v59 = vmul.f32 %v3684_v33, %v3572_v32  ;;  %v8980_v51 = vor.u32 %v10423_v18, %v8979_v20  ;;  %v8908_v56 = vor.u32 %v10405_v7, %v8907_v24  ;;  %v9075_v29 = vld [vmem:[#allocation19 + $0x250] sm:$0xf] }
 0x5e4   : > { %4420 = vmatpush.bf16.msra.mxu0 %v8996_v54  ;;  %v3558_v12 = vadd.f32 %v12338_v0, %v3539_v14  ;;  %4436 = vmatpush.bf16.msra.mxu1 %v9084_v19  ;;  %v10421_v32 = vld [vmem:[#allocation19 + $0x184] sm:$0xf0]  ;;  %v9076_v35 = vor.u32 %v10447_v31, %v9075_v29  ;;  %v8844_v52 = vor.u32 %v10389_v55, %v8843_v48  ;;  %vm3706_vm9 = vweird.f32 %v12406_v46  ;;  %v10443_v14 = vld [vmem:[#allocation19 + $0x234] sm:$0xf0]  ;;  %v10416_v20 = vld [vmem:[#allocation19 + $0x164] sm:$0xf] }
 0x5e5   : > { %v3689_v60 = vmul.f32 %v12398_v9, %v3688_v28  ;;  %v3721_v16 = vadd.f32 %v3717_v59, %v3637_v43  ;;  %4403 = vmatpush.bf16.msrb.mxu3 %v8916_v47  ;;  %v8901_v28 = vld [vmem:[#allocation19 + $0xf8] sm:$0xf0]  ;;  %v8972_v53 = vor.u32 %v10421_v32, %v8971_v22  ;;  %v3576_v0 = vpop.f32.mrf.mxu1  ;;  %vm3711_vm12 = vcmp.eq.f32.partialorder %v3710_v30, 8.507059e+37  ;;  %v8893_v47 = vld [vmem:[#allocation19 + $0xe8] sm:$0xf0] }
 0x5e6   : > { %4384 = vmatpush.bf16.msrb.mxu2 %v8852_v23  ;;  %v8904_v54 = vor.u32 %v10402_v44, %v8901_v28  ;;  %v3577_v59 = vadd.f32 %v3576_v0, %v3558_v12  ;;  %v3753_v61 = vunpack.c.l.b16 %v3736_v39  ;;  %v9068_v5 = vor.u32 %v10445_v21, %v9067_v58  ;;  %v10398_v19 = vld [vmem:[#allocation19 + $0xd4] sm:$0xf]  ;;  %v8885_v18 = vld [vmem:[#allocation19 + $0xd8] sm:$0xf0]  ;;  %v10441_v30 = vld [vmem:[#allocation19 + $0x224] sm:$0xf0] }
 0x5e7   : > { %v3690_v2 = vadd.f32 %v12398_v9, %v3689_v60  ;;  %v3725_v38 = vmul.f32 0.70710677, %v3721_v16  ;;  %v3639_v3 = vunpack.c.l.bf16 %v12305_v1  ;;  %v8888_v7 = vor.u32 %v10398_v19, %v8885_v18  ;;  %v10382_v23 = vld [vmem:[#allocation19 + $0x54] sm:$0xf]  ;;  %v8821_v48 = vld [vmem:[#allocation19 + $0x58] sm:$0xf0] }
 0x5e8   : > { %v12435_v26 = vpop.eup %11008  ;;  %4421 = vmatpush.bf16.msra.mxu0 %v8988_v45  ;;  %4437 = vmatpush.bf16.msra.mxu1 %v9076_v35  ;;  %v10400_v45 = vld [vmem:[#allocation19 + $0xe4] sm:$0xf]  ;;  %v8877_v29 = vld [vmem:[#allocation19 + $0xc8] sm:$0xf0]  ;;  %v9043_v32 = vld [vmem:[#allocation19 + $0x210] sm:$0xf] }
 0x5e9   : > { %v3694_v17 = vsel %vm12431_vm2, %v12398_v9, %v3690_v2  ;;  %v3702_v8 = vmul.f32 %v12435_v26, %v12406_v46  ;;  %v3712_v9 = vand.u32 2147483648, %v12406_v46  ;;  %vm3707_vm8 = vweird.f32 %v12435_v26  ;;  %4404 = vmatpush.bf16.msrb.mxu3 %v8908_v56  ;;  %v8837_v46 = vld [vmem:[#allocation19 + $0x78] sm:$0xf0]  ;;  %v10396_v55 = vld [vmem:[#allocation19 + $0xc4] sm:$0xf] }
 0x5ea   : > { %v3699_v25 = vsel %vm12422_vm7, %v3698_v11, %v3694_v17  ;;  %v12454_v57 = vld [vmem:[#allocation2 + $0x4] sm:$0xf]  ;;  %vm3708_vm11 = vmor %vm3706_vm9, %vm3707_vm8  ;;  %4385 = vmatpush.bf16.msrb.mxu2 %v8844_v52  ;;  %v8840_v40 = vor.u32 %v10386_v37, %v8837_v46  ;;  %v8968_v11 = vor.u32 %v10418_v6, %v8965_v4  ;;  %v8832_v17 = vor.u32 %v10384_v15, %v8829_v13  ;;  %v8949_v56 = vld [vmem:[#allocation19 + $0x158] sm:$0xf0] }
 0x5eb   : > { %v3718_v27 = vmul.f32 %v3699_v25, %v3575_v10  ;;  %v3703_v50 = vsub.f32 1.0, %v3702_v8  ;;  %v3713_v60 = vor.u32 1.1754944e-38, %v3712_v9  ;;  %v3754_v2 = vunpack.c.l.b16 %v12454_v57  ;;  %v8957_v8 = vld [vmem:[#allocation19 + $0x168] sm:$0xf0]  ;;  %v9051_v25 = vld [vmem:[#allocation19 + $0x220] sm:$0xf] }
 0x5ec   : > { %4422 = vmatpush.bf16.msra.mxu0 %v8980_v51  ;;  %4438 = vmatpush.bf16.msra.mxu1 %v9068_v5  ;;  %v8960_v24 = vor.u32 %v10416_v20, %v8957_v8  ;;  %v8824_v9 = vor.u32 %v10382_v23, %v8821_v48  ;;  %v8880_v22 = vor.u32 %v10396_v55, %v8877_v29  ;;  %v10412_v0 = vld [vmem:[#allocation19 + $0x144] sm:$0xf]  ;;  %v8941_v58 = vld [vmem:[#allocation19 + $0x148] sm:$0xf0]  ;;  %v10394_v21 = vld [vmem:[#allocation19 + $0xb4] sm:$0xf] }
 0x5ed   : > { %v3722_v33 = vadd.f32 %v3718_v27, %v3638_v41  ;;  %v3704_v62 = vmul.f32 %v12435_v26, %v3703_v50  ;;  %4473 = vmatpush.bf16.msra.mxu3 %v8904_v54  ;;  %v8896_v41 = vor.u32 %v10400_v45, %v8893_v47  ;;  %v12463_v1 = vpack.c.b16 %v3754_v2, %v3753_v61  ;;  %v10414_v27 = vld [vmem:[#allocation19 + $0x154] sm:$0xf]  ;;  %v8813_v54 = vld [vmem:[#allocation19 + $0x48] sm:$0xf0]  ;;  %v8869_v37 = vld [vmem:[#allocation19 + $0xb8] sm:$0xf0] }
 0x5ee   : > { %4454 = vmatpush.bf16.msra.mxu2 %v8840_v40  ;;  %v9052_v50 = vor.u32 %v10441_v30, %v9051_v25  ;;  %v8952_v31 = vor.u32 %v10414_v27, %v8949_v56  ;;  %v9035_v4 = vld [vmem:[#allocation19 + $0x200] sm:$0xf]  ;;  %v10437_v45 = vld [vmem:[#allocation19 + $0x204] sm:$0xf0]  ;;  %v10378_v47 = vld [vmem:[#allocation19 + $0x34] sm:$0xf] }
 0x5ef   : > { %v3726_v36 = vmul.f32 0.70710677, %v3722_v33  ;;  %v3705_v34 = vadd.f32 %v12435_v26, %v3704_v62  ;;  %v10439_v33 = vld [vmem:[#allocation19 + $0x214] sm:$0xf0]  ;;  %v10380_v62 = vld [vmem:[#allocation19 + $0x44] sm:$0xf] }
 0x5f0   : > { %4423 = vmatpush.bf16.msra.mxu0 %v8972_v53  ;;  %v3768_v28 = vshll.u32 %v12463_v1, 16  ;;  %v3924_v61 = vrot.slane %v12463_v1, 3  ;;  %vm3764_vm14 = vsmask.f32 7424  ;;  %v10410_v20 = vld [vmem:[#allocation19 + $0x134] sm:$0xf] }
 0x5f1   : > { %v10719_v63 = vpack.c.bf16 %v3726_v36, %v3725_v38  ;;  %v3709_v43 = vsel %vm3708_vm11, %v12435_v26, %v3705_v34  ;;  %v9059_v26 = vld [vmem:[#allocation19 + $0x230] sm:$0xf]  ;;  %4474 = vmatpush.bf16.msra.mxu3 %v8896_v41  ;;  %v9044_v36 = vor.u32 %v10439_v33, %v9043_v32  ;;  %v8816_v34 = vor.u32 %v10380_v62, %v8813_v54  ;;  %v8933_v18 = vld [vmem:[#allocation19 + $0x138] sm:$0xf0]  ;;  %v10392_v27 = vld [vmem:[#allocation19 + $0xa4] sm:$0xf] }
 0x5f2   : > { %v3714_v42 = vsel %vm3711_vm12, %v3713_v60, %v3709_v43  ;;  %v9060_v10 = vor.u32 %v10443_v14, %v9059_v26  ;;  %4455 = vmatpush.bf16.msra.mxu2 %v8832_v17  ;;  %v8944_v60 = vor.u32 %v10412_v0, %v8941_v58  ;;  %v3746_v43 = vld [vmem:[#allocation2 + $0x14] sm:$0x1]  ;;  %v3770_v46 = vrot.slane %v3768_v28, 1  ;;  %v8805_v26 = vld [vmem:[#allocation19 + $0x38] sm:$0xf0] }
 0x5f3   : > { %10753 = vst [vmem:[#allocation2 + $0x8] sm:$0xff] %v10719_v63   ;;  %v3719_v49 = vmul.f32 %v3714_v42, %v3577_v59  ;;  %v8872_v63 = vor.u32 %v10394_v21, %v8869_v37  ;;  %v9036_v41 = vor.u32 %v10437_v45, %v9035_v4  ;;  %v3802_v15 = vunpack.c.l.b16 %v3746_v43  ;;  %v10434_v58 = vld [vmem:[#allocation19 + $0x1f4] sm:$0xf]  ;;  %v10408_v43 = vld [vmem:[#allocation19 + $0x124] sm:$0xf] }
 0x5f4   : > { %4492 = vmatpush.bf16.msrb.mxu0 %v8968_v11  ;;  %4439 = vmatpush.bf16.msra.mxu1 %v9060_v10  ;;  %v8808_v13 = vor.u32 %v10378_v47, %v8805_v26  ;;  %v8936_v48 = vor.u32 %v10410_v20, %v8933_v18  ;;  %v10406_v20 = vld [vmem:[#allocation19 + $0x114] sm:$0xf]  ;;  %v10388_v18 = vld [vmem:[#allocation19 + $0x84] sm:$0xf]  ;;  %vm3831_vm15 = vcmask 1041408  }
 0x5f5   : > { %v3723_v16 = vadd.f32 %v3719_v49, %v3639_v3  ;;  %4475 = vmatpush.bf16.msra.mxu3 %v8888_v7  ;;  %v3766_v49 = vshrl.u32 %v12463_v1, 16  ;;  %v12500_v29 = vpack.c.b16 %v3802_v15, %v3802_v15  ;;  %v10432_v15 = vld [vmem:[#allocation19 + $0x1e4] sm:$0xf] }
 0x5f6   : > { %4456 = vmatpush.bf16.msra.mxu2 %v8824_v9 }
 0x5f7   : > { %v3727_v51 = vmul.f32 0.70710677, %v3723_v16  ;;  %v3824_v28 = vshll.u32 %v12500_v29, 16 }
 0x5f8   : > { %4493 = vmatpush.bf16.msrb.mxu0 %v8960_v24  ;;  %4440 = vmatpush.bf16.msra.mxu1 %v9052_v50  ;;  %v3771_v24 = vor.u32 %v3770_v46, %v3766_v49  ;;  %v8861_v50 = vld [vmem:[#allocation19 + $0xa8] sm:$0xf0]  ;;  %v10374_v49 = vld [vmem:[#allocation19 + $0x14] sm:$0xf] }
 0x5f9   : > { %v3731_v12 = vpack.c.bf16 %v3727_v51, %v3727_v51  ;;  %4476 = vmatpush.bf16.msra.mxu3 %v8880_v22 }
 0x5fa   : > { %v12465_v35 = vld [vmem:[#allocation2 + $0x8] sm:$0xf]  ;;  %v12467_v44 = vld [vmem:[#allocation2 + $0xc] sm:$0xf]  ;;  %4457 = vmatpush.bf16.msra.mxu2 %v8816_v34 }
 0x5fb   : > { %v3742_v38 = vld [vmem:[#allocation2 + $0x4] sm:$0xff]   ;;  %3735 = vst [vmem:[#allocation2 + $0x10] sm:$0xf] %v3731_v12  ;;  %v3755_v52 = vunpack.c.l.b16 %v12465_v35  ;;  %v3756_v53 = vunpack.c.l.b16 %v12467_v44 }
 0x5fc   : > { %v12470_v39 = vld [vmem:[#allocation2 + $0x4] sm:$0xf0]  ;;  %4494 = vmatpush.bf16.msrb.mxu0 %v8952_v31  ;;  %v3807_v40 = vshrl.u32 %v3742_v38, 16  ;;  %v3810_v11 = vshll.u32 %v3742_v38, 16  ;;  %4441 = vmatpush.bf16.msra.mxu1 %v9044_v36  ;;  %v8864_v38 = vor.u32 %v10392_v27, %v8861_v50  ;;  %v10372_v27 = vld [vmem:[#allocation19 + $0x4] sm:$0xf] }
 0x5fd   : > { %v12474_v59 = vpack.c.b16 %v3756_v53, %v3755_v52  ;;  %v3788_v42 = vpack.c.b16 %v3755_v52, %v3754_v2  ;;  %4477 = vmatpush.bf16.msra.mxu3 %v8872_v63  ;;  %v10376_v52 = vld [vmem:[#allocation19 + $0x24] sm:$0xf]  ;;  %v8781_v50 = vld [vmem:[#allocation19 + $0x8] sm:$0xf0] }
 0x5fe   : > { %v3809_v17 = vrot.slane %v3807_v40, 5  ;;  %v3812_v8 = vrot.slane %v3810_v11, 6  ;;  %4458 = vmatpush.bf16.msra.mxu2 %v8808_v13  ;;  %v8853_v40 = vld [vmem:[#allocation19 + $0x98] sm:$0xf0]  ;;  %v9021_v13 = vld [vmem:[#allocation19 + $0x1e8] sm:$0xf0] }
 0x5ff   : > { %v3925_v5 = vrot.slane %v12474_v59, 3  ;;  %v3773_v6 = vshll.u32 %v12474_v59, 16  ;;  %v3790_v1 = vrot.slane %v3788_v42, 5  ;;  %v3777_v9 = vshrl.u32 %v12474_v59, 16  ;;  %v10390_v42 = vld [vmem:[#allocation19 + $0x94] sm:$0xf] }
 0x600   : > { %4495 = vmatpush.bf16.msrb.mxu0 %v8944_v60  ;;  %4442 = vmatpush.bf16.msra.mxu1 %v9036_v41  ;;  %v3813_v32 = vor.u32 %v3812_v8, %v3809_v17  ;;  %v9029_v60 = vld [vmem:[#allocation19 + $0x1f8] sm:$0xf0]  ;;  %v8784_v59 = vor.u32 %v10372_v27, %v8781_v50  ;;  %v8973_v27 = vld [vmem:[#allocation19 + $0x188] sm:$0xf0] }
 0x601   : > { %v12484_v3 = vsel %vm3923_vm13, %v3924_v61, %v3925_v5  ;;  %v3775_v14 = vrot.slane %v3773_v6, 1  ;;  %v3930_v0 = vrot.slane %v3790_v1, 3  ;;  %4478 = vmatpush.bf16.msra.mxu3 %v8864_v38  ;;  %v8925_v61 = vld [vmem:[#allocation19 + $0x128] sm:$0xf0]  ;;  %v8789_v41 = vld [vmem:[#allocation19 + $0x18] sm:$0xf0]  ;;  %v9032_v17 = vor.u32 %v10434_v58, %v9029_v60 }
 0x602   : > { %4367 = vmatmul.bf16.vlgmr.msrb.gmra.mxu1 %v12484_v3  ;;  %v12488_v2 = vld [vmem:[#allocation2 + $0x10] sm:$0xf]  ;;  %v3933_v6 = vrot.slane %v3813_v32, 3  ;;  %v8928_v8 = vor.u32 %v10408_v43, %v8925_v61  ;;  %v9093_v38 = vld [vmem:[#allocation19 + $0x278] sm:$0xf0] }
 0x603   : > { %v12490_v10 = vld [vmem:[#allocation2 + $0xc] sm:$0xff]  ;;  %v3762_v16 = vunpack.c.l.b16 %v12488_v2  ;;  %v3776_v31 = vsel %vm3764_vm14, %v3771_v24, %v3775_v14  ;;  %v3779_v36 = vor.u32 %v3777_v9, %v3775_v14  ;;  %v11091_v24 = vld [vmem:[#allocation2 + $0x4] sm:$0xe] }
 0x604   : > { %v3740_v19 = vld [vmem:[#allocation2 + $0x10] sm:$0x7]  ;;  %v3815_v7 = vshrl.u32 %v12490_v10, 16  ;;  %v3818_v25 = vshll.u32 %v12490_v10, 16  ;;  %4496 = vmatpush.bf16.msrb.mxu0 %v8936_v48  ;;  %v3927_v37 = vrot.slane %v3776_v31, 3  ;;  %4511 = vmatpush.bf16.msrb.mxu1 %v9032_v17  ;;  %v9024_v48 = vor.u32 %v10432_v15, %v9021_v13 }
 0x605   : > { %v12495_v30 = vpack.c.b16 %v3762_v16, %v3756_v53  ;;  %v12497_v23 = vpack.c.b16 %v3762_v16, %v3762_v16  ;;  %v3757_v51 = vunpack.c.l.b16 %v3740_v19  ;;  %v8797_v53 = vld [vmem:[#allocation19 + $0x28] sm:$0xf0]  ;;  %v8917_v19 = vld [vmem:[#allocation19 + $0x118] sm:$0xf0]  ;;  %v10430_v31 = vld [vmem:[#allocation19 + $0x1d4] sm:$0xf] }
 0x606   : > { %v3817_v56 = vrot.slane %v3815_v7, 5  ;;  %v3820_v55 = vrot.slane %v3818_v25, 6  ;;  %v8800_v14 = vor.u32 %v10376_v52, %v8797_v53  ;;  %v8856_v7 = vor.u32 %v10390_v42, %v8853_v40  ;;  %v9005_v58 = vld [vmem:[#allocation19 + $0x1c8] sm:$0xf0]  ;;  %v9077_v15 = vld [vmem:[#allocation19 + $0x258] sm:$0xf0] }
 0x607   : > { %v3791_v12 = vrot.slane %v12495_v30, 5  ;;  %v3781_v22 = vshll.u32 %v12497_v23, 16  ;;  %v3760_v62 = vpack.c.b16 %v3757_v51, %v3757_v51  ;;  %v3826_v25 = vrot.slane %v3824_v28, 6  ;;  %v10450_v28 = vld [vmem:[#allocation19 + $0x274] sm:$0xf] }
 0x608   : > { %v12505_v33 = vor.u32 %v3820_v55, %v3817_v56  ;;  %4459 = vmatpush.bf16.msra.mxu2 %v8800_v14  ;;  %v8792_v51 = vor.u32 %v10374_v49, %v8789_v41  ;;  %4497 = vmatpush.bf16.msrb.mxu0 %v8928_v8  ;;  %v8920_v56 = vor.u32 %v10406_v20, %v8917_v19  ;;  %v3785_v52 = vshrl.u32 %v12497_v23, 16  ;;  %v10448_v23 = vld [vmem:[#allocation19 + $0x264] sm:$0xf]  ;;  %v10426_v49 = vld [vmem:[#allocation19 + $0x1b4] sm:$0xf] }
 0x609   : > { %v12511_v54 = vsel %vm1260_vm1, %v3790_v1, %v3791_v12  ;;  %v12513_v34 = vrot.slane %v3781_v22, 1  ;;  %v3939_v47 = vrot.slane %v3760_v62, 3  ;;  %v8845_v1 = vld [vmem:[#allocation19 + $0x88] sm:$0xf0]  ;;  %4479 = vmatpush.bf16.msra.mxu3 %v8856_v7  ;;  %v9013_v22 = vld [vmem:[#allocation19 + $0x1d8] sm:$0xf0]  ;;  %v11092_v53 = vor.u32 %v11091_v24, %v12470_v39  ;;  %4512 = vmatpush.bf16.msrb.mxu1 %v9024_v48 }
 0x60a   : > { %v3931_v21 = vrot.slane %v12511_v54, 3  ;;  %v12518_v63 = vsel %vm3108_vm10, %v3813_v32, %v12505_v33  ;;  %v8848_v55 = vor.u32 %v10388_v18, %v8845_v1  ;;  %v10404_v32 = vld [vmem:[#allocation19 + $0x104] sm:$0xf]  ;;  %v8909_v62 = vld [vmem:[#allocation19 + $0x108] sm:$0xf0]  ;;  %v9096_v60 = vor.u32 %v10450_v28, %v9093_v38 }
 0x60b   : > { %v12522_v46 = vsel %vm3764_vm14, %v3779_v36, %v12513_v34  ;;  %v3934_v4 = vrot.slane %v12518_v63, 3  ;;  %v12547_v9 = vsel %vm3923_vm13, %v3925_v5, %v3939_v47  ;;  %v9016_v5 = vor.u32 %v10430_v31, %v9013_v22  ;;  %v10428_v36 = vld [vmem:[#allocation19 + $0x1c4] sm:$0xf]  ;;  %v8989_v8 = vld [vmem:[#allocation19 + $0x1a8] sm:$0xf0] }
 0x60c   : > { %v12528_v11 = vsel %vm3923_vm13, %v3930_v0, %v3931_v21  ;;  %v3928_v45 = vrot.slane %v12522_v46, 3  ;;  %4460 = vmatpush.bf16.msra.mxu2 %v8792_v51  ;;  %4498 = vmatpush.bf16.msrb.mxu0 %v8920_v56  ;;  %v8912_v0 = vor.u32 %v10404_v32, %v8909_v62  ;;  %v3827_v43 = vsel %vm3108_vm10, %v12505_v33, %v3826_v25  ;;  %v10424_v17 = vld [vmem:[#allocation19 + $0x1a4] sm:$0xf]  ;;  %v9069_v1 = vld [vmem:[#allocation19 + $0x248] sm:$0xf0] }
 0x60d   : > { %4405 = vmatmul.bf16.vlgmr.msrb.gmra.mxu3 %v12528_v11  ;;  %v12535_v26 = vsel %vm3923_vm13, %v3933_v6, %v3934_v4  ;;  %v3833_v61 = vrot.slane %v12490_v10, 6  ;;  %v9085_v6 = vld [vmem:[#allocation19 + $0x268] sm:$0xf0]  ;;  %v3943_v39 = vrot.slane %v3791_v12, 3  ;;  %v3832_v42 = vrot.slane %v11092_v53, 6  ;;  %4513 = vmatpush.bf16.msrb.mxu1 %v9016_v5 }
 0x60e   : > { %v12540_v16 = vsel %vm3923_vm13, %v3927_v37, %v3928_v45  ;;  %4424 = vmatmul.bf16.vlgmr.msra.gmra.mxu0 %v12535_v26  ;;  %4480 = vmatpush.bf16.msra.mxu3 %v8848_v55  ;;  %v3787_v37 = vor.u32 %v3785_v52, %v12513_v34  ;;  %v9008_v40 = vor.u32 %v10428_v36, %v9005_v58  ;;  %v3945_v47 = vrot.slane %v3827_v43, 3  ;;  %v8997_v34 = vld [vmem:[#allocation19 + $0x1b8] sm:$0xf0]  ;;  %v10446_v10 = vld [vmem:[#allocation19 + $0x254] sm:$0xf] }
 0x60f   : > { %4386 = vmatmul.bf16.vlgmr.msrb.gmra.mxu2 %v12540_v16  ;;  %v9088_v41 = vor.u32 %v10448_v23, %v9085_v6  ;;  %v3834_v33 = vsel %vm3831_vm15, %v3832_v42, %v3833_v61  ;;  %v3944_v30 = vsel %vm3923_vm13, %v3931_v21, %v3943_v39  ;;  %v9000_v12 = vor.u32 %v10426_v49, %v8997_v34  ;;  %v10444_v54 = vld [vmem:[#allocation19 + $0x244] sm:$0xf]  ;;  %v8981_v7 = vld [vmem:[#allocation19 + $0x198] sm:$0xf0]  ;;  %v10442_v51 = vld [vmem:[#allocation19 + $0x234] sm:$0xf] }
 0x610   : > { %4461 = vmatpush.bf16.msra.mxu2 %v8784_v59  ;;  %4499 = vmatpush.bf16.msrb.mxu0 %v8912_v0  ;;  %v3941_v14 = vrot.slane %v3787_v37, 3  ;;  %v3946_v13 = vsel %vm3923_vm13, %v3934_v4, %v3945_v47  ;;  %v3937_v20 = vrot.slane %v3834_v33, 3  ;;  %v9080_v19 = vor.u32 %v10446_v10, %v9077_v15  ;;  %v10422_v4 = vld [vmem:[#allocation19 + $0x194] sm:$0xf]  ;;  %v9061_v48 = vld [vmem:[#allocation19 + $0x238] sm:$0xf0] }
 0x611   : > { %4514 = vmatpush.bf16.msrb.mxu1 %v9008_v40  ;;  %v3936_v21 = vrot.slane %v3832_v42, 3  ;;  %v8992_v24 = vor.u32 %v10424_v17, %v8989_v8  ;;  %v9072_v25 = vor.u32 %v10444_v54, %v9069_v1  ;;  %v8984_v46 = vor.u32 %v10422_v4, %v8981_v7  ;;  %v10440_v55 = vld [vmem:[#allocation19 + $0x224] sm:$0xf]  ;;  %v9053_v31 = vld [vmem:[#allocation19 + $0x228] sm:$0xf0] }
 0x612   : > { %4372 = vmatmul.bf16.gmra.mxu1 %v12547_v9  ;;  %v3942_v18 = vsel %vm3923_vm13, %v3928_v45, %v3941_v14  ;;  %v10420_v45 = vld [vmem:[#allocation19 + $0x184] sm:$0xf]  ;;  %v9064_v50 = vor.u32 %v10442_v51, %v9061_v48  ;;  %v3835_v56 = vrot.slane %v12500_v29, 6  ;;  %v9056_v32 = vor.u32 %v10440_v55, %v9053_v31  ;;  %v10438_v28 = vld [vmem:[#allocation19 + $0x214] sm:$0xf] }
 0x613   : > { %v3938_v63 = vsel %vm3923_vm13, %v3936_v21, %v3937_v20  ;;  %v8976_v22 = vor.u32 %v10420_v45, %v8973_v27  ;;  %v9045_v38 = vld [vmem:[#allocation19 + $0x218] sm:$0xf0]  ;;  %v10436_v59 = vld [vmem:[#allocation19 + $0x204] sm:$0xf]  ;;  %v9037_v29 = vld [vmem:[#allocation19 + $0x208] sm:$0xf0] }
 0x614   : > { %4530 = vmatpush.bf16.msrb.mxu2 %v9096_v60  ;;  %v3836_v62 = vsel %vm3831_vm15, %v3833_v61, %v3835_v56  ;;  %v9048_v53 = vor.u32 %v10438_v28, %v9045_v38  ;;  %v9040_v0 = vor.u32 %v10436_v59, %v9037_v29 }
 0x615   : > { %4515 = vmatpush.bf16.msrb.mxu1 %v9000_v12  ;;  %v3947_v52 = vrot.slane %v3836_v62, 3 }
 0x617   : > { %v3948_v5 = vsel %vm3923_vm13, %v3937_v20, %v3947_v52 }
 0x618   : > { %4531 = vmatpush.bf16.msrb.mxu2 %v9088_v41 }
 0x619   : > { %4516 = vmatpush.bf16.msrb.mxu1 %v8992_v24 }
 0x61c   : > { %4532 = vmatpush.bf16.msrb.mxu2 %v9080_v19 }
 0x61d   : > { %4410 = vmatmul.bf16.gmra.mxu3 %v3944_v30  ;;  %4517 = vmatpush.bf16.msrb.mxu1 %v8984_v46 }
 0x61e   : > { %4429 = vmatmul.bf16.gmra.mxu0 %v3946_v13 }
 0x61f   : > { %4391 = vmatmul.bf16.gmra.mxu2 %v3942_v18 }
 0x620   : > { %4533 = vmatpush.bf16.msrb.mxu2 %v9072_v25 }
 0x621   : > { %4518 = vmatpush.bf16.msrb.mxu1 %v8976_v22 }
 0x622   : > { %4443 = vmatmul.bf16.vlgmr.msra.gmra.mxu1 %v3938_v63 }
 0x624   : > { %4534 = vmatpush.bf16.msrb.mxu2 %v9064_v50 }
 0x628   : > { %4535 = vmatpush.bf16.msrb.mxu2 %v9056_v32 }
 0x62c   : > { %4536 = vmatpush.bf16.msrb.mxu2 %v9048_v53 }
 0x62d   : > { %4481 = vmatmul.bf16.vlgmr.msra.gmra.mxu3 %v12540_v16 }
 0x62e   : > { %4500 = vmatmul.bf16.vlgmr.msrb.gmra.mxu0 %v12528_v11 }
 0x62f   : > { %4462 = vmatmul.bf16.vlgmr.msra.gmra.mxu2 %v12484_v3  ;;  %v3917_v3 = vld [vmem:[%s13609_s26] sm:$0x3]  ;;  %s13471_s26 = scalar_lea.vmem [#allocation27], %s7812_s18 }
 0x630   : > { %4537 = vmatpush.bf16.msrb.mxu2 %v9040_v0  ;;  %v12582_v36 = vperm.slane %v3917_v3, 0  ;;  %v3920_v8 = vperm.slane %v3917_v3, 1  ;;  %s7579_s8 = sshll.u32 %s13471_s26, 4  ;;  %s7580_s8 = int_to_ptr.vmem [resolvable:$true] %s7579_s8 }
 0x632   : > { %4448 = vmatmul.bf16.gmra.mxu1 %v3948_v5 }
 0x63d   : > { %4486 = vmatmul.bf16.gmra.mxu3 %v3942_v18 }
 0x63e   : > { %4505 = vmatmul.bf16.gmra.mxu0 %v3944_v30 }
 0x63f   : > { %4467 = vmatmul.bf16.gmra.mxu2 %v12547_v9 }
 0x642   : > { %4519 = vmatmul.bf16.vlgmr.msrb.gmra.mxu1 %v12535_v26 }
 0x64f   : > { %4538 = vmatmul.bf16.vlgmr.msrb.gmra.mxu2 %v3938_v63 }
 0x652   : > { %4524 = vmatmul.bf16.gmra.mxu1 %v3946_v13 }
 0x65f   : > { %4543 = vmatmul.bf16.gmra.mxu2 %v3948_v5 }
 0x67f   : > { %v4368_v11 = vpop.f32.mrf.mxu1 }
 0x680   : > { %v4369_v60 = vadd.f32 %v4368_v11, %v12582_v36 }
 0x687   : > { %v12577_v16 = vpop.f32.mrf.mxu1 }
 0x68b   : > { %v12593_v23 = vpop.f32.mrf.mxu0 }
 0x68f   : > { %v4373_v58 = vpop.f32.mrf.mxu1 }
 0x690   : > { %v12591_v61 = vpop.f32.mrf.mxu3  ;;  %v4374_v39 = vadd.f32 %v4373_v58, %v12582_v36 }
 0x692   : > { %v4387_v37 = vpop.f32.mrf.mxu2 }
 0x693   : > { %v12585_v43 = vadd.f32 %v4387_v37, %v4369_v60  ;;  %v12602_v49 = vpop.f32.mrf.mxu0  ;;  %v9163_v60 = vld [vmem:[#allocation21 + $0x70] sm:$0xf]  ;;  %v10468_v37 = vld [vmem:[#allocation21 + $0x74] sm:$0xf0] }
 0x697   : > { %v12587_v9 = vpop.f32.mrf.mxu1 }
 0x698   : > { %v12600_v47 = vpop.f32.mrf.mxu3 }
 0x69a   : > { %v12589_v26 = vpop.f32.mrf.mxu2 }
 0x69b   : > { %v12610_v10 = vpop.f32.mrf.mxu0 }
 0x69f   : > { %v12595_v6 = vpop.f32.mrf.mxu1 }
 0x6a0   : > { %v12608_v14 = vpop.f32.mrf.mxu3 }
 0x6a2   : > { %v4392_v42 = vpop.f32.mrf.mxu2 }
 0x6a3   : > { %v12598_v40 = vadd.f32 %v4392_v42, %v4374_v39  ;;  %v12616_v13 = vpop.f32.mrf.mxu0 }
 0x6a7   : > { %v12604_v34 = vpop.f32.mrf.mxu1 }
 0x6a8   : > { %v12614_v30 = vpop.f32.mrf.mxu3 }
 0x6aa   : > { %v12606_v41 = vpop.f32.mrf.mxu2 }
 0x6ab   : > { %v4501_v18 = vpop.f32.mrf.mxu0 }
 0x6af   : > { %v12612_v15 = vpop.f32.mrf.mxu1 }
 0x6b0   : > { %v4482_v19 = vpop.f32.mrf.mxu3 }
 0x6b2   : > { %v4463_v33 = vpop.f32.mrf.mxu2 }
 0x6b3   : > { %v4464_v54 = vadd.f32 %v4463_v33, %v3920_v8  ;;  %v4503_v25 = vpop.f32.mrf.mxu0  ;;  %v9164_v33 = vor.u32 %v10468_v37, %v9163_v60  ;;  %v9227_v37 = vld [vmem:[#allocation21 + $0xf0] sm:$0xf] }
 0x6b5   : > { %v4483_v24 = vadd.f32 %v4482_v19, %v4464_v54  ;;  %5269 = vmatpush.bf16.msrb.mxu3 %v9164_v33 }
 0x6b7   : > { %v12618_v20 = vpop.f32.mrf.mxu1  ;;  %v4502_v7 = vadd.f32 %v4501_v18, %v4483_v24 }
 0x6b8   : > { %v4484_v63 = vpop.f32.mrf.mxu3 }
 0x6ba   : > { %v4465_v12 = vpop.f32.mrf.mxu2 }
 0x6bb   : > { %v4466_v4 = vadd.f32 %v4465_v12, %v3920_v8  ;;  %v4506_v38 = vpop.f32.mrf.mxu0 }
 0x6bd   : > { %v4485_v45 = vadd.f32 %v4484_v63, %v4466_v4 }
 0x6bf   : > { %v4520_v1 = vpop.f32.mrf.mxu1  ;;  %v4504_v55 = vadd.f32 %v4503_v25, %v4485_v45 }
 0x6c0   : > { %v4521_v51 = vadd.f32 %v4520_v1, %v4502_v7  ;;  %v4487_v31 = vpop.f32.mrf.mxu3  ;;  %v4371_v7 = vadd.f32 %v12577_v16, %v12582_v36  ;;  %v4549_v16 = vunpack.c.l.bf16 %v12454_v57 }
 0x6c2   : > { %v4468_v17 = vpop.f32.mrf.mxu2  ;;  %v4390_v45 = vadd.f32 %v12589_v26, %v4371_v7  ;;  %v9131_v7 = vld [vmem:[#allocation21 + $0x30] sm:$0xf] }
 0x6c3   : > { %v4469_v56 = vadd.f32 %v4468_v17, %v3920_v8  ;;  %v4508_v18 = vpop.f32.mrf.mxu0 }
 0x6c5   : > { %v4488_v62 = vadd.f32 %v4487_v31, %v4469_v56  ;;  %v9147_v56 = vld [vmem:[#allocation21 + $0x50] sm:$0xf] }
 0x6c7   : > { %v4522_v48 = vpop.f32.mrf.mxu1  ;;  %v4507_v0 = vadd.f32 %v4506_v38, %v4488_v62  ;;  %v9275_v62 = vld [vmem:[#allocation21 + $0x150] sm:$0xf] }
 0x6c8   : > { %v4523_v22 = vadd.f32 %v4522_v48, %v4504_v55  ;;  %v4489_v3 = vpop.f32.mrf.mxu3  ;;  %v10464_v55 = vld [vmem:[#allocation21 + $0x54] sm:$0xf0] }
 0x6ca   : > { %v4470_v21 = vpop.f32.mrf.mxu2 }
 0x6cb   : > { %v4471_v5 = vadd.f32 %v4470_v21, %v3920_v8  ;;  %v9155_v8 = vld [vmem:[#allocation21 + $0x60] sm:$0xf]  ;;  %v10466_v21 = vld [vmem:[#allocation21 + $0x64] sm:$0xf0] }
 0x6cc   : > { %v9156_v4 = vor.u32 %v10466_v21, %v9155_v8  ;;  %v10498_v8 = vld [vmem:[#allocation21 + $0x164] sm:$0xf0] }
 0x6cd   : > { %v4490_v39 = vadd.f32 %v4489_v3, %v4471_v5  ;;  %v4409_v5 = vadd.f32 %v12600_v47, %v4390_v45  ;;  %v9139_v3 = vld [vmem:[#allocation21 + $0x40] sm:$0xf] }
 0x6ce   : > { %5270 = vmatpush.bf16.msrb.mxu3 %v9156_v4 }
 0x6cf   : > { %v4525_v52 = vpop.f32.mrf.mxu1  ;;  %v4509_v63 = vadd.f32 %v4508_v18, %v4490_v39  ;;  %v10484_v39 = vld [vmem:[#allocation21 + $0xf4] sm:$0xf0] }
 0x6d0   : > { %v4526_v11 = vadd.f32 %v4525_v52, %v4507_v0  ;;  %v9291_v52 = vld [vmem:[#allocation21 + $0x170] sm:$0xf] }
 0x6d2   : > { %v4539_v46 = vpop.f32.mrf.mxu2 }
 0x6d3   : > { %v4540_v27 = vadd.f32 %v4539_v46, %v4521_v51  ;;  %v4407_v51 = vadd.f32 %v12591_v61, %v12585_v43 }
 0x6d5   : > { %v9097_v50 = vmul.f32 -1.442695, %v4540_v27 }
 0x6d7   : > { %11010 = vpow2.f32 %v9097_v50  ;;  %v4527_v54 = vpop.f32.mrf.mxu1 }
 0x6d8   : > { %v4528_v46 = vadd.f32 %v4527_v54, %v4509_v63  ;;  %v9283_v54 = vld [vmem:[#allocation21 + $0x160] sm:$0xf] }
 0x6d9   : > { %v9284_v4 = vor.u32 %v10498_v8, %v9283_v54  ;;  %v9203_v54 = vld [vmem:[#allocation21 + $0xc0] sm:$0xf] }
 0x6da   : > { %v4541_v32 = vpop.f32.mrf.mxu2 }
 0x6db   : > { %v4542_v28 = vadd.f32 %v4541_v32, %v4523_v22  ;;  %v9148_v32 = vor.u32 %v10464_v55, %v9147_v56  ;;  %v4550_v56 = vunpack.c.l.bf16 %v12465_v35  ;;  %v4376_v55 = vadd.f32 %v12587_v9, %v12582_v36  ;;  %v10496_v35 = vld [vmem:[#allocation21 + $0x154] sm:$0xf0] }
 0x6dc   : > { %v4412_v36 = vadd.f32 %v12608_v14, %v12598_v40  ;;  %v10480_v14 = vld [vmem:[#allocation21 + $0xd4] sm:$0xf0] }
 0x6dd   : > { %v11011_v53 = vpop.eup %11010  ;;  %v9098_v59 = vmul.f32 -1.442695, %v4542_v28  ;;  %v4426_v28 = vadd.f32 %v12593_v23, %v4407_v51  ;;  %5271 = vmatpush.bf16.msrb.mxu3 %v9148_v32  ;;  %v9347_v32 = vld [vmem:[#allocation21 + $0x1e0] sm:$0xf]  ;;  %v10508_v9 = vld [vmem:[#allocation21 + $0x1b4] sm:$0xf0] }
 0x6de   : > { %v4565_v29 = vadd.f32 1.0, %v11011_v53  ;;  %v10500_v53 = vld [vmem:[#allocation21 + $0x174] sm:$0xf0] }
 0x6df   : > { %11012 = vpow2.f32 %v9098_v59  ;;  %v4445_v23 = vadd.f32 %v12595_v6, %v4426_v28  ;;  %v10516_v6 = vld [vmem:[#allocation21 + $0x1f4] sm:$0xf0] }
 0x6e0   : > { %11014 = vrcp.f32 %v4565_v29  ;;  %v4578_v25 = vand.u32 2147483647, %v4565_v29  ;;  %v4580_v27 = vand.u32 2147483648, %v4565_v29  ;;  %vm4574_vm5 = vweird.f32 %v4565_v29 }
 0x6e2   : > { %v4544_v58 = vpop.f32.mrf.mxu2  ;;  %vm12629_vm4 = vcmp.eq.f32.partialorder %v4578_v25, 8.507059e+37  ;;  %v4581_v57 = vor.u32 1.1754944e-38, %v4580_v27  ;;  %v10460_v25 = vld [vmem:[#allocation21 + $0x34] sm:$0xf0]  ;;  %v9219_v27 = vld [vmem:[#allocation21 + $0xe0] sm:$0xf] }
 0x6e3   : > { %v4545_v42 = vadd.f32 %v4544_v58, %v4526_v11  ;;  %v9292_v11 = vor.u32 %v10500_v53, %v9291_v52  ;;  %v10462_v58 = vld [vmem:[#allocation21 + $0x44] sm:$0xf0]  ;;  %v9132_v45 = vor.u32 %v10460_v25, %v9131_v7  ;;  %v4431_v7 = vadd.f32 %v12610_v10, %v4412_v36 }
 0x6e4   : > { %v9140_v18 = vor.u32 %v10462_v58, %v9139_v3 }
 0x6e5   : > { %v11013_v12 = vpop.eup %11012  ;;  %v9099_v17 = vmul.f32 -1.442695, %v4545_v42  ;;  %v9355_v42 = vld [vmem:[#allocation21 + $0x1f0] sm:$0xf]  ;;  %5307 = vmatpush.bf16.msra.mxu1 %v9292_v11 }
 0x6e6   : > { %v11015_v19 = vpop.eup %11014  ;;  %v12620_v1 = vadd.f32 1.0, %v11013_v12  ;;  %v9356_v63 = vor.u32 %v10516_v6, %v9355_v42  ;;  %5272 = vmatpush.bf16.msrb.mxu3 %v9140_v18  ;;  %v10456_v18 = vld [vmem:[#allocation21 + $0x14] sm:$0xf0] }
 0x6e7   : > { %v4570_v24 = vmul.f32 %v11015_v19, %v4565_v29  ;;  %11016 = vpow2.f32 %v9099_v17  ;;  %vm4575_vm3 = vweird.f32 %v11015_v19 }
 0x6e8   : > { %11018 = vrcp.f32 %v12620_v1  ;;  %v4593_v43 = vand.u32 2147483647, %v12620_v1  ;;  %vm4576_vm6 = vmor %vm4574_vm5, %vm4575_vm3  ;;  %v4595_v12 = vand.u32 2147483648, %v12620_v1  ;;  %5326 = vmatpush.bf16.msra.mxu2 %v9356_v63  ;;  %vm4589_vm2 = vweird.f32 %v12620_v1  ;;  %v10478_v63 = vld [vmem:[#allocation21 + $0xc4] sm:$0xf0] }
 0x6e9   : > { %v4571_v48 = vsub.f32 1.0, %v4570_v24  ;;  %v9228_v24 = vor.u32 %v10484_v39, %v9227_v37  ;;  %5308 = vmatpush.bf16.msra.mxu1 %v9284_v4  ;;  %v9331_v4 = vld [vmem:[#allocation21 + $0x1c0] sm:$0xf] }
 0x6ea   : > { %v4546_v50 = vpop.f32.mrf.mxu2  ;;  %vm12646_vm7 = vcmp.eq.f32.partialorder %v4593_v43, 8.507059e+37  ;;  %5273 = vmatpush.bf16.msrb.mxu3 %v9132_v45  ;;  %v10492_v45 = vld [vmem:[#allocation21 + $0x134] sm:$0xf0]  ;;  %v9315_v39 = vld [vmem:[#allocation21 + $0x1a0] sm:$0xf] }
 0x6eb   : > { %v4572_v31 = vmul.f32 %v11015_v19, %v4571_v48  ;;  %v4547_v22 = vadd.f32 %v4546_v50, %v4528_v46  ;;  %v10482_v50 = vld [vmem:[#allocation21 + $0xe4] sm:$0xf0]  ;;  %5288 = vmatpush.bf16.msra.mxu0 %v9228_v24 }
 0x6ed   : > { %v11017_v61 = vpop.eup %11016  ;;  %v4573_v26 = vadd.f32 %v11015_v19, %v4572_v31  ;;  %v9100_v38 = vmul.f32 -1.442695, %v4547_v22  ;;  %v4428_v31 = vadd.f32 %v12602_v49, %v4409_v5  ;;  %v9220_v22 = vor.u32 %v10482_v50, %v9219_v27 }
 0x6ee   : > { %v12635_v59 = vpop.eup %11018  ;;  %v12639_v0 = vadd.f32 1.0, %v11017_v61  ;;  %v4596_v49 = vor.u32 1.1754944e-38, %v4595_v12  ;;  %v9276_v5 = vor.u32 %v10496_v35, %v9275_v62 }
 0x6ef   : > { %v4577_v60 = vsel %vm4576_vm6, %v11015_v19, %v4573_v26  ;;  %v4585_v29 = vmul.f32 %v12635_v59, %v12620_v1  ;;  %11020 = vpow2.f32 %v9100_v38  ;;  %vm4590_vm0 = vweird.f32 %v12635_v59  ;;  %v9123_v38 = vld [vmem:[#allocation21 + $0x20] sm:$0xf]  ;;  %v10458_v1 = vld [vmem:[#allocation21 + $0x24] sm:$0xf0]  ;;  %5289 = vmatpush.bf16.msra.mxu0 %v9220_v22 }
 0x6f0   : > { %v4582_v47 = vsel %vm12629_vm4, %v4581_v57, %v4577_v60  ;;  %11022 = vrcp.f32 %v12639_v0  ;;  %v4608_v21 = vand.u32 2147483647, %v12639_v0  ;;  %v4610_v46 = vand.u32 2147483648, %v12639_v0  ;;  %vm12668_vm8 = vmor %vm4589_vm2, %vm4590_vm0  ;;  %v9211_v57 = vld [vmem:[#allocation21 + $0xd0] sm:$0xf]  ;;  %5309 = vmatpush.bf16.msra.mxu1 %v9276_v5 }
 0x6f1   : > { %v4629_v17 = vmul.f32 %v4582_v47, %v4445_v23  ;;  %v4586_v19 = vsub.f32 1.0, %v4585_v29  ;;  %v4447_v11 = vadd.f32 %v12604_v34, %v4428_v31  ;;  %v9339_v23 = vld [vmem:[#allocation21 + $0x1d0] sm:$0xf]  ;;  %v10512_v60 = vld [vmem:[#allocation21 + $0x1d4] sm:$0xf0]  ;;  %v4395_v29 = vadd.f32 %v12606_v41, %v4376_v55 }
 0x6f2   : > { %vm12683_vm9 = vcmp.eq.f32.partialorder %v4608_v21, 8.507059e+37  ;;  %v9267_v34 = vld [vmem:[#allocation21 + $0x140] sm:$0xf]  ;;  %v4611_v12 = vor.u32 1.1754944e-38, %v4610_v46  ;;  %v9124_v6 = vor.u32 %v10458_v1, %v9123_v38  ;;  %v9115_v41 = vld [vmem:[#allocation21 + $0x10] sm:$0xf]  ;;  %v9212_v33 = vor.u32 %v10480_v14, %v9211_v57 }
 0x6f3   : > { %v4633_v51 = vadd.f32 %v4629_v17, %v4549_v16  ;;  %v4587_v48 = vmul.f32 %v12635_v59, %v4586_v19  ;;  %v10514_v16 = vld [vmem:[#allocation21 + $0x1e4] sm:$0xf0]  ;;  %v9340_v17 = vor.u32 %v10512_v60, %v9339_v23  ;;  %v9116_v24 = vor.u32 %v10456_v18, %v9115_v41  ;;  %v9259_v46 = vld [vmem:[#allocation21 + $0x130] sm:$0xf]  ;;  %v12701_v22 = vld [vmem:[#allocation3] sm:$0x8] }
 0x6f4   : > { %v9348_v26 = vor.u32 %v10514_v16, %v9347_v32  ;;  %5274 = vmatpush.bf16.msrb.mxu3 %v9124_v6  ;;  %vm4604_vm12 = vweird.f32 %v12639_v0  ;;  %5290 = vmatpush.bf16.msra.mxu0 %v9212_v33  ;;  %v10454_v31 = vld [vmem:[#allocation21 + $0x4] sm:$0xf0]  ;;  %v4551_v16 = vunpack.c.l.bf16 %v12467_v44  ;;  %v4414_v62 = vadd.f32 %v12614_v30, %v4395_v29  ;;  %v9251_v30 = vld [vmem:[#allocation21 + $0x120] sm:$0xf]  ;;  %v9419_v60 = vld [vmem:[#allocation21 + $0x270] sm:$0xf] }
 0x6f5   : > { %v11021_v43 = vpop.eup %11020  ;;  %v4637_v61 = vmul.f32 0.70710677, %v4633_v51  ;;  %v4588_v28 = vadd.f32 %v12635_v59, %v4587_v48  ;;  %v9204_v51 = vor.u32 %v10478_v63, %v9203_v54  ;;  %v10510_v48 = vld [vmem:[#allocation21 + $0x1c4] sm:$0xf0]  ;;  %v4666_v29 = vunpack.c.l.b16 %v12701_v22  ;;  %v9243_v6 = vld [vmem:[#allocation21 + $0x110] sm:$0xf] }
 0x6f6   : > { %v12662_v52 = vpop.eup %11022  ;;  %v12672_v53 = vadd.f32 1.0, %v11021_v43  ;;  %5327 = vmatpush.bf16.msra.mxu2 %v9348_v26  ;;  %v9332_v10 = vor.u32 %v10510_v48, %v9331_v4  ;;  %v9195_v43 = vld [vmem:[#allocation21 + $0xb0] sm:$0xf]  ;;  %v4450_v26 = vadd.f32 %v12612_v15, %v4431_v7  ;;  %v10474_v23 = vld [vmem:[#allocation21 + $0xa4] sm:$0xf0] }
 0x6f7   : > { %v4641_v3 = vpack.c.bf16 %v4637_v61, %v4637_v61  ;;  %v4592_v58 = vsel %vm12668_vm8, %v12635_v59, %v4588_v28  ;;  %v4600_v40 = vmul.f32 %v12662_v52, %v12639_v0  ;;  %v10494_v59 = vld [vmem:[#allocation21 + $0x144] sm:$0xf0]  ;;  %vm4605_vm11 = vweird.f32 %v12662_v52  ;;  %v9107_v0 = vld [vmem:[#allocation21] sm:$0xf]  ;;  %v10476_v61 = vld [vmem:[#allocation21 + $0xb4] sm:$0xf0] }
 0x6f8   : > { %v4597_v37 = vsel %vm12646_vm7, %v4596_v49, %v4592_v58  ;;  %11024 = vrcp.f32 %v12672_v53  ;;  %v9268_v19 = vor.u32 %v10494_v59, %v9267_v34  ;;  %v4623_v21 = vand.u32 2147483647, %v12672_v53  ;;  %vm12696_vm3 = vmor %vm4604_vm12, %vm4605_vm11  ;;  %v9323_v28 = vld [vmem:[#allocation21 + $0x1b0] sm:$0xf]  ;;  %5275 = vmatpush.bf16.msrb.mxu3 %v9116_v24  ;;  %v10490_v49 = vld [vmem:[#allocation21 + $0x124] sm:$0xf0]  ;;  %5291 = vmatpush.bf16.msra.mxu0 %v9204_v51 }
 0x6f9   : > { %4645 = vst [vmem:[#allocation3 + $0x4] sm:$0xf] %v4641_v3  ;;  %v4630_v42 = vmul.f32 %v4597_v37, %v4447_v11  ;;  %v4601_v47 = vsub.f32 1.0, %v4600_v40  ;;  %v4625_v55 = vand.u32 2147483648, %v12672_v53  ;;  %v9108_v44 = vor.u32 %v10454_v31, %v9107_v0  ;;  %v9187_v11 = vld [vmem:[#allocation21 + $0xa0] sm:$0xf] }
 0x6fa   : > { %5328 = vmatpush.bf16.msra.mxu2 %v9340_v17  ;;  %5310 = vmatpush.bf16.msra.mxu1 %v9268_v19  ;;  %vm12713_vm4 = vcmp.eq.f32.partialorder %v4623_v21, 8.507059e+37  ;;  %v9324_v1 = vor.u32 %v10508_v9, %v9323_v28  ;;  %v9252_v14 = vor.u32 %v10490_v49, %v9251_v30  ;;  %v10532_v37 = vld [vmem:[#allocation21 + $0x274] sm:$0xf0]  ;;  %v10506_v34 = vld [vmem:[#allocation21 + $0x1a4] sm:$0xf0]  ;;  %vm4619_vm6 = vweird.f32 %v12672_v53 }
 0x6fb   : > { %v4602_v8 = vmul.f32 %v12662_v52, %v4601_v47  ;;  %v4634_v25 = vadd.f32 %v4630_v42, %v4550_v56  ;;  %v9260_v56 = vor.u32 %v10492_v45, %v9259_v46  ;;  %v4626_v40 = vor.u32 1.1754944e-38, %v4625_v55  ;;  %v10488_v41 = vld [vmem:[#allocation21 + $0x114] sm:$0xf0]  ;;  %v9179_v19 = vld [vmem:[#allocation21 + $0x90] sm:$0xf] }
 0x6fc   : > { %5276 = vmatpush.bf16.msrb.mxu3 %v9108_v44  ;;  %v9188_v33 = vor.u32 %v10474_v23, %v9187_v11  ;;  %v9316_v17 = vor.u32 %v10506_v34, %v9315_v39  ;;  %v9411_v18 = vld [vmem:[#allocation21 + $0x260] sm:$0xf]  ;;  %v10530_v54 = vld [vmem:[#allocation21 + $0x264] sm:$0xf0]  ;;  %v10472_v4 = vld [vmem:[#allocation21 + $0x94] sm:$0xf0]  ;;  %v4552_v0 = vunpack.c.l.bf16 %v12488_v2 }
 0x6fd   : > { %v4603_v27 = vadd.f32 %v12662_v52, %v4602_v8  ;;  %v12717_v5 = vmul.f32 0.70710677, %v4634_v25  ;;  %v4433_v8 = vadd.f32 %v12616_v13, %v4414_v62  ;;  %v9307_v7 = vld [vmem:[#allocation21 + $0x190] sm:$0xf]  ;;  %v9412_v25 = vor.u32 %v10530_v54, %v9411_v18  ;;  %v10504_v51 = vld [vmem:[#allocation21 + $0x194] sm:$0xf0] }
 0x6fe   : > { %v12703_v32 = vpop.eup %11024  ;;  %5329 = vmatpush.bf16.msra.mxu2 %v9332_v10  ;;  %5311 = vmatpush.bf16.msra.mxu1 %v9260_v56  ;;  %v9235_v48 = vld [vmem:[#allocation21 + $0x100] sm:$0xf]  ;;  %v10486_v46 = vld [vmem:[#allocation21 + $0x104] sm:$0xf0]  ;;  %v9403_v56 = vld [vmem:[#allocation21 + $0x250] sm:$0xf]  ;;  %v9308_v22 = vor.u32 %v10504_v51, %v9307_v7 }
 0x6ff   : > { %v4607_v35 = vsel %vm12696_vm3, %v12662_v52, %v4603_v27  ;;  %v4615_v38 = vmul.f32 %v12703_v32, %v12672_v53  ;;  %v9196_v52 = vor.u32 %v10476_v61, %v9195_v43  ;;  %vm4620_vm5 = vweird.f32 %v12703_v32  ;;  %v9171_v55 = vld [vmem:[#allocation21 + $0x80] sm:$0xf]  ;;  %v10470_v10 = vld [vmem:[#allocation21 + $0x84] sm:$0xf0]  ;;  %v10467_v9 = vld [vmem:[#allocation21 + $0x74] sm:$0xf] }
 0x700   : > { %v4612_v15 = vsel %vm12683_vm9, %v4611_v12, %v4607_v35  ;;  %v12721_v57 = vld [vmem:[#allocation3 + $0x4] sm:$0xf]  ;;  %v9420_v12 = vor.u32 %v10532_v37, %v9419_v60  ;;  %vm12732_vm7 = vmor %vm4619_vm6, %vm4620_vm5  ;;  %v9244_v53 = vor.u32 %v10488_v41, %v9243_v6  ;;  %v4452_v13 = vadd.f32 %v12618_v20, %v4433_v8  ;;  %v10502_v43 = vld [vmem:[#allocation21 + $0x184] sm:$0xf0] }
 0x701   : > { %v4631_v3 = vmul.f32 %v4612_v15, %v4450_v26  ;;  %v4616_v58 = vsub.f32 1.0, %v4615_v38  ;;  %v4667_v47 = vunpack.c.l.b16 %v12721_v57  ;;  %5292 = vmatpush.bf16.msra.mxu0 %v9196_v52  ;;  %v9180_v20 = vor.u32 %v10472_v4, %v9179_v19  ;;  %v9299_v62 = vld [vmem:[#allocation21 + $0x180] sm:$0xf]  ;;  %v10483_v26 = vld [vmem:[#allocation21 + $0xf4] sm:$0xf] }
 0x702   : > { %5330 = vmatpush.bf16.msra.mxu2 %v9324_v1  ;;  %5312 = vmatpush.bf16.msra.mxu1 %v9252_v14  ;;  %v9236_v61 = vor.u32 %v10486_v46, %v9235_v48  ;;  %v9229_v35 = vld [vmem:[#allocation21 + $0xf8] sm:$0xf0]  ;;  %v9395_v2 = vld [vmem:[#allocation21 + $0x240] sm:$0xf]  ;;  %v10526_v44 = vld [vmem:[#allocation21 + $0x244] sm:$0xf0]  ;;  %v9172_v15 = vor.u32 %v10470_v10, %v9171_v55  ;;  %v9300_v52 = vor.u32 %v10502_v43, %v9299_v62 }
 0x703   : > { %v4635_v59 = vadd.f32 %v4631_v3, %v4551_v16  ;;  %v4617_v42 = vmul.f32 %v12703_v32, %v4616_v58  ;;  %5345 = vmatpush.bf16.msra.mxu3 %v9420_v12  ;;  %v12743_v50 = vpack.c.b16 %v4667_v47, %v4666_v29  ;;  %v10528_v16 = vld [vmem:[#allocation21 + $0x254] sm:$0xf0]  ;;  %v9232_v38 = vor.u32 %v10483_v26, %v9229_v35  ;;  %v9165_v30 = vld [vmem:[#allocation21 + $0x78] sm:$0xf0]  ;;  %v10499_v49 = vld [vmem:[#allocation21 + $0x174] sm:$0xf] }
 0x704   : > { %v9404_v28 = vor.u32 %v10528_v16, %v9403_v56  ;;  %v9293_v1 = vld [vmem:[#allocation21 + $0x178] sm:$0xf0]  ;;  %v10481_v11 = vld [vmem:[#allocation21 + $0xe4] sm:$0xf]  ;;  %v9396_v58 = vor.u32 %v10526_v44, %v9395_v2  ;;  %v9221_v14 = vld [vmem:[#allocation21 + $0xe8] sm:$0xf0] }
 0x705   : > { %v4639_v21 = vmul.f32 0.70710677, %v4635_v59  ;;  %v4618_v24 = vadd.f32 %v12703_v32, %v4617_v42  ;;  %5293 = vmatpush.bf16.msra.mxu0 %v9188_v33  ;;  %v9387_v23 = vld [vmem:[#allocation21 + $0x230] sm:$0xf]  ;;  %v9296_v60 = vor.u32 %v10499_v49, %v9293_v1  ;;  %v9224_v29 = vor.u32 %v10481_v11, %v9221_v14  ;;  %v10524_v37 = vld [vmem:[#allocation21 + $0x234] sm:$0xf0] }
 0x706   : > { %5331 = vmatpush.bf16.msra.mxu2 %v9316_v17  ;;  %5313 = vmatpush.bf16.msra.mxu1 %v9244_v53  ;;  %v10465_v39 = vld [vmem:[#allocation21 + $0x64] sm:$0xf]  ;;  %v9157_v34 = vld [vmem:[#allocation21 + $0x68] sm:$0xf0]  ;;  %v10479_v6 = vld [vmem:[#allocation21 + $0xd4] sm:$0xf] }
 0x707   : > { %v10724_v45 = vpack.c.bf16 %v4639_v21, %v12717_v5  ;;  %v4622_v27 = vsel %vm12732_vm7, %v12703_v32, %v4618_v24  ;;  %5346 = vmatpush.bf16.msra.mxu3 %v9412_v25  ;;  %v4834_v5 = vrot.slane %v12743_v50, 3  ;;  %v10497_v42 = vld [vmem:[#allocation21 + $0x164] sm:$0xf]  ;;  %v9285_v12 = vld [vmem:[#allocation21 + $0x168] sm:$0xf0]  ;;  %v4680_v17 = vshll.u32 %v12743_v50, 16 }
 0x708   : > { %v4627_v31 = vsel %vm12713_vm4, %v4626_v40, %v4622_v27  ;;  %v9168_v40 = vor.u32 %v10467_v9, %v9165_v30  ;;  %v9388_v21 = vor.u32 %v10524_v37, %v9387_v23  ;;  %v9160_v24 = vor.u32 %v10465_v39, %v9157_v34  ;;  %v9213_v63 = vld [vmem:[#allocation21 + $0xd8] sm:$0xf0]  ;;  %v9379_v53 = vld [vmem:[#allocation21 + $0x220] sm:$0xf]  ;;  %v10522_v25 = vld [vmem:[#allocation21 + $0x224] sm:$0xf0] }
 0x709   : > { %10754 = vst [vmem:[#allocation3 + $0x8] sm:$0xff] %v10724_v45   ;;  %v4632_v32 = vmul.f32 %v4627_v31, %v4452_v13  ;;  %5294 = vmatpush.bf16.msra.mxu0 %v9180_v20  ;;  %v9288_v4 = vor.u32 %v10497_v42, %v9285_v12  ;;  %v9216_v7 = vor.u32 %v10479_v6, %v9213_v63  ;;  %v10463_v51 = vld [vmem:[#allocation21 + $0x54] sm:$0xf]  ;;  %v9149_v48 = vld [vmem:[#allocation21 + $0x58] sm:$0xf0]  ;;  %v4678_v10 = vshrl.u32 %v12743_v50, 16 }
 0x70a   : > { %5332 = vmatpush.bf16.msra.mxu2 %v9308_v22  ;;  %5314 = vmatpush.bf16.msra.mxu1 %v9236_v61  ;;  %v10495_v13 = vld [vmem:[#allocation21 + $0x154] sm:$0xf]  ;;  %v9277_v45 = vld [vmem:[#allocation21 + $0x158] sm:$0xf0]  ;;  %v10477_v27 = vld [vmem:[#allocation21 + $0xc4] sm:$0xf]  ;;  %v9380_v16 = vor.u32 %v10522_v25, %v9379_v53  ;;  %v9152_v62 = vor.u32 %v10463_v51, %v9149_v48 }
 0x70b   : > { %v4636_v36 = vadd.f32 %v4632_v32, %v4552_v0  ;;  %5347 = vmatpush.bf16.msra.mxu3 %v9404_v28  ;;  %v4682_v56 = vrot.slane %v4680_v17, 1  ;;  %v9205_v0 = vld [vmem:[#allocation21 + $0xc8] sm:$0xf0]  ;;  %v9371_v31 = vld [vmem:[#allocation21 + $0x210] sm:$0xf] }
 0x70c   : > { %v10520_v43 = vld [vmem:[#allocation21 + $0x214] sm:$0xf0]  ;;  %v10461_v32 = vld [vmem:[#allocation21 + $0x44] sm:$0xf]  ;;  %v9208_v26 = vor.u32 %v10477_v27, %v9205_v0  ;;  %v9141_v35 = vld [vmem:[#allocation21 + $0x48] sm:$0xf0] }
 0x70d   : > { %v4640_v3 = vmul.f32 0.70710677, %v4636_v36  ;;  %5295 = vmatpush.bf16.msra.mxu0 %v9172_v15  ;;  %v9269_v36 = vld [vmem:[#allocation21 + $0x148] sm:$0xf0]  ;;  %v10475_v9 = vld [vmem:[#allocation21 + $0xb4] sm:$0xf]  ;;  %v4683_v15 = vor.u32 %v4682_v56, %v4678_v10 }
 0x70e   : > { %5383 = vmatpush.bf16.msrb.mxu1 %v9232_v38  ;;  %5333 = vmatpush.bf16.msra.mxu2 %v9300_v52  ;;  %v10493_v38 = vld [vmem:[#allocation21 + $0x144] sm:$0xf]  ;;  %v9197_v14 = vld [vmem:[#allocation21 + $0xb8] sm:$0xf0]  ;;  %v4659_v23 = vld [vmem:[#allocation3 + $0x14] sm:$0x1] }
 0x70f   : > { %v4644_v59 = vpack.c.bf16 %v4640_v3, %v4640_v3  ;;  %5348 = vmatpush.bf16.msra.mxu3 %v9396_v58  ;;  %v9144_v58 = vor.u32 %v10461_v32, %v9141_v35  ;;  %v9200_v12 = vor.u32 %v10475_v9, %v9197_v14  ;;  %v9363_v6 = vld [vmem:[#allocation21 + $0x200] sm:$0xf]  ;;  %v10518_v17 = vld [vmem:[#allocation21 + $0x204] sm:$0xf0]  ;;  %v9261_v0 = vld [vmem:[#allocation21 + $0x138] sm:$0xf0] }
 0x710   : > { %v12749_v41 = vld [vmem:[#allocation3 + $0x8] sm:$0xf]  ;;  %v12751_v33 = vld [vmem:[#allocation3 + $0xc] sm:$0xf] }
 0x711   : > { %v4655_v19 = vld [vmem:[#allocation3 + $0x4] sm:$0xff]   ;;  %4648 = vst [vmem:[#allocation3 + $0x10] sm:$0xf] %v4644_v59  ;;  %v4668_v54 = vunpack.c.l.b16 %v12749_v41  ;;  %v4669_v8 = vunpack.c.l.b16 %v12751_v33  ;;  %5364 = vmatpush.bf16.msrb.mxu0 %v9168_v40  ;;  %v9272_v40 = vor.u32 %v10493_v38, %v9269_v36  ;;  %v9189_v32 = vld [vmem:[#allocation21 + $0xa8] sm:$0xf0] }
 0x712   : > { %v12754_v18 = vld [vmem:[#allocation3 + $0x4] sm:$0xf0]  ;;  %5402 = vmatpush.bf16.msrb.mxu2 %v9296_v60  ;;  %5384 = vmatpush.bf16.msrb.mxu1 %v9224_v29  ;;  %v4719_v61 = vshrl.u32 %v4655_v19, 16  ;;  %v4722_v28 = vshll.u32 %v4655_v19, 16  ;;  %v9125_v35 = vld [vmem:[#allocation21 + $0x28] sm:$0xf0] }
 0x713   : > { %v12760_v46 = vpack.c.b16 %v4669_v8, %v4668_v54  ;;  %v12764_v55 = vpack.c.b16 %v4668_v54, %v4667_v47  ;;  %5349 = vmatpush.bf16.msra.mxu3 %v9388_v21  ;;  %v9280_v47 = vor.u32 %v10495_v13, %v9277_v45  ;;  %v9364_v13 = vor.u32 %v10518_v17, %v9363_v6  ;;  %v10491_v45 = vld [vmem:[#allocation21 + $0x134] sm:$0xf] }
 0x714   : > { %v4721_v1 = vrot.slane %v4719_v61, 5  ;;  %v4724_v11 = vrot.slane %v4722_v28, 6  ;;  %v10457_v61 = vld [vmem:[#allocation21 + $0x24] sm:$0xf]  ;;  %v10515_v38 = vld [vmem:[#allocation21 + $0x1f4] sm:$0xf] }
 0x715   : > { %v4835_v20 = vrot.slane %v12760_v46, 3  ;;  %v4685_v22 = vshll.u32 %v12760_v46, 16  ;;  %5365 = vmatpush.bf16.msrb.mxu0 %v9160_v24  ;;  %v4702_v49 = vrot.slane %v12764_v55, 5  ;;  %v4689_v19 = vshrl.u32 %v12760_v46, 16 }
 0x716   : > { %5403 = vmatpush.bf16.msrb.mxu2 %v9288_v4  ;;  %5385 = vmatpush.bf16.msrb.mxu1 %v9216_v7  ;;  %v4725_v29 = vor.u32 %v4724_v11, %v4721_v1  ;;  %v4714_v24 = vunpack.c.l.b16 %v4659_v23  ;;  %v9133_v7 = vld [vmem:[#allocation21 + $0x38] sm:$0xf0]  ;;  %v9264_v11 = vor.u32 %v10491_v45, %v9261_v0  ;;  %v9128_v14 = vor.u32 %v10457_v61, %v9125_v35  ;;  %v10455_v23 = vld [vmem:[#allocation21 + $0x14] sm:$0xf]  ;;  %v10485_v0 = vld [vmem:[#allocation21 + $0x104] sm:$0xf] }
 0x717   : > { %v12774_v2 = vsel %vm3923_vm13, %v4834_v5, %v4835_v20  ;;  %v4687_v44 = vrot.slane %v4685_v22, 1  ;;  %5350 = vmatpush.bf16.msra.mxu3 %v9380_v16  ;;  %v9372_v5 = vor.u32 %v10520_v43, %v9371_v31  ;;  %v4840_v25 = vrot.slane %v4702_v49, 3  ;;  %v10473_v31 = vld [vmem:[#allocation21 + $0xa4] sm:$0xf]  ;;  %v9421_v61 = vld [vmem:[#allocation21 + $0x278] sm:$0xf0] }
 0x718   : > { %5277 = vmatmul.bf16.vlgmr.msrb.gmra.mxu3 %v12774_v2  ;;  %v12777_v30 = vld [vmem:[#allocation3 + $0x10] sm:$0xf]  ;;  %v4843_v56 = vrot.slane %v4725_v29, 3 }
 0x719   : > { %v12780_v52 = vld [vmem:[#allocation3 + $0xc] sm:$0xff]  ;;  %v4675_v3 = vunpack.c.l.b16 %v12777_v30  ;;  %5366 = vmatpush.bf16.msrb.mxu0 %v9152_v62  ;;  %v4688_v60 = vsel %vm3764_vm14, %v4683_v15, %v4687_v44  ;;  %v4691_v55 = vor.u32 %v4689_v19, %v4687_v44  ;;  %v12811_v62 = vpack.c.b16 %v4714_v24, %v4714_v24  ;;  %v10489_v15 = vld [vmem:[#allocation21 + $0x124] sm:$0xf]  ;;  %v10487_v19 = vld [vmem:[#allocation21 + $0x114] sm:$0xf] }
 0x71a   : > { %v4653_v50 = vld [vmem:[#allocation3 + $0x10] sm:$0x7]  ;;  %v4727_v37 = vshrl.u32 %v12780_v52, 16  ;;  %v4730_v39 = vshll.u32 %v12780_v52, 16  ;;  %5404 = vmatpush.bf16.msrb.mxu2 %v9280_v47  ;;  %5386 = vmatpush.bf16.msrb.mxu1 %v9208_v26  ;;  %v4837_v51 = vrot.slane %v4688_v60, 3 }
 0x71b   : > { %v12788_v34 = vpack.c.b16 %v4675_v3, %v4669_v8  ;;  %v12790_v59 = vpack.c.b16 %v4675_v3, %v4675_v3  ;;  %v4670_v42 = vunpack.c.l.b16 %v4653_v50  ;;  %5351 = vmatpush.bf16.msra.mxu3 %v9372_v5  ;;  %v10459_v8 = vld [vmem:[#allocation21 + $0x34] sm:$0xf]  ;;  %v4736_v9 = vshll.u32 %v12811_v62, 16  ;;  %v9253_v3 = vld [vmem:[#allocation21 + $0x128] sm:$0xf0] }
 0x71c   : > { %v4729_v54 = vrot.slane %v4727_v37, 5  ;;  %v4732_v21 = vrot.slane %v4730_v39, 6  ;;  %v9136_v43 = vor.u32 %v10459_v8, %v9133_v7  ;;  %v10471_v50 = vld [vmem:[#allocation21 + $0x94] sm:$0xf]  ;;  %v9181_v5 = vld [vmem:[#allocation21 + $0x98] sm:$0xf0] }
 0x71d   : > { %v4703_v63 = vrot.slane %v12788_v34, 5  ;;  %v4693_v53 = vshll.u32 %v12790_v59, 16  ;;  %v12795_v4 = vpack.c.b16 %v4670_v42, %v4670_v42  ;;  %5367 = vmatpush.bf16.msrb.mxu0 %v9144_v58  ;;  %v9117_v60 = vld [vmem:[#allocation21 + $0x18] sm:$0xf0]  ;;  %v11094_v37 = vld [vmem:[#allocation3 + $0x4] sm:$0xe]  ;;  %v9184_v6 = vor.u32 %v10471_v50, %v9181_v5 }
 0x71e   : > { %v12797_v48 = vor.u32 %v4732_v21, %v4729_v54  ;;  %5405 = vmatpush.bf16.msrb.mxu2 %v9272_v40  ;;  %5387 = vmatpush.bf16.msrb.mxu1 %v9200_v12  ;;  %v9192_v40 = vor.u32 %v10473_v31, %v9189_v32  ;;  %v9349_v42 = vld [vmem:[#allocation21 + $0x1e8] sm:$0xf0]  ;;  %v9256_v12 = vor.u32 %v10489_v15, %v9253_v3  ;;  %v9245_v54 = vld [vmem:[#allocation21 + $0x118] sm:$0xf0]  ;;  %v10469_v21 = vld [vmem:[#allocation21 + $0x84] sm:$0xf] }
 0x71f   : > { %v12802_v27 = vsel %vm1260_vm1, %v4702_v49, %v4703_v63  ;;  %v12804_v10 = vrot.slane %v4693_v53, 1  ;;  %v4849_v26 = vrot.slane %v12795_v4, 3  ;;  %5352 = vmatpush.bf16.msra.mxu3 %v9364_v13  ;;  %v9357_v49 = vld [vmem:[#allocation21 + $0x1f8] sm:$0xf0]  ;;  %v9120_v17 = vor.u32 %v10455_v23, %v9117_v60  ;;  %v9173_v4 = vld [vmem:[#allocation21 + $0x88] sm:$0xf0] }
 0x720   : > { %v4841_v22 = vrot.slane %v12802_v27, 3  ;;  %v12809_v16 = vsel %vm3108_vm10, %v4725_v29, %v12797_v48  ;;  %v10513_v29 = vld [vmem:[#allocation21 + $0x1e4] sm:$0xf]  ;;  %v9360_v39 = vor.u32 %v10515_v38, %v9357_v49  ;;  %v9109_v7 = vld [vmem:[#allocation21 + $0x8] sm:$0xf0]  ;;  %v4697_v45 = vshrl.u32 %v12790_v59, 16 }
 0x721   : > { %v12815_v28 = vsel %vm3764_vm14, %v4691_v55, %v12804_v10  ;;  %v4844_v47 = vrot.slane %v12809_v16, 3  ;;  %5368 = vmatpush.bf16.msrb.mxu0 %v9136_v43  ;;  %v12842_v24 = vsel %vm3923_vm13, %v4835_v20, %v4849_v26  ;;  %v9352_v53 = vor.u32 %v10513_v29, %v9349_v42  ;;  %v10453_v8 = vld [vmem:[#allocation21 + $0x4] sm:$0xf]  ;;  %v9341_v13 = vld [vmem:[#allocation21 + $0x1d8] sm:$0xf0] }
 0x722   : > { %v12822_v44 = vsel %vm3923_vm13, %v4840_v25, %v4841_v22  ;;  %v4838_v36 = vrot.slane %v12815_v28, 3  ;;  %5406 = vmatpush.bf16.msrb.mxu2 %v9264_v11  ;;  %5388 = vmatpush.bf16.msrb.mxu1 %v9192_v40  ;;  %v4738_v25 = vrot.slane %v4736_v9, 6  ;;  %v9248_v55 = vor.u32 %v10487_v19, %v9245_v54  ;;  %v9237_v31 = vld [vmem:[#allocation21 + $0x108] sm:$0xf0]  ;;  %v10531_v43 = vld [vmem:[#allocation21 + $0x274] sm:$0xf] }
 0x723   : > { %5315 = vmatmul.bf16.vlgmr.msra.gmra.mxu1 %v12822_v44  ;;  %v12830_v1 = vsel %vm3923_vm13, %v4843_v56, %v4844_v47  ;;  %5421 = vmatpush.bf16.msrb.mxu3 %v9360_v39  ;;  %v11095_v56 = vor.u32 %v11094_v37, %v12754_v18  ;;  %v9176_v46 = vor.u32 %v10469_v21, %v9173_v4  ;;  %v4744_v59 = vrot.slane %v12780_v52, 6  ;;  %v10509_v38 = vld [vmem:[#allocation21 + $0x1c4] sm:$0xf]  ;;  %v9333_v9 = vld [vmem:[#allocation21 + $0x1c8] sm:$0xf0] }
 0x724   : > { %v12835_v58 = vsel %vm3923_vm13, %v4837_v51, %v4838_v36  ;;  %5334 = vmatmul.bf16.vlgmr.msra.gmra.mxu2 %v12830_v1  ;;  %v10511_v51 = vld [vmem:[#allocation21 + $0x1d4] sm:$0xf]  ;;  %v9112_v20 = vor.u32 %v10453_v8, %v9109_v7  ;;  %v4699_v26 = vor.u32 %v4697_v45, %v12804_v10  ;;  %v4739_v35 = vsel %vm3108_vm10, %v12797_v48, %v4738_v25  ;;  %v10529_v15 = vld [vmem:[#allocation21 + $0x264] sm:$0xf]  ;;  %v9413_v11 = vld [vmem:[#allocation21 + $0x268] sm:$0xf0] }
 0x725   : > { %5296 = vmatmul.bf16.vlgmr.msra.gmra.mxu0 %v12835_v58  ;;  %v9344_v32 = vor.u32 %v10511_v51, %v9341_v13  ;;  %v9424_v18 = vor.u32 %v10531_v43, %v9421_v61  ;;  %v9240_v49 = vor.u32 %v10485_v0, %v9237_v31  ;;  %v4853_v3 = vrot.slane %v4703_v63, 3  ;;  %v10507_v40 = vld [vmem:[#allocation21 + $0x1b4] sm:$0xf]  ;;  %v9405_v29 = vld [vmem:[#allocation21 + $0x258] sm:$0xf0] }
 0x726   : > { %5369 = vmatpush.bf16.msrb.mxu0 %v9128_v14  ;;  %5407 = vmatpush.bf16.msrb.mxu2 %v9256_v12  ;;  %v4743_v50 = vrot.slane %v11095_v56, 6  ;;  %v4855_v5 = vrot.slane %v4739_v35, 3  ;;  %v9336_v10 = vor.u32 %v10509_v38, %v9333_v9  ;;  %v4851_v48 = vrot.slane %v4699_v26, 3  ;;  %v9325_v14 = vld [vmem:[#allocation21 + $0x1b8] sm:$0xf0] }
 0x727   : > { %5389 = vmatpush.bf16.msrb.mxu1 %v9184_v6  ;;  %5422 = vmatpush.bf16.msrb.mxu3 %v9352_v53  ;;  %v9416_v23 = vor.u32 %v10529_v15, %v9413_v11  ;;  %v10527_v60 = vld [vmem:[#allocation21 + $0x254] sm:$0xf]  ;;  %v4854_v34 = vsel %vm3923_vm13, %v4841_v22, %v4853_v3  ;;  %v9328_v39 = vor.u32 %v10507_v40, %v9325_v14  ;;  %v10505_v12 = vld [vmem:[#allocation21 + $0x1a4] sm:$0xf]  ;;  %v9317_v6 = vld [vmem:[#allocation21 + $0x1a8] sm:$0xf0] }
 0x728   : > { %5282 = vmatmul.bf16.gmra.mxu3 %v12842_v24  ;;  %v4745_v52 = vsel %vm3831_vm15, %v4743_v50, %v4744_v59  ;;  %v4856_v63 = vsel %vm3923_vm13, %v4844_v47, %v4855_v5  ;;  %v4852_v42 = vsel %vm3923_vm13, %v4838_v36, %v4851_v48  ;;  %v4846_v27 = vrot.slane %v4743_v50, 3  ;;  %v10525_v22 = vld [vmem:[#allocation21 + $0x244] sm:$0xf]  ;;  %v9397_v19 = vld [vmem:[#allocation21 + $0x248] sm:$0xf0] }
 0x729   : > { %v4847_v37 = vrot.slane %v4745_v52, 3  ;;  %v9320_v47 = vor.u32 %v10505_v12, %v9317_v6  ;;  %v10503_v54 = vld [vmem:[#allocation21 + $0x194] sm:$0xf]  ;;  %v9309_v21 = vld [vmem:[#allocation21 + $0x198] sm:$0xf0]  ;;  %v9400_v28 = vor.u32 %v10525_v22, %v9397_v19  ;;  %v4746_v8 = vrot.slane %v12811_v62, 6 }
 0x72a   : > { %5370 = vmatpush.bf16.msrb.mxu0 %v9120_v17  ;;  %5408 = vmatpush.bf16.msrb.mxu2 %v9248_v55  ;;  %v9408_v17 = vor.u32 %v10527_v60, %v9405_v29  ;;  %v10523_v53 = vld [vmem:[#allocation21 + $0x234] sm:$0xf]  ;;  %v9389_v36 = vld [vmem:[#allocation21 + $0x238] sm:$0xf0]  ;;  %v9312_v4 = vor.u32 %v10503_v54, %v9309_v21  ;;  %v10501_v7 = vld [vmem:[#allocation21 + $0x184] sm:$0xf] }
 0x72b   : > { %5390 = vmatpush.bf16.msrb.mxu1 %v9176_v46  ;;  %5423 = vmatpush.bf16.msrb.mxu3 %v9344_v32  ;;  %v4848_v16 = vsel %vm3923_vm13, %v4846_v27, %v4847_v37  ;;  %v9301_v25 = vld [vmem:[#allocation21 + $0x188] sm:$0xf0]  ;;  %v9392_v51 = vor.u32 %v10523_v53, %v9389_v36  ;;  %v10521_v13 = vld [vmem:[#allocation21 + $0x224] sm:$0xf]  ;;  %v4747_v56 = vsel %vm3831_vm15, %v4744_v59, %v4746_v8  ;;  %v9373_v0 = vld [vmem:[#allocation21 + $0x218] sm:$0xf0] }
 0x72c   : > { %v9381_v45 = vld [vmem:[#allocation21 + $0x228] sm:$0xf0]  ;;  %v9304_v55 = vor.u32 %v10501_v7, %v9301_v25  ;;  %v4857_v31 = vrot.slane %v4747_v56, 3  ;;  %v10517_v43 = vld [vmem:[#allocation21 + $0x204] sm:$0xf] }
 0x72d   : > { %v9384_v46 = vor.u32 %v10521_v13, %v9381_v45  ;;  %v9365_v32 = vld [vmem:[#allocation21 + $0x208] sm:$0xf0] }
 0x72e   : > { %5371 = vmatpush.bf16.msrb.mxu0 %v9112_v20  ;;  %5409 = vmatpush.bf16.msrb.mxu2 %v9240_v49  ;;  %v10519_v20 = vld [vmem:[#allocation21 + $0x214] sm:$0xf]  ;;  %v4858_v61 = vsel %vm3923_vm13, %v4847_v37, %v4857_v31  ;;  %v9368_v26 = vor.u32 %v10517_v43, %v9365_v32 }
 0x72f   : > { %5424 = vmatpush.bf16.msrb.mxu3 %v9336_v10  ;;  %v9376_v62 = vor.u32 %v10519_v20, %v9373_v0 }
 0x732   : > { %5440 = vmatpush.bf16.msra.mxu0 %v9424_v18 }
 0x733   : > { %5320 = vmatmul.bf16.gmra.mxu1 %v4854_v34  ;;  %5425 = vmatpush.bf16.msrb.mxu3 %v9328_v39 }
 0x734   : > { %5339 = vmatmul.bf16.gmra.mxu2 %v4856_v63 }
 0x735   : > { %5301 = vmatmul.bf16.gmra.mxu0 %v4852_v42 }
 0x736   : > { %5441 = vmatpush.bf16.msra.mxu0 %v9416_v23 }
 0x737   : > { %5426 = vmatpush.bf16.msrb.mxu3 %v9320_v47 }
 0x738   : > { %5353 = vmatmul.bf16.vlgmr.msra.gmra.mxu3 %v4848_v16 }
 0x73a   : > { %5442 = vmatpush.bf16.msra.mxu0 %v9408_v17 }
 0x73b   : > { %5427 = vmatpush.bf16.msrb.mxu3 %v9312_v4 }
 0x73e   : > { %5443 = vmatpush.bf16.msra.mxu0 %v9400_v28 }
 0x73f   : > { %5428 = vmatpush.bf16.msrb.mxu3 %v9304_v55 }
 0x742   : > { %5444 = vmatpush.bf16.msra.mxu0 %v9392_v51 }
 0x743   : > { %5391 = vmatmul.bf16.vlgmr.msrb.gmra.mxu1 %v12835_v58 }
 0x744   : > { %5410 = vmatmul.bf16.vlgmr.msrb.gmra.mxu2 %v12822_v44 }
 0x745   : > { %5372 = vmatmul.bf16.vlgmr.msrb.gmra.mxu0 %v12774_v2  ;;  %v4828_v2 = vld [vmem:[%s13624_s15] sm:$0x3] }
 0x746   : > { %5445 = vmatpush.bf16.msra.mxu0 %v9384_v46  ;;  %v12875_v58 = vperm.slane %v4828_v2, 0 }
 0x748   : > { %5358 = vmatmul.bf16.gmra.mxu3 %v4858_v61 }
 0x74a   : > { %5446 = vmatpush.bf16.msra.mxu0 %v9376_v62 }
 0x74e   : > { %5447 = vmatpush.bf16.msra.mxu0 %v9368_v26 }
 0x753   : > { %5396 = vmatmul.bf16.gmra.mxu1 %v4852_v42  ;;  %v4831_v42 = vperm.slane %v4828_v2, 1 }
 0x754   : > { %5415 = vmatmul.bf16.gmra.mxu2 %v4854_v34 }
 0x755   : > { %5377 = vmatmul.bf16.gmra.mxu0 %v12842_v24 }
 0x758   : > { %5429 = vmatmul.bf16.vlgmr.msrb.gmra.mxu3 %v12830_v1 }
 0x765   : > { %5448 = vmatmul.bf16.vlgmr.msra.gmra.mxu0 %v4848_v16 }
 0x768   : > { %5434 = vmatmul.bf16.gmra.mxu3 %v4856_v63 }
 0x775   : > { %5453 = vmatmul.bf16.gmra.mxu0 %v4858_v61 }
 0x79b   : > { %v5278_v44 = vpop.f32.mrf.mxu3 }
 0x79c   : > { %v5279_v35 = vadd.f32 %v5278_v44, %v12875_v58 }
 0x7a0   : > { %v12884_v18 = vpop.f32.mrf.mxu1 }
 0x7a2   : > { %v5297_v59 = vpop.f32.mrf.mxu0 }
 0x7a3   : > { %v12878_v38 = vadd.f32 %v5297_v59, %v5279_v35  ;;  %v12880_v9 = vpop.f32.mrf.mxu3 }
 0x7a7   : > { %v12886_v49 = vpop.f32.mrf.mxu2 }
 0x7a8   : > { %v12893_v5 = vpop.f32.mrf.mxu1 }
 0x7aa   : > { %v12882_v24 = vpop.f32.mrf.mxu0 }
 0x7ab   : > { %v5283_v1 = vpop.f32.mrf.mxu3 }
 0x7ac   : > { %v5284_v15 = vadd.f32 %v5283_v1, %v12875_v58 }
 0x7af   : > { %v12895_v10 = vpop.f32.mrf.mxu2 }
 0x7b0   : > { %v12901_v40 = vpop.f32.mrf.mxu1 }
 0x7b2   : > { %v5302_v11 = vpop.f32.mrf.mxu0 }
 0x7b3   : > { %v12889_v3 = vadd.f32 %v5302_v11, %v5284_v15  ;;  %v12891_v50 = vpop.f32.mrf.mxu3 }
 0x7b7   : > { %v12903_v14 = vpop.f32.mrf.mxu2 }
 0x7b8   : > { %v12907_v29 = vpop.f32.mrf.mxu1 }
 0x7ba   : > { %v12897_v48 = vpop.f32.mrf.mxu0 }
 0x7bb   : > { %v12899_v52 = vpop.f32.mrf.mxu3 }
 0x7bf   : > { %v12911_v37 = vpop.f32.mrf.mxu2 }
 0x7c0   : > { %v5392_v6 = vpop.f32.mrf.mxu1 }
 0x7c2   : > { %v5373_v23 = vpop.f32.mrf.mxu0 }
 0x7c3   : > { %v12905_v60 = vpop.f32.mrf.mxu3  ;;  %v5374_v27 = vadd.f32 %v5373_v23, %v4831_v42 }
 0x7c5   : > { %v5393_v19 = vadd.f32 %v5392_v6, %v5374_v27 }
 0x7c7   : > { %v5411_v17 = vpop.f32.mrf.mxu2 }
 0x7c8   : > { %v5394_v47 = vpop.f32.mrf.mxu1  ;;  %v5412_v54 = vadd.f32 %v5411_v17, %v5393_v19 }
 0x7ca   : > { %v5375_v34 = vpop.f32.mrf.mxu0 }
 0x7cb   : > { %v12909_v63 = vpop.f32.mrf.mxu3  ;;  %v5376_v21 = vadd.f32 %v5375_v34, %v4831_v42 }
 0x7cd   : > { %v5395_v4 = vadd.f32 %v5394_v47, %v5376_v21 }
 0x7cf   : > { %v5413_v28 = vpop.f32.mrf.mxu2 }
 0x7d0   : > { %v5414_v51 = vadd.f32 %v5413_v28, %v5395_v4  ;;  %v5397_v45 = vpop.f32.mrf.mxu1 }
 0x7d2   : > { %v5378_v39 = vpop.f32.mrf.mxu0 }
 0x7d3   : > { %v12913_v12 = vpop.f32.mrf.mxu3  ;;  %v5379_v13 = vadd.f32 %v5378_v39, %v4831_v42 }
 0x7d5   : > { %v5398_v20 = vadd.f32 %v5397_v45, %v5379_v13 }
 0x7d7   : > { %v5416_v56 = vpop.f32.mrf.mxu2 }
 0x7d8   : > { %v5417_v61 = vadd.f32 %v5416_v56, %v5398_v20  ;;  %v5399_v44 = vpop.f32.mrf.mxu1  ;;  %v5459_v56 = vunpack.c.l.bf16 %v12721_v57  ;;  %v9491_v20 = vld [vmem:[#allocation22 + $0x70] sm:$0xf] }
 0x7da   : > { %v5380_v22 = vpop.f32.mrf.mxu0 }
 0x7db   : > { %v5430_v16 = vpop.f32.mrf.mxu3  ;;  %v5381_v26 = vadd.f32 %v5380_v22, %v4831_v42  ;;  %v5317_v42 = vadd.f32 %v12884_v18, %v12878_v38 }
 0x7dc   : > { %v5431_v53 = vadd.f32 %v5430_v16, %v5412_v54  ;;  %v5281_v16 = vadd.f32 %v12880_v9, %v12875_v58 }
 0x7dd   : > { %v5400_v59 = vadd.f32 %v5399_v44, %v5381_v26 }
 0x7de   : > { %v5300_v4 = vadd.f32 %v12882_v24, %v5281_v16  ;;  %v10565_v16 = vld [vmem:[#allocation22 + $0xf4] sm:$0xf0] }
 0x7df   : > { %v5418_v15 = vpop.f32.mrf.mxu2 }
 0x7e0   : > { %v5419_v17 = vadd.f32 %v5418_v15, %v5400_v59  ;;  %v5319_v24 = vadd.f32 %v12893_v5, %v5300_v4  ;;  %v9619_v59 = vld [vmem:[#allocation22 + $0x170] sm:$0xf]  ;;  %v9467_v4 = vld [vmem:[#allocation22 + $0x40] sm:$0xf] }
 0x7e2   : > { %v5449_v36 = vpop.f32.mrf.mxu0  ;;  %v5338_v57 = vadd.f32 %v12895_v10, %v5319_v24  ;;  %v5322_v10 = vadd.f32 %v12901_v40, %v12889_v3  ;;  %v9675_v24 = vld [vmem:[#allocation22 + $0x1e0] sm:$0xf] }
 0x7e3   : > { %v5450_v8 = vadd.f32 %v5449_v36, %v5431_v53  ;;  %v5432_v25 = vpop.f32.mrf.mxu3  ;;  %v5336_v36 = vadd.f32 %v12886_v49, %v5317_v42  ;;  %v5286_v42 = vadd.f32 %v12891_v50, %v12875_v58  ;;  %v9611_v58 = vld [vmem:[#allocation22 + $0x160] sm:$0xf]  ;;  %v10579_v50 = vld [vmem:[#allocation22 + $0x164] sm:$0xf0] }
 0x7e4   : > { %v5433_v55 = vadd.f32 %v5432_v25, %v5414_v51 }
 0x7e5   : > { %v9425_v7 = vmul.f32 -1.442695, %v5450_v8  ;;  %v5355_v25 = vadd.f32 %v12899_v52, %v5336_v36 }
 0x7e7   : > { %11026 = vpow2.f32 %v9425_v7 }
 0x7ea   : > { %v5451_v46 = vpop.f32.mrf.mxu0 }
 0x7eb   : > { %v5452_v0 = vadd.f32 %v5451_v46, %v5433_v55  ;;  %v5435_v43 = vpop.f32.mrf.mxu3 }
 0x7ec   : > { %v5436_v2 = vadd.f32 %v5435_v43, %v5417_v61  ;;  %v10547_v61 = vld [vmem:[#allocation22 + $0x64] sm:$0xf0] }
 0x7ed   : > { %v11027_v31 = vpop.eup %11026  ;;  %v9426_v62 = vmul.f32 -1.442695, %v5452_v0  ;;  %v10549_v0 = vld [vmem:[#allocation22 + $0x74] sm:$0xf0] }
 0x7ee   : > { %v5475_v32 = vadd.f32 1.0, %v11027_v31  ;;  %v9492_v43 = vor.u32 %v10549_v0, %v9491_v20  ;;  %v9459_v31 = vld [vmem:[#allocation22 + $0x30] sm:$0xf] }
 0x7ef   : > { %11028 = vpow2.f32 %v9426_v62 }
 0x7f0   : > { %11030 = vrcp.f32 %v5475_v32  ;;  %v5490_v47 = vand.u32 2147483648, %v5475_v32  ;;  %v5488_v28 = vand.u32 2147483647, %v5475_v32  ;;  %vm5484_vm2 = vweird.f32 %v5475_v32  ;;  %6179 = vmatpush.bf16.msra.mxu1 %v9492_v43 }
 0x7f2   : > { %v5454_v35 = vpop.f32.mrf.mxu0  ;;  %v5491_v51 = vor.u32 1.1754944e-38, %v5490_v47  ;;  %vm5489_vm9 = vcmp.eq.f32.partialorder %v5488_v28, 8.507059e+37  ;;  %v9683_v47 = vld [vmem:[#allocation22 + $0x1f0] sm:$0xf] }
 0x7f3   : > { %v5455_v1 = vadd.f32 %v5454_v35, %v5436_v2  ;;  %v5437_v6 = vpop.f32.mrf.mxu3  ;;  %v9475_v35 = vld [vmem:[#allocation22 + $0x50] sm:$0xf] }
 0x7f4   : > { %v5438_v19 = vadd.f32 %v5437_v6, %v5419_v17  ;;  %v9555_v17 = vld [vmem:[#allocation22 + $0xf0] sm:$0xf] }
 0x7f5   : > { %v11029_v11 = vpop.eup %11028  ;;  %v9427_v23 = vmul.f32 -1.442695, %v5455_v1  ;;  %v10581_v1 = vld [vmem:[#allocation22 + $0x174] sm:$0xf0] }
 0x7f6   : > { %v11031_v34 = vpop.eup %11030  ;;  %v12915_v39 = vadd.f32 1.0, %v11029_v11  ;;  %v9620_v6 = vor.u32 %v10581_v1, %v9619_v59  ;;  %v9667_v59 = vld [vmem:[#allocation22 + $0x1d0] sm:$0xf]  ;;  %v10593_v1 = vld [vmem:[#allocation22 + $0x1d4] sm:$0xf0] }
 0x7f7   : > { %v5480_v27 = vmul.f32 %v11031_v34, %v5475_v32  ;;  %11032 = vpow2.f32 %v9427_v23  ;;  %vm5485_vm0 = vweird.f32 %v11031_v34  ;;  %v9483_v32 = vld [vmem:[#allocation22 + $0x60] sm:$0xf] }
 0x7f8   : > { %11034 = vrcp.f32 %v12915_v39  ;;  %vm5486_vm8 = vmor %vm5484_vm2, %vm5485_vm0  ;;  %v5503_v9 = vand.u32 2147483647, %v12915_v39  ;;  %v5505_v62 = vand.u32 2147483648, %v12915_v39  ;;  %v9484_v44 = vor.u32 %v10547_v61, %v9483_v32  ;;  %6217 = vmatpush.bf16.msra.mxu3 %v9620_v6  ;;  %v10541_v32 = vld [vmem:[#allocation22 + $0x34] sm:$0xf0] }
 0x7f9   : > { %v5481_v22 = vsub.f32 1.0, %v5480_v27  ;;  %vm5499_vm3 = vweird.f32 %v12915_v39  ;;  %v9451_v6 = vld [vmem:[#allocation22 + $0x20] sm:$0xf] }
 0x7fa   : > { %v5456_v54 = vpop.f32.mrf.mxu0  ;;  %vm12932_vm11 = vcmp.eq.f32.partialorder %v5503_v9, 8.507059e+37  ;;  %6180 = vmatpush.bf16.msra.mxu1 %v9484_v44 }
 0x7fb   : > { %v5482_v21 = vmul.f32 %v11031_v34, %v5481_v22  ;;  %v5457_v53 = vadd.f32 %v5456_v54, %v5438_v19  ;;  %v5506_v22 = vor.u32 1.1754944e-38, %v5505_v62  ;;  %v10577_v62 = vld [vmem:[#allocation22 + $0x154] sm:$0xf0] }
 0x7fd   : > { %v11033_v8 = vpop.eup %11032  ;;  %v5483_v7 = vadd.f32 %v11031_v34, %v5482_v21  ;;  %v9428_v38 = vmul.f32 -1.442695, %v5457_v53  ;;  %v10597_v53 = vld [vmem:[#allocation22 + $0x1f4] sm:$0xf0] }
 0x7fe   : > { %v11035_v18 = vpop.eup %11034  ;;  %v12926_v13 = vadd.f32 1.0, %v11033_v8  ;;  %v5460_v8 = vunpack.c.l.bf16 %v12749_v41  ;;  %v9684_v9 = vor.u32 %v10597_v53, %v9683_v47  ;;  %v10559_v47 = vld [vmem:[#allocation22 + $0xc4] sm:$0xf0]  ;;  %v9659_v53 = vld [vmem:[#allocation22 + $0x1c0] sm:$0xf] }
 0x7ff   : > { %v5487_v45 = vsel %vm5486_vm8, %v11031_v34, %v5483_v7  ;;  %v5495_v55 = vmul.f32 %v11035_v18, %v12915_v39  ;;  %11036 = vpow2.f32 %v9428_v38  ;;  %vm5500_vm12 = vweird.f32 %v11035_v18  ;;  %v10545_v34 = vld [vmem:[#allocation22 + $0x54] sm:$0xf0] }
 0x800   : > { %v5492_v49 = vsel %vm5489_vm9, %v5491_v51, %v5487_v45  ;;  %11038 = vrcp.f32 %v12926_v13  ;;  %v5518_v2 = vand.u32 2147483647, %v12926_v13  ;;  %vm5501_vm4 = vmor %vm5499_vm3, %vm5500_vm12  ;;  %v5357_v39 = vadd.f32 %v12905_v60, %v5338_v57  ;;  %v10543_v60 = vld [vmem:[#allocation22 + $0x44] sm:$0xf0]  ;;  %6236 = vmatpush.bf16.msrb.mxu0 %v9684_v9  ;;  %v9651_v9 = vld [vmem:[#allocation22 + $0x1b0] sm:$0xf] }
 0x801   : > { %v5539_v46 = vmul.f32 %v5492_v49, %v5355_v25  ;;  %v5496_v52 = vsub.f32 1.0, %v5495_v55  ;;  %v5520_v40 = vand.u32 2147483648, %v12926_v13  ;;  %v9476_v36 = vor.u32 %v10545_v34, %v9475_v35  ;;  %v10563_v55 = vld [vmem:[#allocation22 + $0xe4] sm:$0xf0] }
 0x802   : > { %v9556_v38 = vor.u32 %v10565_v16, %v9555_v17  ;;  %v5305_v25 = vadd.f32 %v12897_v48, %v5286_v42  ;;  %v9612_v45 = vor.u32 %v10579_v50, %v9611_v58  ;;  %v5341_v49 = vadd.f32 %v12903_v14, %v5322_v10  ;;  %v10575_v42 = vld [vmem:[#allocation22 + $0x144] sm:$0xf0]  ;;  %v9579_v48 = vld [vmem:[#allocation22 + $0x120] sm:$0xf] }
 0x803   : > { %v5543_v26 = vadd.f32 %v5539_v46, %v5459_v56  ;;  %v5497_v5 = vmul.f32 %v11035_v18, %v5496_v52  ;;  %vm5514_vm6 = vweird.f32 %v12926_v13  ;;  %v10595_v46 = vld [vmem:[#allocation22 + $0x1e4] sm:$0xf0]  ;;  %v9603_v52 = vld [vmem:[#allocation22 + $0x150] sm:$0xf]  ;;  %vm12968_vm0 = vcmp.eq.f32.partialorder %v5518_v2, 8.507059e+37  ;;  %6181 = vmatpush.bf16.msra.mxu1 %v9476_v36 }
 0x804   : > { %6198 = vmatpush.bf16.msra.mxu2 %v9556_v38  ;;  %v5521_v0 = vor.u32 1.1754944e-38, %v5520_v40  ;;  %v9468_v14 = vor.u32 %v10543_v60, %v9467_v4  ;;  %6218 = vmatpush.bf16.msra.mxu3 %v9612_v45  ;;  %v9604_v61 = vor.u32 %v10577_v62, %v9603_v52  ;;  %v5324_v2 = vadd.f32 %v12907_v29, %v5305_v25  ;;  %v10591_v58 = vld [vmem:[#allocation22 + $0x1c4] sm:$0xf0]  ;;  %v9443_v4 = vld [vmem:[#allocation22 + $0x10] sm:$0xf] }
 0x805   : > { %v11037_v15 = vpop.eup %11036  ;;  %v5547_v11 = vmul.f32 0.70710677, %v5543_v26  ;;  %v5498_v23 = vadd.f32 %v11035_v18, %v5497_v5  ;;  %v9539_v26 = vld [vmem:[#allocation22 + $0xd0] sm:$0xf]  ;;  %v10561_v5 = vld [vmem:[#allocation22 + $0xd4] sm:$0xf0]  ;;  %v5360_v44 = vadd.f32 %v12909_v63, %v5341_v49  ;;  %v5461_v29 = vunpack.c.l.bf16 %v12751_v33 }
 0x806   : > { %v12940_v27 = vpop.eup %11038  ;;  %v12947_v19 = vadd.f32 1.0, %v11037_v15  ;;  %v9595_v15 = vld [vmem:[#allocation22 + $0x140] sm:$0xf]  ;;  %v9540_v17 = vor.u32 %v10561_v5, %v9539_v26  ;;  %v9460_v10 = vor.u32 %v10541_v32, %v9459_v31  ;;  %v9668_v16 = vor.u32 %v10593_v1, %v9667_v59  ;;  %v9587_v33 = vld [vmem:[#allocation22 + $0x130] sm:$0xf] }
 0x807   : > { %v5551_v54 = vpack.c.bf16 %v5547_v11, %v5547_v11  ;;  %v5502_v21 = vsel %vm5501_vm4, %v11035_v18, %v5498_v23  ;;  %v5510_v28 = vmul.f32 %v12940_v27, %v12926_v13  ;;  %vm5515_vm5 = vweird.f32 %v12940_v27  ;;  %v9547_v18 = vld [vmem:[#allocation22 + $0xe0] sm:$0xf]  ;;  %6182 = vmatpush.bf16.msra.mxu1 %v9468_v14  ;;  %v10537_v60 = vld [vmem:[#allocation22 + $0x14] sm:$0xf0]  ;;  %v5559_v45 = vld [vmem:[#allocation2] sm:$0x8] }
 0x808   : > { %v5507_v3 = vsel %vm12932_vm11, %v5506_v22, %v5502_v21  ;;  %11040 = vrcp.f32 %v12947_v19  ;;  %v9548_v41 = vor.u32 %v10563_v55, %v9547_v18  ;;  %vm12964_vm7 = vmor %vm5514_vm6, %vm5515_vm5  ;;  %v9676_v13 = vor.u32 %v10595_v46, %v9675_v24  ;;  %v10539_v22 = vld [vmem:[#allocation22 + $0x24] sm:$0xf0]  ;;  %6219 = vmatpush.bf16.msra.mxu3 %v9604_v61  ;;  %v9435_v62 = vld [vmem:[#allocation22] sm:$0xf] }
 0x809   : > { %5555 = vst [vmem:[#allocation2 + $0x4] sm:$0xf] %v5551_v54  ;;  %v5511_v7 = vsub.f32 1.0, %v5510_v28  ;;  %v5540_v51 = vmul.f32 %v5507_v3, %v5357_v39  ;;  %v5533_v34 = vand.u32 2147483647, %v12947_v19  ;;  %v5535_v21 = vand.u32 2147483648, %v12947_v19 }
 0x80a   : > { %6199 = vmatpush.bf16.msra.mxu2 %v9548_v41  ;;  %6237 = vmatpush.bf16.msrb.mxu0 %v9676_v13  ;;  %v9596_v28 = vor.u32 %v10575_v42, %v9595_v15  ;;  %v10573_v3 = vld [vmem:[#allocation22 + $0x134] sm:$0xf0]  ;;  %v5343_v38 = vadd.f32 %v12911_v37, %v5324_v2  ;;  %vm5529_vm8 = vweird.f32 %v12947_v19  ;;  %v9452_v18 = vor.u32 %v10539_v22, %v9451_v6  ;;  %v9515_v26 = vld [vmem:[#allocation22 + $0xa0] sm:$0xf]  ;;  %v10555_v5 = vld [vmem:[#allocation22 + $0xa4] sm:$0xf0] }
 0x80b   : > { %v5512_v56 = vmul.f32 %v12940_v27, %v5511_v7  ;;  %v5544_v35 = vadd.f32 %v5540_v51, %v5460_v8  ;;  %v9523_v7 = vld [vmem:[#allocation22 + $0xb0] sm:$0xf]  ;;  %6183 = vmatpush.bf16.msra.mxu1 %v9460_v10  ;;  %v9660_v25 = vor.u32 %v10591_v58, %v9659_v53  ;;  %v10557_v51 = vld [vmem:[#allocation22 + $0xb4] sm:$0xf0]  ;;  %v9588_v49 = vor.u32 %v10573_v3, %v9587_v33  ;;  %v9643_v59 = vld [vmem:[#allocation22 + $0x1a0] sm:$0xf] }
 0x80c   : > { %6220 = vmatpush.bf16.msra.mxu3 %v9596_v28  ;;  %v5576_v46 = vunpack.c.l.b16 %v5559_v45  ;;  %v5362_v37 = vadd.f32 %v12913_v12, %v5343_v38  ;;  %vm5534_vm11 = vcmp.eq.f32.partialorder %v5533_v34, 8.507059e+37  ;;  %v5536_v52 = vor.u32 1.1754944e-38, %v5535_v21  ;;  %v9747_v2 = vld [vmem:[#allocation22 + $0x270] sm:$0xf]  ;;  %v10587_v1 = vld [vmem:[#allocation22 + $0x1a4] sm:$0xf0] }
 0x80d   : > { %v5513_v43 = vadd.f32 %v12940_v27, %v5512_v56  ;;  %v5548_v50 = vmul.f32 0.70710677, %v5544_v35  ;;  %v10589_v56 = vld [vmem:[#allocation22 + $0x1b4] sm:$0xf0]  ;;  %v9444_v13 = vor.u32 %v10537_v60, %v9443_v4  ;;  %v9524_v32 = vor.u32 %v10557_v51, %v9523_v7  ;;  %v9739_v10 = vld [vmem:[#allocation22 + $0x260] sm:$0xf] }
 0x80e   : > { %v12973_v57 = vpop.eup %11040  ;;  %6200 = vmatpush.bf16.msra.mxu2 %v9540_v17  ;;  %6238 = vmatpush.bf16.msrb.mxu0 %v9668_v16  ;;  %v9652_v61 = vor.u32 %v10589_v56, %v9651_v9  ;;  %v10613_v15 = vld [vmem:[#allocation22 + $0x274] sm:$0xf0]  ;;  %v9516_v6 = vor.u32 %v10555_v5, %v9515_v26  ;;  %v9507_v17 = vld [vmem:[#allocation22 + $0x90] sm:$0xf]  ;;  %v10611_v22 = vld [vmem:[#allocation22 + $0x264] sm:$0xf0] }
 0x80f   : > { %v5517_v11 = vsel %vm12964_vm7, %v12940_v27, %v5513_v43  ;;  %v5525_v23 = vmul.f32 %v12973_v57, %v12947_v19  ;;  %v9531_v27 = vld [vmem:[#allocation22 + $0xc0] sm:$0xf]  ;;  %vm5530_vm2 = vweird.f32 %v12973_v57  ;;  %v10535_v43 = vld [vmem:[#allocation22 + $0x4] sm:$0xf0]  ;;  %6184 = vmatpush.bf16.msra.mxu1 %v9452_v18  ;;  %v10553_v42 = vld [vmem:[#allocation22 + $0x94] sm:$0xf0] }
 0x810   : > { %v5522_v63 = vsel %vm12968_vm0, %v5521_v0, %v5517_v11  ;;  %v9532_v8 = vor.u32 %v10559_v47, %v9531_v27  ;;  %v12992_v41 = vld [vmem:[#allocation2 + $0x4] sm:$0xf]  ;;  %vm5531_vm9 = vmor %vm5529_vm8, %vm5530_vm2  ;;  %6221 = vmatpush.bf16.msra.mxu3 %v9588_v49  ;;  %v9571_v11 = vld [vmem:[#allocation22 + $0x110] sm:$0xf]  ;;  %v9508_v3 = vor.u32 %v10553_v42, %v9507_v17 }
 0x811   : > { %v5541_v39 = vmul.f32 %v5522_v63, %v5360_v44  ;;  %v5526_v54 = vsub.f32 1.0, %v5525_v23  ;;  %v5577_v20 = vunpack.c.l.b16 %v12992_v41  ;;  %v10571_v0 = vld [vmem:[#allocation22 + $0x124] sm:$0xf0]  ;;  %v5462_v44 = vunpack.c.l.bf16 %v12777_v30  ;;  %v10569_v23 = vld [vmem:[#allocation22 + $0x114] sm:$0xf0] }
 0x812   : > { %6201 = vmatpush.bf16.msra.mxu2 %v9532_v8  ;;  %6239 = vmatpush.bf16.msrb.mxu0 %v9660_v25  ;;  %v9580_v35 = vor.u32 %v10571_v0, %v9579_v48  ;;  %v9644_v30 = vor.u32 %v10587_v1, %v9643_v59  ;;  %v9635_v16 = vld [vmem:[#allocation22 + $0x190] sm:$0xf]  ;;  %v10585_v21 = vld [vmem:[#allocation22 + $0x194] sm:$0xf0]  ;;  %v9563_v28 = vld [vmem:[#allocation22 + $0x100] sm:$0xf] }
 0x813   : > { %v5545_v40 = vadd.f32 %v5541_v39, %v5461_v29  ;;  %v5527_v36 = vmul.f32 %v12973_v57, %v5526_v54  ;;  %v13003_v19 = vpack.c.b16 %v5577_v20, %v5576_v46  ;;  %6185 = vmatpush.bf16.msra.mxu1 %v9444_v13  ;;  %v9436_v29 = vor.u32 %v10535_v43, %v9435_v62  ;;  %v10567_v53 = vld [vmem:[#allocation22 + $0x104] sm:$0xf0]  ;;  %v9499_v58 = vld [vmem:[#allocation22 + $0x80] sm:$0xf]  ;;  %v10564_v4 = vld [vmem:[#allocation22 + $0xf4] sm:$0xf] }
 0x814   : > { %6222 = vmatpush.bf16.msra.mxu3 %v9580_v35  ;;  %v9748_v39 = vor.u32 %v10613_v15, %v9747_v2  ;;  %v9572_v54 = vor.u32 %v10569_v23, %v9571_v11  ;;  %v9557_v60 = vld [vmem:[#allocation22 + $0xf8] sm:$0xf0]  ;;  %v9636_v38 = vor.u32 %v10585_v21, %v9635_v16  ;;  %v9627_v49 = vld [vmem:[#allocation22 + $0x180] sm:$0xf]  ;;  %v10583_v56 = vld [vmem:[#allocation22 + $0x184] sm:$0xf0] }
 0x815   : > { %v5549_v55 = vmul.f32 0.70710677, %v5545_v40  ;;  %v5528_v24 = vadd.f32 %v12973_v57, %v5527_v36  ;;  %v5744_v63 = vrot.slane %v13003_v19, 3  ;;  %v5588_v27 = vshrl.u32 %v13003_v19, 16  ;;  %v13008_v40 = vld [vmem:[#allocation22 + $0x250] sm:$0xf] }
 0x816   : > { %6202 = vmatpush.bf16.msra.mxu2 %v9524_v32  ;;  %6240 = vmatpush.bf16.msrb.mxu0 %v9652_v61  ;;  %v13010_v36 = vld [vmem:[#allocation22 + $0x254] sm:$0xf0]  ;;  %v5590_v18 = vshll.u32 %v13003_v19, 16  ;;  %v9560_v46 = vor.u32 %v10564_v4, %v9557_v60  ;;  %v10580_v48 = vld [vmem:[#allocation22 + $0x174] sm:$0xf] }
 0x817   : > { %v10729_v14 = vpack.c.bf16 %v5549_v55, %v5548_v50  ;;  %v5532_v31 = vsel %vm5531_vm9, %v12973_v57, %v5528_v24  ;;  %v10551_v50 = vld [vmem:[#allocation22 + $0x84] sm:$0xf0]  ;;  %6186 = vmatpush.bf16.msra.mxu1 %v9436_v29  ;;  %v9740_v55 = vor.u32 %v10611_v22, %v9739_v10  ;;  %v9564_v24 = vor.u32 %v10567_v53, %v9563_v28  ;;  %v9621_v13 = vld [vmem:[#allocation22 + $0x178] sm:$0xf0]  ;;  %v10562_v62 = vld [vmem:[#allocation22 + $0xe4] sm:$0xf] }
 0x818   : > { %v5537_v12 = vsel %vm5534_vm11, %v5536_v52, %v5532_v31  ;;  %6223 = vmatpush.bf16.msra.mxu3 %v9572_v54  ;;  %v9493_v52 = vld [vmem:[#allocation22 + $0x78] sm:$0xf0]  ;;  %v9549_v43 = vld [vmem:[#allocation22 + $0xe8] sm:$0xf0]  ;;  %v9732_v32 = vor.u32 %v13010_v36, %v13008_v40  ;;  %v5592_v61 = vrot.slane %v5590_v18, 1  ;;  %v9624_v15 = vor.u32 %v10580_v48, %v9621_v13 }
 0x819   : > { %10755 = vst [vmem:[#allocation2 + $0x8] sm:$0xff] %v10729_v14   ;;  %v5542_v57 = vmul.f32 %v5537_v12, %v5362_v37  ;;  %v10548_v37 = vld [vmem:[#allocation22 + $0x74] sm:$0xf]  ;;  %v9500_v14 = vor.u32 %v10551_v50, %v9499_v58  ;;  %v9628_v12 = vor.u32 %v10583_v56, %v9627_v49  ;;  %v9723_v26 = vld [vmem:[#allocation22 + $0x240] sm:$0xf]  ;;  %v9552_v11 = vor.u32 %v10562_v62, %v9549_v43 }
 0x81a   : > { %6203 = vmatpush.bf16.msra.mxu2 %v9516_v6  ;;  %6241 = vmatpush.bf16.msrb.mxu0 %v9644_v30  ;;  %v10607_v5 = vld [vmem:[#allocation22 + $0x244] sm:$0xf0]  ;;  %v10546_v35 = vld [vmem:[#allocation22 + $0x64] sm:$0xf]  ;;  %v13034_v23 = vld [vmem:[#allocation22 + $0x230] sm:$0xf] }
 0x81b   : > { %v5546_v34 = vadd.f32 %v5542_v57, %v5462_v44  ;;  %6255 = vmatpush.bf16.msrb.mxu1 %v9748_v39  ;;  %v9496_v57 = vor.u32 %v10548_v37, %v9493_v52  ;;  %v9485_v6 = vld [vmem:[#allocation22 + $0x68] sm:$0xf0]  ;;  %v10578_v17 = vld [vmem:[#allocation22 + $0x164] sm:$0xf]  ;;  %v9724_v29 = vor.u32 %v10607_v5, %v9723_v26  ;;  %v10560_v10 = vld [vmem:[#allocation22 + $0xd4] sm:$0xf] }
 0x81c   : > { %6224 = vmatpush.bf16.msra.mxu3 %v9564_v24  ;;  %v9613_v30 = vld [vmem:[#allocation22 + $0x168] sm:$0xf0]  ;;  %v9541_v22 = vld [vmem:[#allocation22 + $0xd8] sm:$0xf0]  ;;  %v10544_v36 = vld [vmem:[#allocation22 + $0x54] sm:$0xf] }
 0x81d   : > { %v5550_v47 = vmul.f32 0.70710677, %v5546_v34  ;;  %v13036_v34 = vld [vmem:[#allocation22 + $0x234] sm:$0xf0]  ;;  %v9544_v40 = vor.u32 %v10560_v10, %v9541_v22  ;;  %v10558_v37 = vld [vmem:[#allocation22 + $0xc4] sm:$0xf] }
 0x81e   : > { %6204 = vmatpush.bf16.msra.mxu2 %v9508_v3  ;;  %6242 = vmatpush.bf16.msrb.mxu0 %v9636_v38  ;;  %v9716_v18 = vor.u32 %v13036_v34, %v13034_v23  ;;  %v9533_v62 = vld [vmem:[#allocation22 + $0xc8] sm:$0xf0]  ;;  %v10542_v26 = vld [vmem:[#allocation22 + $0x44] sm:$0xf]  ;;  %v9699_v10 = vld [vmem:[#allocation22 + $0x210] sm:$0xf] }
 0x81f   : > { %v5554_v33 = vpack.c.bf16 %v5550_v47, %v5550_v47  ;;  %6256 = vmatpush.bf16.msrb.mxu1 %v9740_v55  ;;  %v5593_v47 = vor.u32 %v5592_v61, %v5588_v27  ;;  %v9616_v27 = vor.u32 %v10578_v17, %v9613_v30  ;;  %v9605_v55 = vld [vmem:[#allocation22 + $0x158] sm:$0xf0]  ;;  %v9536_v61 = vor.u32 %v10558_v37, %v9533_v62  ;;  %v9469_v5 = vld [vmem:[#allocation22 + $0x48] sm:$0xf0]  ;;  %v5569_v22 = vld [vmem:[#allocation2 + $0x14] sm:$0x1] }
 0x820   : > { %v13012_v8 = vld [vmem:[#allocation2 + $0x8] sm:$0xf]  ;;  %v13014_v7 = vld [vmem:[#allocation2 + $0xc] sm:$0xf]  ;;  %6293 = vmatpush.bf16.msrb.mxu3 %v9560_v46  ;;  %v9525_v17 = vld [vmem:[#allocation22 + $0xb8] sm:$0xf0] }
 0x821   : > { %v5565_v25 = vld [vmem:[#allocation2 + $0x4] sm:$0xff]   ;;  %5558 = vst [vmem:[#allocation2 + $0x10] sm:$0xf] %v5554_v33  ;;  %v5578_v9 = vunpack.c.l.b16 %v13012_v8  ;;  %v5579_v45 = vunpack.c.l.b16 %v13014_v7  ;;  %v9488_v33 = vor.u32 %v10546_v35, %v9485_v6  ;;  %v10556_v6 = vld [vmem:[#allocation22 + $0xb4] sm:$0xf] }
 0x822   : > { %v13017_v51 = vld [vmem:[#allocation2 + $0x4] sm:$0xf0]  ;;  %v5629_v59 = vshrl.u32 %v5565_v25, 16  ;;  %v5632_v1 = vshll.u32 %v5565_v25, 16  ;;  %6205 = vmatpush.bf16.msra.mxu2 %v9500_v14  ;;  %6243 = vmatpush.bf16.msrb.mxu0 %v9628_v12  ;;  %v9477_v25 = vld [vmem:[#allocation22 + $0x58] sm:$0xf0] }
 0x823   : > { %v13023_v0 = vpack.c.b16 %v5579_v45, %v5578_v9  ;;  %v13027_v31 = vpack.c.b16 %v5578_v9, %v5577_v20  ;;  %6257 = vmatpush.bf16.msrb.mxu1 %v9732_v32  ;;  %v10576_v9 = vld [vmem:[#allocation22 + $0x154] sm:$0xf]  ;;  %v9707_v14 = vld [vmem:[#allocation22 + $0x220] sm:$0xf]  ;;  %v9480_v13 = vor.u32 %v10544_v36, %v9477_v25  ;;  %v10603_v32 = vld [vmem:[#allocation22 + $0x224] sm:$0xf0] }
 0x824   : > { %v5631_v21 = vrot.slane %v5629_v59, 5  ;;  %v5634_v28 = vrot.slane %v5632_v1, 6  ;;  %6294 = vmatpush.bf16.msrb.mxu3 %v9552_v11  ;;  %v9608_v12 = vor.u32 %v10576_v9, %v9605_v55  ;;  %v10574_v1 = vld [vmem:[#allocation22 + $0x144] sm:$0xf]  ;;  %v9708_v30 = vor.u32 %v10603_v32, %v9707_v14  ;;  %v9691_v9 = vld [vmem:[#allocation22 + $0x200] sm:$0xf] }
 0x825   : > { %v5745_v2 = vrot.slane %v13023_v0, 3  ;;  %v5612_v44 = vrot.slane %v13027_v31, 5  ;;  %v5595_v20 = vshll.u32 %v13023_v0, 16  ;;  %v5599_v58 = vshrl.u32 %v13023_v0, 16  ;;  %v10554_v36 = vld [vmem:[#allocation22 + $0xa4] sm:$0xf] }
 0x826   : > { %6274 = vmatpush.bf16.msrb.mxu2 %v9496_v57  ;;  %6312 = vmatpush.bf16.msra.mxu0 %v9624_v15  ;;  %v5635_v49 = vor.u32 %v5634_v28, %v5631_v21  ;;  %v9597_v15 = vld [vmem:[#allocation22 + $0x148] sm:$0xf0]  ;;  %v10601_v21 = vld [vmem:[#allocation22 + $0x214] sm:$0xf0]  ;;  %v9472_v28 = vor.u32 %v10542_v26, %v9469_v5  ;;  %v10599_v55 = vld [vmem:[#allocation22 + $0x204] sm:$0xf0] }
 0x827   : > { %v13043_v42 = vsel %vm3923_vm13, %v5744_v63, %v5745_v2  ;;  %v5597_v39 = vrot.slane %v5595_v20, 1  ;;  %v5750_v53 = vrot.slane %v5612_v44, 3  ;;  %6258 = vmatpush.bf16.msrb.mxu1 %v9724_v29  ;;  %v9453_v37 = vld [vmem:[#allocation22 + $0x28] sm:$0xf0]  ;;  %v9685_v32 = vld [vmem:[#allocation22 + $0x1f8] sm:$0xf0]  ;;  %v9692_v0 = vor.u32 %v10599_v55, %v9691_v9 }
 0x828   : > { %6187 = vmatmul.bf16.vlgmr.msra.gmra.mxu1 %v13043_v42  ;;  %v13046_v16 = vld [vmem:[#allocation2 + $0x10] sm:$0xf]  ;;  %6295 = vmatpush.bf16.msrb.mxu3 %v9544_v40  ;;  %v5753_v34 = vrot.slane %v5635_v49, 3  ;;  %v9509_v5 = vld [vmem:[#allocation22 + $0x98] sm:$0xf0] }
 0x829   : > { %v13050_v54 = vld [vmem:[#allocation2 + $0xc] sm:$0xff]  ;;  %v5585_v63 = vunpack.c.l.b16 %v13046_v16  ;;  %v5598_v24 = vsel %vm3764_vm14, %v5593_v47, %v5597_v39  ;;  %v5601_v57 = vor.u32 %v5599_v58, %v5597_v39  ;;  %v10566_v9 = vld [vmem:[#allocation22 + $0x104] sm:$0xf]  ;;  %v9565_v55 = vld [vmem:[#allocation22 + $0x108] sm:$0xf0] }
 0x82a   : > { %v5563_v50 = vld [vmem:[#allocation2 + $0x10] sm:$0x7]  ;;  %v5637_v3 = vshrl.u32 %v13050_v54, 16  ;;  %v5640_v19 = vshll.u32 %v13050_v54, 16  ;;  %6275 = vmatpush.bf16.msrb.mxu2 %v9488_v33  ;;  %6313 = vmatpush.bf16.msra.mxu0 %v9616_v27  ;;  %v5747_v59 = vrot.slane %v5598_v24, 3  ;;  %v9528_v33 = vor.u32 %v10556_v6, %v9525_v17 }
 0x82b   : > { %v13060_v4 = vpack.c.b16 %v5585_v63, %v5579_v45  ;;  %v13062_v60 = vpack.c.b16 %v5585_v63, %v5585_v63  ;;  %v5580_v38 = vunpack.c.l.b16 %v5563_v50  ;;  %6259 = vmatpush.bf16.msrb.mxu1 %v9716_v18  ;;  %v9600_v63 = vor.u32 %v10574_v1, %v9597_v15  ;;  %v10540_v58 = vld [vmem:[#allocation22 + $0x34] sm:$0xf]  ;;  %v9589_v27 = vld [vmem:[#allocation22 + $0x138] sm:$0xf0]  ;;  %v11097_v24 = vld [vmem:[#allocation2 + $0x4] sm:$0xe] }
 0x82c   : > { %v5639_v56 = vrot.slane %v5637_v3, 5  ;;  %v5642_v46 = vrot.slane %v5640_v19, 6  ;;  %6296 = vmatpush.bf16.msrb.mxu3 %v9536_v61  ;;  %v5624_v3 = vunpack.c.l.b16 %v5569_v22  ;;  %v9461_v19 = vld [vmem:[#allocation22 + $0x38] sm:$0xf0]  ;;  %v9700_v18 = vor.u32 %v10601_v21, %v9699_v10  ;;  %v9581_v61 = vld [vmem:[#allocation22 + $0x128] sm:$0xf0] }
 0x82d   : > { %v5613_v52 = vrot.slane %v13060_v4, 5  ;;  %v5603_v45 = vshll.u32 %v13062_v60, 16  ;;  %v13069_v48 = vpack.c.b16 %v5580_v38, %v5580_v38  ;;  %v9517_v38 = vld [vmem:[#allocation22 + $0xa8] sm:$0xf0]  ;;  %v5607_v14 = vshrl.u32 %v13062_v60, 16 }
 0x82e   : > { %v13071_v43 = vor.u32 %v5642_v46, %v5639_v56  ;;  %6276 = vmatpush.bf16.msrb.mxu2 %v9480_v13  ;;  %6314 = vmatpush.bf16.msra.mxu0 %v9608_v12  ;;  %v13109_v25 = vpack.c.b16 %v5624_v3, %v5624_v3  ;;  %v10538_v46 = vld [vmem:[#allocation22 + $0x24] sm:$0xf]  ;;  %v9520_v62 = vor.u32 %v10554_v36, %v9517_v38  ;;  %v10552_v26 = vld [vmem:[#allocation22 + $0x94] sm:$0xf]  ;;  %v9677_v10 = vld [vmem:[#allocation22 + $0x1e8] sm:$0xf0] }
 0x82f   : > { %v13078_v20 = vsel %vm1260_vm1, %v5612_v44, %v5613_v52  ;;  %v5605_v35 = vrot.slane %v5603_v45, 1  ;;  %v5759_v44 = vrot.slane %v13069_v48, 3  ;;  %6260 = vmatpush.bf16.msrb.mxu1 %v9708_v30  ;;  %v10596_v45 = vld [vmem:[#allocation22 + $0x1f4] sm:$0xf]  ;;  %v10570_v12 = vld [vmem:[#allocation22 + $0x124] sm:$0xf]  ;;  %v9456_v1 = vor.u32 %v10538_v46, %v9453_v37 }
 0x830   : > { %v5751_v11 = vrot.slane %v13078_v20, 3  ;;  %v13083_v23 = vsel %vm3108_vm10, %v5635_v49, %v13071_v43  ;;  %v9464_v49 = vor.u32 %v10540_v58, %v9461_v19  ;;  %6297 = vmatpush.bf16.msrb.mxu3 %v9528_v33  ;;  %v5646_v13 = vshll.u32 %v13109_v25, 16  ;;  %v10536_v15 = vld [vmem:[#allocation22 + $0x14] sm:$0xf]  ;;  %v10594_v30 = vld [vmem:[#allocation22 + $0x1e4] sm:$0xf] }
 0x831   : > { %v13086_v29 = vsel %vm3764_vm14, %v5601_v57, %v5605_v35  ;;  %v5754_v31 = vrot.slane %v13083_v23, 3  ;;  %v13114_v48 = vsel %vm3923_vm13, %v5745_v2, %v5759_v44  ;;  %v5609_v57 = vor.u32 %v5607_v14, %v5605_v35  ;;  %v9445_v44 = vld [vmem:[#allocation22 + $0x18] sm:$0xf0]  ;;  %v10568_v22 = vld [vmem:[#allocation22 + $0x114] sm:$0xf] }
 0x832   : > { %v13093_v47 = vsel %vm3923_vm13, %v5750_v53, %v5751_v11  ;;  %v5748_v39 = vrot.slane %v13086_v29, 3  ;;  %v10572_v53 = vld [vmem:[#allocation22 + $0x134] sm:$0xf]  ;;  %6277 = vmatpush.bf16.msrb.mxu2 %v9472_v28  ;;  %6315 = vmatpush.bf16.msra.mxu0 %v9600_v63  ;;  %v11098_v2 = vor.u32 %v11097_v24, %v13017_v51  ;;  %v9688_v60 = vor.u32 %v10596_v45, %v9685_v32  ;;  %v9573_v21 = vld [vmem:[#allocation22 + $0x118] sm:$0xf0] }
 0x833   : > { %6225 = vmatmul.bf16.vlgmr.msra.gmra.mxu3 %v13093_v47  ;;  %v13100_v50 = vsel %vm3923_vm13, %v5753_v34, %v5754_v31  ;;  %v9592_v56 = vor.u32 %v10572_v53, %v9589_v27  ;;  %6261 = vmatpush.bf16.msrb.mxu1 %v9700_v18  ;;  %v9584_v6 = vor.u32 %v10570_v12, %v9581_v61  ;;  %v5654_v35 = vrot.slane %v13050_v54, 6  ;;  %v10550_v63 = vld [vmem:[#allocation22 + $0x84] sm:$0xf]  ;;  %v9501_v58 = vld [vmem:[#allocation22 + $0x88] sm:$0xf0] }
 0x834   : > { %v13105_v40 = vsel %vm3923_vm13, %v5747_v59, %v5748_v39  ;;  %6244 = vmatmul.bf16.vlgmr.msrb.gmra.mxu0 %v13100_v50  ;;  %v5648_v59 = vrot.slane %v5646_v13, 6  ;;  %6298 = vmatpush.bf16.msrb.mxu3 %v9520_v62  ;;  %v9512_v17 = vor.u32 %v10552_v26, %v9509_v5  ;;  %v5763_v28 = vrot.slane %v5613_v52, 3  ;;  %v10534_v53 = vld [vmem:[#allocation22 + $0x4] sm:$0xf]  ;;  %v9437_v27 = vld [vmem:[#allocation22 + $0x8] sm:$0xf0] }
 0x835   : > { %6206 = vmatmul.bf16.vlgmr.msra.gmra.mxu2 %v13105_v40  ;;  %v5761_v51 = vrot.slane %v5609_v57, 3  ;;  %v5653_v3 = vrot.slane %v11098_v2, 6  ;;  %v9680_v19 = vor.u32 %v10594_v30, %v9677_v10  ;;  %v9576_v36 = vor.u32 %v10568_v22, %v9573_v21  ;;  %v10592_v38 = vld [vmem:[#allocation22 + $0x1d4] sm:$0xf]  ;;  %v9669_v18 = vld [vmem:[#allocation22 + $0x1d8] sm:$0xf0] }
 0x836   : > { %6278 = vmatpush.bf16.msrb.mxu2 %v9464_v49  ;;  %6316 = vmatpush.bf16.msra.mxu0 %v9592_v56  ;;  %v5649_v34 = vsel %vm3108_vm10, %v13071_v43, %v5648_v59  ;;  %v9448_v43 = vor.u32 %v10536_v15, %v9445_v44  ;;  %v9504_v52 = vor.u32 %v10550_v63, %v9501_v58  ;;  %v10612_v24 = vld [vmem:[#allocation22 + $0x274] sm:$0xf]  ;;  %v9749_v49 = vld [vmem:[#allocation22 + $0x278] sm:$0xf0]  ;;  %v10590_v62 = vld [vmem:[#allocation22 + $0x1c4] sm:$0xf] }
 0x837   : > { %6262 = vmatpush.bf16.msrb.mxu1 %v9692_v0  ;;  %v5765_v33 = vrot.slane %v5649_v34, 3  ;;  %v13128_v4 = vsel %vm3831_vm15, %v5653_v3, %v5654_v35  ;;  %v13133_v56 = vsel %vm3923_vm13, %v5751_v11, %v5763_v28  ;;  %v9440_v46 = vor.u32 %v10534_v53, %v9437_v27  ;;  %v9661_v20 = vld [vmem:[#allocation22 + $0x1c8] sm:$0xf0]  ;;  %v10610_v12 = vld [vmem:[#allocation22 + $0x264] sm:$0xf] }
 0x838   : > { %6192 = vmatmul.bf16.gmra.mxu1 %v13114_v48  ;;  %6299 = vmatpush.bf16.msrb.mxu3 %v9512_v17  ;;  %v9672_v37 = vor.u32 %v10592_v38, %v9669_v18  ;;  %v5757_v14 = vrot.slane %v13128_v4, 3  ;;  %v9568_v13 = vor.u32 %v10566_v9, %v9565_v55  ;;  %v9752_v32 = vor.u32 %v10612_v24, %v9749_v49  ;;  %v9741_v23 = vld [vmem:[#allocation22 + $0x268] sm:$0xf0]  ;;  %v10588_v5 = vld [vmem:[#allocation22 + $0x1b4] sm:$0xf] }
 0x839   : > { %v13139_v45 = vsel %vm3923_vm13, %v5754_v31, %v5765_v33  ;;  %v13145_v11 = vsel %vm3923_vm13, %v5748_v39, %v5761_v51  ;;  %v5756_v31 = vrot.slane %v5653_v3, 3  ;;  %v9664_v61 = vor.u32 %v10590_v62, %v9661_v20  ;;  %v9653_v29 = vld [vmem:[#allocation22 + $0x1b8] sm:$0xf0]  ;;  %v10608_v39 = vld [vmem:[#allocation22 + $0x254] sm:$0xf] }
 0x83a   : > { %6279 = vmatpush.bf16.msrb.mxu2 %v9456_v1  ;;  %6317 = vmatpush.bf16.msra.mxu0 %v9584_v6  ;;  %v9744_v57 = vor.u32 %v10610_v12, %v9741_v23  ;;  %v9733_v59 = vld [vmem:[#allocation22 + $0x258] sm:$0xf0]  ;;  %v9656_v0 = vor.u32 %v10588_v5, %v9653_v29  ;;  %v10586_v2 = vld [vmem:[#allocation22 + $0x1a4] sm:$0xf]  ;;  %v9645_v1 = vld [vmem:[#allocation22 + $0x1a8] sm:$0xf0] }
 0x83b   : > { %6331 = vmatpush.bf16.msra.mxu1 %v9688_v60  ;;  %v5758_v26 = vsel %vm3923_vm13, %v5756_v31, %v5757_v14  ;;  %v9736_v60 = vor.u32 %v10608_v39, %v9733_v59  ;;  %v5656_v15 = vrot.slane %v13109_v25, 6  ;;  %v10606_v34 = vld [vmem:[#allocation22 + $0x244] sm:$0xf]  ;;  %v9725_v6 = vld [vmem:[#allocation22 + $0x248] sm:$0xf0]  ;;  %v9648_v17 = vor.u32 %v10586_v2, %v9645_v1 }
 0x83c   : > { %6300 = vmatpush.bf16.msrb.mxu3 %v9504_v52  ;;  %v10584_v44 = vld [vmem:[#allocation22 + $0x194] sm:$0xf]  ;;  %v9637_v30 = vld [vmem:[#allocation22 + $0x198] sm:$0xf0]  ;;  %v9728_v10 = vor.u32 %v10606_v34, %v9725_v6  ;;  %v10582_v25 = vld [vmem:[#allocation22 + $0x184] sm:$0xf] }
 0x83d   : > { %v5657_v22 = vsel %vm3831_vm15, %v5654_v35, %v5656_v15  ;;  %v10604_v21 = vld [vmem:[#allocation22 + $0x234] sm:$0xf]  ;;  %v9717_v28 = vld [vmem:[#allocation22 + $0x238] sm:$0xf0]  ;;  %v9640_v51 = vor.u32 %v10584_v44, %v9637_v30  ;;  %v9629_v58 = vld [vmem:[#allocation22 + $0x188] sm:$0xf0] }
 0x83e   : > { %6280 = vmatpush.bf16.msrb.mxu2 %v9448_v43  ;;  %6318 = vmatpush.bf16.msra.mxu0 %v9576_v36  ;;  %v5767_v63 = vrot.slane %v5657_v22, 3  ;;  %v9720_v33 = vor.u32 %v10604_v21, %v9717_v28  ;;  %v10602_v3 = vld [vmem:[#allocation22 + $0x224] sm:$0xf]  ;;  %v9709_v43 = vld [vmem:[#allocation22 + $0x228] sm:$0xf0]  ;;  %v9632_v54 = vor.u32 %v10582_v25, %v9629_v58 }
 0x83f   : > { %6332 = vmatpush.bf16.msra.mxu1 %v9680_v19  ;;  %v9712_v19 = vor.u32 %v10602_v3, %v9709_v43  ;;  %v10600_v53 = vld [vmem:[#allocation22 + $0x214] sm:$0xf]  ;;  %v10598_v36 = vld [vmem:[#allocation22 + $0x204] sm:$0xf]  ;;  %v9693_v38 = vld [vmem:[#allocation22 + $0x208] sm:$0xf0] }
 0x840   : > { %v5768_v35 = vsel %vm3923_vm13, %v5757_v14, %v5767_v63  ;;  %v5738_v9 = vld [vmem:[%s13631_s14] sm:$0x3]  ;;  %s7581_s14 = sshll.u32 %s7578_s7, 4  ;;  %s7582_s14 = int_to_ptr.hbm [resolvable:$true] %s7581_s14 }
 0x841   : > { %v5740_v4 = vperm.slane %v5738_v9, 0  ;;  %v5741_v6 = vperm.slane %v5738_v9, 1  ;;  %s11536_s11 = sshra.s32 %s7582_s14, 4  ;;  %s11537_s11 = int_to_ptr.hbm [resolvable:$true] %s11536_s11 }
 0x842   : > { %6281 = vmatpush.bf16.msrb.mxu2 %v9440_v46  ;;  %6319 = vmatpush.bf16.msra.mxu0 %v9568_v13  ;;  %p11543_p12 = scmp.lt.s32.totalorder %s11537_s11, %s13640_s0 }
 0x843   : > { %6230 = vmatmul.bf16.gmra.mxu3 %v13133_v56  ;;  %6333 = vmatpush.bf16.msra.mxu1 %v9672_v37 }
 0x844   : > { %6249 = vmatmul.bf16.gmra.mxu0 %v13139_v45 }
 0x845   : > { %6211 = vmatmul.bf16.gmra.mxu2 %v13145_v11 }
 0x846   : > { %6350 = vmatpush.bf16.msra.mxu2 %v9752_v32 }
 0x847   : > { %6334 = vmatpush.bf16.msra.mxu1 %v9664_v61 }
 0x848   : > { %6263 = vmatmul.bf16.vlgmr.msrb.gmra.mxu1 %v5758_v26 }
 0x84a   : > { %6351 = vmatpush.bf16.msra.mxu2 %v9744_v57 }
 0x84b   : > { %6335 = vmatpush.bf16.msra.mxu1 %v9656_v0 }
 0x84e   : > { %6352 = vmatpush.bf16.msra.mxu2 %v9736_v60 }
 0x84f   : > { %6336 = vmatpush.bf16.msra.mxu1 %v9648_v17 }
 0x852   : > { %6353 = vmatpush.bf16.msra.mxu2 %v9728_v10 }
 0x853   : > { %6301 = vmatmul.bf16.vlgmr.msrb.gmra.mxu3 %v13105_v40  ;;  %6337 = vmatpush.bf16.msra.mxu1 %v9640_v51  ;;  %v9701_v40 = vld [vmem:[#allocation22 + $0x218] sm:$0xf0] }
 0x854   : > { %6320 = vmatmul.bf16.vlgmr.msra.gmra.mxu0 %v13093_v47  ;;  %v9704_v27 = vor.u32 %v10600_v53, %v9701_v40  ;;  %v9696_v47 = vor.u32 %v10598_v36, %v9693_v38 }
 0x855   : > { %6282 = vmatmul.bf16.vlgmr.msrb.gmra.mxu2 %v13043_v42 }
 0x856   : > { %6354 = vmatpush.bf16.msra.mxu2 %v9720_v33 }
 0x857   : > { %6338 = vmatpush.bf16.msra.mxu1 %v9632_v54 }
 0x858   : > { %6268 = vmatmul.bf16.gmra.mxu1 %v5768_v35 }
 0x85a   : > { %6355 = vmatpush.bf16.msra.mxu2 %v9712_v19 }
 0x85e   : > { %6356 = vmatpush.bf16.msra.mxu2 %v9704_v27 }
 0x862   : > { %6357 = vmatpush.bf16.msra.mxu2 %v9696_v47 }
 0x863   : > { %6306 = vmatmul.bf16.gmra.mxu3 %v13145_v11 }
 0x864   : > { %6325 = vmatmul.bf16.gmra.mxu0 %v13133_v56 }
 0x865   : > { %6287 = vmatmul.bf16.gmra.mxu2 %v13114_v48 }
 0x868   : > { %6339 = vmatmul.bf16.vlgmr.msra.gmra.mxu1 %v13100_v50 }
 0x875   : > { %6358 = vmatmul.bf16.vlgmr.msra.gmra.mxu2 %v5758_v26 }
 0x878   : > { %6344 = vmatmul.bf16.gmra.mxu1 %v13139_v45 }
 0x885   : > { %6363 = vmatmul.bf16.gmra.mxu2 %v5768_v35 }
 0x8a5   : > { %v6188_v42 = vpop.f32.mrf.mxu1 }
 0x8a6   : > { %v6189_v55 = vadd.f32 %v6188_v42, %v5740_v4 }
 0x8ad   : > { %v6190_v18 = vpop.f32.mrf.mxu1 }
 0x8ae   : > { %v6191_v46 = vadd.f32 %v6190_v18, %v5740_v4 }
 0x8b1   : > { %v13170_v48 = vpop.f32.mrf.mxu0 }
 0x8b5   : > { %v6193_v52 = vpop.f32.mrf.mxu1 }
 0x8b6   : > { %v13166_v24 = vpop.f32.mrf.mxu3  ;;  %v6194_v11 = vadd.f32 %v6193_v52, %v5740_v4 }
 0x8b8   : > { %v6207_v49 = vpop.f32.mrf.mxu2 }
 0x8b9   : > { %v13168_v56 = vadd.f32 %v6207_v49, %v6189_v55  ;;  %v6247_v62 = vpop.f32.mrf.mxu0 }
 0x8bd   : > { %v6195_v50 = vpop.f32.mrf.mxu1 }
 0x8be   : > { %v6228_v14 = vpop.f32.mrf.mxu3  ;;  %v6196_v26 = vadd.f32 %v6195_v50, %v5740_v4 }
 0x8c0   : > { %v6209_v37 = vpop.f32.mrf.mxu2 }
 0x8c1   : > { %v6210_v45 = vadd.f32 %v6209_v37, %v6191_v46  ;;  %v13182_v59 = vpop.f32.mrf.mxu0 }
 0x8c3   : > { %v6229_v13 = vadd.f32 %v6228_v14, %v6210_v45 }
 0x8c5   : > { %v13172_v20 = vpop.f32.mrf.mxu1  ;;  %v6248_v32 = vadd.f32 %v6247_v62, %v6229_v13 }
 0x8c6   : > { %v13180_v57 = vpop.f32.mrf.mxu3 }
 0x8c8   : > { %v6212_v12 = vpop.f32.mrf.mxu2 }
 0x8c9   : > { %v13174_v23 = vadd.f32 %v6212_v12, %v6194_v11  ;;  %v13188_v60 = vpop.f32.mrf.mxu0 }
 0x8cd   : > { %v6266_v31 = vpop.f32.mrf.mxu1 }
 0x8ce   : > { %v13176_v61 = vadd.f32 %v6266_v31, %v6248_v32  ;;  %v13186_v2 = vpop.f32.mrf.mxu3 }
 0x8d0   : > { %v6214_v5 = vpop.f32.mrf.mxu2 }
 0x8d1   : > { %v13178_v29 = vadd.f32 %v6214_v5, %v6196_v26  ;;  %v6321_v44 = vpop.f32.mrf.mxu0  ;;  %v6227_v26 = vadd.f32 %v13166_v24, %v13168_v56 }
 0x8d5   : > { %v13184_v0 = vpop.f32.mrf.mxu1 }
 0x8d6   : > { %v6302_v17 = vpop.f32.mrf.mxu3 }
 0x8d8   : > { %v6283_v39 = vpop.f32.mrf.mxu2 }
 0x8d9   : > { %v6284_v30 = vadd.f32 %v6283_v39, %v5741_v6  ;;  %v6323_v25 = vpop.f32.mrf.mxu0 }
 0x8db   : > { %v6303_v21 = vadd.f32 %v6302_v17, %v6284_v30  ;;  %v6246_v30 = vadd.f32 %v13170_v48, %v6227_v26 }
 0x8dd   : > { %v13190_v15 = vpop.f32.mrf.mxu1  ;;  %v6322_v63 = vadd.f32 %v6321_v44, %v6303_v21 }
 0x8de   : > { %v6304_v28 = vpop.f32.mrf.mxu3 }
 0x8e0   : > { %v6285_v1 = vpop.f32.mrf.mxu2 }
 0x8e1   : > { %v6286_v51 = vadd.f32 %v6285_v1, %v5741_v6  ;;  %v6326_v42 = vpop.f32.mrf.mxu0 }
 0x8e3   : > { %v6305_v43 = vadd.f32 %v6304_v28, %v6286_v51  ;;  %v6265_v28 = vadd.f32 %v13172_v20, %v6246_v30  ;;  %v10660_v30 = vld [vmem:[#allocation24 + $0x164] sm:$0xf0] }
 0x8e5   : > { %v6340_v10 = vpop.f32.mrf.mxu1  ;;  %v6324_v53 = vadd.f32 %v6323_v25, %v6305_v43 }
 0x8e6   : > { %v6341_v58 = vadd.f32 %v6340_v10, %v6322_v63  ;;  %v6307_v40 = vpop.f32.mrf.mxu3 }
 0x8e8   : > { %v6288_v34 = vpop.f32.mrf.mxu2 }
 0x8e9   : > { %v6289_v19 = vadd.f32 %v6288_v34, %v5741_v6  ;;  %v6328_v11 = vpop.f32.mrf.mxu0 }
 0x8eb   : > { %v6308_v38 = vadd.f32 %v6307_v40, %v6289_v19  ;;  %v9819_v19 = vld [vmem:[#allocation24 + $0x70] sm:$0xf] }
 0x8ed   : > { %v6342_v33 = vpop.f32.mrf.mxu1  ;;  %v6327_v49 = vadd.f32 %v6326_v42, %v6308_v38  ;;  %v10628_v38 = vld [vmem:[#allocation24 + $0x64] sm:$0xf0] }
 0x8ee   : > { %v6343_v27 = vadd.f32 %v6342_v33, %v6324_v53  ;;  %v6309_v46 = vpop.f32.mrf.mxu3  ;;  %v10630_v53 = vld [vmem:[#allocation24 + $0x74] sm:$0xf0] }
 0x8f0   : > { %v6290_v22 = vpop.f32.mrf.mxu2 }
 0x8f1   : > { %v6291_v55 = vadd.f32 %v6290_v22, %v5741_v6 }
 0x8f3   : > { %v6310_v45 = vadd.f32 %v6309_v46, %v6291_v55  ;;  %v10626_v46 = vld [vmem:[#allocation24 + $0x54] sm:$0xf0] }
 0x8f5   : > { %v6345_v18 = vpop.f32.mrf.mxu1  ;;  %v6329_v39 = vadd.f32 %v6328_v11, %v6310_v45  ;;  %v10646_v11 = vld [vmem:[#allocation24 + $0xf4] sm:$0xf0] }
 0x8f6   : > { %v6346_v50 = vadd.f32 %v6345_v18, %v6327_v49 }
 0x8f8   : > { %v6359_v3 = vpop.f32.mrf.mxu2 }
 0x8f9   : > { %v6360_v54 = vadd.f32 %v6359_v3, %v6341_v58 }
 0x8fb   : > { %v9753_v35 = vmul.f32 -1.442695, %v6360_v54  ;;  %v6369_v54 = vunpack.c.l.bf16 %v12992_v41  ;;  %v9803_v41 = vld [vmem:[#allocation24 + $0x50] sm:$0xf] }
 0x8fd   : > { %11042 = vpow2.f32 %v9753_v35  ;;  %v6347_v12 = vpop.f32.mrf.mxu1 }
 0x8fe   : > { %v6348_v34 = vadd.f32 %v6347_v12, %v6329_v39  ;;  %v9795_v39 = vld [vmem:[#allocation24 + $0x40] sm:$0xf] }
 0x900   : > { %v6361_v36 = vpop.f32.mrf.mxu2 }
 0x901   : > { %v6362_v47 = vadd.f32 %v6361_v36, %v6343_v27  ;;  %v9820_v27 = vor.u32 %v10630_v53, %v9819_v19  ;;  %v9811_v36 = vld [vmem:[#allocation24 + $0x60] sm:$0xf]  ;;  %v10658_v19 = vld [vmem:[#allocation24 + $0x154] sm:$0xf0] }
 0x903   : > { %v11043_v9 = vpop.eup %11042  ;;  %v9754_v4 = vmul.f32 -1.442695, %v6362_v47  ;;  %7089 = vmatpush.bf16.msra.mxu3 %v9820_v27  ;;  %v10622_v27 = vld [vmem:[#allocation24 + $0x34] sm:$0xf0] }
 0x904   : > { %v6385_v52 = vadd.f32 1.0, %v11043_v9 }
 0x905   : > { %11044 = vpow2.f32 %v9754_v4  ;;  %v9812_v4 = vor.u32 %v10628_v38, %v9811_v36  ;;  %v9867_v38 = vld [vmem:[#allocation24 + $0xd0] sm:$0xf] }
 0x906   : > { %11046 = vrcp.f32 %v6385_v52  ;;  %v6398_v6 = vand.u32 2147483647, %v6385_v52  ;;  %v6400_v17 = vand.u32 2147483648, %v6385_v52  ;;  %vm6394_vm3 = vweird.f32 %v6385_v52 }
 0x907   : > { %7090 = vmatpush.bf16.msra.mxu3 %v9812_v4  ;;  %v10674_v4 = vld [vmem:[#allocation24 + $0x1d4] sm:$0xf0] }
 0x908   : > { %v6364_v37 = vpop.f32.mrf.mxu2  ;;  %vm6399_vm5 = vcmp.eq.f32.partialorder %v6398_v6, 8.507059e+37  ;;  %v6401_v63 = vor.u32 1.1754944e-38, %v6400_v17  ;;  %v9804_v6 = vor.u32 %v10626_v46, %v9803_v41  ;;  %v10624_v17 = vld [vmem:[#allocation24 + $0x44] sm:$0xf0] }
 0x909   : > { %v6365_v14 = vadd.f32 %v6364_v37, %v6346_v50  ;;  %v10662_v37 = vld [vmem:[#allocation24 + $0x174] sm:$0xf0] }
 0x90b   : > { %v11045_v13 = vpop.eup %11044  ;;  %v9755_v62 = vmul.f32 -1.442695, %v6365_v14  ;;  %7091 = vmatpush.bf16.msra.mxu3 %v9804_v6 }
 0x90c   : > { %v11047_v32 = vpop.eup %11046  ;;  %v6386_v31 = vadd.f32 1.0, %v11045_v13 }
 0x90d   : > { %v6390_v5 = vmul.f32 %v11047_v32, %v6385_v52  ;;  %11048 = vpow2.f32 %v9755_v62  ;;  %vm6395_vm12 = vweird.f32 %v11047_v32  ;;  %v9947_v52 = vld [vmem:[#allocation24 + $0x170] sm:$0xf] }
 0x90e   : > { %11050 = vrcp.f32 %v6386_v31  ;;  %vm6396_vm4 = vmor %vm6394_vm3, %vm6395_vm12  ;;  %v6413_v25 = vand.u32 2147483647, %v6386_v31  ;;  %v6415_v43 = vand.u32 2147483648, %v6386_v31  ;;  %vm6409_vm0 = vweird.f32 %v6386_v31 }
 0x90f   : > { %v6391_v1 = vsub.f32 1.0, %v6390_v5  ;;  %v9948_v62 = vor.u32 %v10662_v37, %v9947_v52 }
 0x910   : > { %v6366_v44 = vpop.f32.mrf.mxu2  ;;  %vm13200_vm6 = vcmp.eq.f32.partialorder %v6413_v25, 8.507059e+37  ;;  %v6416_v18 = vor.u32 1.1754944e-38, %v6415_v43  ;;  %v10644_v25 = vld [vmem:[#allocation24 + $0xe4] sm:$0xf0] }
 0x911   : > { %v6392_v10 = vmul.f32 %v11047_v32, %v6391_v1  ;;  %v6367_v22 = vadd.f32 %v6366_v44, %v6348_v34  ;;  %v10011_v1 = vld [vmem:[#allocation24 + $0x1f0] sm:$0xf]  ;;  %7127 = vmatpush.bf16.msrb.mxu1 %v9948_v62  ;;  %v9939_v44 = vld [vmem:[#allocation24 + $0x160] sm:$0xf]  ;;  %v10640_v62 = vld [vmem:[#allocation24 + $0xc4] sm:$0xf0] }
 0x913   : > { %v11049_v21 = vpop.eup %11048  ;;  %v6393_v51 = vadd.f32 %v11047_v32, %v6392_v10  ;;  %v9756_v24 = vmul.f32 -1.442695, %v6367_v22  ;;  %v6232_v10 = vadd.f32 %v13180_v57, %v13174_v23  ;;  %v10676_v57 = vld [vmem:[#allocation24 + $0x1e4] sm:$0xf0] }
 0x914   : > { %v11051_v56 = vpop.eup %11050  ;;  %v13196_v58 = vadd.f32 1.0, %v11049_v21 }
 0x915   : > { %v6397_v33 = vsel %vm6396_vm4, %v11047_v32, %v6393_v51  ;;  %v6405_v3 = vmul.f32 %v11051_v56, %v6386_v31  ;;  %11052 = vpow2.f32 %v9756_v24  ;;  %vm6410_vm7 = vweird.f32 %v11051_v56  ;;  %v9883_v32 = vld [vmem:[#allocation24 + $0xf0] sm:$0xf]  ;;  %v10678_v31 = vld [vmem:[#allocation24 + $0x1f4] sm:$0xf0] }
 0x916   : > { %v6402_v48 = vsel %vm6399_vm5, %v6401_v63, %v6397_v33  ;;  %11054 = vrcp.f32 %v13196_v58  ;;  %v6428_v9 = vand.u32 2147483647, %v13196_v58  ;;  %vm6411_vm2 = vmor %vm6409_vm0, %vm6410_vm7  ;;  %v6430_v14 = vand.u32 2147483648, %v13196_v58  ;;  %v10003_v33 = vld [vmem:[#allocation24 + $0x1e0] sm:$0xf] }
 0x917   : > { %v6449_v20 = vmul.f32 %v6402_v48, %v6265_v28  ;;  %v6406_v35 = vsub.f32 1.0, %v6405_v3  ;;  %v9884_v21 = vor.u32 %v10646_v11, %v9883_v32  ;;  %v9875_v28 = vld [vmem:[#allocation24 + $0xe0] sm:$0xf]  ;;  %v9940_v63 = vor.u32 %v10660_v30, %v9939_v44  ;;  %v10654_v30 = vld [vmem:[#allocation24 + $0x134] sm:$0xf0] }
 0x918   : > { %vm13218_vm8 = vcmp.eq.f32.partialorder %v6428_v9, 8.507059e+37  ;;  %v6431_v43 = vor.u32 1.1754944e-38, %v6430_v14  ;;  %v9876_v23 = vor.u32 %v10644_v25, %v9875_v28  ;;  %v6370_v48 = vunpack.c.l.bf16 %v13012_v8  ;;  %v9995_v9 = vld [vmem:[#allocation24 + $0x1d0] sm:$0xf] }
 0x919   : > { %v6453_v47 = vadd.f32 %v6449_v20, %v6369_v54  ;;  %v6407_v42 = vmul.f32 %v11051_v56, %v6406_v35  ;;  %7108 = vmatpush.bf16.msrb.mxu0 %v9884_v21  ;;  %v9787_v54 = vld [vmem:[#allocation24 + $0x30] sm:$0xf]  ;;  %v10004_v20 = vor.u32 %v10676_v57, %v10003_v33  ;;  %v6251_v53 = vadd.f32 %v13182_v59, %v6232_v10 }
 0x91a   : > { %v9931_v35 = vld [vmem:[#allocation24 + $0x150] sm:$0xf]  ;;  %vm6424_vm11 = vweird.f32 %v13196_v58  ;;  %7128 = vmatpush.bf16.msrb.mxu1 %v9940_v63  ;;  %v6234_v8 = vadd.f32 %v13186_v2, %v13178_v29  ;;  %v9923_v29 = vld [vmem:[#allocation24 + $0x140] sm:$0xf]  ;;  %v10656_v2 = vld [vmem:[#allocation24 + $0x144] sm:$0xf0]  ;;  %v9788_v37 = vor.u32 %v10622_v27, %v9787_v54  ;;  %v9996_v14 = vor.u32 %v10674_v4, %v9995_v9 }
 0x91b   : > { %v11053_v55 = vpop.eup %11052  ;;  %v6457_v49 = vmul.f32 0.70710677, %v6453_v47  ;;  %v6408_v50 = vadd.f32 %v11051_v56, %v6407_v42  ;;  %v9932_v36 = vor.u32 %v10658_v19, %v9931_v35  ;;  %v10642_v47 = vld [vmem:[#allocation24 + $0xd4] sm:$0xf0]  ;;  %v9851_v10 = vld [vmem:[#allocation24 + $0xb0] sm:$0xf] }
 0x91c   : > { %v13205_v45 = vpop.eup %11054  ;;  %v13208_v13 = vadd.f32 1.0, %v11053_v55  ;;  %v13239_v55 = vld [vmem:[#allocation24 + $0x20] sm:$0xf]  ;;  %v9979_v24 = vld [vmem:[#allocation24 + $0x1b0] sm:$0xf] }
 0x91d   : > { %v6461_v12 = vpack.c.bf16 %v6457_v49, %v6457_v49  ;;  %v6412_v26 = vsel %vm6411_vm2, %v11051_v56, %v6408_v50  ;;  %v6420_v5 = vmul.f32 %v13205_v45, %v13196_v58  ;;  %v10012_v56 = vor.u32 %v10678_v31, %v10011_v1  ;;  %7109 = vmatpush.bf16.msrb.mxu0 %v9876_v23  ;;  %v9915_v31 = vld [vmem:[#allocation24 + $0x130] sm:$0xf]  ;;  %v10652_v54 = vld [vmem:[#allocation24 + $0x124] sm:$0xf0]  ;;  %v9971_v9 = vld [vmem:[#allocation24 + $0x1a0] sm:$0xf] }
 0x91e   : > { %v6417_v34 = vsel %vm13200_vm6, %v6416_v18, %v6412_v26  ;;  %11056 = vrcp.f32 %v13208_v13  ;;  %vm6425_vm9 = vweird.f32 %v13205_v45  ;;  %v6443_v59 = vand.u32 2147483647, %v13208_v13  ;;  %7129 = vmatpush.bf16.msrb.mxu1 %v9932_v36  ;;  %v10668_v4 = vld [vmem:[#allocation24 + $0x1a4] sm:$0xf0] }
 0x91f   : > { %6465 = vst [vmem:[#allocation3 + $0x4] sm:$0xf] %v6461_v12  ;;  %v6421_v22 = vsub.f32 1.0, %v6420_v5  ;;  %v6450_v51 = vmul.f32 %v6417_v34, %v13176_v61  ;;  %v9796_v61 = vor.u32 %v10624_v17, %v9795_v39  ;;  %7146 = vmatpush.bf16.msrb.mxu2 %v10012_v56  ;;  %vm6426_vm12 = vmor %vm6424_vm11, %vm6425_vm9  ;;  %v6270_v58 = vadd.f32 %v13184_v0, %v6251_v53  ;;  %v10620_v0 = vld [vmem:[#allocation24 + $0x24] sm:$0xf0] }
 0x920   : > { %v9868_v49 = vor.u32 %v10642_v47, %v9867_v38  ;;  %v6371_v50 = vunpack.c.l.bf16 %v13014_v7  ;;  %v6445_v12 = vand.u32 2147483648, %v13208_v13  ;;  %v9924_v26 = vor.u32 %v10656_v2, %v9923_v29  ;;  %v9987_v5 = vld [vmem:[#allocation24 + $0x1c0] sm:$0xf]  ;;  %v10672_v39 = vld [vmem:[#allocation24 + $0x1c4] sm:$0xf0] }
 0x921   : > { %v6422_v3 = vmul.f32 %v13205_v45, %v6421_v22  ;;  %v6454_v18 = vadd.f32 %v6450_v51, %v6370_v48  ;;  %7092 = vmatpush.bf16.msra.mxu3 %v9796_v61  ;;  %v9771_v7 = vld [vmem:[#allocation24 + $0x10] sm:$0xf]  ;;  %v10618_v17 = vld [vmem:[#allocation24 + $0x14] sm:$0xf0]  ;;  %v6253_v22 = vadd.f32 %v13188_v60, %v6234_v8  ;;  %vm6439_vm4 = vweird.f32 %v13208_v13  ;;  %v6469_v56 = vld [vmem:[#allocation3] sm:$0x8] }
 0x922   : > { %7110 = vmatpush.bf16.msrb.mxu0 %v9868_v49  ;;  %v9780_v21 = vor.u32 %v10620_v0, %v13239_v55  ;;  %v9988_v28 = vor.u32 %v10672_v39, %v9987_v5  ;;  %v10638_v51 = vld [vmem:[#allocation24 + $0xb4] sm:$0xf0]  ;;  %7130 = vmatpush.bf16.msrb.mxu1 %v9924_v26  ;;  %v9916_v33 = vor.u32 %v10654_v30, %v9915_v31  ;;  %v6486_v23 = vunpack.c.l.b16 %v6469_v56  ;;  %v9907_v61 = vld [vmem:[#allocation24 + $0x120] sm:$0xf]  ;;  %v10075_v38 = vld [vmem:[#allocation24 + $0x270] sm:$0xf] }
 0x923   : > { %v6423_v40 = vadd.f32 %v13205_v45, %v6422_v3  ;;  %7147 = vmatpush.bf16.msrb.mxu2 %v10004_v20  ;;  %v6458_v1 = vmul.f32 0.70710677, %v6454_v18  ;;  %v10670_v3 = vld [vmem:[#allocation24 + $0x1b4] sm:$0xf0]  ;;  %v6272_v60 = vadd.f32 %v13190_v15, %v6253_v22  ;;  %vm6444_vm6 = vcmp.eq.f32.partialorder %v6443_v59, 8.507059e+37 }
 0x924   : > { %v13228_v42 = vpop.eup %11056  ;;  %v6446_v57 = vor.u32 1.1754944e-38, %v6445_v12  ;;  %v9772_v19 = vor.u32 %v10618_v17, %v9771_v7  ;;  %v9763_v53 = vld [vmem:[#allocation24] sm:$0xf]  ;;  %v9852_v27 = vor.u32 %v10638_v51, %v9851_v10  ;;  %v9980_v36 = vor.u32 %v10670_v3, %v9979_v24  ;;  %v10636_v8 = vld [vmem:[#allocation24 + $0xa4] sm:$0xf0] }
 0x925   : > { %v6427_v41 = vsel %vm6426_vm12, %v13205_v45, %v6423_v40  ;;  %v6435_v52 = vmul.f32 %v13228_v42, %v13208_v13  ;;  %v9859_v45 = vld [vmem:[#allocation24 + $0xc0] sm:$0xf]  ;;  %vm6440_vm3 = vweird.f32 %v13228_v42  ;;  %7093 = vmatpush.bf16.msra.mxu3 %v9788_v37  ;;  %v10616_v40 = vld [vmem:[#allocation24 + $0x4] sm:$0xf0]  ;;  %v6372_v18 = vunpack.c.l.bf16 %v13046_v16  ;;  %v9835_v37 = vld [vmem:[#allocation24 + $0x90] sm:$0xf] }
 0x926   : > { %v6432_v46 = vsel %vm13218_vm8, %v6431_v43, %v6427_v41  ;;  %v9860_v44 = vor.u32 %v10640_v62, %v9859_v45  ;;  %v13251_v43 = vld [vmem:[#allocation3 + $0x4] sm:$0xf]  ;;  %vm6441_vm5 = vmor %vm6439_vm4, %vm6440_vm3  ;;  %7131 = vmatpush.bf16.msrb.mxu1 %v9916_v33  ;;  %v9908_v59 = vor.u32 %v10652_v54, %v9907_v61  ;;  %v9899_v41 = vld [vmem:[#allocation24 + $0x110] sm:$0xf]  ;;  %v9764_v29 = vor.u32 %v10616_v40, %v9763_v53 }
 0x927   : > { %v6451_v32 = vmul.f32 %v6432_v46, %v6270_v58  ;;  %v6436_v11 = vsub.f32 1.0, %v6435_v52  ;;  %7148 = vmatpush.bf16.msrb.mxu2 %v9996_v14  ;;  %v6487_v48 = vunpack.c.l.b16 %v13251_v43  ;;  %v9843_v47 = vld [vmem:[#allocation24 + $0xa0] sm:$0xf]  ;;  %v10694_v58 = vld [vmem:[#allocation24 + $0x274] sm:$0xf0] }
 0x928   : > { %7111 = vmatpush.bf16.msrb.mxu0 %v9860_v44  ;;  %v10650_v52 = vld [vmem:[#allocation24 + $0x114] sm:$0xf0]  ;;  %v9844_v49 = vor.u32 %v10636_v8, %v9843_v47  ;;  %v10067_v46 = vld [vmem:[#allocation24 + $0x260] sm:$0xf]  ;;  %v10692_v16 = vld [vmem:[#allocation24 + $0x264] sm:$0xf0]  ;;  %v10076_v62 = vor.u32 %v10694_v58, %v10075_v38 }
 0x929   : > { %v6455_v34 = vadd.f32 %v6451_v32, %v6371_v50  ;;  %v6437_v6 = vmul.f32 %v13228_v42, %v6436_v11  ;;  %7094 = vmatpush.bf16.msra.mxu3 %v9780_v21  ;;  %v13262_v13 = vpack.c.b16 %v6487_v48, %v6486_v23  ;;  %v9972_v50 = vor.u32 %v10668_v4, %v9971_v9  ;;  %v10634_v0 = vld [vmem:[#allocation24 + $0x94] sm:$0xf0]  ;;  %v9963_v11 = vld [vmem:[#allocation24 + $0x190] sm:$0xf]  ;;  %v9891_v26 = vld [vmem:[#allocation24 + $0x100] sm:$0xf] }
 0x92a   : > { %7132 = vmatpush.bf16.msrb.mxu1 %v9908_v59  ;;  %v9900_v32 = vor.u32 %v10650_v52, %v9899_v41  ;;  %v10666_v12 = vld [vmem:[#allocation24 + $0x194] sm:$0xf0]  ;;  %v10648_v5 = vld [vmem:[#allocation24 + $0x104] sm:$0xf0]  ;;  %v9827_v39 = vld [vmem:[#allocation24 + $0x80] sm:$0xf]  ;;  %v9836_v7 = vor.u32 %v10634_v0, %v9835_v37 }
 0x92b   : > { %v6459_v63 = vmul.f32 0.70710677, %v6455_v34  ;;  %v6438_v25 = vadd.f32 %v13228_v42, %v6437_v6  ;;  %7149 = vmatpush.bf16.msrb.mxu2 %v9988_v28  ;;  %v6654_v2 = vrot.slane %v13262_v13, 3  ;;  %v6498_v14 = vshrl.u32 %v13262_v13, 16  ;;  %v13267_v31 = vld [vmem:[#allocation24 + $0x250] sm:$0xf] }
 0x92c   : > { %7112 = vmatpush.bf16.msrb.mxu0 %v9852_v27  ;;  %v13269_v34 = vld [vmem:[#allocation24 + $0x254] sm:$0xf0]  ;;  %v10632_v6 = vld [vmem:[#allocation24 + $0x84] sm:$0xf0]  ;;  %v10645_v17 = vld [vmem:[#allocation24 + $0xf4] sm:$0xf]  ;;  %v9964_v22 = vor.u32 %v10666_v12, %v9963_v11 }
 0x92d   : > { %v10734_v20 = vpack.c.bf16 %v6459_v63, %v6458_v1  ;;  %v6442_v35 = vsel %vm6441_vm5, %v13228_v42, %v6438_v25  ;;  %7095 = vmatpush.bf16.msra.mxu3 %v9772_v19  ;;  %v9885_v44 = vld [vmem:[#allocation24 + $0xf8] sm:$0xf0]  ;;  %v6500_v21 = vshll.u32 %v13262_v13, 16  ;;  %v10068_v63 = vor.u32 %v10692_v16, %v10067_v46  ;;  %v9955_v33 = vld [vmem:[#allocation24 + $0x180] sm:$0xf] }
 0x92e   : > { %v6447_v15 = vsel %vm6444_vm6, %v6446_v57, %v6442_v35  ;;  %7133 = vmatpush.bf16.msrb.mxu1 %v9900_v32  ;;  %v9892_v25 = vor.u32 %v10648_v5, %v9891_v26  ;;  %v10664_v3 = vld [vmem:[#allocation24 + $0x184] sm:$0xf0]  ;;  %v13280_v23 = vld [vmem:[#allocation24 + $0x240] sm:$0xf]  ;;  %v10629_v57 = vld [vmem:[#allocation24 + $0x74] sm:$0xf]  ;;  %v10060_v27 = vor.u32 %v13269_v34, %v13267_v31 }
 0x92f   : > { %10756 = vst [vmem:[#allocation3 + $0x8] sm:$0xff] %v10734_v20   ;;  %v6452_v42 = vmul.f32 %v6447_v15, %v6272_v60  ;;  %7150 = vmatpush.bf16.msrb.mxu2 %v9980_v36  ;;  %v9888_v60 = vor.u32 %v10645_v17, %v9885_v44  ;;  %v9821_v61 = vld [vmem:[#allocation24 + $0x78] sm:$0xf0]  ;;  %v9828_v20 = vor.u32 %v10632_v6, %v9827_v39  ;;  %v10661_v19 = vld [vmem:[#allocation24 + $0x174] sm:$0xf]  ;;  %v6502_v38 = vrot.slane %v6500_v21, 1 }
 0x930   : > { %7113 = vmatpush.bf16.msrb.mxu0 %v9844_v49  ;;  %v9949_v53 = vld [vmem:[#allocation24 + $0x178] sm:$0xf0]  ;;  %v10643_v40 = vld [vmem:[#allocation24 + $0xe4] sm:$0xf]  ;;  %v9956_v15 = vor.u32 %v10664_v3, %v9955_v33  ;;  %v10688_v36 = vld [vmem:[#allocation24 + $0x244] sm:$0xf0] }
 0x931   : > { %v6456_v55 = vadd.f32 %v6452_v42, %v6372_v18  ;;  %7096 = vmatpush.bf16.msra.mxu3 %v9764_v29  ;;  %v9877_v47 = vld [vmem:[#allocation24 + $0xe8] sm:$0xf0]  ;;  %v9824_v42 = vor.u32 %v10629_v57, %v9821_v61  ;;  %v13295_v59 = vld [vmem:[#allocation24 + $0x230] sm:$0xf]  ;;  %v13297_v9 = vld [vmem:[#allocation24 + $0x234] sm:$0xf0]  ;;  %v9952_v41 = vor.u32 %v10661_v19, %v9949_v53 }
 0x932   : > { %7134 = vmatpush.bf16.msrb.mxu1 %v9892_v25  ;;  %v9880_v52 = vor.u32 %v10643_v40, %v9877_v47  ;;  %v9813_v49 = vld [vmem:[#allocation24 + $0x68] sm:$0xf0]  ;;  %v10659_v46 = vld [vmem:[#allocation24 + $0x164] sm:$0xf]  ;;  %v10641_v37 = vld [vmem:[#allocation24 + $0xd4] sm:$0xf]  ;;  %v10044_v31 = vor.u32 %v13297_v9, %v13295_v59 }
 0x933   : > { %v6460_v45 = vmul.f32 0.70710677, %v6456_v55  ;;  %7151 = vmatpush.bf16.msrb.mxu2 %v9972_v50  ;;  %v10627_v55 = vld [vmem:[#allocation24 + $0x64] sm:$0xf]  ;;  %v10052_v50 = vor.u32 %v10688_v36, %v13280_v23  ;;  %v9941_v16 = vld [vmem:[#allocation24 + $0x168] sm:$0xf0] }
 0x934   : > { %7114 = vmatpush.bf16.msrb.mxu0 %v9836_v7  ;;  %v9869_v7 = vld [vmem:[#allocation24 + $0xd8] sm:$0xf0]  ;;  %v9944_v34 = vor.u32 %v10659_v46, %v9941_v16  ;;  %v10625_v6 = vld [vmem:[#allocation24 + $0x54] sm:$0xf]  ;;  %v10639_v19 = vld [vmem:[#allocation24 + $0xc4] sm:$0xf] }
 0x935   : > { %v6464_v1 = vpack.c.bf16 %v6460_v45, %v6460_v45  ;;  %7165 = vmatpush.bf16.msrb.mxu3 %v10076_v62  ;;  %v6503_v45 = vor.u32 %v6502_v38, %v6498_v14  ;;  %v9805_v17 = vld [vmem:[#allocation24 + $0x58] sm:$0xf0]  ;;  %v9861_v53 = vld [vmem:[#allocation24 + $0xc8] sm:$0xf0]  ;;  %v10623_v38 = vld [vmem:[#allocation24 + $0x44] sm:$0xf] }
 0x936   : > { %v13271_v30 = vld [vmem:[#allocation3 + $0x8] sm:$0xf]  ;;  %v13273_v10 = vld [vmem:[#allocation3 + $0xc] sm:$0xf]  ;;  %7203 = vmatpush.bf16.msra.mxu1 %v9888_v60  ;;  %v10035_v60 = vld [vmem:[#allocation24 + $0x220] sm:$0xf]  ;;  %v9864_v36 = vor.u32 %v10639_v19, %v9861_v53 }
 0x937   : > { %v6475_v28 = vld [vmem:[#allocation3 + $0x4] sm:$0xff]   ;;  %6468 = vst [vmem:[#allocation3 + $0x10] sm:$0xf] %v6464_v1  ;;  %v6488_v24 = vunpack.c.l.b16 %v13271_v30  ;;  %v6489_v56 = vunpack.c.l.b16 %v13273_v10  ;;  %7152 = vmatpush.bf16.msrb.mxu2 %v9964_v22  ;;  %v9816_v1 = vor.u32 %v10627_v55, %v9813_v49  ;;  %v9797_v47 = vld [vmem:[#allocation24 + $0x48] sm:$0xf0] }
 0x938   : > { %v13276_v51 = vld [vmem:[#allocation3 + $0x4] sm:$0xf0]  ;;  %v6539_v4 = vshrl.u32 %v6475_v28, 16  ;;  %v6542_v58 = vshll.u32 %v6475_v28, 16  ;;  %7115 = vmatpush.bf16.msrb.mxu0 %v9828_v20  ;;  %v9872_v28 = vor.u32 %v10641_v37, %v9869_v7  ;;  %v10027_v49 = vld [vmem:[#allocation24 + $0x210] sm:$0xf] }
 0x939   : > { %v13284_v54 = vpack.c.b16 %v6489_v56, %v6488_v24  ;;  %v13288_v35 = vpack.c.b16 %v6488_v24, %v6487_v48  ;;  %7166 = vmatpush.bf16.msrb.mxu3 %v10068_v63  ;;  %v10657_v24 = vld [vmem:[#allocation24 + $0x154] sm:$0xf]  ;;  %v9933_v63 = vld [vmem:[#allocation24 + $0x158] sm:$0xf0] }
 0x93a   : > { %v6541_v11 = vrot.slane %v6539_v4, 5  ;;  %7204 = vmatpush.bf16.msra.mxu1 %v9880_v52  ;;  %v10655_v4 = vld [vmem:[#allocation24 + $0x144] sm:$0xf]  ;;  %v9853_v37 = vld [vmem:[#allocation24 + $0xb8] sm:$0xf0] }
 0x93b   : > { %v6655_v8 = vrot.slane %v13284_v54, 3  ;;  %v6522_v18 = vrot.slane %v13288_v35, 5  ;;  %v6505_v48 = vshll.u32 %v13284_v54, 16  ;;  %7153 = vmatpush.bf16.msrb.mxu2 %v9956_v15  ;;  %v6509_v5 = vshrl.u32 %v13284_v54, 16 }
 0x93c   : > { %7184 = vmatpush.bf16.msra.mxu0 %v9824_v42  ;;  %v9936_v15 = vor.u32 %v10657_v24, %v9933_v63  ;;  %v11100_v63 = vld [vmem:[#allocation3 + $0x4] sm:$0xe] }
 0x93d   : > { %v13304_v29 = vsel %vm3923_vm13, %v6654_v2, %v6655_v8  ;;  %v6507_v62 = vrot.slane %v6505_v48, 1  ;;  %v6544_v2 = vrot.slane %v6542_v58, 6  ;;  %7167 = vmatpush.bf16.msrb.mxu3 %v10060_v27  ;;  %v6660_v26 = vrot.slane %v6522_v18, 3  ;;  %v10684_v27 = vld [vmem:[#allocation24 + $0x224] sm:$0xf0] }
 0x93e   : > { %7097 = vmatmul.bf16.vlgmr.msra.gmra.mxu3 %v13304_v29  ;;  %v13308_v0 = vld [vmem:[#allocation3 + $0x10] sm:$0xf]  ;;  %7205 = vmatpush.bf16.msra.mxu1 %v9872_v28  ;;  %v10036_v16 = vor.u32 %v10684_v27, %v10035_v60  ;;  %v10680_v28 = vld [vmem:[#allocation24 + $0x204] sm:$0xf0]  ;;  %v10013_v60 = vld [vmem:[#allocation24 + $0x1f8] sm:$0xf0] }
 0x93f   : > { %v13312_v32 = vld [vmem:[#allocation3 + $0xc] sm:$0xff]  ;;  %v6495_v12 = vunpack.c.l.b16 %v13308_v0  ;;  %7222 = vmatpush.bf16.msra.mxu2 %v9952_v41  ;;  %v6508_v25 = vsel %vm3764_vm14, %v6503_v45, %v6507_v62  ;;  %v6545_v33 = vor.u32 %v6544_v2, %v6541_v11  ;;  %v6511_v42 = vor.u32 %v6509_v5, %v6507_v62  ;;  %v6479_v45 = vld [vmem:[#allocation3 + $0x14] sm:$0x1]  ;;  %v10682_v2 = vld [vmem:[#allocation24 + $0x214] sm:$0xf0] }
 0x940   : > { %v6473_v39 = vld [vmem:[#allocation3 + $0x10] sm:$0x7]  ;;  %v6547_v13 = vshrl.u32 %v13312_v32, 16  ;;  %v6550_v14 = vshll.u32 %v13312_v32, 16  ;;  %7185 = vmatpush.bf16.msra.mxu0 %v9816_v1  ;;  %v6657_v9 = vrot.slane %v6508_v25, 3 }
 0x941   : > { %v13324_v44 = vpack.c.b16 %v6495_v12, %v6489_v56  ;;  %v13326_v22 = vpack.c.b16 %v6495_v12, %v6495_v12  ;;  %v6490_v21 = vunpack.c.l.b16 %v6473_v39  ;;  %7168 = vmatpush.bf16.msrb.mxu3 %v10052_v50  ;;  %v9808_v56 = vor.u32 %v10625_v6, %v9805_v17  ;;  %v9925_v58 = vld [vmem:[#allocation24 + $0x148] sm:$0xf0]  ;;  %v10637_v50 = vld [vmem:[#allocation24 + $0xb4] sm:$0xf]  ;;  %v10019_v6 = vld [vmem:[#allocation24 + $0x200] sm:$0xf] }
 0x942   : > { %v6549_v3 = vrot.slane %v6547_v13, 5  ;;  %v6552_v23 = vrot.slane %v6550_v14, 6  ;;  %v6663_v55 = vrot.slane %v6545_v33, 3  ;;  %7206 = vmatpush.bf16.msra.mxu1 %v9864_v36  ;;  %v9800_v12 = vor.u32 %v10623_v38, %v9797_v47  ;;  %v10621_v39 = vld [vmem:[#allocation24 + $0x34] sm:$0xf] }
 0x943   : > { %v6523_v57 = vrot.slane %v13324_v44, 5  ;;  %v6513_v61 = vshll.u32 %v13326_v22, 16  ;;  %v13331_v20 = vpack.c.b16 %v6490_v21, %v6490_v21  ;;  %7223 = vmatpush.bf16.msra.mxu2 %v9944_v34  ;;  %v9928_v5 = vor.u32 %v10655_v4, %v9925_v58  ;;  %v9789_v14 = vld [vmem:[#allocation24 + $0x38] sm:$0xf0]  ;;  %v10635_v17 = vld [vmem:[#allocation24 + $0xa4] sm:$0xf] }
 0x944   : > { %v13333_v40 = vor.u32 %v6552_v23, %v6549_v3  ;;  %7186 = vmatpush.bf16.msra.mxu0 %v9808_v56  ;;  %v9856_v7 = vor.u32 %v10637_v50, %v9853_v37  ;;  %v6534_v13 = vunpack.c.l.b16 %v6479_v45  ;;  %v10028_v21 = vor.u32 %v10682_v2, %v10027_v49  ;;  %v9845_v25 = vld [vmem:[#allocation24 + $0xa8] sm:$0xf0]  ;;  %v10677_v23 = vld [vmem:[#allocation24 + $0x1f4] sm:$0xf]  ;;  %v9837_v47 = vld [vmem:[#allocation24 + $0x98] sm:$0xf0] }
 0x945   : > { %v13340_v48 = vsel %vm1260_vm1, %v6522_v18, %v6523_v57  ;;  %v13342_v59 = vrot.slane %v6513_v61, 1  ;;  %v6669_v46 = vrot.slane %v13331_v20, 3  ;;  %7169 = vmatpush.bf16.msrb.mxu3 %v10044_v31  ;;  %v9917_v31 = vld [vmem:[#allocation24 + $0x138] sm:$0xf0]  ;;  %v10619_v61 = vld [vmem:[#allocation24 + $0x24] sm:$0xf]  ;;  %v9848_v53 = vor.u32 %v10635_v17, %v9845_v25 }
 0x946   : > { %v6661_v41 = vrot.slane %v13340_v48, 3  ;;  %v13347_v52 = vsel %vm3108_vm10, %v6545_v33, %v13333_v40  ;;  %v13374_v24 = vpack.c.b16 %v6534_v13, %v6534_v13  ;;  %v9792_v33 = vor.u32 %v10621_v39, %v9789_v14  ;;  %7207 = vmatpush.bf16.msra.mxu1 %v9856_v7  ;;  %v9781_v27 = vld [vmem:[#allocation24 + $0x28] sm:$0xf0]  ;;  %v10633_v38 = vld [vmem:[#allocation24 + $0x94] sm:$0xf] }
 0x947   : > { %v13351_v35 = vsel %vm3764_vm14, %v6511_v42, %v13342_v59  ;;  %v6664_v18 = vrot.slane %v13347_v52, 3  ;;  %7224 = vmatpush.bf16.msra.mxu2 %v9936_v15  ;;  %v13379_v20 = vsel %vm3923_vm13, %v6655_v8, %v6669_v46  ;;  %v6517_v56 = vshrl.u32 %v13326_v22, 16  ;;  %v10651_v15 = vld [vmem:[#allocation24 + $0x124] sm:$0xf]  ;;  %v9909_v36 = vld [vmem:[#allocation24 + $0x128] sm:$0xf0] }
 0x948   : > { %v13358_v62 = vsel %vm3923_vm13, %v6660_v26, %v6661_v41  ;;  %v6658_v11 = vrot.slane %v13351_v35, 3  ;;  %v10653_v26 = vld [vmem:[#allocation24 + $0x134] sm:$0xf]  ;;  %7187 = vmatpush.bf16.msra.mxu0 %v9800_v12  ;;  %v6556_v19 = vshll.u32 %v13374_v24, 16  ;;  %v10020_v42 = vor.u32 %v10680_v28, %v10019_v6  ;;  %v10675_v58 = vld [vmem:[#allocation24 + $0x1e4] sm:$0xf] }
 0x949   : > { %7135 = vmatmul.bf16.vlgmr.msrb.gmra.mxu1 %v13358_v62  ;;  %v13365_v1 = vsel %vm3923_vm13, %v6663_v55, %v6664_v18  ;;  %7170 = vmatpush.bf16.msrb.mxu3 %v10036_v16  ;;  %v9920_v3 = vor.u32 %v10653_v26, %v9917_v31  ;;  %v6519_v54 = vor.u32 %v6517_v56, %v13342_v59  ;;  %v10005_v46 = vld [vmem:[#allocation24 + $0x1e8] sm:$0xf0]  ;;  %v10617_v16 = vld [vmem:[#allocation24 + $0x14] sm:$0xf]  ;;  %v9773_v37 = vld [vmem:[#allocation24 + $0x18] sm:$0xf0] }
 0x94a   : > { %v13370_v34 = vsel %vm3923_vm13, %v6657_v9, %v6658_v11  ;;  %7154 = vmatmul.bf16.vlgmr.msrb.gmra.mxu2 %v13365_v1  ;;  %v6558_v9 = vrot.slane %v6556_v19, 6  ;;  %v11101_v8 = vor.u32 %v11100_v63, %v13276_v51  ;;  %v10016_v22 = vor.u32 %v10677_v23, %v10013_v60  ;;  %7208 = vmatpush.bf16.msra.mxu1 %v9848_v53  ;;  %v10649_v59 = vld [vmem:[#allocation24 + $0x114] sm:$0xf]  ;;  %v9901_v2 = vld [vmem:[#allocation24 + $0x118] sm:$0xf0] }
 0x94b   : > { %7116 = vmatmul.bf16.vlgmr.msrb.gmra.mxu0 %v13370_v34  ;;  %7225 = vmatpush.bf16.msra.mxu2 %v9928_v5  ;;  %v9784_v4 = vor.u32 %v10619_v61, %v9781_v27  ;;  %v9912_v49 = vor.u32 %v10651_v15, %v9909_v36  ;;  %v9840_v50 = vor.u32 %v10633_v38, %v9837_v47  ;;  %v6564_v45 = vrot.slane %v13312_v32, 6  ;;  %v10631_v5 = vld [vmem:[#allocation24 + $0x84] sm:$0xf]  ;;  %v9829_v39 = vld [vmem:[#allocation24 + $0x88] sm:$0xf0] }
 0x94c   : > { %7188 = vmatpush.bf16.msra.mxu0 %v9792_v33  ;;  %v6559_v55 = vsel %vm3108_vm10, %v13333_v40, %v6558_v9  ;;  %v6673_v12 = vrot.slane %v6523_v57, 3  ;;  %v6671_v51 = vrot.slane %v6519_v54, 3  ;;  %v6563_v13 = vrot.slane %v11101_v8, 6  ;;  %v10673_v26 = vld [vmem:[#allocation24 + $0x1d4] sm:$0xf] }
 0x94d   : > { %7171 = vmatpush.bf16.msrb.mxu3 %v10028_v21  ;;  %v6675_v7 = vrot.slane %v6559_v55, 3  ;;  %v10008_v40 = vor.u32 %v10675_v58, %v10005_v46  ;;  %v9776_v14 = vor.u32 %v10617_v16, %v9773_v37  ;;  %v9997_v31 = vld [vmem:[#allocation24 + $0x1d8] sm:$0xf0]  ;;  %v9904_v6 = vor.u32 %v10649_v59, %v9901_v2  ;;  %v10615_v17 = vld [vmem:[#allocation24 + $0x4] sm:$0xf] }
 0x94e   : > { %7102 = vmatmul.bf16.gmra.mxu3 %v13379_v20  ;;  %7209 = vmatpush.bf16.msra.mxu1 %v9840_v50  ;;  %v9765_v21 = vld [vmem:[#allocation24 + $0x8] sm:$0xf0]  ;;  %v10647_v28 = vld [vmem:[#allocation24 + $0x104] sm:$0xf]  ;;  %v13394_v44 = vsel %vm3831_vm15, %v6563_v13, %v6564_v45  ;;  %v9832_v57 = vor.u32 %v10631_v5, %v9829_v39  ;;  %v10693_v25 = vld [vmem:[#allocation24 + $0x274] sm:$0xf]  ;;  %v10000_v23 = vor.u32 %v10673_v26, %v9997_v31 }
 0x94f   : > { %7226 = vmatpush.bf16.msra.mxu2 %v9920_v3  ;;  %v9893_v63 = vld [vmem:[#allocation24 + $0x108] sm:$0xf0]  ;;  %v10077_v33 = vld [vmem:[#allocation24 + $0x278] sm:$0xf0]  ;;  %v13399_v3 = vsel %vm3923_vm13, %v6661_v41, %v6673_v12  ;;  %v9768_v60 = vor.u32 %v10615_v17, %v9765_v21  ;;  %v13405_v61 = vsel %vm3923_vm13, %v6664_v18, %v6675_v7  ;;  %v6667_v56 = vrot.slane %v13394_v44, 3 }
 0x950   : > { %7189 = vmatpush.bf16.msra.mxu0 %v9784_v4  ;;  %v9896_v19 = vor.u32 %v10647_v28, %v9893_v63  ;;  %v10671_v53 = vld [vmem:[#allocation24 + $0x1c4] sm:$0xf]  ;;  %v9989_v48 = vld [vmem:[#allocation24 + $0x1c8] sm:$0xf0]  ;;  %v10080_v27 = vor.u32 %v10693_v25, %v10077_v33  ;;  %v13411_v41 = vsel %vm3923_vm13, %v6658_v11, %v6671_v51  ;;  %v6666_v18 = vrot.slane %v6563_v13, 3 }
 0x951   : > { %7172 = vmatpush.bf16.msrb.mxu3 %v10020_v42  ;;  %v10691_v15 = vld [vmem:[#allocation24 + $0x264] sm:$0xf]  ;;  %v10069_v52 = vld [vmem:[#allocation24 + $0x268] sm:$0xf0]  ;;  %v9992_v36 = vor.u32 %v10671_v53, %v9989_v48  ;;  %v10669_v35 = vld [vmem:[#allocation24 + $0x1b4] sm:$0xf] }
 0x952   : > { %7210 = vmatpush.bf16.msra.mxu1 %v9832_v57  ;;  %v13416_v38 = vsel %vm3923_vm13, %v6666_v18, %v6667_v56  ;;  %v9981_v47 = vld [vmem:[#allocation24 + $0x1b8] sm:$0xf0]  ;;  %v10072_v11 = vor.u32 %v10691_v15, %v10069_v52  ;;  %v10689_v42 = vld [vmem:[#allocation24 + $0x254] sm:$0xf]  ;;  %v10667_v8 = vld [vmem:[#allocation24 + $0x1a4] sm:$0xf] }
 0x953   : > { %7227 = vmatpush.bf16.msra.mxu2 %v9912_v49  ;;  %v10061_v54 = vld [vmem:[#allocation24 + $0x258] sm:$0xf0]  ;;  %v9984_v9 = vor.u32 %v10669_v35, %v9981_v47  ;;  %v6566_v58 = vrot.slane %v13374_v24, 6  ;;  %v10687_v55 = vld [vmem:[#allocation24 + $0x244] sm:$0xf] }
 0x954   : > { %7190 = vmatpush.bf16.msra.mxu0 %v9776_v14  ;;  %v10064_v4 = vor.u32 %v10689_v42, %v10061_v54  ;;  %v10053_v49 = vld [vmem:[#allocation24 + $0x248] sm:$0xf0]  ;;  %v10665_v46 = vld [vmem:[#allocation24 + $0x194] sm:$0xf]  ;;  %v9965_v16 = vld [vmem:[#allocation24 + $0x198] sm:$0xf0] }
 0x955   : > { %7241 = vmatpush.bf16.msra.mxu3 %v10016_v22  ;;  %v9973_v22 = vld [vmem:[#allocation24 + $0x1a8] sm:$0xf0]  ;;  %v10056_v37 = vor.u32 %v10687_v55, %v10053_v49  ;;  %v6567_v59 = vsel %vm3831_vm15, %v6564_v45, %v6566_v58  ;;  %v10685_v2 = vld [vmem:[#allocation24 + $0x234] sm:$0xf]  ;;  %v10045_v12 = vld [vmem:[#allocation24 + $0x238] sm:$0xf0]  ;;  %v9968_v51 = vor.u32 %v10665_v46, %v9965_v16 }
 0x956   : > { %v9976_v50 = vor.u32 %v10667_v8, %v9973_v22  ;;  %v6677_v24 = vrot.slane %v6567_v59, 3  ;;  %v10663_v5 = vld [vmem:[#allocation24 + $0x184] sm:$0xf]  ;;  %v9957_v39 = vld [vmem:[#allocation24 + $0x188] sm:$0xf0]  ;;  %v10048_v7 = vor.u32 %v10685_v2, %v10045_v12 }
 0x957   : > { %7228 = vmatpush.bf16.msra.mxu2 %v9904_v6  ;;  %v10683_v13 = vld [vmem:[#allocation24 + $0x224] sm:$0xf]  ;;  %v9960_v32 = vor.u32 %v10663_v5, %v9957_v39  ;;  %v10029_v26 = vld [vmem:[#allocation24 + $0x218] sm:$0xf0] }
 0x958   : > { %7191 = vmatpush.bf16.msra.mxu0 %v9768_v60  ;;  %v6678_v45 = vsel %vm3923_vm13, %v6667_v56, %v6677_v24  ;;  %v10679_v6 = vld [vmem:[#allocation24 + $0x204] sm:$0xf] }
 0x959   : > { %7242 = vmatpush.bf16.msra.mxu3 %v10008_v40  ;;  %7140 = vmatmul.bf16.gmra.mxu1 %v13399_v3  ;;  %v10037_v40 = vld [vmem:[#allocation24 + $0x228] sm:$0xf0] }
 0x95a   : > { %7159 = vmatmul.bf16.gmra.mxu2 %v13405_v61  ;;  %v10040_v14 = vor.u32 %v10683_v13, %v10037_v40 }
 0x95b   : > { %7121 = vmatmul.bf16.gmra.mxu0 %v13411_v41  ;;  %7229 = vmatpush.bf16.msra.mxu2 %v9896_v19 }
 0x95c   : > { %7260 = vmatpush.bf16.msrb.mxu0 %v10080_v27 }
 0x95d   : > { %7243 = vmatpush.bf16.msra.mxu3 %v10000_v23 }
 0x95e   : > { %7173 = vmatmul.bf16.vlgmr.msrb.gmra.mxu3 %v13416_v38 }
 0x95f   : > { %10759 = vmatpush.bf16.msrb.mxu2 %v10080_v27 }
 0x960   : > { %7261 = vmatpush.bf16.msrb.mxu0 %v10072_v11 }
 0x961   : > { %7244 = vmatpush.bf16.msra.mxu3 %v9992_v36 }
 0x963   : > { %10760 = vmatpush.bf16.msrb.mxu2 %v10072_v11 }
 0x964   : > { %7262 = vmatpush.bf16.msrb.mxu0 %v10064_v4 }
 0x965   : > { %7245 = vmatpush.bf16.msra.mxu3 %v9984_v9 }
 0x967   : > { %10761 = vmatpush.bf16.msrb.mxu2 %v10064_v4 }
 0x968   : > { %7263 = vmatpush.bf16.msrb.mxu0 %v10056_v37 }
 0x969   : > { %7246 = vmatpush.bf16.msra.mxu3 %v9976_v50  ;;  %7211 = vmatmul.bf16.vlgmr.msra.gmra.mxu1 %v13370_v34  ;;  %v10681_v34 = vld [vmem:[#allocation24 + $0x214] sm:$0xf] }
 0x96a   : > { %7230 = vmatmul.bf16.vlgmr.msra.gmra.mxu2 %v13358_v62  ;;  %v10032_v31 = vor.u32 %v10681_v34, %v10029_v26  ;;  %v10021_v62 = vld [vmem:[#allocation24 + $0x208] sm:$0xf0] }
 0x96b   : > { %7192 = vmatmul.bf16.vlgmr.msra.gmra.mxu0 %v13304_v29  ;;  %10762 = vmatpush.bf16.msrb.mxu2 %v10056_v37  ;;  %v10024_v17 = vor.u32 %v10679_v6, %v10021_v62  ;;  %v6648_v29 = vld [vmem:[%s13636_s1] sm:$0x3]  ;;  %s11538_s1 = scalar_lea.hbm %s11537_s11, 16 }
 0x96c   : > { %7264 = vmatpush.bf16.msrb.mxu0 %v10048_v7  ;;  %v6650_v28 = vperm.slane %v6648_v29, 0  ;;  %v6651_v12 = vperm.slane %v6648_v29, 1  ;;  %p11539_p1 = scmp.ne.s32.totalorder %s11537_s11, %s11538_s1 }
 0x96d   : > { %7247 = vmatpush.bf16.msra.mxu3 %v9968_v51 }
 0x96e   : > { %7178 = vmatmul.bf16.gmra.mxu3 %v6678_v45  ;;  %p11540_p3 = pnand %p11539_p1, %p11931_p13 }
 0x96f   : > { %10763 = vmatpush.bf16.msrb.mxu2 %v10048_v7 }
 0x970   : > { %7265 = vmatpush.bf16.msrb.mxu0 %v10040_v14  ;;  %p11541_p5 = pneg %p11540_p3 }
 0x971   : > { %7248 = vmatpush.bf16.msra.mxu3 %v9960_v32 }
 0x973   : > { %10764 = vmatpush.bf16.msrb.mxu2 %v10040_v14 }
 0x974   : > { %7266 = vmatpush.bf16.msrb.mxu0 %v10032_v31 }
 0x977   : > { %10765 = vmatpush.bf16.msrb.mxu2 %v10032_v31 }
 0x978   : > { %7267 = vmatpush.bf16.msrb.mxu0 %v10024_v17 }
 0x979   : > { %7216 = vmatmul.bf16.gmra.mxu1 %v13411_v41 }
 0x97a   : > { %7235 = vmatmul.bf16.gmra.mxu2 %v13399_v3 }
 0x97b   : > { %7197 = vmatmul.bf16.gmra.mxu0 %v13379_v20  ;;  %10766 = vmatpush.bf16.msrb.mxu2 %v10024_v17 }
 0x97e   : > { %7249 = vmatmul.bf16.vlgmr.msra.gmra.mxu3 %v13365_v1 }
 0x98a   : > { %7273 = vmatmul.bf16.vlgmr.msrb.gmra.mxu2 %v6678_v45 }
 0x98b   : > { %7268 = vmatmul.bf16.vlgmr.msrb.gmra.mxu0 %v13416_v38 }
 0x98e   : > { %7254 = vmatmul.bf16.gmra.mxu3 %v13405_v61 }
 0x9c1   : > { %v7098_v21 = vpop.f32.mrf.mxu3 }
 0x9c2   : > { %v7099_v57 = vadd.f32 %v7098_v21, %v6650_v28 }
 0x9c6   : > { %v7136_v44 = vpop.f32.mrf.mxu1 }
 0x9c8   : > { %v7117_v63 = vpop.f32.mrf.mxu0 }
 0x9c9   : > { %v7118_v25 = vadd.f32 %v7117_v63, %v7099_v57  ;;  %v7100_v33 = vpop.f32.mrf.mxu3 }
 0x9ca   : > { %v7101_v60 = vadd.f32 %v7100_v33, %v6650_v28 }
 0x9cb   : > { %v7137_v20 = vadd.f32 %v7136_v44, %v7118_v25 }
 0x9cd   : > { %v7155_v3 = vpop.f32.mrf.mxu2 }
 0x9ce   : > { %v7138_v23 = vpop.f32.mrf.mxu1  ;;  %v13436_v1 = vadd.f32 %v7155_v3, %v7137_v20 }
 0x9d0   : > { %v7119_v56 = vpop.f32.mrf.mxu0 }
 0x9d1   : > { %v7120_v19 = vadd.f32 %v7119_v56, %v7101_v60  ;;  %v7103_v61 = vpop.f32.mrf.mxu3 }
 0x9d2   : > { %v7104_v41 = vadd.f32 %v7103_v61, %v6650_v28 }
 0x9d3   : > { %v7139_v53 = vadd.f32 %v7138_v23, %v7120_v19 }
 0x9d5   : > { %v7157_v48 = vpop.f32.mrf.mxu2 }
 0x9d6   : > { %v7158_v27 = vadd.f32 %v7157_v48, %v7139_v53  ;;  %v7141_v15 = vpop.f32.mrf.mxu1 }
 0x9d8   : > { %v7122_v52 = vpop.f32.mrf.mxu0 }
 0x9d9   : > { %v7123_v18 = vadd.f32 %v7122_v52, %v7104_v41  ;;  %v7105_v36 = vpop.f32.mrf.mxu3 }
 0x9da   : > { %v7106_v11 = vadd.f32 %v7105_v36, %v6650_v28 }
 0x9db   : > { %v7142_v38 = vadd.f32 %v7141_v15, %v7123_v18 }
 0x9dd   : > { %v7160_v35 = vpop.f32.mrf.mxu2 }
 0x9de   : > { %v13438_v47 = vadd.f32 %v7160_v35, %v7142_v38  ;;  %v7143_v8 = vpop.f32.mrf.mxu1 }
 0x9e0   : > { %v7124_v42 = vpop.f32.mrf.mxu0 }
 0x9e1   : > { %v7125_v54 = vadd.f32 %v7124_v42, %v7106_v11  ;;  %v13440_v9 = vpop.f32.mrf.mxu3 }
 0x9e3   : > { %v7144_v22 = vadd.f32 %v7143_v8, %v7125_v54 }
 0x9e5   : > { %v7162_v4 = vpop.f32.mrf.mxu2 }
 0x9e6   : > { %v13442_v58 = vadd.f32 %v7162_v4, %v7144_v22  ;;  %v7212_v24 = vpop.f32.mrf.mxu1 }
 0x9e8   : > { %v7193_v55 = vpop.f32.mrf.mxu0 }
 0x9e9   : > { %v7176_v49 = vpop.f32.mrf.mxu3  ;;  %v7194_v5 = vadd.f32 %v7193_v55, %v6651_v12 }
 0x9ea   : > { %v13444_v50 = vadd.f32 %v7176_v49, %v7158_v27 }
 0x9eb   : > { %v7213_v7 = vadd.f32 %v7212_v24, %v7194_v5 }
 0x9ed   : > { %v7231_v46 = vpop.f32.mrf.mxu2 }
 0x9ee   : > { %v7214_v32 = vpop.f32.mrf.mxu1  ;;  %v7232_v45 = vadd.f32 %v7231_v46, %v7213_v7 }
 0x9f0   : > { %v7195_v16 = vpop.f32.mrf.mxu0 }
 0x9f1   : > { %v13446_v37 = vpop.f32.mrf.mxu3  ;;  %v7196_v14 = vadd.f32 %v7195_v16, %v6651_v12 }
 0x9f3   : > { %v7215_v31 = vadd.f32 %v7214_v32, %v7196_v14  ;;  %v7279_v32 = vunpack.c.l.bf16 %v13251_v43  ;;  %v10702_v43 = vld [vmem:[#allocation25 + $0x28] sm:$0xff] }
 0x9f5   : > { %v7233_v59 = vpop.f32.mrf.mxu2 }
 0x9f6   : > { %v7234_v21 = vadd.f32 %v7233_v59, %v7215_v31  ;;  %v7217_v44 = vpop.f32.mrf.mxu1 }
 0x9f8   : > { %v7198_v2 = vpop.f32.mrf.mxu0 }
 0x9f9   : > { %v13448_v51 = vpop.f32.mrf.mxu3  ;;  %v7199_v28 = vadd.f32 %v7198_v2, %v6651_v12 }
 0x9fb   : > { %v7218_v25 = vadd.f32 %v7217_v44, %v7199_v28 }
 0x9fd   : > { %v7236_v13 = vpop.f32.mrf.mxu2 }
 0x9fe   : > { %v7237_v60 = vadd.f32 %v7236_v13, %v7218_v25  ;;  %v7219_v48 = vpop.f32.mrf.mxu1 }
 0xa00   : > { %v7200_v39 = vpop.f32.mrf.mxu0 }
 0xa01   : > { %v7250_v40 = vpop.f32.mrf.mxu3  ;;  %v7201_v56 = vadd.f32 %v7200_v39, %v6651_v12  ;;  %v7175_v12 = vadd.f32 %v13440_v9, %v13436_v1 }
 0xa02   : > { %v7251_v34 = vadd.f32 %v7250_v40, %v7232_v45  ;;  %v10704_v40 = vld [vmem:[#allocation25 + $0x38] sm:$0xff] }
 0xa03   : > { %v7220_v27 = vadd.f32 %v7219_v48, %v7201_v56  ;;  %7463 = vmatpush.bf16.msrb.mxu1 %v10704_v40  ;;  %10767 = vmatpush.bf16.msrb.mxu3 %v10704_v40 }
 0xa05   : > { %v7238_v17 = vpop.f32.mrf.mxu2 }
 0xa06   : > { %v7239_v38 = vadd.f32 %v7238_v17, %v7220_v27 }
 0xa08   : > { %v7269_v26 = vpop.f32.mrf.mxu0 }
 0xa09   : > { %v7270_v6 = vadd.f32 %v7269_v26, %v7251_v34  ;;  %v7252_v29 = vpop.f32.mrf.mxu3  ;;  %v10703_v26 = vld [vmem:[#allocation25 + $0x30] sm:$0xff] }
 0xa0a   : > { %v7253_v57 = vadd.f32 %v7252_v29, %v7234_v21  ;;  %7464 = vmatpush.bf16.msrb.mxu1 %v10703_v26  ;;  %10768 = vmatpush.bf16.msrb.mxu3 %v10703_v26 }
 0xa0b   : > { %v10081_v62 = vmul.f32 -1.442695, %v7270_v6 }
 0xa0d   : > { %11058 = vpow2.f32 %v10081_v62  ;;  %v7274_v61 = vpop.f32.mrf.mxu2 }
 0xa0e   : > { %7465 = vmatpush.bf16.msrb.mxu1 %v10702_v43  ;;  %10769 = vmatpush.bf16.msrb.mxu3 %v10702_v43 }
 0xa10   : > { %v7271_v63 = vpop.f32.mrf.mxu0 }
 0xa11   : > { %v7272_v33 = vadd.f32 %v7271_v63, %v7253_v57  ;;  %v7255_v19 = vpop.f32.mrf.mxu3 }
 0xa12   : > { %v7256_v53 = vadd.f32 %v7255_v19, %v7237_v60  ;;  %v10701_v60 = vld [vmem:[#allocation25 + $0x20] sm:$0xff] }
 0xa13   : > { %v11059_v20 = vpop.eup %11058  ;;  %v10082_v3 = vmul.f32 -1.442695, %v7272_v33  ;;  %v7280_v33 = vunpack.c.l.bf16 %v13271_v30  ;;  %7466 = vmatpush.bf16.msrb.mxu1 %v10701_v60  ;;  %10770 = vmatpush.bf16.msrb.mxu3 %v10701_v60  ;;  %v7180_v30 = vadd.f32 %v13446_v37, %v13438_v47  ;;  %v10698_v37 = vld [vmem:[#allocation25 + $0x8] sm:$0xff] }
 0xa14   : > { %v7295_v23 = vadd.f32 1.0, %v11059_v20  ;;  %v7275_v41 = vadd.f32 %v7274_v61, %v7256_v53 }
 0xa15   : > { %11060 = vpow2.f32 %v10082_v3  ;;  %v7276_v22 = vpop.f32.mrf.mxu2 }
 0xa16   : > { %11062 = vrcp.f32 %v7295_v23  ;;  %v10083_v52 = vmul.f32 -1.442695, %v7275_v41  ;;  %v7310_v8 = vand.u32 2147483648, %v7295_v23  ;;  %v7308_v55 = vand.u32 2147483647, %v7295_v23  ;;  %v10700_v41 = vld [vmem:[#allocation25 + $0x18] sm:$0xff] }
 0xa17   : > { %vm7304_vm10 = vweird.f32 %v7295_v23  ;;  %7467 = vmatpush.bf16.msrb.mxu1 %v10700_v41  ;;  %10771 = vmatpush.bf16.msrb.mxu3 %v10700_v41 }
 0xa18   : > { %11064 = vpow2.f32 %v10083_v52  ;;  %v7311_v24 = vor.u32 1.1754944e-38, %v7310_v8  ;;  %vm7309_vm14 = vcmp.eq.f32.partialorder %v7308_v55, 8.507059e+37 }
 0xa19   : > { %v7257_v11 = vpop.f32.mrf.mxu3 }
 0xa1a   : > { %v7258_v54 = vadd.f32 %v7257_v11, %v7239_v38  ;;  %v10699_v11 = vld [vmem:[#allocation25 + $0x10] sm:$0xff] }
 0xa1b   : > { %v11061_v15 = vpop.eup %11060  ;;  %7468 = vmatpush.bf16.msrb.mxu1 %v10699_v11  ;;  %10772 = vmatpush.bf16.msrb.mxu3 %v10699_v11 }
 0xa1c   : > { %v11063_v18 = vpop.eup %11062  ;;  %v7296_v36 = vadd.f32 1.0, %v11061_v15  ;;  %v7277_v49 = vadd.f32 %v7276_v22, %v7258_v54 }
 0xa1d   : > { %v7300_v35 = vmul.f32 %v11063_v18, %v7295_v23  ;;  %vm7305_vm1 = vweird.f32 %v11063_v18 }
 0xa1e   : > { %11066 = vrcp.f32 %v7296_v36  ;;  %v11065_v46 = vpop.eup %11064  ;;  %v10084_v59 = vmul.f32 -1.442695, %v7277_v49  ;;  %vm7306_vm13 = vmor %vm7304_vm10, %vm7305_vm1  ;;  %v7325_v34 = vand.u32 2147483648, %v7296_v36  ;;  %v7323_v9 = vand.u32 2147483647, %v7296_v36 }
 0xa1f   : > { %v7301_v42 = vsub.f32 1.0, %v7300_v35  ;;  %v7297_v5 = vadd.f32 1.0, %v11065_v46  ;;  %vm7319_vm7 = vweird.f32 %v7296_v36  ;;  %7469 = vmatpush.bf16.msrb.mxu1 %v10698_v37  ;;  %10773 = vmatpush.bf16.msrb.mxu3 %v10698_v37 }
 0xa20   : > { %11068 = vpow2.f32 %v10084_v59  ;;  %v7326_v28 = vor.u32 1.1754944e-38, %v7325_v34  ;;  %vm7324_vm2 = vcmp.eq.f32.partialorder %v7323_v9, 8.507059e+37  ;;  %v7282_v59 = vunpack.c.l.bf16 %v13308_v0 }
 0xa21   : > { %v7302_v4 = vmul.f32 %v11063_v18, %v7301_v42  ;;  %11070 = vrcp.f32 %v7297_v5  ;;  %v7340_v23 = vand.u32 2147483648, %v7297_v5  ;;  %v7338_v61 = vand.u32 2147483647, %v7297_v5 }
 0xa22   : > { %vm7334_vm9 = vweird.f32 %v7297_v5 }
 0xa23   : > { %v7303_v16 = vadd.f32 %v11063_v18, %v7302_v4  ;;  %v7341_v27 = vor.u32 1.1754944e-38, %v7340_v23  ;;  %vm7339_vm12 = vcmp.eq.f32.partialorder %v7338_v61, 8.507059e+37 }
 0xa24   : > { %v11067_v2 = vpop.eup %11066 }
 0xa25   : > { %v7307_v39 = vsel %vm7306_vm13, %v11063_v18, %v7303_v16  ;;  %v7315_v7 = vmul.f32 %v11067_v2, %v7296_v36  ;;  %vm7320_vm15 = vweird.f32 %v11067_v2  ;;  %v7281_v18 = vunpack.c.l.bf16 %v13273_v10 }
 0xa26   : > { %v7312_v13 = vsel %vm7309_vm14, %v7311_v24, %v7307_v39  ;;  %v11069_v6 = vpop.eup %11068  ;;  %vm7321_vm0 = vmor %vm7319_vm7, %vm7320_vm15  ;;  %v7182_v10 = vadd.f32 %v13448_v51, %v13442_v58  ;;  %v10961_v51 = vld [vmem:[%s13637_s3] ss:$0 sm:$0xff]  ;;  %s11542_s3 = scalar_lea.hbm %s13640_s0, 32 }
 0xa27   : > { %v7359_v45 = vmul.f32 %v7312_v13, %v7175_v12  ;;  %v7316_v14 = vsub.f32 1.0, %v7315_v7  ;;  %v11071_v21 = vpop.eup %11070  ;;  %v7298_v29 = vadd.f32 1.0, %v11069_v6  ;;  %v10697_v12 = vld [vmem:[#allocation25] sm:$0xff]  ;;  %p11544_p8 = scmp.lt.s32.totalorder %s11542_s3, %s11538_s1 }
 0xa28   : > { %v7330_v63 = vmul.f32 %v11071_v21, %v7297_v5  ;;  %vm7335_vm8 = vweird.f32 %v11071_v21  ;;  %7470 = vmatpush.bf16.msrb.mxu1 %v10697_v12  ;;  %10774 = vmatpush.bf16.msrb.mxu3 %v10697_v12 }
 0xa29   : > { %v7363_v31 = vadd.f32 %v7359_v45, %v7279_v32  ;;  %v7317_v1 = vmul.f32 %v11067_v2, %v7316_v14  ;;  %11072 = vrcp.f32 %v7298_v29  ;;  %vm7336_vm11 = vmor %vm7334_vm9, %vm7335_vm8  ;;  %v7355_v35 = vand.u32 2147483648, %v7298_v29  ;;  %p11545_p7 = por %p11544_p8, %p11543_p12 }
 0xa2a   : > { %v7331_v3 = vsub.f32 1.0, %v7330_v63  ;;  %v7353_v8 = vand.u32 2147483647, %v7298_v29  ;;  %vm7349_vm4 = vweird.f32 %v7298_v29 }
 0xa2b   : > { %v7367_v62 = vmul.f32 0.70710677, %v7363_v31  ;;  %v7318_v17 = vadd.f32 %v11067_v2, %v7317_v1  ;;  %v7356_v47 = vor.u32 1.1754944e-38, %v7355_v35  ;;  %p11546_p9 = pnand %p11545_p7, %p11541_p5 }
 0xa2c   : > { %v7332_v19 = vmul.f32 %v11071_v21, %v7331_v3  ;;  %vm7354_vm6 = vcmp.eq.f32.partialorder %v7353_v8, 8.507059e+37 }
 0xa2d   : > { %v7371_v44 = vpack.c.bf16 %v7367_v62, %v7367_v62  ;;  %v7322_v57 = vsel %vm7321_vm0, %v11067_v2, %v7318_v17 }
 0xa2e   : > { %v7327_v25 = vsel %vm7324_vm2, %v7326_v28, %v7322_v57  ;;  %v7333_v53 = vadd.f32 %v11071_v21, %v7332_v19 }
 0xa2f   : > { %7375 = vst [vmem:[#allocation2 + $0x4] sm:$0xf] %v7371_v44  ;;  %v7360_v20 = vmul.f32 %v7327_v25, %v13444_v50  ;;  %v11073_v48 = vpop.eup %11072 }
 0xa30   : > { %v7337_v50 = vsel %vm7336_vm11, %v11071_v21, %v7333_v53  ;;  %v7345_v15 = vmul.f32 %v11073_v48, %v7298_v29  ;;  %vm7350_vm3 = vweird.f32 %v11073_v48 }
 0xa31   : > { %v7364_v56 = vadd.f32 %v7360_v20, %v7280_v33  ;;  %v7342_v52 = vsel %vm7339_vm12, %v7341_v27, %v7337_v50  ;;  %vm7351_vm5 = vmor %vm7349_vm4, %vm7350_vm3 }
 0xa32   : > { %v7361_v36 = vmul.f32 %v7342_v52, %v7180_v30  ;;  %v7346_v38 = vsub.f32 1.0, %v7345_v15 }
 0xa33   : > { %v7368_v22 = vmul.f32 0.70710677, %v7364_v56 }
 0xa34   : > { %v7365_v42 = vadd.f32 %v7361_v36, %v7281_v18  ;;  %v7347_v54 = vmul.f32 %v11073_v48, %v7346_v38 }
 0xa36   : > { %v7369_v4 = vmul.f32 0.70710677, %v7365_v42  ;;  %v7348_v55 = vadd.f32 %v11073_v48, %v7347_v54 }
 0xa38   : > { %v10739_v49 = vpack.c.bf16 %v7369_v4, %v7368_v22  ;;  %v7352_v46 = vsel %vm7351_vm5, %v11073_v48, %v7348_v55 }
 0xa39   : > { %v7357_v16 = vsel %vm7354_vm6, %v7356_v47, %v7352_v46 }
 0xa3a   : > { %10757 = vst [vmem:[#allocation2 + $0x8] sm:$0xff] %v10739_v49   ;;  %v7362_v2 = vmul.f32 %v7357_v16, %v7182_v10 }
 0xa3c   : > { %v7366_v24 = vadd.f32 %v7362_v2, %v7282_v59 }
 0xa3e   : > { %v7370_v5 = vmul.f32 0.70710677, %v7366_v24 }
 0xa40   : > { %v7374_v39 = vpack.c.bf16 %v7370_v5, %v7370_v5 }
 0xa41   : > { %v10695_v7 = vld [vmem:[#allocation2 + $0x4] sm:$0xff] }
 0xa42   : > { %7378 = vst [vmem:[#allocation2 + $0x10] sm:$0xf] %v7374_v39  ;;  %7471 = vmatmul.bf16.vlgmr.msrb.gmra.mxu1 %v10695_v7 }
 0xa49   : > { %v10696_v58 = vld [vmem:[#allocation2 + $0xc] sm:$0xff] }
 0xa4a   : > { %7476 = vmatmul.bf16.vlgmr.msrb.gmra.mxu3 %v10696_v58 }
 0xabf   : > { %v7472_v0 = vpop.f32.mrf.mxu1 }
 0xac0   : > { %v7473_v13 = vadd.f32 %v10961_v51, %v7472_v0 }
 0xac2   : > { %v10125_v40 = vmul.f32 -1.442695, %v7473_v13 }
 0xac4   : > { %11074 = vpow2.f32 %v10125_v40 }
 0xac7   : > { %v7474_v32 = vpop.f32.mrf.mxu1 }
 0xac8   : > { %v7475_v45 = vadd.f32 %v10961_v51, %v7474_v32 }
 0xaca   : > { %v11075_v14 = vpop.eup %11074  ;;  %v10126_v34 = vmul.f32 -1.442695, %v7475_v45 }
 0xacb   : > { %v7494_v26 = vadd.f32 1.0, %v11075_v14 }
 0xacc   : > { %11076 = vpow2.f32 %v10126_v34 }
 0xacd   : > { %11078 = vrcp.f32 %v7494_v26  ;;  %v7477_v31 = vpop.f32.mrf.mxu3  ;;  %vm7503_vm10 = vweird.f32 %v7494_v26  ;;  %v7509_v60 = vand.u32 2147483648, %v7494_v26  ;;  %v7507_v61 = vand.u32 2147483647, %v7494_v26 }
 0xace   : > { %v7478_v1 = vadd.f32 %v10961_v51, %v7477_v31 }
 0xacf   : > { %v7510_v18 = vor.u32 1.1754944e-38, %v7509_v60  ;;  %vm7508_vm0 = vcmp.eq.f32.partialorder %v7507_v61, 8.507059e+37 }
 0xad0   : > { %v10127_v9 = vmul.f32 -1.442695, %v7478_v1 }
 0xad2   : > { %v11077_v6 = vpop.eup %11076  ;;  %11080 = vpow2.f32 %v10127_v9 }
 0xad3   : > { %v11079_v62 = vpop.eup %11078  ;;  %v7495_v17 = vadd.f32 1.0, %v11077_v6 }
 0xad4   : > { %v7499_v21 = vmul.f32 %v11079_v62, %v7494_v26  ;;  %vm7504_vm1 = vweird.f32 %v11079_v62 }
 0xad5   : > { %11082 = vrcp.f32 %v7495_v17  ;;  %v7479_v28 = vpop.f32.mrf.mxu3  ;;  %v7524_v56 = vand.u32 2147483648, %v7495_v17  ;;  %v7522_v48 = vand.u32 2147483647, %v7495_v17  ;;  %vm13464_vm14 = vmor %vm7503_vm10, %vm7504_vm1  ;;  %vm7518_vm15 = vweird.f32 %v7495_v17 }
 0xad6   : > { %v7500_v29 = vsub.f32 1.0, %v7499_v21  ;;  %v7480_v43 = vadd.f32 %v10961_v51, %v7479_v28 }
 0xad7   : > { %v7525_v36 = vor.u32 1.1754944e-38, %v7524_v56  ;;  %vm7523_vm2 = vcmp.eq.f32.partialorder %v7522_v48, 8.507059e+37 }
 0xad8   : > { %v11081_v44 = vpop.eup %11080  ;;  %v10128_v57 = vmul.f32 -1.442695, %v7480_v43  ;;  %v7501_v25 = vmul.f32 %v11079_v62, %v7500_v29 }
 0xad9   : > { %v7496_v63 = vadd.f32 1.0, %v11081_v44 }
 0xada   : > { %11084 = vpow2.f32 %v10128_v57  ;;  %v7502_v3 = vadd.f32 %v11079_v62, %v7501_v25 }
 0xadb   : > { %v11083_v33 = vpop.eup %11082  ;;  %11086 = vrcp.f32 %v7496_v63  ;;  %vm7533_vm9 = vweird.f32 %v7496_v63  ;;  %v7539_v37 = vand.u32 2147483648, %v7496_v63  ;;  %v7537_v49 = vand.u32 2147483647, %v7496_v63 }
 0xadc   : > { %v7514_v20 = vmul.f32 %v11083_v33, %v7495_v17  ;;  %vm7519_vm13 = vweird.f32 %v11083_v33  ;;  %v7506_v50 = vsel %vm13464_vm14, %v11079_v62, %v7502_v3 }
 0xadd   : > { %vm7520_vm7 = vmor %vm7518_vm15, %vm7519_vm13  ;;  %v7511_v11 = vsel %vm7508_vm0, %v7510_v18, %v7506_v50  ;;  %v7540_v12 = vor.u32 1.1754944e-38, %v7539_v37  ;;  %vm7538_vm5 = vcmp.eq.f32.partialorder %v7537_v49, 8.507059e+37 }
 0xade   : > { %v7515_v23 = vsub.f32 1.0, %v7514_v20 }
 0xae0   : > { %v11085_v19 = vpop.eup %11084  ;;  %v7516_v53 = vmul.f32 %v11083_v33, %v7515_v23 }
 0xae1   : > { %v11087_v27 = vpop.eup %11086  ;;  %v7497_v30 = vadd.f32 1.0, %v11085_v19 }
 0xae2   : > { %v7517_v15 = vadd.f32 %v11083_v33, %v7516_v53  ;;  %v7529_v52 = vmul.f32 %v11087_v27, %v7496_v63  ;;  %vm7534_vm8 = vweird.f32 %v11087_v27 }
 0xae3   : > { %11088 = vrcp.f32 %v7497_v30  ;;  %v7554_v10 = vand.u32 2147483648, %v7497_v30  ;;  %v7552_v16 = vand.u32 2147483647, %v7497_v30  ;;  %vm7535_vm12 = vmor %vm7533_vm9, %vm7534_vm8  ;;  %vm7548_vm3 = vweird.f32 %v7497_v30 }
 0xae4   : > { %v7521_v38 = vsel %vm7520_vm7, %v11083_v33, %v7517_v15  ;;  %v7530_v35 = vsub.f32 1.0, %v7529_v52 }
 0xae5   : > { %v7526_v42 = vsel %vm7523_vm2, %v7525_v36, %v7521_v38  ;;  %v7555_v24 = vor.u32 1.1754944e-38, %v7554_v10  ;;  %vm7553_vm6 = vcmp.eq.f32.partialorder %v7552_v16, 8.507059e+37 }
 0xae6   : > { %v10744_v54 = vpack.c.bf16 %v7526_v42, %v7511_v11  ;;  %v7531_v8 = vmul.f32 %v11087_v27, %v7530_v35 }
 0xae8   : > { %10745 = vst [vmem:[%s13471_s26] sm:$0xff] %v10744_v54   ;;  %v7532_v55 = vadd.f32 %v11087_v27, %v7531_v8 }
 0xae9   : > { %v11089_v22 = vpop.eup %11088 }
 0xaea   : > { %v7544_v4 = vmul.f32 %v11089_v22, %v7497_v30  ;;  %vm7549_vm11 = vweird.f32 %v11089_v22  ;;  %v7536_v59 = vsel %vm7535_vm12, %v11087_v27, %v7532_v55 }
 0xaeb   : > { %vm7550_vm4 = vmor %vm7548_vm3, %vm7549_vm11  ;;  %v7541_v39 = vsel %vm7538_vm5, %v7540_v12, %v7536_v59 }
 0xaec   : > { %v7545_v47 = vsub.f32 1.0, %v7544_v4 }
 0xaee   : > { %v7546_v46 = vmul.f32 %v11089_v22, %v7545_v47 }
 0xaf0   : > { %v7547_v2 = vadd.f32 %v11089_v22, %v7546_v46 }
 0xaf2   : > { %v7551_v5 = vsel %vm7550_vm4, %v11089_v22, %v7547_v2 }
 0xaf3   : > { %v7556_v7 = vsel %vm7553_vm6, %v7555_v24, %v7551_v5 }
 0xaf4   : > { %v10749_v58 = vpack.c.bf16 %v7556_v7, %v7541_v39 }
 0xaf6   : > { %10758 = vst [vmem:[%s13471_s26 + $0x8] sm:$0xff] %v10749_v58  }
 0xaf7   : > { %11549 = shalt.err (!%p11546_p9)
}
 0xaf8   : > { %s11637_s25 = smov 64   ;;  %s11638_s26 = smov 4  }
 0xaf9   : > { %10829 = dma.vmem_to_hbm [thread:$0]  (%p11931_p13), %s7580_s8, 256, %s7582_s14, %s7567_s20, %s11637_s25, %s11637_s25, %s11638_s26  }
 0xafa PF: > { %s7596_s4 = sand.u32 1, %s11604_s29   ;;  %p13641_p10 = scmp.ge.s32.totalorder %s11616_s30, 2 }
 0xafb   : > { %s7597_s15 = scalar_lea.sflag [#allocation6], %s7596_s4 }
 0xafc   : > { %p10876_p11 = pnand %p13641_p10, %p11936_p4 }
 0xafe   : > { %p10877_p0 = pneg %p10876_p11 }
 0xb00   : > { %11599 = dma.done.wait (%p10877_p0), %s7597_s15, 256  }
 0xb01   : > { %11601 = vsyncadd (%p10877_p0), %s7597_s15, 4294967040  ;;  %p45_p2 = scmp.ge.s32.totalorder %s11911_s24, 4   ;;  %s13642_s29 = smov %s11608_s2 }
 0xb02   : > { %s13643_s2 = smov %s11612_s6  ;;  %s13644_s6 = smov %s11923_s9 }
 0xb03   : > { %s13645_s30 = smov %s11911_s24  ;;  %47 = sbr.rel (!%p45_p2) target bundleno = 33 (0x21), region = 217 }
 0xb08   :  { %7603 = vsyncpa [#allocation5], 1 }
 0xb09   :  { %7605 = vsyncpa [#allocation5 + $0x1], 1 }
 0xb0a   :  { %7606 = vsyncpa [#allocation8], 1 }
 0xb0b   :  { %7607 = vsyncpa [#allocation11], 1 }
 0xb0c   :  { %7608 = vsyncpa [#allocation14], 1 }
 0xb0d   :  { %7609 = vsyncpa [#allocation17], 1 }
 0xb0e   :  { %7610 = vsyncpa [#allocation20], 1 }
 0xb0f   :  { %7611 = vsyncpa [#allocation23], 1 }
 0xb10   :  { %7612 = vsyncpa [#allocation26], 1 }
 0xb11   :  { %7613 = vsyncpa [#allocation6], 1 }
 0xb12   :  { %7615 = vsyncpa [#allocation6 + $0x1], 1 }

</bundles_post_ra>
